<compile_context>
chip_gen: v7x
topology: tpu7x:2x2x1
jax: 0.10.0
libtpu: 0.0.40
codegen_flags: <defaults>
</compile_context>

<pallas_src>
import functools

import jax
import jax.numpy as jnp
import numpy as np
from jax.experimental import pallas as pl
from jax.experimental.pallas import tpu as pltpu

BN_EPS = 1e-5
COP = 16          # output-channel padding: one bf16 sublane tile


def _round_up(x, m):
    return ((x + m - 1) // m) * m


# --------------------------------------------------------------------------------------
# Pass 1: 27 shifted tap matmuls from a 3*TM-lane window (MXU, f32 acc) + masked
#         per-tile per-channel sum / sum-of-squares partials.
# --------------------------------------------------------------------------------------
def _conv_stats_kernel(w_ref, prev_ref, cur_ref, next_ref, mask_ref,
                       conv_ref, stats_ref, *, tm, s_d, s_h):
    """w_ref: (27, COP, Cs) bf16 | prev/cur/next_ref: (Cs, TM) bf16 slab blocks i-1,i,i+1
    mask_ref: (1, TM) bf16 (1=valid voxel) | conv_ref: (COP, TM) bf16
    stats_ref: (COP, 128) f32 (lane 0 = sum, lane 1 = sum of squares)."""
    # Window column c corresponds to flat padded-voxel index (i-1)*tm + c.  The clamped
    # prev/next blocks only feed invalid (padding) output positions, which are masked
    # out below and zeroed in pass 2.
    window = jnp.concatenate(
        [prev_ref[...], cur_ref[...], next_ref[...]], axis=1)          # (Cs, 3*TM)
    acc = None
    t = 0
    for kd in range(3):
        for kh in range(3):
            for kw in range(3):
                off = tm + (kd - 1) * s_d + (kh - 1) * s_h + (kw - 1)  # static
                part = jnp.dot(w_ref[t], window[:, off:off + tm],
                               preferred_element_type=jnp.float32)     # (COP, TM) f32
                acc = part if acc is None else acc + part
                t += 1
    conv_ref[...] = acc.astype(conv_ref.dtype)

    valid = mask_ref[...] > 0.0                                        # (1, TM) bool
    am = jnp.where(valid, acc, 0.0)                                    # NaN-safe masking
    stats_ref[:, 0:1] = jnp.sum(am, axis=1, keepdims=True)
    stats_ref[:, 1:2] = jnp.sum(am * am, axis=1, keepdims=True)


# --------------------------------------------------------------------------------------
# Pass 2: fused BatchNorm affine (precomputed scale/shift) + ReLU + pad-voxel zeroing,
#         written in place over the conv intermediate (its output doubles as the next
#         stage's zero-padded input slab).
# --------------------------------------------------------------------------------------
def _bn_relu_kernel(conv_ref, scale_ref, shift_ref, mask_ref, out_ref):
    y = conv_ref[...].astype(jnp.float32) * scale_ref[...] + shift_ref[...]
    y = jnp.maximum(y, 0.0)
    out_ref[...] = jnp.where(mask_ref[...] > 0.0, y, 0.0).astype(out_ref.dtype)


# --------------------------------------------------------------------------------------
# One Conv3d(3, pad=1) + BatchNorm3d(train) + ReLU stage.
# --------------------------------------------------------------------------------------
def _conv_bn_relu_stage(slab, mask, w_taps, gamma, beta, *, dims, tm):
    """slab: (Cs, Mpad) bf16  channel-major flattened zero-padded (N, D+2, H+2, W+2)
    mask: (1, Mpad) bf16      1.0 at interior voxels, 0.0 at padding / tail
    w_taps: (27, COP, Cs) bf16, tap index = kd*9 + kh*3 + kw
    Returns (COP, Mpad) bf16, exactly 0 at padded voxels."""
    n, d, h, w = dims
    dp, hp, wp = d + 2, h + 2, w + 2
    s_h, s_d = wp, hp * wp
    cs, mpad = slab.shape
    grid_m = mpad // tm
    cout = int(gamma.shape[0])
    assert tm % 128 == 0 and mpad % tm == 0
    assert tm >= s_d + s_h + 1, "tile must span the widest 3x3x3 tap offset"

    cparams = pltpu.CompilerParams(
        dimension_semantics=("parallel",),
        vmem_limit_bytes=48 * 1024 * 1024,
    )

    conv_cost = pl.CostEstimate(
        flops=2 * mpad * 27 * cs * COP,
        transcendentals=0,
        bytes_accessed=(3 * cs + 1 + COP) * mpad * 2
        + 27 * COP * cs * 2 + grid_m * COP * 128 * 4,
    )

    kern = functools.partial(_conv_stats_kernel, tm=tm, s_d=s_d, s_h=s_h)
    conv_out, stats = pl.pallas_call(
        kern,
        out_shape=(
            jax.ShapeDtypeStruct((COP, mpad), jnp.bfloat16),
            jax.ShapeDtypeStruct((grid_m * COP, 128), jnp.float32),
        ),
        grid_spec=pltpu.PrefetchScalarGridSpec(
            num_scalar_prefetch=0,
            grid=(grid_m,),
            in_specs=[
                pl.BlockSpec((27, COP, cs), lambda i: (0, 0, 0)),          # weights
                pl.BlockSpec((cs, tm), lambda i: (0, jnp.maximum(i - 1, 0))),
                pl.BlockSpec((cs, tm), lambda i: (0, i)),
                pl.BlockSpec((cs, tm),
                             lambda i: (0, jnp.minimum(i + 1, grid_m - 1))),
                pl.BlockSpec((1, tm), lambda i: (0, i)),                   # valid mask
            ],
            out_specs=[
                pl.BlockSpec((COP, tm), lambda i: (0, i)),
                pl.BlockSpec((COP, 128), lambda i: (i, 0)),
            ],
        ),
        compiler_params=cparams,
        cost_estimate=conv_cost,
    )(w_taps, slab, slab, slab, mask)

    # Tiny O(Cout) combine: exact biased batch statistics over the N*D*H*W valid voxels
    # (padding was masked out of the sums), folded into per-channel scale/shift.
    st = stats.reshape(grid_m, COP, 128)
    count = float(n * d * h * w)
    mean = jnp.sum(st[:, :, 0], axis=0) / count
    var = jnp.maximum(jnp.sum(st[:, :, 1], axis=0) / count - mean * mean, 0.0)
    gamma_p = jnp.pad(gamma.astype(jnp.float32), (0, COP - cout))
    beta_p = jnp.pad(beta.astype(jnp.float32), (0, COP - cout))
    scale = gamma_p * jax.lax.rsqrt(var + BN_EPS)
    shift = beta_p - mean * scale

    bn_cost = pl.CostEstimate(
        flops=4 * COP * mpad,
        transcendentals=0,
        bytes_accessed=(2 * COP + 1) * mpad * 2 + 2 * COP * 4,
    )

    out = pl.pallas_call(
        _bn_relu_kernel,
        out_shape=jax.ShapeDtypeStruct((COP, mpad), jnp.bfloat16),
        grid_spec=pltpu.PrefetchScalarGridSpec(
            num_scalar_prefetch=0,
            grid=(grid_m,),
            in_specs=[
                pl.BlockSpec((COP, tm), lambda i: (0, i)),
                pl.BlockSpec((COP, 1), lambda i: (0, 0)),
                pl.BlockSpec((COP, 1), lambda i: (0, 0)),
                pl.BlockSpec((1, tm), lambda i: (0, i)),
            ],
            out_specs=pl.BlockSpec((COP, tm), lambda i: (0, i)),
        ),
        compiler_params=cparams,
        cost_estimate=bn_cost,
        input_output_aliases={0: 0},   # overwrite the conv intermediate in place
    )(conv_out, scale.reshape(COP, 1), shift.reshape(COP, 1), mask)
    return out


# --------------------------------------------------------------------------------------
# Glue (plain JAX, cheap): build the channel-major zero-padded slab + validity mask, and
# repack the conv weights as per-tap (Cout, Cin) matrices.
# --------------------------------------------------------------------------------------
def _build_slab_and_mask(x_ncdhw, tm, cin_p):
    n, c, d, h, w = x_ncdhw.shape
    dp, hp, wp = d + 2, h + 2, w + 2
    mp = n * dp * hp * wp
    mpad = _round_up(mp, tm)
    xc = jnp.transpose(x_ncdhw, (1, 0, 2, 3, 4))                  # (C, N, D, H, W)
    xc = jnp.pad(xc, ((0, cin_p - c), (0, 0), (1, 1), (1, 1), (1, 1)))
    slab = xc.astype(jnp.bfloat16).reshape(cin_p, mp)
    slab = jnp.pad(slab, ((0, 0), (0, mpad - mp)))                # (Cin_p, Mpad)
    valid = jnp.pad(jnp.ones((n, d, h, w), jnp.bfloat16),
                    ((0, 0), (1, 1), (1, 1), (1, 1)))
    mask = jnp.pad(valid.reshape(1, mp), ((0, 0), (0, mpad - mp)))
    return slab, mask


def _prep_weights(w_dhwio, cs):
    """(3,3,3,Cin,Cout) -> (27, COP, cs) bf16, tap index = kd*9 + kh*3 + kw."""
    _, _, _, cin, cout = w_dhwio.shape
    wt = w_dhwio.reshape(27, cin, cout)
    wt = jnp.transpose(wt, (0, 2, 1))                             # (27, Cout, Cin)
    wt = jnp.pad(wt, ((0, 0), (0, COP - cout), (0, cs - cin)))
    return wt.astype(jnp.bfloat16)


@jax.jit
def unet3d_convblock(x_ncdhw, params):
    """Forward pass of UNet3D_ConvBlock.  Input/output are NCDHW (PyTorch convention)."""
    n, c0, d, h, w = x_ncdhw.shape
    dims = (n, d, h, w)
    # One tile must span the widest tap offset (one depth plane + one row + 1 voxel).
    g = (h + 2) * (w + 2) + (w + 2) + 1
    tm = max(1024, _round_up(g, 128))

    cin_p = _round_up(c0, 8)
    slab, mask = _build_slab_and_mask(x_ncdhw, tm, cin_p)

    w1 = _prep_weights(params["w1"], cin_p)
    y1 = _conv_bn_relu_stage(slab, mask, w1, params["g1"], params["beta1"],
                             dims=dims, tm=tm)                    # (COP, Mpad) bf16
    w2 = _prep_weights(params["w2"], COP)                         # pad channels are 0
    y2 = _conv_bn_relu_stage(y1, mask, w2, params["g2"], params["beta2"],
                             dims=dims, tm=tm)

    c2 = params["g2"].shape[0]
    dp, hp, wp = d + 2, h + 2, w + 2
    mp = n * dp * hp * wp
    out = y2[:c2, :mp].reshape(c2, n, dp, hp, wp)[:, :, 1:-1, 1:-1, 1:-1]
    return jnp.transpose(out, (1, 0, 2, 3, 4)).astype(jnp.float32)


# --------------------------------------------------------------------------------------
# Pure-JAX f32 reference (includes the conv bias: training-mode BN's batch-mean
# subtraction cancels it, so it matches the bias-free kernel path in exact arithmetic).
# --------------------------------------------------------------------------------------
def _ref_stage(x_ndhwc, w_dhwio, b, gamma, beta):
    out = jax.lax.conv_general_dilated(
        x_ndhwc, w_dhwio, window_strides=(1, 1, 1), padding="SAME",
        dimension_numbers=("NDHWC", "DHWIO", "NDHWC"),
        precision=jax.lax.Precision.HIGHEST)
    out = out + b
    mean = out.mean(axis=(0, 1, 2, 3), keepdims=True)
    var = jnp.square(out - mean).mean(axis=(0, 1, 2, 3), keepdims=True)
    out = (out - mean) * jax.lax.rsqrt(var + BN_EPS) * gamma + beta
    return jnp.maximum(out, 0.0)


def unet3d_convblock_ref(x_ncdhw, params):
    x = jnp.transpose(x_ncdhw, (0, 2, 3, 4, 1))
    y = _ref_stage(x, params["w1"], params["b1"], params["g1"], params["beta1"])
    y = _ref_stage(y, params["w2"], params["b2"], params["g2"], params["beta2"])
    return jnp.transpose(y, (0, 4, 1, 2, 3))


def init_params(key, filters):
    """Deterministic synthetic parameters.

    Conv weights are (kD, kH, kW, Cin, Cout); the mapping from the PyTorch Conv3d layout
    (Cout, Cin, kD, kH, kW) is w_here = w_torch.transpose(2, 3, 4, 1, 0).
    """
    c0, c1, c2 = filters
    k = jax.random.split(key, 8)
    s1 = 1.0 / np.sqrt(c0 * 27)
    s2 = 1.0 / np.sqrt(c1 * 27)
    return {
        "w1": jax.random.uniform(k[0], (3, 3, 3, c0, c1), jnp.float32, -s1, s1),
        "b1": jax.random.uniform(k[1], (c1,), jnp.float32, -s1, s1),
        "g1": 1.0 + 0.1 * jax.random.normal(k[2], (c1,), jnp.float32),
        "beta1": 0.1 * jax.random.normal(k[3], (c1,), jnp.float32),
        "w2": jax.random.uniform(k[4], (3, 3, 3, c1, c2), jnp.float32, -s2, s2),
        "b2": jax.random.uniform(k[5], (c2,), jnp.float32, -s2, s2),
        "g2": 1.0 + 0.1 * jax.random.normal(k[6], (c2,), jnp.float32),
        "beta2": 0.1 * jax.random.normal(k[7], (c2,), jnp.float32),
    }


if __name__ == "__main__":
    filters = [4, 8, 8]                      # UNet3D_ConvBlock(filters)
    N, D, H, W = 2, 8, 8, 8                  # padded volume = 2*10*10*10 = 2000 voxels
                                             # -> Mpad = 2048, TM = 1024, 2-tile grid

    key = jax.random.PRNGKey(0)
    kx, kp = jax.random.split(key)
    x = jax.random.normal(kx, (N, filters[0], D, H, W), jnp.float32)   # NCDHW
    params = init_params(kp, filters)

    out = jax.block_until_ready(unet3d_convblock(x, params))
    assert out.shape == (N, filters[2], D, H, W)

    ref = jax.block_until_ready(unet3d_convblock_ref(x, params))
    max_diff = float(jnp.max(jnp.abs(out - ref)))
    mean_diff = float(jnp.mean(jnp.abs(out - ref)))
    # bf16 MXU inputs + bf16 intermediates through two conv+BN stages vs f32 HIGHEST ref.
    assert max_diff < 1.5e-1, f"mismatch vs reference: max |diff| = {max_diff}"
    assert mean_diff < 2e-2, f"mismatch vs reference: mean |diff| = {mean_diff}"

    print("KERNEL_OK")
</pallas_src>

<mosaic_0001>
module attributes {stable_mosaic.version = 11 : i64} {
  func.func @_conv_stats_kernel(%arg0: i32, %arg1: memref<27x16x8xbf16, #tpu.memory_space<vmem>>, %arg2: memref<8x1024xbf16, #tpu.memory_space<vmem>>, %arg3: memref<8x1024xbf16, #tpu.memory_space<vmem>>, %arg4: memref<8x1024xbf16, #tpu.memory_space<vmem>>, %arg5: memref<1x1024xbf16, #tpu.memory_space<vmem>>, %arg6: memref<16x1024xbf16, #tpu.memory_space<vmem>>, %arg7: memref<16x128xf32, #tpu.memory_space<vmem>>) attributes {dimension_semantics = [#tpu.dimension_semantics<parallel>], iteration_bounds = array<i64: 2>, scalar_prefetch = 0 : i64, scratch_operands = 0 : i64, tpu.core_type = #tpu.core_type<tc>, window_params = [{pipeline_mode = #tpu.pipeline_mode<synchronous>, transform_indices = @transform_0, window_bounds = array<i64: 27, 16, 8>}, {transform_indices = @transform_1, window_bounds = array<i64: 8, 1024>}, {transform_indices = @transform_2, window_bounds = array<i64: 8, 1024>}, {transform_indices = @transform_3, window_bounds = array<i64: 8, 1024>}, {transform_indices = @transform_4, window_bounds = array<i64: 1, 1024>}, {transform_indices = @transform_5, window_bounds = array<i64: 16, 1024>}, {transform_indices = @transform_6, window_bounds = array<i64: 16, 128>}]} {
    %c0 = arith.constant 0 : index
    %c0_0 = arith.constant 0 : index
    %0 = vector.load %arg2[%c0, %c0_0] : memref<8x1024xbf16, #tpu.memory_space<vmem>>, vector<8x1024xbf16>
    %c0_1 = arith.constant 0 : index
    %c0_2 = arith.constant 0 : index
    %1 = vector.load %arg3[%c0_1, %c0_2] : memref<8x1024xbf16, #tpu.memory_space<vmem>>, vector<8x1024xbf16>
    %c0_3 = arith.constant 0 : index
    %c0_4 = arith.constant 0 : index
    %2 = vector.load %arg4[%c0_3, %c0_4] : memref<8x1024xbf16, #tpu.memory_space<vmem>>, vector<8x1024xbf16>
    %3 = tpu.concatenate %0, %1, %2 in 1 : vector<8x1024xbf16>, vector<8x1024xbf16>, vector<8x1024xbf16> -> vector<8x3072xbf16>
    %c0_5 = arith.constant 0 : index
    %c0_6 = arith.constant 0 : index
    %c0_7 = arith.constant 0 : index
    %4 = vector.load %arg1[%c0_5, %c0_6, %c0_7] : memref<27x16x8xbf16, #tpu.memory_space<vmem>>, vector<1x16x8xbf16>
    %5 = vector.shape_cast %4 : vector<1x16x8xbf16> to vector<16x8xbf16>
    %6 = vector.extract_strided_slice %3 {offsets = [0, 913], sizes = [8, 1024], strides = [1, 1]} : vector<8x3072xbf16> to vector<8x1024xbf16>
    %cst = arith.constant dense<0.000000e+00> : vector<16x1024xf32>
    %7 = tpu.matmul %5, %6, %cst {dimension_numbers = #tpu.dot_dimension_numbers<[1], [0], [0], [1], [0, 0, 1, 1], [], []>} : vector<16x8xbf16>, vector<8x1024xbf16>, vector<16x1024xf32> -> vector<16x1024xf32>
    %c1 = arith.constant 1 : index
    %c0_8 = arith.constant 0 : index
    %c0_9 = arith.constant 0 : index
    %8 = vector.load %arg1[%c1, %c0_8, %c0_9] : memref<27x16x8xbf16, #tpu.memory_space<vmem>>, vector<1x16x8xbf16>
    %9 = vector.shape_cast %8 : vector<1x16x8xbf16> to vector<16x8xbf16>
    %10 = vector.extract_strided_slice %3 {offsets = [0, 914], sizes = [8, 1024], strides = [1, 1]} : vector<8x3072xbf16> to vector<8x1024xbf16>
    %cst_10 = arith.constant dense<0.000000e+00> : vector<16x1024xf32>
    %11 = tpu.matmul %9, %10, %cst_10 {dimension_numbers = #tpu.dot_dimension_numbers<[1], [0], [0], [1], [0, 0, 1, 1], [], []>} : vector<16x8xbf16>, vector<8x1024xbf16>, vector<16x1024xf32> -> vector<16x1024xf32>
    %12 = arith.addf %7, %11 : vector<16x1024xf32>
    %c2 = arith.constant 2 : index
    %c0_11 = arith.constant 0 : index
    %c0_12 = arith.constant 0 : index
    %13 = vector.load %arg1[%c2, %c0_11, %c0_12] : memref<27x16x8xbf16, #tpu.memory_space<vmem>>, vector<1x16x8xbf16>
    %14 = vector.shape_cast %13 : vector<1x16x8xbf16> to vector<16x8xbf16>
    %15 = vector.extract_strided_slice %3 {offsets = [0, 915], sizes = [8, 1024], strides = [1, 1]} : vector<8x3072xbf16> to vector<8x1024xbf16>
    %cst_13 = arith.constant dense<0.000000e+00> : vector<16x1024xf32>
    %16 = tpu.matmul %14, %15, %cst_13 {dimension_numbers = #tpu.dot_dimension_numbers<[1], [0], [0], [1], [0, 0, 1, 1], [], []>} : vector<16x8xbf16>, vector<8x1024xbf16>, vector<16x1024xf32> -> vector<16x1024xf32>
    %17 = arith.addf %12, %16 : vector<16x1024xf32>
    %c3 = arith.constant 3 : index
    %c0_14 = arith.constant 0 : index
    %c0_15 = arith.constant 0 : index
    %18 = vector.load %arg1[%c3, %c0_14, %c0_15] : memref<27x16x8xbf16, #tpu.memory_space<vmem>>, vector<1x16x8xbf16>
    %19 = vector.shape_cast %18 : vector<1x16x8xbf16> to vector<16x8xbf16>
    %20 = vector.extract_strided_slice %3 {offsets = [0, 923], sizes = [8, 1024], strides = [1, 1]} : vector<8x3072xbf16> to vector<8x1024xbf16>
    %cst_16 = arith.constant dense<0.000000e+00> : vector<16x1024xf32>
    %21 = tpu.matmul %19, %20, %cst_16 {dimension_numbers = #tpu.dot_dimension_numbers<[1], [0], [0], [1], [0, 0, 1, 1], [], []>} : vector<16x8xbf16>, vector<8x1024xbf16>, vector<16x1024xf32> -> vector<16x1024xf32>
    %22 = arith.addf %17, %21 : vector<16x1024xf32>
    %c4 = arith.constant 4 : index
    %c0_17 = arith.constant 0 : index
    %c0_18 = arith.constant 0 : index
    %23 = vector.load %arg1[%c4, %c0_17, %c0_18] : memref<27x16x8xbf16, #tpu.memory_space<vmem>>, vector<1x16x8xbf16>
    %24 = vector.shape_cast %23 : vector<1x16x8xbf16> to vector<16x8xbf16>
    %25 = vector.extract_strided_slice %3 {offsets = [0, 924], sizes = [8, 1024], strides = [1, 1]} : vector<8x3072xbf16> to vector<8x1024xbf16>
    %cst_19 = arith.constant dense<0.000000e+00> : vector<16x1024xf32>
    %26 = tpu.matmul %24, %25, %cst_19 {dimension_numbers = #tpu.dot_dimension_numbers<[1], [0], [0], [1], [0, 0, 1, 1], [], []>} : vector<16x8xbf16>, vector<8x1024xbf16>, vector<16x1024xf32> -> vector<16x1024xf32>
    %27 = arith.addf %22, %26 : vector<16x1024xf32>
    %c5 = arith.constant 5 : index
    %c0_20 = arith.constant 0 : index
    %c0_21 = arith.constant 0 : index
    %28 = vector.load %arg1[%c5, %c0_20, %c0_21] : memref<27x16x8xbf16, #tpu.memory_space<vmem>>, vector<1x16x8xbf16>
    %29 = vector.shape_cast %28 : vector<1x16x8xbf16> to vector<16x8xbf16>
    %30 = vector.extract_strided_slice %3 {offsets = [0, 925], sizes = [8, 1024], strides = [1, 1]} : vector<8x3072xbf16> to vector<8x1024xbf16>
    %cst_22 = arith.constant dense<0.000000e+00> : vector<16x1024xf32>
    %31 = tpu.matmul %29, %30, %cst_22 {dimension_numbers = #tpu.dot_dimension_numbers<[1], [0], [0], [1], [0, 0, 1, 1], [], []>} : vector<16x8xbf16>, vector<8x1024xbf16>, vector<16x1024xf32> -> vector<16x1024xf32>
    %32 = arith.addf %27, %31 : vector<16x1024xf32>
    %c6 = arith.constant 6 : index
    %c0_23 = arith.constant 0 : index
    %c0_24 = arith.constant 0 : index
    %33 = vector.load %arg1[%c6, %c0_23, %c0_24] : memref<27x16x8xbf16, #tpu.memory_space<vmem>>, vector<1x16x8xbf16>
    %34 = vector.shape_cast %33 : vector<1x16x8xbf16> to vector<16x8xbf16>
    %35 = vector.extract_strided_slice %3 {offsets = [0, 933], sizes = [8, 1024], strides = [1, 1]} : vector<8x3072xbf16> to vector<8x1024xbf16>
    %cst_25 = arith.constant dense<0.000000e+00> : vector<16x1024xf32>
    %36 = tpu.matmul %34, %35, %cst_25 {dimension_numbers = #tpu.dot_dimension_numbers<[1], [0], [0], [1], [0, 0, 1, 1], [], []>} : vector<16x8xbf16>, vector<8x1024xbf16>, vector<16x1024xf32> -> vector<16x1024xf32>
    %37 = arith.addf %32, %36 : vector<16x1024xf32>
    %c7 = arith.constant 7 : index
    %c0_26 = arith.constant 0 : index
    %c0_27 = arith.constant 0 : index
    %38 = vector.load %arg1[%c7, %c0_26, %c0_27] : memref<27x16x8xbf16, #tpu.memory_space<vmem>>, vector<1x16x8xbf16>
    %39 = vector.shape_cast %38 : vector<1x16x8xbf16> to vector<16x8xbf16>
    %40 = vector.extract_strided_slice %3 {offsets = [0, 934], sizes = [8, 1024], strides = [1, 1]} : vector<8x3072xbf16> to vector<8x1024xbf16>
    %cst_28 = arith.constant dense<0.000000e+00> : vector<16x1024xf32>
    %41 = tpu.matmul %39, %40, %cst_28 {dimension_numbers = #tpu.dot_dimension_numbers<[1], [0], [0], [1], [0, 0, 1, 1], [], []>} : vector<16x8xbf16>, vector<8x1024xbf16>, vector<16x1024xf32> -> vector<16x1024xf32>
    %42 = arith.addf %37, %41 : vector<16x1024xf32>
    %c8 = arith.constant 8 : index
    %c0_29 = arith.constant 0 : index
    %c0_30 = arith.constant 0 : index
    %43 = vector.load %arg1[%c8, %c0_29, %c0_30] : memref<27x16x8xbf16, #tpu.memory_space<vmem>>, vector<1x16x8xbf16>
    %44 = vector.shape_cast %43 : vector<1x16x8xbf16> to vector<16x8xbf16>
    %45 = vector.extract_strided_slice %3 {offsets = [0, 935], sizes = [8, 1024], strides = [1, 1]} : vector<8x3072xbf16> to vector<8x1024xbf16>
    %cst_31 = arith.constant dense<0.000000e+00> : vector<16x1024xf32>
    %46 = tpu.matmul %44, %45, %cst_31 {dimension_numbers = #tpu.dot_dimension_numbers<[1], [0], [0], [1], [0, 0, 1, 1], [], []>} : vector<16x8xbf16>, vector<8x1024xbf16>, vector<16x1024xf32> -> vector<16x1024xf32>
    %47 = arith.addf %42, %46 : vector<16x1024xf32>
    %c9 = arith.constant 9 : index
    %c0_32 = arith.constant 0 : index
    %c0_33 = arith.constant 0 : index
    %48 = vector.load %arg1[%c9, %c0_32, %c0_33] : memref<27x16x8xbf16, #tpu.memory_space<vmem>>, vector<1x16x8xbf16>
    %49 = vector.shape_cast %48 : vector<1x16x8xbf16> to vector<16x8xbf16>
    %50 = vector.extract_strided_slice %3 {offsets = [0, 1013], sizes = [8, 1024], strides = [1, 1]} : vector<8x3072xbf16> to vector<8x1024xbf16>
    %cst_34 = arith.constant dense<0.000000e+00> : vector<16x1024xf32>
    %51 = tpu.matmul %49, %50, %cst_34 {dimension_numbers = #tpu.dot_dimension_numbers<[1], [0], [0], [1], [0, 0, 1, 1], [], []>} : vector<16x8xbf16>, vector<8x1024xbf16>, vector<16x1024xf32> -> vector<16x1024xf32>
    %52 = arith.addf %47, %51 : vector<16x1024xf32>
    %c10 = arith.constant 10 : index
    %c0_35 = arith.constant 0 : index
    %c0_36 = arith.constant 0 : index
    %53 = vector.load %arg1[%c10, %c0_35, %c0_36] : memref<27x16x8xbf16, #tpu.memory_space<vmem>>, vector<1x16x8xbf16>
    %54 = vector.shape_cast %53 : vector<1x16x8xbf16> to vector<16x8xbf16>
    %55 = vector.extract_strided_slice %3 {offsets = [0, 1014], sizes = [8, 1024], strides = [1, 1]} : vector<8x3072xbf16> to vector<8x1024xbf16>
    %cst_37 = arith.constant dense<0.000000e+00> : vector<16x1024xf32>
    %56 = tpu.matmul %54, %55, %cst_37 {dimension_numbers = #tpu.dot_dimension_numbers<[1], [0], [0], [1], [0, 0, 1, 1], [], []>} : vector<16x8xbf16>, vector<8x1024xbf16>, vector<16x1024xf32> -> vector<16x1024xf32>
    %57 = arith.addf %52, %56 : vector<16x1024xf32>
    %c11 = arith.constant 11 : index
    %c0_38 = arith.constant 0 : index
    %c0_39 = arith.constant 0 : index
    %58 = vector.load %arg1[%c11, %c0_38, %c0_39] : memref<27x16x8xbf16, #tpu.memory_space<vmem>>, vector<1x16x8xbf16>
    %59 = vector.shape_cast %58 : vector<1x16x8xbf16> to vector<16x8xbf16>
    %60 = vector.extract_strided_slice %3 {offsets = [0, 1015], sizes = [8, 1024], strides = [1, 1]} : vector<8x3072xbf16> to vector<8x1024xbf16>
    %cst_40 = arith.constant dense<0.000000e+00> : vector<16x1024xf32>
    %61 = tpu.matmul %59, %60, %cst_40 {dimension_numbers = #tpu.dot_dimension_numbers<[1], [0], [0], [1], [0, 0, 1, 1], [], []>} : vector<16x8xbf16>, vector<8x1024xbf16>, vector<16x1024xf32> -> vector<16x1024xf32>
    %62 = arith.addf %57, %61 : vector<16x1024xf32>
    %c12 = arith.constant 12 : index
    %c0_41 = arith.constant 0 : index
    %c0_42 = arith.constant 0 : index
    %63 = vector.load %arg1[%c12, %c0_41, %c0_42] : memref<27x16x8xbf16, #tpu.memory_space<vmem>>, vector<1x16x8xbf16>
    %64 = vector.shape_cast %63 : vector<1x16x8xbf16> to vector<16x8xbf16>
    %65 = vector.extract_strided_slice %3 {offsets = [0, 1023], sizes = [8, 1024], strides = [1, 1]} : vector<8x3072xbf16> to vector<8x1024xbf16>
    %cst_43 = arith.constant dense<0.000000e+00> : vector<16x1024xf32>
    %66 = tpu.matmul %64, %65, %cst_43 {dimension_numbers = #tpu.dot_dimension_numbers<[1], [0], [0], [1], [0, 0, 1, 1], [], []>} : vector<16x8xbf16>, vector<8x1024xbf16>, vector<16x1024xf32> -> vector<16x1024xf32>
    %67 = arith.addf %62, %66 : vector<16x1024xf32>
    %c13 = arith.constant 13 : index
    %c0_44 = arith.constant 0 : index
    %c0_45 = arith.constant 0 : index
    %68 = vector.load %arg1[%c13, %c0_44, %c0_45] : memref<27x16x8xbf16, #tpu.memory_space<vmem>>, vector<1x16x8xbf16>
    %69 = vector.shape_cast %68 : vector<1x16x8xbf16> to vector<16x8xbf16>
    %70 = vector.extract_strided_slice %3 {offsets = [0, 1024], sizes = [8, 1024], strides = [1, 1]} : vector<8x3072xbf16> to vector<8x1024xbf16>
    %cst_46 = arith.constant dense<0.000000e+00> : vector<16x1024xf32>
    %71 = tpu.matmul %69, %70, %cst_46 {dimension_numbers = #tpu.dot_dimension_numbers<[1], [0], [0], [1], [0, 0, 1, 1], [], []>} : vector<16x8xbf16>, vector<8x1024xbf16>, vector<16x1024xf32> -> vector<16x1024xf32>
    %72 = arith.addf %67, %71 : vector<16x1024xf32>
    %c14 = arith.constant 14 : index
    %c0_47 = arith.constant 0 : index
    %c0_48 = arith.constant 0 : index
    %73 = vector.load %arg1[%c14, %c0_47, %c0_48] : memref<27x16x8xbf16, #tpu.memory_space<vmem>>, vector<1x16x8xbf16>
    %74 = vector.shape_cast %73 : vector<1x16x8xbf16> to vector<16x8xbf16>
    %75 = vector.extract_strided_slice %3 {offsets = [0, 1025], sizes = [8, 1024], strides = [1, 1]} : vector<8x3072xbf16> to vector<8x1024xbf16>
    %cst_49 = arith.constant dense<0.000000e+00> : vector<16x1024xf32>
    %76 = tpu.matmul %74, %75, %cst_49 {dimension_numbers = #tpu.dot_dimension_numbers<[1], [0], [0], [1], [0, 0, 1, 1], [], []>} : vector<16x8xbf16>, vector<8x1024xbf16>, vector<16x1024xf32> -> vector<16x1024xf32>
    %77 = arith.addf %72, %76 : vector<16x1024xf32>
    %c15 = arith.constant 15 : index
    %c0_50 = arith.constant 0 : index
    %c0_51 = arith.constant 0 : index
    %78 = vector.load %arg1[%c15, %c0_50, %c0_51] : memref<27x16x8xbf16, #tpu.memory_space<vmem>>, vector<1x16x8xbf16>
    %79 = vector.shape_cast %78 : vector<1x16x8xbf16> to vector<16x8xbf16>
    %80 = vector.extract_strided_slice %3 {offsets = [0, 1033], sizes = [8, 1024], strides = [1, 1]} : vector<8x3072xbf16> to vector<8x1024xbf16>
    %cst_52 = arith.constant dense<0.000000e+00> : vector<16x1024xf32>
    %81 = tpu.matmul %79, %80, %cst_52 {dimension_numbers = #tpu.dot_dimension_numbers<[1], [0], [0], [1], [0, 0, 1, 1], [], []>} : vector<16x8xbf16>, vector<8x1024xbf16>, vector<16x1024xf32> -> vector<16x1024xf32>
    %82 = arith.addf %77, %81 : vector<16x1024xf32>
    %c16 = arith.constant 16 : index
    %c0_53 = arith.constant 0 : index
    %c0_54 = arith.constant 0 : index
    %83 = vector.load %arg1[%c16, %c0_53, %c0_54] : memref<27x16x8xbf16, #tpu.memory_space<vmem>>, vector<1x16x8xbf16>
    %84 = vector.shape_cast %83 : vector<1x16x8xbf16> to vector<16x8xbf16>
    %85 = vector.extract_strided_slice %3 {offsets = [0, 1034], sizes = [8, 1024], strides = [1, 1]} : vector<8x3072xbf16> to vector<8x1024xbf16>
    %cst_55 = arith.constant dense<0.000000e+00> : vector<16x1024xf32>
    %86 = tpu.matmul %84, %85, %cst_55 {dimension_numbers = #tpu.dot_dimension_numbers<[1], [0], [0], [1], [0, 0, 1, 1], [], []>} : vector<16x8xbf16>, vector<8x1024xbf16>, vector<16x1024xf32> -> vector<16x1024xf32>
    %87 = arith.addf %82, %86 : vector<16x1024xf32>
    %c17 = arith.constant 17 : index
    %c0_56 = arith.constant 0 : index
    %c0_57 = arith.constant 0 : index
    %88 = vector.load %arg1[%c17, %c0_56, %c0_57] : memref<27x16x8xbf16, #tpu.memory_space<vmem>>, vector<1x16x8xbf16>
    %89 = vector.shape_cast %88 : vector<1x16x8xbf16> to vector<16x8xbf16>
    %90 = vector.extract_strided_slice %3 {offsets = [0, 1035], sizes = [8, 1024], strides = [1, 1]} : vector<8x3072xbf16> to vector<8x1024xbf16>
    %cst_58 = arith.constant dense<0.000000e+00> : vector<16x1024xf32>
    %91 = tpu.matmul %89, %90, %cst_58 {dimension_numbers = #tpu.dot_dimension_numbers<[1], [0], [0], [1], [0, 0, 1, 1], [], []>} : vector<16x8xbf16>, vector<8x1024xbf16>, vector<16x1024xf32> -> vector<16x1024xf32>
    %92 = arith.addf %87, %91 : vector<16x1024xf32>
    %c18 = arith.constant 18 : index
    %c0_59 = arith.constant 0 : index
    %c0_60 = arith.constant 0 : index
    %93 = vector.load %arg1[%c18, %c0_59, %c0_60] : memref<27x16x8xbf16, #tpu.memory_space<vmem>>, vector<1x16x8xbf16>
    %94 = vector.shape_cast %93 : vector<1x16x8xbf16> to vector<16x8xbf16>
    %95 = vector.extract_strided_slice %3 {offsets = [0, 1113], sizes = [8, 1024], strides = [1, 1]} : vector<8x3072xbf16> to vector<8x1024xbf16>
    %cst_61 = arith.constant dense<0.000000e+00> : vector<16x1024xf32>
    %96 = tpu.matmul %94, %95, %cst_61 {dimension_numbers = #tpu.dot_dimension_numbers<[1], [0], [0], [1], [0, 0, 1, 1], [], []>} : vector<16x8xbf16>, vector<8x1024xbf16>, vector<16x1024xf32> -> vector<16x1024xf32>
    %97 = arith.addf %92, %96 : vector<16x1024xf32>
    %c19 = arith.constant 19 : index
    %c0_62 = arith.constant 0 : index
    %c0_63 = arith.constant 0 : index
    %98 = vector.load %arg1[%c19, %c0_62, %c0_63] : memref<27x16x8xbf16, #tpu.memory_space<vmem>>, vector<1x16x8xbf16>
    %99 = vector.shape_cast %98 : vector<1x16x8xbf16> to vector<16x8xbf16>
    %100 = vector.extract_strided_slice %3 {offsets = [0, 1114], sizes = [8, 1024], strides = [1, 1]} : vector<8x3072xbf16> to vector<8x1024xbf16>
    %cst_64 = arith.constant dense<0.000000e+00> : vector<16x1024xf32>
    %101 = tpu.matmul %99, %100, %cst_64 {dimension_numbers = #tpu.dot_dimension_numbers<[1], [0], [0], [1], [0, 0, 1, 1], [], []>} : vector<16x8xbf16>, vector<8x1024xbf16>, vector<16x1024xf32> -> vector<16x1024xf32>
    %102 = arith.addf %97, %101 : vector<16x1024xf32>
    %c20 = arith.constant 20 : index
    %c0_65 = arith.constant 0 : index
    %c0_66 = arith.constant 0 : index
    %103 = vector.load %arg1[%c20, %c0_65, %c0_66] : memref<27x16x8xbf16, #tpu.memory_space<vmem>>, vector<1x16x8xbf16>
    %104 = vector.shape_cast %103 : vector<1x16x8xbf16> to vector<16x8xbf16>
    %105 = vector.extract_strided_slice %3 {offsets = [0, 1115], sizes = [8, 1024], strides = [1, 1]} : vector<8x3072xbf16> to vector<8x1024xbf16>
    %cst_67 = arith.constant dense<0.000000e+00> : vector<16x1024xf32>
    %106 = tpu.matmul %104, %105, %cst_67 {dimension_numbers = #tpu.dot_dimension_numbers<[1], [0], [0], [1], [0, 0, 1, 1], [], []>} : vector<16x8xbf16>, vector<8x1024xbf16>, vector<16x1024xf32> -> vector<16x1024xf32>
    %107 = arith.addf %102, %106 : vector<16x1024xf32>
    %c21 = arith.constant 21 : index
    %c0_68 = arith.constant 0 : index
    %c0_69 = arith.constant 0 : index
    %108 = vector.load %arg1[%c21, %c0_68, %c0_69] : memref<27x16x8xbf16, #tpu.memory_space<vmem>>, vector<1x16x8xbf16>
    %109 = vector.shape_cast %108 : vector<1x16x8xbf16> to vector<16x8xbf16>
    %110 = vector.extract_strided_slice %3 {offsets = [0, 1123], sizes = [8, 1024], strides = [1, 1]} : vector<8x3072xbf16> to vector<8x1024xbf16>
    %cst_70 = arith.constant dense<0.000000e+00> : vector<16x1024xf32>
    %111 = tpu.matmul %109, %110, %cst_70 {dimension_numbers = #tpu.dot_dimension_numbers<[1], [0], [0], [1], [0, 0, 1, 1], [], []>} : vector<16x8xbf16>, vector<8x1024xbf16>, vector<16x1024xf32> -> vector<16x1024xf32>
    %112 = arith.addf %107, %111 : vector<16x1024xf32>
    %c22 = arith.constant 22 : index
    %c0_71 = arith.constant 0 : index
    %c0_72 = arith.constant 0 : index
    %113 = vector.load %arg1[%c22, %c0_71, %c0_72] : memref<27x16x8xbf16, #tpu.memory_space<vmem>>, vector<1x16x8xbf16>
    %114 = vector.shape_cast %113 : vector<1x16x8xbf16> to vector<16x8xbf16>
    %115 = vector.extract_strided_slice %3 {offsets = [0, 1124], sizes = [8, 1024], strides = [1, 1]} : vector<8x3072xbf16> to vector<8x1024xbf16>
    %cst_73 = arith.constant dense<0.000000e+00> : vector<16x1024xf32>
    %116 = tpu.matmul %114, %115, %cst_73 {dimension_numbers = #tpu.dot_dimension_numbers<[1], [0], [0], [1], [0, 0, 1, 1], [], []>} : vector<16x8xbf16>, vector<8x1024xbf16>, vector<16x1024xf32> -> vector<16x1024xf32>
    %117 = arith.addf %112, %116 : vector<16x1024xf32>
    %c23 = arith.constant 23 : index
    %c0_74 = arith.constant 0 : index
    %c0_75 = arith.constant 0 : index
    %118 = vector.load %arg1[%c23, %c0_74, %c0_75] : memref<27x16x8xbf16, #tpu.memory_space<vmem>>, vector<1x16x8xbf16>
    %119 = vector.shape_cast %118 : vector<1x16x8xbf16> to vector<16x8xbf16>
    %120 = vector.extract_strided_slice %3 {offsets = [0, 1125], sizes = [8, 1024], strides = [1, 1]} : vector<8x3072xbf16> to vector<8x1024xbf16>
    %cst_76 = arith.constant dense<0.000000e+00> : vector<16x1024xf32>
    %121 = tpu.matmul %119, %120, %cst_76 {dimension_numbers = #tpu.dot_dimension_numbers<[1], [0], [0], [1], [0, 0, 1, 1], [], []>} : vector<16x8xbf16>, vector<8x1024xbf16>, vector<16x1024xf32> -> vector<16x1024xf32>
    %122 = arith.addf %117, %121 : vector<16x1024xf32>
    %c24 = arith.constant 24 : index
    %c0_77 = arith.constant 0 : index
    %c0_78 = arith.constant 0 : index
    %123 = vector.load %arg1[%c24, %c0_77, %c0_78] : memref<27x16x8xbf16, #tpu.memory_space<vmem>>, vector<1x16x8xbf16>
    %124 = vector.shape_cast %123 : vector<1x16x8xbf16> to vector<16x8xbf16>
    %125 = vector.extract_strided_slice %3 {offsets = [0, 1133], sizes = [8, 1024], strides = [1, 1]} : vector<8x3072xbf16> to vector<8x1024xbf16>
    %cst_79 = arith.constant dense<0.000000e+00> : vector<16x1024xf32>
    %126 = tpu.matmul %124, %125, %cst_79 {dimension_numbers = #tpu.dot_dimension_numbers<[1], [0], [0], [1], [0, 0, 1, 1], [], []>} : vector<16x8xbf16>, vector<8x1024xbf16>, vector<16x1024xf32> -> vector<16x1024xf32>
    %127 = arith.addf %122, %126 : vector<16x1024xf32>
    %c25 = arith.constant 25 : index
    %c0_80 = arith.constant 0 : index
    %c0_81 = arith.constant 0 : index
    %128 = vector.load %arg1[%c25, %c0_80, %c0_81] : memref<27x16x8xbf16, #tpu.memory_space<vmem>>, vector<1x16x8xbf16>
    %129 = vector.shape_cast %128 : vector<1x16x8xbf16> to vector<16x8xbf16>
    %130 = vector.extract_strided_slice %3 {offsets = [0, 1134], sizes = [8, 1024], strides = [1, 1]} : vector<8x3072xbf16> to vector<8x1024xbf16>
    %cst_82 = arith.constant dense<0.000000e+00> : vector<16x1024xf32>
    %131 = tpu.matmul %129, %130, %cst_82 {dimension_numbers = #tpu.dot_dimension_numbers<[1], [0], [0], [1], [0, 0, 1, 1], [], []>} : vector<16x8xbf16>, vector<8x1024xbf16>, vector<16x1024xf32> -> vector<16x1024xf32>
    %132 = arith.addf %127, %131 : vector<16x1024xf32>
    %c26 = arith.constant 26 : index
    %c0_83 = arith.constant 0 : index
    %c0_84 = arith.constant 0 : index
    %133 = vector.load %arg1[%c26, %c0_83, %c0_84] : memref<27x16x8xbf16, #tpu.memory_space<vmem>>, vector<1x16x8xbf16>
    %134 = vector.shape_cast %133 : vector<1x16x8xbf16> to vector<16x8xbf16>
    %135 = vector.extract_strided_slice %3 {offsets = [0, 1135], sizes = [8, 1024], strides = [1, 1]} : vector<8x3072xbf16> to vector<8x1024xbf16>
    %cst_85 = arith.constant dense<0.000000e+00> : vector<16x1024xf32>
    %136 = tpu.matmul %134, %135, %cst_85 {dimension_numbers = #tpu.dot_dimension_numbers<[1], [0], [0], [1], [0, 0, 1, 1], [], []>} : vector<16x8xbf16>, vector<8x1024xbf16>, vector<16x1024xf32> -> vector<16x1024xf32>
    %137 = arith.addf %132, %136 : vector<16x1024xf32>
    %138 = arith.truncf %137 : vector<16x1024xf32> to vector<16x1024xbf16>
    %c0_86 = arith.constant 0 : index
    %c0_87 = arith.constant 0 : index
    %139 = vector.load %arg6[%c0_86, %c0_87] : memref<16x1024xbf16, #tpu.memory_space<vmem>>, vector<16x1024xbf16>
    tpu.vector_store %arg6[%c0_86, %c0_87], %138 {strides = array<i32>} : memref<16x1024xbf16, #tpu.memory_space<vmem>>, vector<16x1024xbf16>,
    %c0_88 = arith.constant 0 : index
    %c0_89 = arith.constant 0 : index
    %140 = vector.load %arg5[%c0_88, %c0_89] : memref<1x1024xbf16, #tpu.memory_space<vmem>>, vector<1x1024xbf16>
    %cst_90 = arith.constant 0.000000e+00 : bf16
    %141 = vector.broadcast %cst_90 : bf16 to vector<1x1024xbf16>
    %142 = arith.cmpf ogt, %140, %141 : vector<1x1024xbf16>
    %cst_91 = arith.constant 0.000000e+00 : f32
    %143 = vector.shape_cast %142 : vector<1x1024xi1> to vector<1x1024xi1>
    %144 = vector.broadcast %143 : vector<1x1024xi1> to vector<16x1024xi1>
    %145 = vector.broadcast %cst_91 : f32 to vector<16x1024xf32>
    %146 = arith.select %144, %137, %145 : vector<16x1024xi1>, vector<16x1024xf32>
    %cst_92 = arith.constant dense<0.000000e+00> : vector<16xf32>
    %147 = vector.multi_reduction <add>, %146, %cst_92 [1] : vector<16x1024xf32> to vector<16xf32>
    %148 = vector.shape_cast %147 : vector<16xf32> to vector<16x1xf32>
    %c0_93 = arith.constant 0 : index
    %c0_94 = arith.constant 0 : index
    %149 = vector.load %arg7[%c0_93, %c0_94] : memref<16x128xf32, #tpu.memory_space<vmem>>, vector<16x1xf32>
    tpu.vector_store %arg7[%c0_93, %c0_94], %148 {strides = array<i32>} : memref<16x128xf32, #tpu.memory_space<vmem>>, vector<16x1xf32>,
    %150 = arith.mulf %146, %146 : vector<16x1024xf32>
    %cst_95 = arith.constant dense<0.000000e+00> : vector<16xf32>
    %151 = vector.multi_reduction <add>, %150, %cst_95 [1] : vector<16x1024xf32> to vector<16xf32>
    %152 = vector.shape_cast %151 : vector<16xf32> to vector<16x1xf32>
    %c0_96 = arith.constant 0 : index
    %c1_97 = arith.constant 1 : index
    %153 = vector.load %arg7[%c0_96, %c1_97] : memref<16x128xf32, #tpu.memory_space<vmem>>, vector<16x1xf32>
    tpu.vector_store %arg7[%c0_96, %c1_97], %152 {strides = array<i32>} : memref<16x128xf32, #tpu.memory_space<vmem>>, vector<16x1xf32>,
    return
  }
  func.func @transform_0(%arg0: i32) -> (i32, i32, i32) {
    %c0_i32 = arith.constant 0 : i32
    %c0_i32_0 = arith.constant 0 : i32
    %c0_i32_1 = arith.constant 0 : i32
    %c0_i32_2 = arith.constant 0 : i32
    return %c0_i32, %c0_i32_0, %c0_i32_1 : i32, i32, i32
  }
  func.func @transform_1(%arg0: i32) -> (i32, i32) {
    %c1_i32 = arith.constant 1 : i32
    %0 = arith.subi %arg0, %c1_i32 : i32
    %c0_i32 = arith.constant 0 : i32
    %1 = arith.maxsi %0, %c0_i32 : i32
    %c0_i32_0 = arith.constant 0 : i32
    %c0_i32_1 = arith.constant 0 : i32
    return %c0_i32_0, %1 : i32, i32
  }
  func.func @transform_2(%arg0: i32) -> (i32, i32) {
    %c0_i32 = arith.constant 0 : i32
    %c0_i32_0 = arith.constant 0 : i32
    return %c0_i32, %arg0 : i32, i32
  }
  func.func @transform_3(%arg0: i32) -> (i32, i32) {
    %c1_i32 = arith.constant 1 : i32
    %0 = arith.addi %arg0, %c1_i32 : i32
    %c1_i32_0 = arith.constant 1 : i32
    %1 = arith.minsi %0, %c1_i32_0 : i32
    %c0_i32 = arith.constant 0 : i32
    %c0_i32_1 = arith.constant 0 : i32
    return %c0_i32, %1 : i32, i32
  }
  func.func @transform_4(%arg0: i32) -> (i32, i32) {
    %c0_i32 = arith.constant 0 : i32
    %c0_i32_0 = arith.constant 0 : i32
    return %c0_i32, %arg0 : i32, i32
  }
  func.func @transform_5(%arg0: i32) -> (i32, i32) {
    %c0_i32 = arith.constant 0 : i32
    %c0_i32_0 = arith.constant 0 : i32
    return %c0_i32, %arg0 : i32, i32
  }
  func.func @transform_6(%arg0: i32) -> (i32, i32) {
    %c0_i32 = arith.constant 0 : i32
    %c0_i32_0 = arith.constant 0 : i32
    return %arg0, %c0_i32 : i32, i32
  }
}

module attributes {stable_mosaic.version = 11 : i64} {
  func.func @_bn_relu_kernel(%arg0: i32, %arg1: memref<16x1024xbf16, #tpu.memory_space<vmem>>, %arg2: memref<16x1xf32, #tpu.memory_space<vmem>>, %arg3: memref<16x1xf32, #tpu.memory_space<vmem>>, %arg4: memref<1x1024xbf16, #tpu.memory_space<vmem>>, %arg5: memref<16x1024xbf16, #tpu.memory_space<vmem>>) attributes {dimension_semantics = [#tpu.dimension_semantics<parallel>], iteration_bounds = array<i64: 2>, scalar_prefetch = 0 : i64, scratch_operands = 0 : i64, tpu.core_type = #tpu.core_type<tc>, window_params = [{transform_indices = @transform_0, window_bounds = array<i64: 16, 1024>}, {pipeline_mode = #tpu.pipeline_mode<synchronous>, transform_indices = @transform_1, window_bounds = array<i64: 16, 1>}, {pipeline_mode = #tpu.pipeline_mode<synchronous>, transform_indices = @transform_2, window_bounds = array<i64: 16, 1>}, {transform_indices = @transform_3, window_bounds = array<i64: 1, 1024>}, {transform_indices = @transform_4, window_bounds = array<i64: 16, 1024>}]} {
    %c0 = arith.constant 0 : index
    %c0_0 = arith.constant 0 : index
    %0 = vector.load %arg1[%c0, %c0_0] : memref<16x1024xbf16, #tpu.memory_space<vmem>>, vector<16x1024xbf16>
    %1 = arith.extf %0 : vector<16x1024xbf16> to vector<16x1024xf32>
    %c0_1 = arith.constant 0 : index
    %c0_2 = arith.constant 0 : index
    %2 = vector.load %arg2[%c0_1, %c0_2] : memref<16x1xf32, #tpu.memory_space<vmem>>, vector<16x1xf32>
    %3 = vector.broadcast %2 : vector<16x1xf32> to vector<16x1024xf32>
    %4 = arith.mulf %1, %3 : vector<16x1024xf32>
    %c0_3 = arith.constant 0 : index
    %c0_4 = arith.constant 0 : index
    %5 = vector.load %arg3[%c0_3, %c0_4] : memref<16x1xf32, #tpu.memory_space<vmem>>, vector<16x1xf32>
    %6 = vector.broadcast %5 : vector<16x1xf32> to vector<16x1024xf32>
    %7 = arith.addf %4, %6 : vector<16x1024xf32>
    %cst = arith.constant 0.000000e+00 : f32
    %8 = vector.broadcast %cst : f32 to vector<16x1024xf32>
    %9 = arith.maximumf %7, %8 : vector<16x1024xf32>
    %c0_5 = arith.constant 0 : index
    %c0_6 = arith.constant 0 : index
    %10 = vector.load %arg4[%c0_5, %c0_6] : memref<1x1024xbf16, #tpu.memory_space<vmem>>, vector<1x1024xbf16>
    %cst_7 = arith.constant 0.000000e+00 : bf16
    %11 = vector.broadcast %cst_7 : bf16 to vector<1x1024xbf16>
    %12 = arith.cmpf ogt, %10, %11 : vector<1x1024xbf16>
    %cst_8 = arith.constant 0.000000e+00 : f32
    %13 = vector.shape_cast %12 : vector<1x1024xi1> to vector<1x1024xi1>
    %14 = vector.broadcast %13 : vector<1x1024xi1> to vector<16x1024xi1>
    %15 = vector.broadcast %cst_8 : f32 to vector<16x1024xf32>
    %16 = arith.select %14, %9, %15 : vector<16x1024xi1>, vector<16x1024xf32>
    %17 = arith.truncf %16 : vector<16x1024xf32> to vector<16x1024xbf16>
    %c0_9 = arith.constant 0 : index
    %c0_10 = arith.constant 0 : index
    %18 = vector.load %arg5[%c0_9, %c0_10] : memref<16x1024xbf16, #tpu.memory_space<vmem>>, vector<16x1024xbf16>
    tpu.vector_store %arg5[%c0_9, %c0_10], %17 {strides = array<i32>} : memref<16x1024xbf16, #tpu.memory_space<vmem>>, vector<16x1024xbf16>,
    return
  }
  func.func @transform_0(%arg0: i32) -> (i32, i32) {
    %c0_i32 = arith.constant 0 : i32
    %c0_i32_0 = arith.constant 0 : i32
    return %c0_i32, %arg0 : i32, i32
  }
  func.func @transform_1(%arg0: i32) -> (i32, i32) {
    %c0_i32 = arith.constant 0 : i32
    %c0_i32_0 = arith.constant 0 : i32
    %c0_i32_1 = arith.constant 0 : i32
    return %c0_i32, %c0_i32_0 : i32, i32
  }
  func.func @transform_2(%arg0: i32) -> (i32, i32) {
    %c0_i32 = arith.constant 0 : i32
    %c0_i32_0 = arith.constant 0 : i32
    %c0_i32_1 = arith.constant 0 : i32
    return %c0_i32, %c0_i32_0 : i32, i32
  }
  func.func @transform_3(%arg0: i32) -> (i32, i32) {
    %c0_i32 = arith.constant 0 : i32
    %c0_i32_0 = arith.constant 0 : i32
    return %c0_i32, %arg0 : i32, i32
  }
  func.func @transform_4(%arg0: i32) -> (i32, i32) {
    %c0_i32 = arith.constant 0 : i32
    %c0_i32_0 = arith.constant 0 : i32
    return %c0_i32, %arg0 : i32, i32
  }
}

module attributes {stable_mosaic.version = 11 : i64} {
  func.func @_conv_stats_kernel(%arg0: i32, %arg1: memref<27x16x16xbf16, #tpu.memory_space<vmem>>, %arg2: memref<16x1024xbf16, #tpu.memory_space<vmem>>, %arg3: memref<16x1024xbf16, #tpu.memory_space<vmem>>, %arg4: memref<16x1024xbf16, #tpu.memory_space<vmem>>, %arg5: memref<1x1024xbf16, #tpu.memory_space<vmem>>, %arg6: memref<16x1024xbf16, #tpu.memory_space<vmem>>, %arg7: memref<16x128xf32, #tpu.memory_space<vmem>>) attributes {dimension_semantics = [#tpu.dimension_semantics<parallel>], iteration_bounds = array<i64: 2>, scalar_prefetch = 0 : i64, scratch_operands = 0 : i64, tpu.core_type = #tpu.core_type<tc>, window_params = [{pipeline_mode = #tpu.pipeline_mode<synchronous>, transform_indices = @transform_0, window_bounds = array<i64: 27, 16, 16>}, {transform_indices = @transform_1, window_bounds = array<i64: 16, 1024>}, {transform_indices = @transform_2, window_bounds = array<i64: 16, 1024>}, {transform_indices = @transform_3, window_bounds = array<i64: 16, 1024>}, {transform_indices = @transform_4, window_bounds = array<i64: 1, 1024>}, {transform_indices = @transform_5, window_bounds = array<i64: 16, 1024>}, {transform_indices = @transform_6, window_bounds = array<i64: 16, 128>}]} {
    %c0 = arith.constant 0 : index
    %c0_0 = arith.constant 0 : index
    %0 = vector.load %arg2[%c0, %c0_0] : memref<16x1024xbf16, #tpu.memory_space<vmem>>, vector<16x1024xbf16>
    %c0_1 = arith.constant 0 : index
    %c0_2 = arith.constant 0 : index
    %1 = vector.load %arg3[%c0_1, %c0_2] : memref<16x1024xbf16, #tpu.memory_space<vmem>>, vector<16x1024xbf16>
    %c0_3 = arith.constant 0 : index
    %c0_4 = arith.constant 0 : index
    %2 = vector.load %arg4[%c0_3, %c0_4] : memref<16x1024xbf16, #tpu.memory_space<vmem>>, vector<16x1024xbf16>
    %3 = tpu.concatenate %0, %1, %2 in 1 : vector<16x1024xbf16>, vector<16x1024xbf16>, vector<16x1024xbf16> -> vector<16x3072xbf16>
    %c0_5 = arith.constant 0 : index
    %c0_6 = arith.constant 0 : index
    %c0_7 = arith.constant 0 : index
    %4 = vector.load %arg1[%c0_5, %c0_6, %c0_7] : memref<27x16x16xbf16, #tpu.memory_space<vmem>>, vector<1x16x16xbf16>
    %5 = vector.shape_cast %4 : vector<1x16x16xbf16> to vector<16x16xbf16>
    %6 = vector.extract_strided_slice %3 {offsets = [0, 913], sizes = [16, 1024], strides = [1, 1]} : vector<16x3072xbf16> to vector<16x1024xbf16>
    %cst = arith.constant dense<0.000000e+00> : vector<16x1024xf32>
    %7 = tpu.matmul %5, %6, %cst {dimension_numbers = #tpu.dot_dimension_numbers<[1], [0], [0], [1], [0, 0, 1, 1], [], []>} : vector<16x16xbf16>, vector<16x1024xbf16>, vector<16x1024xf32> -> vector<16x1024xf32>
    %c1 = arith.constant 1 : index
    %c0_8 = arith.constant 0 : index
    %c0_9 = arith.constant 0 : index
    %8 = vector.load %arg1[%c1, %c0_8, %c0_9] : memref<27x16x16xbf16, #tpu.memory_space<vmem>>, vector<1x16x16xbf16>
    %9 = vector.shape_cast %8 : vector<1x16x16xbf16> to vector<16x16xbf16>
    %10 = vector.extract_strided_slice %3 {offsets = [0, 914], sizes = [16, 1024], strides = [1, 1]} : vector<16x3072xbf16> to vector<16x1024xbf16>
    %cst_10 = arith.constant dense<0.000000e+00> : vector<16x1024xf32>
    %11 = tpu.matmul %9, %10, %cst_10 {dimension_numbers = #tpu.dot_dimension_numbers<[1], [0], [0], [1], [0, 0, 1, 1], [], []>} : vector<16x16xbf16>, vector<16x1024xbf16>, vector<16x1024xf32> -> vector<16x1024xf32>
    %12 = arith.addf %7, %11 : vector<16x1024xf32>
    %c2 = arith.constant 2 : index
    %c0_11 = arith.constant 0 : index
    %c0_12 = arith.constant 0 : index
    %13 = vector.load %arg1[%c2, %c0_11, %c0_12] : memref<27x16x16xbf16, #tpu.memory_space<vmem>>, vector<1x16x16xbf16>
    %14 = vector.shape_cast %13 : vector<1x16x16xbf16> to vector<16x16xbf16>
    %15 = vector.extract_strided_slice %3 {offsets = [0, 915], sizes = [16, 1024], strides = [1, 1]} : vector<16x3072xbf16> to vector<16x1024xbf16>
    %cst_13 = arith.constant dense<0.000000e+00> : vector<16x1024xf32>
    %16 = tpu.matmul %14, %15, %cst_13 {dimension_numbers = #tpu.dot_dimension_numbers<[1], [0], [0], [1], [0, 0, 1, 1], [], []>} : vector<16x16xbf16>, vector<16x1024xbf16>, vector<16x1024xf32> -> vector<16x1024xf32>
    %17 = arith.addf %12, %16 : vector<16x1024xf32>
    %c3 = arith.constant 3 : index
    %c0_14 = arith.constant 0 : index
    %c0_15 = arith.constant 0 : index
    %18 = vector.load %arg1[%c3, %c0_14, %c0_15] : memref<27x16x16xbf16, #tpu.memory_space<vmem>>, vector<1x16x16xbf16>
    %19 = vector.shape_cast %18 : vector<1x16x16xbf16> to vector<16x16xbf16>
    %20 = vector.extract_strided_slice %3 {offsets = [0, 923], sizes = [16, 1024], strides = [1, 1]} : vector<16x3072xbf16> to vector<16x1024xbf16>
    %cst_16 = arith.constant dense<0.000000e+00> : vector<16x1024xf32>
    %21 = tpu.matmul %19, %20, %cst_16 {dimension_numbers = #tpu.dot_dimension_numbers<[1], [0], [0], [1], [0, 0, 1, 1], [], []>} : vector<16x16xbf16>, vector<16x1024xbf16>, vector<16x1024xf32> -> vector<16x1024xf32>
    %22 = arith.addf %17, %21 : vector<16x1024xf32>
    %c4 = arith.constant 4 : index
    %c0_17 = arith.constant 0 : index
    %c0_18 = arith.constant 0 : index
    %23 = vector.load %arg1[%c4, %c0_17, %c0_18] : memref<27x16x16xbf16, #tpu.memory_space<vmem>>, vector<1x16x16xbf16>
    %24 = vector.shape_cast %23 : vector<1x16x16xbf16> to vector<16x16xbf16>
    %25 = vector.extract_strided_slice %3 {offsets = [0, 924], sizes = [16, 1024], strides = [1, 1]} : vector<16x3072xbf16> to vector<16x1024xbf16>
    %cst_19 = arith.constant dense<0.000000e+00> : vector<16x1024xf32>
    %26 = tpu.matmul %24, %25, %cst_19 {dimension_numbers = #tpu.dot_dimension_numbers<[1], [0], [0], [1], [0, 0, 1, 1], [], []>} : vector<16x16xbf16>, vector<16x1024xbf16>, vector<16x1024xf32> -> vector<16x1024xf32>
    %27 = arith.addf %22, %26 : vector<16x1024xf32>
    %c5 = arith.constant 5 : index
    %c0_20 = arith.constant 0 : index
    %c0_21 = arith.constant 0 : index
    %28 = vector.load %arg1[%c5, %c0_20, %c0_21] : memref<27x16x16xbf16, #tpu.memory_space<vmem>>, vector<1x16x16xbf16>
    %29 = vector.shape_cast %28 : vector<1x16x16xbf16> to vector<16x16xbf16>
    %30 = vector.extract_strided_slice %3 {offsets = [0, 925], sizes = [16, 1024], strides = [1, 1]} : vector<16x3072xbf16> to vector<16x1024xbf16>
    %cst_22 = arith.constant dense<0.000000e+00> : vector<16x1024xf32>
    %31 = tpu.matmul %29, %30, %cst_22 {dimension_numbers = #tpu.dot_dimension_numbers<[1], [0], [0], [1], [0, 0, 1, 1], [], []>} : vector<16x16xbf16>, vector<16x1024xbf16>, vector<16x1024xf32> -> vector<16x1024xf32>
    %32 = arith.addf %27, %31 : vector<16x1024xf32>
    %c6 = arith.constant 6 : index
    %c0_23 = arith.constant 0 : index
    %c0_24 = arith.constant 0 : index
    %33 = vector.load %arg1[%c6, %c0_23, %c0_24] : memref<27x16x16xbf16, #tpu.memory_space<vmem>>, vector<1x16x16xbf16>
    %34 = vector.shape_cast %33 : vector<1x16x16xbf16> to vector<16x16xbf16>
    %35 = vector.extract_strided_slice %3 {offsets = [0, 933], sizes = [16, 1024], strides = [1, 1]} : vector<16x3072xbf16> to vector<16x1024xbf16>
    %cst_25 = arith.constant dense<0.000000e+00> : vector<16x1024xf32>
    %36 = tpu.matmul %34, %35, %cst_25 {dimension_numbers = #tpu.dot_dimension_numbers<[1], [0], [0], [1], [0, 0, 1, 1], [], []>} : vector<16x16xbf16>, vector<16x1024xbf16>, vector<16x1024xf32> -> vector<16x1024xf32>
    %37 = arith.addf %32, %36 : vector<16x1024xf32>
    %c7 = arith.constant 7 : index
    %c0_26 = arith.constant 0 : index
    %c0_27 = arith.constant 0 : index
    %38 = vector.load %arg1[%c7, %c0_26, %c0_27] : memref<27x16x16xbf16, #tpu.memory_space<vmem>>, vector<1x16x16xbf16>
    %39 = vector.shape_cast %38 : vector<1x16x16xbf16> to vector<16x16xbf16>
    %40 = vector.extract_strided_slice %3 {offsets = [0, 934], sizes = [16, 1024], strides = [1, 1]} : vector<16x3072xbf16> to vector<16x1024xbf16>
    %cst_28 = arith.constant dense<0.000000e+00> : vector<16x1024xf32>
    %41 = tpu.matmul %39, %40, %cst_28 {dimension_numbers = #tpu.dot_dimension_numbers<[1], [0], [0], [1], [0, 0, 1, 1], [], []>} : vector<16x16xbf16>, vector<16x1024xbf16>, vector<16x1024xf32> -> vector<16x1024xf32>
    %42 = arith.addf %37, %41 : vector<16x1024xf32>
    %c8 = arith.constant 8 : index
    %c0_29 = arith.constant 0 : index
    %c0_30 = arith.constant 0 : index
    %43 = vector.load %arg1[%c8, %c0_29, %c0_30] : memref<27x16x16xbf16, #tpu.memory_space<vmem>>, vector<1x16x16xbf16>
    %44 = vector.shape_cast %43 : vector<1x16x16xbf16> to vector<16x16xbf16>
    %45 = vector.extract_strided_slice %3 {offsets = [0, 935], sizes = [16, 1024], strides = [1, 1]} : vector<16x3072xbf16> to vector<16x1024xbf16>
    %cst_31 = arith.constant dense<0.000000e+00> : vector<16x1024xf32>
    %46 = tpu.matmul %44, %45, %cst_31 {dimension_numbers = #tpu.dot_dimension_numbers<[1], [0], [0], [1], [0, 0, 1, 1], [], []>} : vector<16x16xbf16>, vector<16x1024xbf16>, vector<16x1024xf32> -> vector<16x1024xf32>
    %47 = arith.addf %42, %46 : vector<16x1024xf32>
    %c9 = arith.constant 9 : index
    %c0_32 = arith.constant 0 : index
    %c0_33 = arith.constant 0 : index
    %48 = vector.load %arg1[%c9, %c0_32, %c0_33] : memref<27x16x16xbf16, #tpu.memory_space<vmem>>, vector<1x16x16xbf16>
    %49 = vector.shape_cast %48 : vector<1x16x16xbf16> to vector<16x16xbf16>
    %50 = vector.extract_strided_slice %3 {offsets = [0, 1013], sizes = [16, 1024], strides = [1, 1]} : vector<16x3072xbf16> to vector<16x1024xbf16>
    %cst_34 = arith.constant dense<0.000000e+00> : vector<16x1024xf32>
    %51 = tpu.matmul %49, %50, %cst_34 {dimension_numbers = #tpu.dot_dimension_numbers<[1], [0], [0], [1], [0, 0, 1, 1], [], []>} : vector<16x16xbf16>, vector<16x1024xbf16>, vector<16x1024xf32> -> vector<16x1024xf32>
    %52 = arith.addf %47, %51 : vector<16x1024xf32>
    %c10 = arith.constant 10 : index
    %c0_35 = arith.constant 0 : index
    %c0_36 = arith.constant 0 : index
    %53 = vector.load %arg1[%c10, %c0_35, %c0_36] : memref<27x16x16xbf16, #tpu.memory_space<vmem>>, vector<1x16x16xbf16>
    %54 = vector.shape_cast %53 : vector<1x16x16xbf16> to vector<16x16xbf16>
    %55 = vector.extract_strided_slice %3 {offsets = [0, 1014], sizes = [16, 1024], strides = [1, 1]} : vector<16x3072xbf16> to vector<16x1024xbf16>
    %cst_37 = arith.constant dense<0.000000e+00> : vector<16x1024xf32>
    %56 = tpu.matmul %54, %55, %cst_37 {dimension_numbers = #tpu.dot_dimension_numbers<[1], [0], [0], [1], [0, 0, 1, 1], [], []>} : vector<16x16xbf16>, vector<16x1024xbf16>, vector<16x1024xf32> -> vector<16x1024xf32>
    %57 = arith.addf %52, %56 : vector<16x1024xf32>
    %c11 = arith.constant 11 : index
    %c0_38 = arith.constant 0 : index
    %c0_39 = arith.constant 0 : index
    %58 = vector.load %arg1[%c11, %c0_38, %c0_39] : memref<27x16x16xbf16, #tpu.memory_space<vmem>>, vector<1x16x16xbf16>
    %59 = vector.shape_cast %58 : vector<1x16x16xbf16> to vector<16x16xbf16>
    %60 = vector.extract_strided_slice %3 {offsets = [0, 1015], sizes = [16, 1024], strides = [1, 1]} : vector<16x3072xbf16> to vector<16x1024xbf16>
    %cst_40 = arith.constant dense<0.000000e+00> : vector<16x1024xf32>
    %61 = tpu.matmul %59, %60, %cst_40 {dimension_numbers = #tpu.dot_dimension_numbers<[1], [0], [0], [1], [0, 0, 1, 1], [], []>} : vector<16x16xbf16>, vector<16x1024xbf16>, vector<16x1024xf32> -> vector<16x1024xf32>
    %62 = arith.addf %57, %61 : vector<16x1024xf32>
    %c12 = arith.constant 12 : index
    %c0_41 = arith.constant 0 : index
    %c0_42 = arith.constant 0 : index
    %63 = vector.load %arg1[%c12, %c0_41, %c0_42] : memref<27x16x16xbf16, #tpu.memory_space<vmem>>, vector<1x16x16xbf16>
    %64 = vector.shape_cast %63 : vector<1x16x16xbf16> to vector<16x16xbf16>
    %65 = vector.extract_strided_slice %3 {offsets = [0, 1023], sizes = [16, 1024], strides = [1, 1]} : vector<16x3072xbf16> to vector<16x1024xbf16>
    %cst_43 = arith.constant dense<0.000000e+00> : vector<16x1024xf32>
    %66 = tpu.matmul %64, %65, %cst_43 {dimension_numbers = #tpu.dot_dimension_numbers<[1], [0], [0], [1], [0, 0, 1, 1], [], []>} : vector<16x16xbf16>, vector<16x1024xbf16>, vector<16x1024xf32> -> vector<16x1024xf32>
    %67 = arith.addf %62, %66 : vector<16x1024xf32>
    %c13 = arith.constant 13 : index
    %c0_44 = arith.constant 0 : index
    %c0_45 = arith.constant 0 : index
    %68 = vector.load %arg1[%c13, %c0_44, %c0_45] : memref<27x16x16xbf16, #tpu.memory_space<vmem>>, vector<1x16x16xbf16>
    %69 = vector.shape_cast %68 : vector<1x16x16xbf16> to vector<16x16xbf16>
    %70 = vector.extract_strided_slice %3 {offsets = [0, 1024], sizes = [16, 1024], strides = [1, 1]} : vector<16x3072xbf16> to vector<16x1024xbf16>
    %cst_46 = arith.constant dense<0.000000e+00> : vector<16x1024xf32>
    %71 = tpu.matmul %69, %70, %cst_46 {dimension_numbers = #tpu.dot_dimension_numbers<[1], [0], [0], [1], [0, 0, 1, 1], [], []>} : vector<16x16xbf16>, vector<16x1024xbf16>, vector<16x1024xf32> -> vector<16x1024xf32>
    %72 = arith.addf %67, %71 : vector<16x1024xf32>
    %c14 = arith.constant 14 : index
    %c0_47 = arith.constant 0 : index
    %c0_48 = arith.constant 0 : index
    %73 = vector.load %arg1[%c14, %c0_47, %c0_48] : memref<27x16x16xbf16, #tpu.memory_space<vmem>>, vector<1x16x16xbf16>
    %74 = vector.shape_cast %73 : vector<1x16x16xbf16> to vector<16x16xbf16>
    %75 = vector.extract_strided_slice %3 {offsets = [0, 1025], sizes = [16, 1024], strides = [1, 1]} : vector<16x3072xbf16> to vector<16x1024xbf16>
    %cst_49 = arith.constant dense<0.000000e+00> : vector<16x1024xf32>
    %76 = tpu.matmul %74, %75, %cst_49 {dimension_numbers = #tpu.dot_dimension_numbers<[1], [0], [0], [1], [0, 0, 1, 1], [], []>} : vector<16x16xbf16>, vector<16x1024xbf16>, vector<16x1024xf32> -> vector<16x1024xf32>
    %77 = arith.addf %72, %76 : vector<16x1024xf32>
    %c15 = arith.constant 15 : index
    %c0_50 = arith.constant 0 : index
    %c0_51 = arith.constant 0 : index
    %78 = vector.load %arg1[%c15, %c0_50, %c0_51] : memref<27x16x16xbf16, #tpu.memory_space<vmem>>, vector<1x16x16xbf16>
    %79 = vector.shape_cast %78 : vector<1x16x16xbf16> to vector<16x16xbf16>
    %80 = vector.extract_strided_slice %3 {offsets = [0, 1033], sizes = [16, 1024], strides = [1, 1]} : vector<16x3072xbf16> to vector<16x1024xbf16>
    %cst_52 = arith.constant dense<0.000000e+00> : vector<16x1024xf32>
    %81 = tpu.matmul %79, %80, %cst_52 {dimension_numbers = #tpu.dot_dimension_numbers<[1], [0], [0], [1], [0, 0, 1, 1], [], []>} : vector<16x16xbf16>, vector<16x1024xbf16>, vector<16x1024xf32> -> vector<16x1024xf32>
    %82 = arith.addf %77, %81 : vector<16x1024xf32>
    %c16 = arith.constant 16 : index
    %c0_53 = arith.constant 0 : index
    %c0_54 = arith.constant 0 : index
    %83 = vector.load %arg1[%c16, %c0_53, %c0_54] : memref<27x16x16xbf16, #tpu.memory_space<vmem>>, vector<1x16x16xbf16>
    %84 = vector.shape_cast %83 : vector<1x16x16xbf16> to vector<16x16xbf16>
    %85 = vector.extract_strided_slice %3 {offsets = [0, 1034], sizes = [16, 1024], strides = [1, 1]} : vector<16x3072xbf16> to vector<16x1024xbf16>
    %cst_55 = arith.constant dense<0.000000e+00> : vector<16x1024xf32>
    %86 = tpu.matmul %84, %85, %cst_55 {dimension_numbers = #tpu.dot_dimension_numbers<[1], [0], [0], [1], [0, 0, 1, 1], [], []>} : vector<16x16xbf16>, vector<16x1024xbf16>, vector<16x1024xf32> -> vector<16x1024xf32>
    %87 = arith.addf %82, %86 : vector<16x1024xf32>
    %c17 = arith.constant 17 : index
    %c0_56 = arith.constant 0 : index
    %c0_57 = arith.constant 0 : index
    %88 = vector.load %arg1[%c17, %c0_56, %c0_57] : memref<27x16x16xbf16, #tpu.memory_space<vmem>>, vector<1x16x16xbf16>
    %89 = vector.shape_cast %88 : vector<1x16x16xbf16> to vector<16x16xbf16>
    %90 = vector.extract_strided_slice %3 {offsets = [0, 1035], sizes = [16, 1024], strides = [1, 1]} : vector<16x3072xbf16> to vector<16x1024xbf16>
    %cst_58 = arith.constant dense<0.000000e+00> : vector<16x1024xf32>
    %91 = tpu.matmul %89, %90, %cst_58 {dimension_numbers = #tpu.dot_dimension_numbers<[1], [0], [0], [1], [0, 0, 1, 1], [], []>} : vector<16x16xbf16>, vector<16x1024xbf16>, vector<16x1024xf32> -> vector<16x1024xf32>
    %92 = arith.addf %87, %91 : vector<16x1024xf32>
    %c18 = arith.constant 18 : index
    %c0_59 = arith.constant 0 : index
    %c0_60 = arith.constant 0 : index
    %93 = vector.load %arg1[%c18, %c0_59, %c0_60] : memref<27x16x16xbf16, #tpu.memory_space<vmem>>, vector<1x16x16xbf16>
    %94 = vector.shape_cast %93 : vector<1x16x16xbf16> to vector<16x16xbf16>
    %95 = vector.extract_strided_slice %3 {offsets = [0, 1113], sizes = [16, 1024], strides = [1, 1]} : vector<16x3072xbf16> to vector<16x1024xbf16>
    %cst_61 = arith.constant dense<0.000000e+00> : vector<16x1024xf32>
    %96 = tpu.matmul %94, %95, %cst_61 {dimension_numbers = #tpu.dot_dimension_numbers<[1], [0], [0], [1], [0, 0, 1, 1], [], []>} : vector<16x16xbf16>, vector<16x1024xbf16>, vector<16x1024xf32> -> vector<16x1024xf32>
    %97 = arith.addf %92, %96 : vector<16x1024xf32>
    %c19 = arith.constant 19 : index
    %c0_62 = arith.constant 0 : index
    %c0_63 = arith.constant 0 : index
    %98 = vector.load %arg1[%c19, %c0_62, %c0_63] : memref<27x16x16xbf16, #tpu.memory_space<vmem>>, vector<1x16x16xbf16>
    %99 = vector.shape_cast %98 : vector<1x16x16xbf16> to vector<16x16xbf16>
    %100 = vector.extract_strided_slice %3 {offsets = [0, 1114], sizes = [16, 1024], strides = [1, 1]} : vector<16x3072xbf16> to vector<16x1024xbf16>
    %cst_64 = arith.constant dense<0.000000e+00> : vector<16x1024xf32>
    %101 = tpu.matmul %99, %100, %cst_64 {dimension_numbers = #tpu.dot_dimension_numbers<[1], [0], [0], [1], [0, 0, 1, 1], [], []>} : vector<16x16xbf16>, vector<16x1024xbf16>, vector<16x1024xf32> -> vector<16x1024xf32>
    %102 = arith.addf %97, %101 : vector<16x1024xf32>
    %c20 = arith.constant 20 : index
    %c0_65 = arith.constant 0 : index
    %c0_66 = arith.constant 0 : index
    %103 = vector.load %arg1[%c20, %c0_65, %c0_66] : memref<27x16x16xbf16, #tpu.memory_space<vmem>>, vector<1x16x16xbf16>
    %104 = vector.shape_cast %103 : vector<1x16x16xbf16> to vector<16x16xbf16>
    %105 = vector.extract_strided_slice %3 {offsets = [0, 1115], sizes = [16, 1024], strides = [1, 1]} : vector<16x3072xbf16> to vector<16x1024xbf16>
    %cst_67 = arith.constant dense<0.000000e+00> : vector<16x1024xf32>
    %106 = tpu.matmul %104, %105, %cst_67 {dimension_numbers = #tpu.dot_dimension_numbers<[1], [0], [0], [1], [0, 0, 1, 1], [], []>} : vector<16x16xbf16>, vector<16x1024xbf16>, vector<16x1024xf32> -> vector<16x1024xf32>
    %107 = arith.addf %102, %106 : vector<16x1024xf32>
    %c21 = arith.constant 21 : index
    %c0_68 = arith.constant 0 : index
    %c0_69 = arith.constant 0 : index
    %108 = vector.load %arg1[%c21, %c0_68, %c0_69] : memref<27x16x16xbf16, #tpu.memory_space<vmem>>, vector<1x16x16xbf16>
    %109 = vector.shape_cast %108 : vector<1x16x16xbf16> to vector<16x16xbf16>
    %110 = vector.extract_strided_slice %3 {offsets = [0, 1123], sizes = [16, 1024], strides = [1, 1]} : vector<16x3072xbf16> to vector<16x1024xbf16>
    %cst_70 = arith.constant dense<0.000000e+00> : vector<16x1024xf32>
    %111 = tpu.matmul %109, %110, %cst_70 {dimension_numbers = #tpu.dot_dimension_numbers<[1], [0], [0], [1], [0, 0, 1, 1], [], []>} : vector<16x16xbf16>, vector<16x1024xbf16>, vector<16x1024xf32> -> vector<16x1024xf32>
    %112 = arith.addf %107, %111 : vector<16x1024xf32>
    %c22 = arith.constant 22 : index
    %c0_71 = arith.constant 0 : index
    %c0_72 = arith.constant 0 : index
    %113 = vector.load %arg1[%c22, %c0_71, %c0_72] : memref<27x16x16xbf16, #tpu.memory_space<vmem>>, vector<1x16x16xbf16>
    %114 = vector.shape_cast %113 : vector<1x16x16xbf16> to vector<16x16xbf16>
    %115 = vector.extract_strided_slice %3 {offsets = [0, 1124], sizes = [16, 1024], strides = [1, 1]} : vector<16x3072xbf16> to vector<16x1024xbf16>
    %cst_73 = arith.constant dense<0.000000e+00> : vector<16x1024xf32>
    %116 = tpu.matmul %114, %115, %cst_73 {dimension_numbers = #tpu.dot_dimension_numbers<[1], [0], [0], [1], [0, 0, 1, 1], [], []>} : vector<16x16xbf16>, vector<16x1024xbf16>, vector<16x1024xf32> -> vector<16x1024xf32>
    %117 = arith.addf %112, %116 : vector<16x1024xf32>
    %c23 = arith.constant 23 : index
    %c0_74 = arith.constant 0 : index
    %c0_75 = arith.constant 0 : index
    %118 = vector.load %arg1[%c23, %c0_74, %c0_75] : memref<27x16x16xbf16, #tpu.memory_space<vmem>>, vector<1x16x16xbf16>
    %119 = vector.shape_cast %118 : vector<1x16x16xbf16> to vector<16x16xbf16>
    %120 = vector.extract_strided_slice %3 {offsets = [0, 1125], sizes = [16, 1024], strides = [1, 1]} : vector<16x3072xbf16> to vector<16x1024xbf16>
    %cst_76 = arith.constant dense<0.000000e+00> : vector<16x1024xf32>
    %121 = tpu.matmul %119, %120, %cst_76 {dimension_numbers = #tpu.dot_dimension_numbers<[1], [0], [0], [1], [0, 0, 1, 1], [], []>} : vector<16x16xbf16>, vector<16x1024xbf16>, vector<16x1024xf32> -> vector<16x1024xf32>
    %122 = arith.addf %117, %121 : vector<16x1024xf32>
    %c24 = arith.constant 24 : index
    %c0_77 = arith.constant 0 : index
    %c0_78 = arith.constant 0 : index
    %123 = vector.load %arg1[%c24, %c0_77, %c0_78] : memref<27x16x16xbf16, #tpu.memory_space<vmem>>, vector<1x16x16xbf16>
    %124 = vector.shape_cast %123 : vector<1x16x16xbf16> to vector<16x16xbf16>
    %125 = vector.extract_strided_slice %3 {offsets = [0, 1133], sizes = [16, 1024], strides = [1, 1]} : vector<16x3072xbf16> to vector<16x1024xbf16>
    %cst_79 = arith.constant dense<0.000000e+00> : vector<16x1024xf32>
    %126 = tpu.matmul %124, %125, %cst_79 {dimension_numbers = #tpu.dot_dimension_numbers<[1], [0], [0], [1], [0, 0, 1, 1], [], []>} : vector<16x16xbf16>, vector<16x1024xbf16>, vector<16x1024xf32> -> vector<16x1024xf32>
    %127 = arith.addf %122, %126 : vector<16x1024xf32>
    %c25 = arith.constant 25 : index
    %c0_80 = arith.constant 0 : index
    %c0_81 = arith.constant 0 : index
    %128 = vector.load %arg1[%c25, %c0_80, %c0_81] : memref<27x16x16xbf16, #tpu.memory_space<vmem>>, vector<1x16x16xbf16>
    %129 = vector.shape_cast %128 : vector<1x16x16xbf16> to vector<16x16xbf16>
    %130 = vector.extract_strided_slice %3 {offsets = [0, 1134], sizes = [16, 1024], strides = [1, 1]} : vector<16x3072xbf16> to vector<16x1024xbf16>
    %cst_82 = arith.constant dense<0.000000e+00> : vector<16x1024xf32>
    %131 = tpu.matmul %129, %130, %cst_82 {dimension_numbers = #tpu.dot_dimension_numbers<[1], [0], [0], [1], [0, 0, 1, 1], [], []>} : vector<16x16xbf16>, vector<16x1024xbf16>, vector<16x1024xf32> -> vector<16x1024xf32>
    %132 = arith.addf %127, %131 : vector<16x1024xf32>
    %c26 = arith.constant 26 : index
    %c0_83 = arith.constant 0 : index
    %c0_84 = arith.constant 0 : index
    %133 = vector.load %arg1[%c26, %c0_83, %c0_84] : memref<27x16x16xbf16, #tpu.memory_space<vmem>>, vector<1x16x16xbf16>
    %134 = vector.shape_cast %133 : vector<1x16x16xbf16> to vector<16x16xbf16>
    %135 = vector.extract_strided_slice %3 {offsets = [0, 1135], sizes = [16, 1024], strides = [1, 1]} : vector<16x3072xbf16> to vector<16x1024xbf16>
    %cst_85 = arith.constant dense<0.000000e+00> : vector<16x1024xf32>
    %136 = tpu.matmul %134, %135, %cst_85 {dimension_numbers = #tpu.dot_dimension_numbers<[1], [0], [0], [1], [0, 0, 1, 1], [], []>} : vector<16x16xbf16>, vector<16x1024xbf16>, vector<16x1024xf32> -> vector<16x1024xf32>
    %137 = arith.addf %132, %136 : vector<16x1024xf32>
    %138 = arith.truncf %137 : vector<16x1024xf32> to vector<16x1024xbf16>
    %c0_86 = arith.constant 0 : index
    %c0_87 = arith.constant 0 : index
    %139 = vector.load %arg6[%c0_86, %c0_87] : memref<16x1024xbf16, #tpu.memory_space<vmem>>, vector<16x1024xbf16>
    tpu.vector_store %arg6[%c0_86, %c0_87], %138 {strides = array<i32>} : memref<16x1024xbf16, #tpu.memory_space<vmem>>, vector<16x1024xbf16>,
    %c0_88 = arith.constant 0 : index
    %c0_89 = arith.constant 0 : index
    %140 = vector.load %arg5[%c0_88, %c0_89] : memref<1x1024xbf16, #tpu.memory_space<vmem>>, vector<1x1024xbf16>
    %cst_90 = arith.constant 0.000000e+00 : bf16
    %141 = vector.broadcast %cst_90 : bf16 to vector<1x1024xbf16>
    %142 = arith.cmpf ogt, %140, %141 : vector<1x1024xbf16>
    %cst_91 = arith.constant 0.000000e+00 : f32
    %143 = vector.shape_cast %142 : vector<1x1024xi1> to vector<1x1024xi1>
    %144 = vector.broadcast %143 : vector<1x1024xi1> to vector<16x1024xi1>
    %145 = vector.broadcast %cst_91 : f32 to vector<16x1024xf32>
    %146 = arith.select %144, %137, %145 : vector<16x1024xi1>, vector<16x1024xf32>
    %cst_92 = arith.constant dense<0.000000e+00> : vector<16xf32>
    %147 = vector.multi_reduction <add>, %146, %cst_92 [1] : vector<16x1024xf32> to vector<16xf32>
    %148 = vector.shape_cast %147 : vector<16xf32> to vector<16x1xf32>
    %c0_93 = arith.constant 0 : index
    %c0_94 = arith.constant 0 : index
    %149 = vector.load %arg7[%c0_93, %c0_94] : memref<16x128xf32, #tpu.memory_space<vmem>>, vector<16x1xf32>
    tpu.vector_store %arg7[%c0_93, %c0_94], %148 {strides = array<i32>} : memref<16x128xf32, #tpu.memory_space<vmem>>, vector<16x1xf32>,
    %150 = arith.mulf %146, %146 : vector<16x1024xf32>
    %cst_95 = arith.constant dense<0.000000e+00> : vector<16xf32>
    %151 = vector.multi_reduction <add>, %150, %cst_95 [1] : vector<16x1024xf32> to vector<16xf32>
    %152 = vector.shape_cast %151 : vector<16xf32> to vector<16x1xf32>
    %c0_96 = arith.constant 0 : index
    %c1_97 = arith.constant 1 : index
    %153 = vector.load %arg7[%c0_96, %c1_97] : memref<16x128xf32, #tpu.memory_space<vmem>>, vector<16x1xf32>
    tpu.vector_store %arg7[%c0_96, %c1_97], %152 {strides = array<i32>} : memref<16x128xf32, #tpu.memory_space<vmem>>, vector<16x1xf32>,
    return
  }
  func.func @transform_0(%arg0: i32) -> (i32, i32, i32) {
    %c0_i32 = arith.constant 0 : i32
    %c0_i32_0 = arith.constant 0 : i32
    %c0_i32_1 = arith.constant 0 : i32
    %c0_i32_2 = arith.constant 0 : i32
    return %c0_i32, %c0_i32_0, %c0_i32_1 : i32, i32, i32
  }
  func.func @transform_1(%arg0: i32) -> (i32, i32) {
    %c1_i32 = arith.constant 1 : i32
    %0 = arith.subi %arg0, %c1_i32 : i32
    %c0_i32 = arith.constant 0 : i32
    %1 = arith.maxsi %0, %c0_i32 : i32
    %c0_i32_0 = arith.constant 0 : i32
    %c0_i32_1 = arith.constant 0 : i32
    return %c0_i32_0, %1 : i32, i32
  }
  func.func @transform_2(%arg0: i32) -> (i32, i32) {
    %c0_i32 = arith.constant 0 : i32
    %c0_i32_0 = arith.constant 0 : i32
    return %c0_i32, %arg0 : i32, i32
  }
  func.func @transform_3(%arg0: i32) -> (i32, i32) {
    %c1_i32 = arith.constant 1 : i32
    %0 = arith.addi %arg0, %c1_i32 : i32
    %c1_i32_0 = arith.constant 1 : i32
    %1 = arith.minsi %0, %c1_i32_0 : i32
    %c0_i32 = arith.constant 0 : i32
    %c0_i32_1 = arith.constant 0 : i32
    return %c0_i32, %1 : i32, i32
  }
  func.func @transform_4(%arg0: i32) -> (i32, i32) {
    %c0_i32 = arith.constant 0 : i32
    %c0_i32_0 = arith.constant 0 : i32
    return %c0_i32, %arg0 : i32, i32
  }
  func.func @transform_5(%arg0: i32) -> (i32, i32) {
    %c0_i32 = arith.constant 0 : i32
    %c0_i32_0 = arith.constant 0 : i32
    return %c0_i32, %arg0 : i32, i32
  }
  func.func @transform_6(%arg0: i32) -> (i32, i32) {
    %c0_i32 = arith.constant 0 : i32
    %c0_i32_0 = arith.constant 0 : i32
    return %arg0, %c0_i32 : i32, i32
  }
}

</mosaic_0001>

<bundles_post_ra>
// kernel: unet3d_convblock.5
= control target key start
LH: loop header
LB: loop body
LE: loop exit
PB: predicated region body
PF: predicated region fallthrough
CT: control target
= control target key end

     0   :  { %s732_s15 = smov 0   ;;  %s734_s16 = smov 0   ;;  %s919_s0 = inlined_call_operand.vmem [shape: bf16[16,2048], index: 0, kind: input, shape index: {}, may-alias: {0,4}]   ;;  %s920_s1 = inlined_call_operand.vmem [shape: f32[16,1], index: 1, kind: input, shape index: {}]   ;;  %s921_s2 = inlined_call_operand.vmem [shape: f32[16,1], index: 2, kind: input, shape index: {}]   ;;  %s922_s3 = inlined_call_operand.vmem [shape: bf16[1,2048], index: 3, kind: input, shape index: {}]   ;;  %s923_s4 = inlined_call_operand.vmem [shape: bf16[16,2048], index: 4, kind: output, shape index: {}, may-alias: {0,4}]  }
   0x1   :  { %s736_s17 = smov 0  }
   0x2 LB: > { %s748_s18 = sadd.s32 4294967295, %s704_s17   ;;  %s751_s19 = sadd.s32 1, %s704_s17   ;;  %s704_s17 = sphi %s736_s17, %s943_s17   ;;  %s700_s16 = sphi %s734_s16, %s942_s16   ;;  %s696_s15 = sphi %s732_s15, %s941_s15  }
   0x3   : > { %s18_s20 = ssub.s32 %s704_s17, %s751_s19  ;;  %s21_s21 = sadd.s32 1, %s700_s16 }
   0x4   : > { %p19_p0 = scmp.eq.s32.totalorder %s18_s20, 0  ;;  %p28_p1 = scmp.ne.s32.totalorder %s700_s16, %s696_s15 }
   0x5   : > { %p29_p2 = scmp.eq.s32.totalorder %s704_s17, 0  ;;  %p126_p3 = scmp.eq.s32.totalorder %s748_s18, 1 }
   0x6   : > { %s761_s22 = scalar_select %p19_p0, %s700_s16, %s21_s21  }
   0x7   : > { %p30_p4 = por %p29_p2, %p28_p1  ;;  %p763_p5 = por %p126_p3, %p28_p1 }
   0x8   : > { %p624_p6 = scmp.ge.s32.totalorder %s704_s17, 2 }
   0xa   : > { %154 = sbr.rel (%p624_p6) target bundleno = 25 (0x19), region = 24 }
  0x11   : > { %157 = sbr.rel (!%p30_p4) target bundleno = 25 (0x19), region = 28  ;;  %s159_s24 = sand.u32 (%p30_p4), 1, %s700_s16  }
  0x12   : > { %s645_s25 = sshll.u32 (%p30_p4), %s704_s17, 5  ;;  %s625_s26 = sshll.u32 (%p30_p4), %s159_s24, 6 }
  0x13   : > { %s164_s29 = scalar_lea.vmem (%p30_p4), %s919_s0, %s645_s25  ;;  %s161_s30 = scalar_lea.vmem (%p30_p4), [#allocation2], %s625_s26 }
  0x14   : > { %v177_v0 = vld [vmem:[%s164_s29] sm:$0xff] (%p30_p4)  ;;  %v179_v1 = vld [vmem:[%s164_s29 + $0x8] sm:$0xff] (%p30_p4)  ;;  %v181_v2 = vld [vmem:[%s164_s29 + $0x10] sm:$0xff] (%p30_p4) }
  0x15   : > { %178 = vst [vmem:[%s161_s30] sm:$0xff] (%p30_p4), %v177_v0  ;;  %180 = vst [vmem:[%s161_s30 + $0x8] sm:$0xff] (%p30_p4), %v179_v1  ;;  %v183_v3 = vld [vmem:[%s164_s29 + $0x18] sm:$0xff] (%p30_p4)  ;;  %v185_v4 = vld [vmem:[%s164_s29 + $0x40] sm:$0xff] (%p30_p4) }
  0x16   : > { %182 = vst [vmem:[%s161_s30 + $0x10] sm:$0xff] (%p30_p4), %v181_v2  ;;  %v187_v5 = vld [vmem:[%s164_s29 + $0x48] sm:$0xff] (%p30_p4)  ;;  %184 = vst [vmem:[%s161_s30 + $0x18] sm:$0xff] (%p30_p4), %v183_v3  ;;  %v189_v6 = vld [vmem:[%s164_s29 + $0x50] sm:$0xff] (%p30_p4) }
  0x17   : > { %186 = vst [vmem:[%s161_s30 + $0x20] sm:$0xff] (%p30_p4), %v185_v4  ;;  %188 = vst [vmem:[%s161_s30 + $0x28] sm:$0xff] (%p30_p4), %v187_v5  ;;  %v191_v7 = vld [vmem:[%s164_s29 + $0x58] sm:$0xff] (%p30_p4) }
  0x18   : > { %190 = vst [vmem:[%s161_s30 + $0x30] sm:$0xff] %v189_v6  ;;  %192 = vst [vmem:[%s161_s30 + $0x38] sm:$0xff] %v191_v7 }
  0x19 PF: > { %p628_p7 = scmp.ge.s32.totalorder %s704_s17, 1  ;;  %p205_p8 = scmp.lt.s32.totalorder %s704_s17, 3 }
  0x1b   : > { %p206_p9 = pnand %p628_p7, %p205_p8 }
  0x1c   : > { %v302_v8 = vld [vmem:[%s921_s2] sm:$0xff] (!%p206_p9)  ;;  %v706_v10 = vmov (!%p206_p9), 0   ;;  %v303_v11 = vld [vmem:[%s921_s2 + $0x8] sm:$0xff] (!%p206_p9)  ;;  %s631_s13 = sshll.u32 (!%p206_p9), %s748_s18, 3  ;;  %v355_v15 = vlaneseq (!%p206_p9)  ;;  %s212_s21 = sand.u32 (!%p206_p9), 1, %s696_s15  }
  0x1d   : > { %209 = sbr.rel (%p206_p9) target bundleno = 188 (0xbc), region = 55  ;;  %v274_v9 = vld [vmem:[%s920_s1] sm:$0xff] (!%p206_p9)  ;;  %681 = vset.pattern.permute.xlu1 (!%p206_p9), %v706_v10  ;;  %680 = vset.pattern.permute.xlu0 (!%p206_p9), %v706_v10  ;;  %v275_v12 = vld [vmem:[%s920_s1 + $0x8] sm:$0xff] (!%p206_p9)  ;;  %p242_p10 = scmp.lt.s32.totalorder (!%p206_p9), %s631_s13, 15 }
  0x1e   : > { %306 = vperm.xlu1 (!%p206_p9), %681, %v302_v8   ;;  %278 = vperm.xlu0 (!%p206_p9), %680, %v274_v9   ;;  %v356_v18 = vshrl.u32 (!%p206_p9), %v355_v15, 7  ;;  %s795_s24 = sshll.u32 (!%p206_p9), %s212_s21, 6 }
  0x1f   : > { %s802_s25 = scalar_lea.vmem (!%p206_p9), [#allocation2], %s795_s24  ;;  %s239_s15 = scalar_lea.vmem (!%p206_p9), [#allocation3], %s795_s24 }
  0x20   : > { %v797_v19 = vsub.s32 (!%p206_p9), 0, %v356_v18  ;;  %v361_v20 = vsub.s32 (!%p206_p9), 2, %v356_v18  ;;  %v365_v21 = vsub.s32 (!%p206_p9), 4, %v356_v18  ;;  %v369_v22 = vsub.s32 (!%p206_p9), 6, %v356_v18  ;;  %v250_v25 = vld [vmem:[%s802_s25] sm:$0xff] (!%p206_p9)  ;;  %v251_v26 = vld [vmem:[%s802_s25 + $0x8] sm:$0xff] (!%p206_p9) }
  0x21   : > { %v252_v35 = vld [vmem:[%s802_s25 + $0x10] sm:$0xff] (!%p206_p9)  ;;  %v253_v36 = vld [vmem:[%s802_s25 + $0x18] sm:$0xff] (!%p206_p9)  ;;  %v258_v37 = vunpack.c.l.bf16 (!%p206_p9), %v250_v25  ;;  %v259_v38 = vunpack.c.h.bf16 (!%p206_p9), %v250_v25  ;;  %v260_v39 = vunpack.c.l.bf16 (!%p206_p9), %v251_v26  ;;  %v261_v40 = vunpack.c.h.bf16 (!%p206_p9), %v251_v26  ;;  %v811_v45 = vld [vmem:[%s802_s25 + $0x20] sm:$0xff] (!%p206_p9) }
  0x22   : > { %311 = vperm.xlu1 (!%p206_p9), %681, %v303_v11   ;;  %283 = vperm.xlu0 (!%p206_p9), %680, %v275_v12   ;;  %v262_v41 = vunpack.c.l.bf16 (!%p206_p9), %v252_v35  ;;  %v263_v42 = vunpack.c.h.bf16 (!%p206_p9), %v252_v35  ;;  %v264_v43 = vunpack.c.l.bf16 (!%p206_p9), %v253_v36  ;;  %v265_v44 = vunpack.c.h.bf16 (!%p206_p9), %v253_v36  ;;  %v814_v46 = vld [vmem:[%s802_s25 + $0x28] sm:$0xff] (!%p206_p9)  ;;  %v256_v55 = vld [vmem:[%s802_s25 + $0x30] sm:$0xff] (!%p206_p9)  ;;  %v257_v56 = vld [vmem:[%s802_s25 + $0x38] sm:$0xff] (!%p206_p9) }
  0x23   : > { %v266_v57 = vunpack.c.l.bf16 (!%p206_p9), %v811_v45  ;;  %v267_v58 = vunpack.c.h.bf16 (!%p206_p9), %v811_v45  ;;  %v268_v59 = vunpack.c.l.bf16 (!%p206_p9), %v814_v46  ;;  %v269_v60 = vunpack.c.h.bf16 (!%p206_p9), %v814_v46 }
  0x24   : > { %s945_s13 = smov (!%p242_p10, %s631_s13), 15  ;;  %v270_v6 = vunpack.c.l.bf16 %v256_v55  ;;  %v271_v7 = vunpack.c.h.bf16 %v256_v55  ;;  %v272_v8 = vunpack.c.l.bf16 %v257_v56  ;;  %v273_v9 = vunpack.c.h.bf16 %v257_v56  ;;  %s654_s26 = sshll.u32 (%p763_p5), %s748_s18, 5 }
  0x25   : > { %s244_s20 = scalar_lea.vmem %s922_s3, %s945_s13  ;;  %s524_s29 = scalar_lea.vmem (%p763_p5), %s923_s4, %s654_s26 }
  0x26   : > { %v346_v13 = vld [vmem:[%s244_s20] sm:$0xff] }
  0x27   : > { %vm347_vm0 = vcmp.gt.bf16.partialorder %v346_v13, 0 }
  0x28   : > { %v348_v14 = vsel %vm347_vm0, 65537, %v706_v10 }
  0x29   : > { %v349_v16 = vunpack.c.l.b16 %v348_v14  ;;  %v350_v17 = vunpack.c.h.b16 %v348_v14 }
  0x2b   : > { %vm351_vm1 = vcmp.ne.s32.totalorder %v349_v16, 0  ;;  %vm352_vm2 = vcmp.ne.s32.totalorder %v350_v17, 0 }
  0x2c   : > { %v353_v23 = vsel %vm351_vm1, 1, %v706_v10  ;;  %v354_v24 = vsel %vm352_vm2, 1, %v706_v10 }
  0x2d   : > { %v358_v27 = vrot.slane %v353_v23, %v797_v19  ;;  %v362_v28 = vrot.slane %v353_v23, %v361_v20  ;;  %v366_v29 = vrot.slane %v353_v23, %v365_v21  ;;  %v370_v30 = vrot.slane %v353_v23, %v369_v22 }
  0x2e   : > { %v374_v31 = vrot.slane %v354_v24, %v797_v19  ;;  %v378_v32 = vrot.slane %v354_v24, %v361_v20  ;;  %v382_v33 = vrot.slane %v354_v24, %v365_v21  ;;  %v386_v34 = vrot.slane %v354_v24, %v369_v22 }
  0x2f   : > { %vm387_vm3 = vcmp.ne.s32.totalorder %v358_v27, 0  ;;  %vm388_vm4 = vcmp.ne.s32.totalorder %v362_v28, 0  ;;  %vm389_vm5 = vcmp.ne.s32.totalorder %v366_v29, 0  ;;  %vm390_vm6 = vcmp.ne.s32.totalorder %v370_v30, 0 }
  0x30   : > { %vm391_vm7 = vcmp.ne.s32.totalorder %v374_v31, 0  ;;  %vm392_vm8 = vcmp.ne.s32.totalorder %v378_v32, 0  ;;  %vm393_vm9 = vcmp.ne.s32.totalorder %v382_v33, 0  ;;  %vm394_vm10 = vcmp.ne.s32.totalorder %v386_v34, 0 }
  0x31   : > { %v395_v47 = vsel %vm387_vm3, 1, %v706_v10  ;;  %v396_v48 = vsel %vm388_vm4, 1, %v706_v10  ;;  %v397_v49 = vsel %vm389_vm5, 1, %v706_v10  ;;  %v398_v50 = vsel %vm390_vm6, 1, %v706_v10 }
  0x32   : > { %v399_v51 = vsel %vm391_vm7, 1, %v706_v10  ;;  %v400_v52 = vsel %vm392_vm8, 1, %v706_v10  ;;  %v401_v53 = vsel %vm393_vm9, 1, %v706_v10  ;;  %v402_v54 = vsel %vm394_vm10, 1, %v706_v10 }
  0x33   : > { %v406_v61 = vrot.slane %v395_v47, %v797_v19  ;;  %v410_v62 = vrot.slane %v396_v48, %v797_v19  ;;  %v414_v63 = vrot.slane %v397_v49, %v797_v19  ;;  %v418_v0 = vrot.slane %v398_v50, %v797_v19 }
  0x34   : > { %v422_v1 = vrot.slane %v399_v51, %v797_v19  ;;  %v426_v2 = vrot.slane %v400_v52, %v797_v19  ;;  %v430_v3 = vrot.slane %v401_v53, %v797_v19  ;;  %v434_v4 = vrot.slane %v402_v54, %v797_v19 }
  0x35   : > { %vm838_vm11 = vcmp.eq.s32.totalorder %v406_v61, 1  ;;  %vm842_vm12 = vcmp.eq.s32.totalorder %v410_v62, 1  ;;  %vm846_vm13 = vcmp.eq.s32.totalorder %v414_v63, 1  ;;  %vm850_vm14 = vcmp.eq.s32.totalorder %v418_v0, 1 }
  0x36   : > { %vm854_vm15 = vcmp.eq.s32.totalorder %v422_v1, 1  ;;  %vm858_vm0 = vcmp.eq.s32.totalorder %v426_v2, 1  ;;  %vm862_vm1 = vcmp.eq.s32.totalorder %v430_v3, 1  ;;  %vm866_vm2 = vcmp.eq.s32.totalorder %v434_v4, 1 }
  0x9d   : > { %v279_v5 = vpop.permute.xlu0 %278  ;;  %v307_v14 = vpop.permute.xlu1 %306 }
  0x9e   : > { %v286_v10 = vmul.f32 %v279_v5, %v258_v37  ;;  %v287_v11 = vmul.f32 %v279_v5, %v259_v38  ;;  %v288_v12 = vmul.f32 %v279_v5, %v260_v39  ;;  %v289_v13 = vmul.f32 %v279_v5, %v261_v40 }
  0x9f   : > { %v290_v15 = vmul.f32 %v279_v5, %v262_v41  ;;  %v291_v16 = vmul.f32 %v279_v5, %v263_v42  ;;  %v292_v17 = vmul.f32 %v279_v5, %v264_v43  ;;  %v293_v18 = vmul.f32 %v279_v5, %v265_v44 }
  0xa0   : > { %v314_v23 = vadd.f32 %v307_v14, %v286_v10  ;;  %v315_v24 = vadd.f32 %v307_v14, %v287_v11  ;;  %v316_v25 = vadd.f32 %v307_v14, %v288_v12  ;;  %v317_v26 = vadd.f32 %v307_v14, %v289_v13 }
  0xa1   : > { %v318_v31 = vadd.f32 %v307_v14, %v290_v15  ;;  %v319_v32 = vadd.f32 %v307_v14, %v291_v16  ;;  %v320_v33 = vadd.f32 %v307_v14, %v292_v17  ;;  %v321_v34 = vadd.f32 %v307_v14, %v293_v18  ;;  %v284_v35 = vpop.permute.xlu0 %283  ;;  %v312_v48 = vpop.permute.xlu1 %311 }
  0xa2   : > { %v330_v36 = vmax.f32 %v314_v23, 0.0  ;;  %v331_v37 = vmax.f32 %v315_v24, 0.0  ;;  %v332_v38 = vmax.f32 %v316_v25, 0.0  ;;  %v333_v39 = vmax.f32 %v317_v26, 0.0 }
  0xa3   : > { %v334_v40 = vmax.f32 %v318_v31, 0.0  ;;  %v335_v41 = vmax.f32 %v319_v32, 0.0  ;;  %v336_v42 = vmax.f32 %v320_v33, 0.0  ;;  %v337_v43 = vmax.f32 %v321_v34, 0.0 }
  0xa4   : > { %v294_v44 = vmul.f32 %v284_v35, %v266_v57  ;;  %v295_v45 = vmul.f32 %v284_v35, %v267_v58  ;;  %v296_v46 = vmul.f32 %v284_v35, %v268_v59  ;;  %v297_v47 = vmul.f32 %v284_v35, %v269_v60 }
  0xa5   : > { %v298_v49 = vmul.f32 %v284_v35, %v270_v6  ;;  %v299_v50 = vmul.f32 %v284_v35, %v271_v7  ;;  %v300_v51 = vmul.f32 %v284_v35, %v272_v8  ;;  %v301_v52 = vmul.f32 %v284_v35, %v273_v9 }
  0xa6   : > { %v322_v53 = vadd.f32 %v312_v48, %v294_v44  ;;  %v323_v54 = vadd.f32 %v312_v48, %v295_v45  ;;  %v324_v55 = vadd.f32 %v312_v48, %v296_v46  ;;  %v325_v56 = vadd.f32 %v312_v48, %v297_v47 }
  0xa7   : > { %v326_v61 = vadd.f32 %v312_v48, %v298_v49  ;;  %v327_v62 = vadd.f32 %v312_v48, %v299_v50  ;;  %v328_v63 = vadd.f32 %v312_v48, %v300_v51  ;;  %v329_v0 = vadd.f32 %v312_v48, %v301_v52 }
  0xa8   : > { %v338_v1 = vmax.f32 %v322_v53, 0.0  ;;  %v339_v2 = vmax.f32 %v323_v54, 0.0  ;;  %v340_v3 = vmax.f32 %v324_v55, 0.0  ;;  %v341_v57 = vmax.f32 %v325_v56, 0.0 }
  0xa9   : > { %v342_v58 = vmax.f32 %v326_v61, 0.0  ;;  %v343_v59 = vmax.f32 %v327_v62, 0.0  ;;  %v344_v60 = vmax.f32 %v328_v63, 0.0  ;;  %v345_v4 = vmax.f32 %v329_v0, 0.0 }
  0xaa   : > { %v443_v5 = vsel %vm838_vm11, %v330_v36, 0.0  ;;  %v444_v6 = vsel %vm842_vm12, %v331_v37, 0.0  ;;  %v445_v7 = vsel %vm846_vm13, %v332_v38, 0.0  ;;  %v446_v8 = vsel %vm850_vm14, %v333_v39, 0.0 }
  0xab   : > { %v447_v9 = vsel %vm854_vm15, %v334_v40, 0.0  ;;  %v448_v10 = vsel %vm858_vm0, %v335_v41, 0.0  ;;  %v449_v11 = vsel %vm862_vm1, %v336_v42, 0.0  ;;  %v450_v12 = vsel %vm866_vm2, %v337_v43, 0.0 }
  0xac   : > { %v451_v13 = vsel %vm838_vm11, %v338_v1, 0.0  ;;  %v452_v14 = vsel %vm842_vm12, %v339_v2, 0.0  ;;  %v453_v15 = vsel %vm846_vm13, %v340_v3, 0.0  ;;  %v454_v16 = vsel %vm850_vm14, %v341_v57, 0.0 }
  0xad   : > { %v455_v17 = vsel %vm854_vm15, %v342_v58, 0.0  ;;  %v456_v18 = vsel %vm858_vm0, %v343_v59, 0.0  ;;  %v457_v20 = vsel %vm862_vm1, %v344_v60, 0.0  ;;  %v458_v19 = vsel %vm866_vm2, %v345_v4, 0.0  ;;  %521 = sbr.rel (!%p763_p5) target bundleno = 188 (0xbc), region = 63 }
  0xae   : > { %v646_v23 = vpack.c.bf16 %v444_v6, %v443_v5  ;;  %v647_v24 = vpack.c.bf16 %v446_v8, %v445_v7  ;;  %v648_v25 = vpack.c.bf16 %v448_v10, %v447_v9  ;;  %v649_v21 = vpack.c.bf16 %v450_v12, %v449_v11 }
  0xaf   : > { %v650_v26 = vpack.c.bf16 %v452_v14, %v451_v13  ;;  %v651_v31 = vpack.c.bf16 %v454_v16, %v453_v15  ;;  %v652_v22 = vpack.c.bf16 %v456_v18, %v455_v17  ;;  %v653_v32 = vpack.c.bf16 %v458_v19, %v457_v20 }
  0xb0   : > { %507 = vst [vmem:[%s239_s15] sm:$0xff] %v646_v23  ;;  %508 = vst [vmem:[%s239_s15 + $0x8] sm:$0xff] %v647_v24 }
  0xb1   : > { %509 = vst [vmem:[%s239_s15 + $0x10] sm:$0xff] %v648_v25  ;;  %510 = vst [vmem:[%s239_s15 + $0x18] sm:$0xff] %v649_v21 }
  0xb2   : > { %511 = vst [vmem:[%s239_s15 + $0x20] sm:$0xff] %v650_v26  ;;  %512 = vst [vmem:[%s239_s15 + $0x28] sm:$0xff] %v651_v31 }
  0xb3   : > { %513 = vst [vmem:[%s239_s15 + $0x30] sm:$0xff] %v652_v22  ;;  %514 = vst [vmem:[%s239_s15 + $0x38] sm:$0xff] %v653_v32 }
  0xb7   : > { %v537_v27 = vld [vmem:[%s239_s15] sm:$0xff]  ;;  %v539_v28 = vld [vmem:[%s239_s15 + $0x8] sm:$0xff] }
  0xb8   : > { %v541_v29 = vld [vmem:[%s239_s15 + $0x10] sm:$0xff]  ;;  %v543_v30 = vld [vmem:[%s239_s15 + $0x18] sm:$0xff]  ;;  %538 = vst [vmem:[%s524_s29] sm:$0xff] %v537_v27  ;;  %540 = vst [vmem:[%s524_s29 + $0x8] sm:$0xff] %v539_v28 }
  0xb9   : > { %v545_v33 = vld [vmem:[%s239_s15 + $0x20] sm:$0xff]  ;;  %v547_v34 = vld [vmem:[%s239_s15 + $0x28] sm:$0xff]  ;;  %542 = vst [vmem:[%s524_s29 + $0x10] sm:$0xff] %v541_v29  ;;  %544 = vst [vmem:[%s524_s29 + $0x18] sm:$0xff] %v543_v30 }
  0xba   : > { %546 = vst [vmem:[%s524_s29 + $0x40] sm:$0xff] %v545_v33  ;;  %548 = vst [vmem:[%s524_s29 + $0x48] sm:$0xff] %v547_v34  ;;  %v549_v35 = vld [vmem:[%s239_s15 + $0x30] sm:$0xff]  ;;  %v551_v36 = vld [vmem:[%s239_s15 + $0x38] sm:$0xff] }
  0xbb   : > { %550 = vst [vmem:[%s524_s29 + $0x50] sm:$0xff] %v549_v35  ;;  %552 = vst [vmem:[%s524_s29 + $0x58] sm:$0xff] %v551_v36 }
  0xbc PF: > { %p11_p11 = scmp.ge.s32.totalorder %s751_s19, 4   ;;  %s941_s15 = smov %s700_s16 }
  0xbd   : > { %s942_s16 = smov %s761_s22  ;;  %s943_s17 = smov %s751_s19 }
  0xbe   :  { %13 = sbr.rel (!%p11_p11) target bundleno = 2 (0x2), region = 120 }

// kernel: unet3d_convblock.4
= control target key start
LH: loop header
LB: loop body
LE: loop exit
PB: predicated region body
PF: predicated region fallthrough
CT: control target
= control target key end

     0   :  { %s8416_s21 = smov 0   ;;  %s8418_s22 = smov 0   ;;  %s9761_s0 = inlined_call_operand.vmem [shape: bf16[27,16,8], index: 0, kind: input, shape index: {}]   ;;  %s9762_s1 = inlined_call_operand.vmem [shape: bf16[8,2048], index: 1, kind: input, shape index: {}, may-alias: {1,2,3}]   ;;  %s9763_s2 = inlined_call_operand.vmem [shape: bf16[8,2048], index: 2, kind: input, shape index: {}, may-alias: {1,2,3}]   ;;  %s9764_s3 = inlined_call_operand.vmem [shape: bf16[8,2048], index: 3, kind: input, shape index: {}, may-alias: {1,2,3}]   ;;  %s9765_s4 = inlined_call_operand.vmem [shape: bf16[1,2048], index: 4, kind: input, shape index: {}]   ;;  %s9766_s5 = inlined_call_operand.vmem [shape: bf16[16,2048], index: 5, kind: output, shape index: {0}]   ;;  %s9767_s6 = inlined_call_operand.vmem [shape: f32[32,128], index: 6, kind: output, shape index: {1}]  }
   0x1   :  { %s8420_s23 = smov 0  }
   0x2 LB: > { %s8429_s24 = sadd.s32 4294967295, %s8352_s23   ;;  %s8431_s25 = sadd.s32 1, %s8352_s23   ;;  %s8352_s23 = sphi %s8420_s23, %s9787_s23   ;;  %s8348_s22 = sphi %s8418_s22, %s9786_s22   ;;  %s8344_s21 = sphi %s8416_s21, %s9785_s21  }
   0x3   : > { %s158_s26 = ssub.s32 %s8352_s23, %s8431_s25  ;;  %s161_s27 = sadd.s32 1, %s8348_s22 }
   0x4   : > { %p159_p0 = scmp.eq.s32.totalorder %s158_s26, 0  ;;  %p171_p1 = scmp.ne.s32.totalorder %s8348_s22, %s8344_s21 }
   0x5   : > { %p172_p2 = scmp.eq.s32.totalorder %s8429_s24, 1  ;;  %p7486_p3 = scmp.ge.s32.totalorder %s8352_s23, 1 }
   0x6   : > { %s8439_s28 = scalar_select %p159_p0, %s8348_s22, %s161_s27  }
   0x7   : > { %p8441_p4 = por %p172_p2, %p171_p1  ;;  %p272_p5 = scmp.lt.s32.totalorder %s8352_s23, 3 }
   0x9   : > { %p273_p6 = pnand %p7486_p3, %p272_p5 }
   0xa   : > { %s7491_s30 = sshll.u32 (!%p273_p6), %s8429_s24, 3  ;;  %s7488_s7 = sadd.s32 (!%p273_p6), 4294967295, %s8429_s24  ;;  %v8355_v10 = vmov (!%p273_p6), 0   ;;  %vm431_vm0 = vcmask (!%p273_p6), 900096   ;;  %vm444_vm1 = vcmask (!%p273_p6), 1043456   ;;  %v8301_v22 = vld [vmem:[%s9761_s0 + $0x8] sm:$0xff] (!%p273_p6)  }
   0xb   : > { %276 = sbr.rel (%p273_p6) target bundleno = 979 (0x3d3), region = 40  ;;  %p339_p7 = scmp.lt.s32.totalorder (!%p273_p6), %s7491_s30, 15  ;;  %501 = vmatprep.mubr.bf16.mxu0 (!%p273_p6), %v8355_v10  ;;  %544 = vmatprep.mubr.bf16.mxu1 (!%p273_p6), %v8355_v10  ;;  %vm440_vm2 = vcmask (!%p273_p6), 64512   ;;  %vm664_vm3 = vcmask (!%p273_p6), 908288   ;;  %v8302_v49 = vld [vmem:[%s9761_s0] sm:$0xff] (!%p273_p6)   ;;  %vm898_vm4 = vcmask (!%p273_p6), 891904  }
   0xc   : > { %p327_p8 = scmp.gt.s32.totalorder (!%p273_p6), %s7488_s7, 0  ;;  %s8354_s13 = smov (!%p273_p6), 110   ;;  %vm1148_vm5 = vcmask (!%p273_p6), 826368   ;;  %vm1398_vm6 = vcmask (!%p273_p6), 818176   ;;  %vm1648_vm7 = vcmask (!%p273_p6), 809984   ;;  %vm1898_vm8 = vcmask (!%p273_p6), 744448  }
   0xd   : > { %s8356_s18 = smov (!%p273_p6), 111   ;;  %s8357_s19 = smov (!%p273_p6), 109   ;;  %vm2148_vm9 = vcmask (!%p273_p6), 736256   ;;  %vm2398_vm10 = vcmask (!%p273_p6), 728064   ;;  %vm2648_vm11 = vcmask (!%p273_p6), 89088   ;;  %vm2898_vm12 = vcmask (!%p273_p6), 80896  }
   0xe   : > { %s8358_s20 = smov (!%p273_p6), 101   ;;  %s8359_s23 = smov (!%p273_p6), 100   ;;  %vm3148_vm13 = vcmask (!%p273_p6), 72704   ;;  %vm3398_vm14 = vcmask (!%p273_p6), 7168   ;;  %vm3871_vm15 = vcmask (!%p273_p6), 1039360  }
   0xf   : > { %s8360_s26 = smov (!%p273_p6), 99   ;;  %s8361_s27 = smov (!%p273_p6), 91  }
  0x10   : > { %s8362_s15 = smov (!%p273_p6), 90   ;;  %s8366_s10 = smov (!%p273_p6), 9  }
  0x11   : > { %s8373_s16 = smov (!%p273_p6), 38  }
  0x12   : > { %s9789_s30 = smov (!%p339_p7, %s7491_s30), 15  ;;  %s9791_s7 = smov (!%p327_p8, %s7488_s7), 0 }
  0x13   : > { %s7492_s8 = sshll.u32 %s9789_s30, 2  ;;  %s7489_s12 = sshll.u32 %s9791_s7, 3 }
  0x14   : > { %s342_s11 = scalar_lea.vmem %s9763_s2, %s7492_s8  ;;  %p330_p9 = scmp.lt.s32.totalorder %s7489_s12, 15 }
  0x15   : > { %v372_v0 = vld [vmem:[%s342_s11] sm:$0xff]  ;;  %v373_v1 = vld [vmem:[%s342_s11 + $0x8] sm:$0xff]  ;;  %v374_v6 = vld [vmem:[%s342_s11 + $0x10] sm:$0xff]  ;;  %s344_s7 = sadd.s32 1, %s8429_s24 }
  0x16   : > { %v8453_v2 = vcombine.high %v372_v0, %v372_v0  ;;  %v8455_v3 = vcombine.low %v372_v0, %v372_v0  ;;  %s9793_s12 = smov (!%p330_p9, %s7489_s12), 15  ;;  %v8459_v4 = vcombine.low %v373_v1, %v373_v1  ;;  %v8461_v5 = vcombine.high %v373_v1, %v373_v1  ;;  %v375_v7 = vld [vmem:[%s342_s11 + $0x18] sm:$0xff]  ;;  %p345_p10 = scmp.lt.s32.totalorder %s344_s7, 1 }
  0x17   : > { %s7490_s14 = sshll.u32 %s9793_s12, 2  ;;  %v8468_v8 = vcombine.low %v374_v6, %v374_v6  ;;  %v8470_v9 = vcombine.high %v374_v6, %v374_v6  ;;  %v8478_v12 = vcombine.low %v375_v7, %v375_v7  ;;  %v8482_v13 = vcombine.high %v375_v7, %v375_v7  ;;  %s8377_s11 = smov 27  }
  0x18   : > { %417 = vrot.lane.b32.xlu1 %v8453_v2, %s8354_s13  ;;  %415 = vrot.lane.b32.xlu0 %v8455_v3, %s8354_s13  ;;  %s333_s17 = scalar_lea.vmem %s9762_s1, %s7490_s14  ;;  %s9795_s7 = smov (!%p345_p10, %s344_s7), 1 }
  0x19   : > { %v8474_v11 = vld [vmem:[%s333_s17 + $0x1c] ss:$0 sps:$4 sm:$0xff]   ;;  %s7493_s8 = sshll.u32 %s9795_s7, 3  ;;  %s8365_s7 = smov 10  }
  0x1a   : > { %p348_p11 = scmp.lt.s32.totalorder %s7493_s8, 15  ;;  %s8367_s14 = smov 1  }
  0x1b   : > { %s8368_s17 = smov 127  }
  0x1c   : > { %419 = vrot.lane.b32.xlu1 %v8459_v4, %s8354_s13  ;;  %421 = vrot.lane.b32.xlu0 %v8461_v5, %s8354_s13  ;;  %s9797_s8 = smov (!%p348_p11, %s7493_s8), 15 }
  0x1d   : > { %s7494_s9 = sshll.u32 %s9797_s8, 2  ;;  %s8376_s8 = smov 28  }
  0x1e   : > { %s8550_s12 = scalar_lea.vmem %s9764_s3, %s7494_s9  ;;  %s8371_s9 = smov 117  }
  0x20   : > { %423 = vrot.lane.b32.xlu1 %v8468_v8, %s8354_s13  ;;  %425 = vrot.lane.b32.xlu0 %v8470_v9, %s8354_s13 }
  0x24   : > { %427 = vrot.lane.b32.xlu1 %v8478_v12, %s8354_s13  ;;  %413 = vrot.lane.b32.xlu0 %v8474_v11, %s8354_s13 }
  0x28   : > { %646 = vrot.lane.b32.xlu1 %v8474_v11, %s8356_s18  ;;  %429 = vrot.lane.b32.xlu0 %v8482_v13, %s8354_s13  ;;  %s8372_s13 = smov 39  }
  0x2c   : > { %650 = vrot.lane.b32.xlu1 %v8453_v2, %s8356_s18  ;;  %648 = vrot.lane.b32.xlu0 %v8455_v3, %s8356_s18 }
  0x30   : > { %654 = vrot.lane.b32.xlu1 %v8461_v5, %s8356_s18  ;;  %652 = vrot.lane.b32.xlu0 %v8459_v4, %s8356_s18 }
  0x34   : > { %658 = vrot.lane.b32.xlu1 %v8470_v9, %s8356_s18  ;;  %656 = vrot.lane.b32.xlu0 %v8468_v8, %s8356_s18 }
  0x38   : > { %662 = vrot.lane.b32.xlu1 %v8482_v13, %s8356_s18  ;;  %660 = vrot.lane.b32.xlu0 %v8478_v12, %s8356_s18  ;;  %s8363_s18 = smov 89  }
  0x3c   : > { %882 = vrot.lane.b32.xlu1 %v8455_v3, %s8357_s19  ;;  %880 = vrot.lane.b32.xlu0 %v8474_v11, %s8357_s19 }
  0x40   : > { %886 = vrot.lane.b32.xlu1 %v8459_v4, %s8357_s19  ;;  %884 = vrot.lane.b32.xlu0 %v8453_v2, %s8357_s19 }
  0x44   : > { %890 = vrot.lane.b32.xlu1 %v8468_v8, %s8357_s19  ;;  %888 = vrot.lane.b32.xlu0 %v8461_v5, %s8357_s19 }
  0x48   : > { %894 = vrot.lane.b32.xlu1 %v8478_v12, %s8357_s19  ;;  %892 = vrot.lane.b32.xlu0 %v8470_v9, %s8357_s19 }
  0x4c   : > { %1130 = vrot.lane.b32.xlu1 %v8474_v11, %s8358_s20  ;;  %896 = vrot.lane.b32.xlu0 %v8482_v13, %s8357_s19  ;;  %s8364_s19 = smov 11  }
  0x50   : > { %1134 = vrot.lane.b32.xlu1 %v8453_v2, %s8358_s20  ;;  %1132 = vrot.lane.b32.xlu0 %v8455_v3, %s8358_s20 }
  0x54   : > { %1138 = vrot.lane.b32.xlu1 %v8461_v5, %s8358_s20  ;;  %1136 = vrot.lane.b32.xlu0 %v8459_v4, %s8358_s20 }
  0x58   : > { %1142 = vrot.lane.b32.xlu1 %v8470_v9, %s8358_s20  ;;  %1140 = vrot.lane.b32.xlu0 %v8468_v8, %s8358_s20 }
  0x5c   : > { %1146 = vrot.lane.b32.xlu1 %v8482_v13, %s8358_s20  ;;  %1144 = vrot.lane.b32.xlu0 %v8478_v12, %s8358_s20  ;;  %s8369_s20 = smov 119  }
  0x60   : > { %1382 = vrot.lane.b32.xlu1 %v8455_v3, %s8359_s23  ;;  %1380 = vrot.lane.b32.xlu0 %v8474_v11, %s8359_s23 }
  0x64   : > { %1386 = vrot.lane.b32.xlu1 %v8459_v4, %s8359_s23  ;;  %1384 = vrot.lane.b32.xlu0 %v8453_v2, %s8359_s23 }
  0x68   : > { %1390 = vrot.lane.b32.xlu1 %v8468_v8, %s8359_s23  ;;  %1388 = vrot.lane.b32.xlu0 %v8461_v5, %s8359_s23 }
  0x6c   : > { %1394 = vrot.lane.b32.xlu1 %v8478_v12, %s8359_s23  ;;  %1392 = vrot.lane.b32.xlu0 %v8470_v9, %s8359_s23 }
  0x70   : > { %1630 = vrot.lane.b32.xlu1 %v8474_v11, %s8360_s26  ;;  %1396 = vrot.lane.b32.xlu0 %v8482_v13, %s8359_s23 }
  0x74   : > { %1634 = vrot.lane.b32.xlu1 %v8453_v2, %s8360_s26  ;;  %1632 = vrot.lane.b32.xlu0 %v8455_v3, %s8360_s26 }
  0x78   : > { %1638 = vrot.lane.b32.xlu1 %v8461_v5, %s8360_s26  ;;  %1636 = vrot.lane.b32.xlu0 %v8459_v4, %s8360_s26 }
  0x7c   : > { %1642 = vrot.lane.b32.xlu1 %v8470_v9, %s8360_s26  ;;  %1640 = vrot.lane.b32.xlu0 %v8468_v8, %s8360_s26 }
  0x80   : > { %1646 = vrot.lane.b32.xlu1 %v8482_v13, %s8360_s26  ;;  %1644 = vrot.lane.b32.xlu0 %v8478_v12, %s8360_s26  ;;  %s8375_s26 = smov 29  }
  0x84   : > { %1882 = vrot.lane.b32.xlu1 %v8455_v3, %s8361_s27  ;;  %1880 = vrot.lane.b32.xlu0 %v8474_v11, %s8361_s27 }
  0x88   : > { %1886 = vrot.lane.b32.xlu1 %v8459_v4, %s8361_s27  ;;  %1884 = vrot.lane.b32.xlu0 %v8453_v2, %s8361_s27 }
  0x8a   : > { %v418_v14 = vpop.permute.xlu1 %417  ;;  %v416_v15 = vpop.permute.xlu0 %415 }
  0x8b   : > { %v433_v16 = vsel %vm431_vm0, %v416_v15, %v418_v14 }
  0x8c   : > { %7511 = vmatprep.subr.msk.bf16.mxu0 %vm444_vm1, %v433_v16  ;;  %1890 = vrot.lane.b32.xlu1 %v8468_v8, %s8361_s27  ;;  %v8303_v16 = vld [vmem:[%s9761_s0 + $0x10] sm:$0xff]  }
  0x8d   : > { %1888 = vrot.lane.b32.xlu0 %v8461_v5, %s8361_s27 }
  0x8e   : > { %v420_v17 = vpop.permute.xlu1 %419  ;;  %v422_v18 = vpop.permute.xlu0 %421 }
  0x8f   : > { %v435_v19 = vsel %vm431_vm0, %v420_v17, %v422_v18  ;;  %v434_v20 = vsel %vm431_vm0, %v418_v14, %v420_v17 }
  0x90   : > { %7513 = vmatprep.subr.msk.bf16.mxu1 %vm444_vm1, %v435_v19  ;;  %1894 = vrot.lane.b32.xlu1 %v8478_v12, %s8361_s27  ;;  %v452_v21 = vsel %vm444_vm1, %v434_v20, 0 }
  0x91   : > { %1892 = vrot.lane.b32.xlu0 %v8470_v9, %s8361_s27  ;;  %513 = vmatpush1.bf16.msra.mxu1 %v452_v21 }
  0x92   : > { %v424_v23 = vpop.permute.xlu1 %423  ;;  %v426_v24 = vpop.permute.xlu0 %425 }
  0x93   : > { %v437_v29 = vsel %vm431_vm0, %v424_v23, %v426_v24  ;;  %v436_v30 = vsel %vm431_vm0, %v422_v18, %v424_v23 }
  0x94   : > { %2130 = vrot.lane.b32.xlu1 %v8474_v11, %s8362_s15  ;;  %7514 = vmatmul.mubr.msk.bf16.vlgmr.msra.gmra.mrb[0].mxu1 %vm440_vm2, %v8301_v22  ;;  %v458_v35 = vsel %vm444_vm1, %v436_v30, 0 }
  0x95   : > { %1896 = vrot.lane.b32.xlu0 %v8482_v13, %s8361_s27  ;;  %630 = vmatprep.mubr.bf16.mxu1 %v8355_v10  ;;  %s8370_s27 = smov 118  }
  0x96   : > { %v428_v25 = vpop.permute.xlu1 %427  ;;  %v414_v26 = vpop.permute.xlu0 %413 }
  0x97   : > { %v432_v27 = vsel %vm431_vm0, %v414_v26, %v416_v15  ;;  %v438_v31 = vsel %vm431_vm0, %v426_v24, %v428_v25 }
  0x98   : > { %2134 = vrot.lane.b32.xlu1 %v8453_v2, %s8362_s15  ;;  %v446_v28 = vsel %vm444_vm1, %v432_v27, 0  ;;  %v464_v36 = vsel %vm444_vm1, %v438_v31, 0 }
  0x99   : > { %2132 = vrot.lane.b32.xlu0 %v8455_v3, %s8362_s15  ;;  %470 = vmatpush1.bf16.msra.mxu0 %v446_v28 }
  0x9a   : > { %v647_v32 = vpop.permute.xlu1 %646  ;;  %7515 = vmatprep.subr.msk.bf16.mxu0 %vm444_vm1, %v437_v29  ;;  %v430_v33 = vpop.permute.xlu0 %429 }
  0x9b   : > { %v439_v34 = vsel %vm431_vm0, %v428_v25, %v430_v33  ;;  %vm4121_vm0 = vcmask 973824  }
  0x9c   : > { %2138 = vrot.lane.b32.xlu1 %v8461_v5, %s8362_s15  ;;  %7512 = vmatmul.mubr.msk.bf16.vlgmr.msra.gmra.mrb[0].mxu0 %vm440_vm2, %v8301_v22 }
  0x9d   : > { %2136 = vrot.lane.b32.xlu0 %v8459_v4, %s8362_s15  ;;  %7517 = vmatprep.subr.msk.bf16.mxu1 %vm444_vm1, %v439_v34 }
  0x9e   : > { %556 = vmatpush1.bf16.msra.mxu0 %v458_v35  ;;  %599 = vmatpush1.bf16.msra.mxu1 %v464_v36  ;;  %v651_v37 = vpop.permute.xlu1 %650  ;;  %v649_v38 = vpop.permute.xlu0 %648 }
  0x9f   : > { %v666_v39 = vsel %vm664_vm3, %v649_v38, %v651_v37  ;;  %587 = vmatprep.mubr.bf16.mxu0 %v8355_v10  ;;  %v665_v40 = vsel %vm664_vm3, %v647_v32, %v649_v38 }
  0xa0   : > { %2142 = vrot.lane.b32.xlu1 %v8470_v9, %s8362_s15  ;;  %7520 = vmatprep.subr.msk.bf16.mxu0 %vm444_vm1, %v666_v39  ;;  %v677_v45 = vsel %vm444_vm1, %v665_v40, 0 }
  0xa1   : > { %2140 = vrot.lane.b32.xlu0 %v8468_v8, %s8362_s15  ;;  %7518 = vmatmul.mubr.msk.bf16.vlgmr.msra.gmra.mrb[4].mxu1 %vm440_vm2, %v8301_v22 }
  0xa2   : > { %v655_v41 = vpop.permute.xlu1 %654  ;;  %v653_v42 = vpop.permute.xlu0 %652  ;;  %775 = vmatprep.mubr.bf16.mxu1 %v8355_v10 }
  0xa3   : > { %v667_v43 = vsel %vm664_vm3, %v651_v37, %v653_v42  ;;  %v668_v44 = vsel %vm664_vm3, %v653_v42, %v655_v41  ;;  %v8304_v37 = vld [vmem:[%s9761_s0 + $0x18] sm:$0xff]  }
  0xa4   : > { %2146 = vrot.lane.b32.xlu1 %v8482_v13, %s8362_s15  ;;  %7516 = vmatmul.mubr.msk.bf16.vlgmr.msra.gmra.mrb[4].mxu0 %vm440_vm2, %v8301_v22  ;;  %v683_v46 = vsel %vm444_vm1, %v667_v43, 0 }
  0xa5   : > { %2144 = vrot.lane.b32.xlu0 %v8478_v12, %s8362_s15  ;;  %701 = vmatpush1.bf16.msra.mxu0 %v677_v45  ;;  %s8378_s15 = smov 19  }
  0xa6   : > { %7522 = vmatprep.subr.msk.bf16.mxu1 %vm444_vm1, %v668_v44  ;;  %v659_v47 = vpop.permute.xlu1 %658  ;;  %v657_v48 = vpop.permute.xlu0 %656  ;;  %732 = vmatprep.mubr.bf16.mxu0 %v8355_v10 }
  0xa7   : > { %744 = vmatpush1.bf16.msra.mxu1 %v683_v46  ;;  %v670_v50 = vsel %vm664_vm3, %v657_v48, %v659_v47  ;;  %v669_v51 = vsel %vm664_vm3, %v655_v41, %v657_v48 }
  0xa8   : > { %2382 = vrot.lane.b32.xlu1 %v8455_v3, %s8363_s18  ;;  %7524 = vmatprep.subr.msk.bf16.mxu0 %vm444_vm1, %v670_v50  ;;  %v689_v56 = vsel %vm444_vm1, %v669_v51, 0 }
  0xa9   : > { %2380 = vrot.lane.b32.xlu0 %v8474_v11, %s8363_s18 }
  0xaa   : > { %v663_v52 = vpop.permute.xlu1 %662  ;;  %v661_v53 = vpop.permute.xlu0 %660  ;;  %7523 = vmatmul.mubr.msk.bf16.vlgmr.msra.gmra.mrb[0].mxu1 %vm440_vm2, %v8302_v49 }
  0xab   : > { %v671_v54 = vsel %vm664_vm3, %v659_v47, %v661_v53  ;;  %v672_v55 = vsel %vm664_vm3, %v661_v53, %v663_v52  ;;  %861 = vmatprep.mubr.bf16.mxu1 %v8355_v10  ;;  %vm4371_vm3 = vcmask 965632  }
  0xac   : > { %2386 = vrot.lane.b32.xlu1 %v8459_v4, %s8363_s18  ;;  %7521 = vmatmul.mubr.msk.bf16.vlgmr.msra.gmra.mrb[0].mxu0 %vm440_vm2, %v8302_v49  ;;  %v695_v57 = vsel %vm444_vm1, %v671_v54, 0 }
  0xad   : > { %2384 = vrot.lane.b32.xlu0 %v8453_v2, %s8363_s18  ;;  %787 = vmatpush1.bf16.msra.mxu0 %v689_v56 }
  0xae   : > { %7526 = vmatprep.subr.msk.bf16.mxu1 %vm444_vm1, %v672_v55  ;;  %v883_v58 = vpop.permute.xlu1 %882  ;;  %v881_v59 = vpop.permute.xlu0 %880  ;;  %818 = vmatprep.mubr.bf16.mxu0 %v8355_v10 }
  0xaf   : > { %830 = vmatpush1.bf16.msra.mxu1 %v695_v57  ;;  %v899_v60 = vsel %vm898_vm4, %v881_v59, %v883_v58 }
  0xb0   : > { %2390 = vrot.lane.b32.xlu1 %v8468_v8, %s8363_s18  ;;  %v911_v0 = vsel %vm444_vm1, %v899_v60, 0 }
  0xb1   : > { %2388 = vrot.lane.b32.xlu0 %v8461_v5, %s8363_s18 }
  0xb2   : > { %v887_v61 = vpop.permute.xlu1 %886  ;;  %v885_v62 = vpop.permute.xlu0 %884  ;;  %7527 = vmatmul.mubr.msk.bf16.vlgmr.msra.gmra.mrb[4].mxu1 %vm440_vm2, %v8302_v49 }
  0xb3   : > { %v900_v63 = vsel %vm898_vm4, %v883_v58, %v885_v62  ;;  %1009 = vmatprep.mubr.bf16.mxu1 %v8355_v10  ;;  %v901_v1 = vsel %vm898_vm4, %v885_v62, %v887_v61  ;;  %v8305_v58 = vld [vmem:[%s9761_s0 + $0x20] sm:$0xff]  }
  0xb4   : > { %2394 = vrot.lane.b32.xlu1 %v8478_v12, %s8363_s18  ;;  %7531 = vmatprep.subr.msk.bf16.mxu0 %vm444_vm1, %v900_v63  ;;  %v917_v15 = vsel %vm444_vm1, %v901_v1, 0 }
  0xb5   : > { %2392 = vrot.lane.b32.xlu0 %v8470_v9, %s8363_s18  ;;  %7525 = vmatmul.mubr.msk.bf16.vlgmr.msra.gmra.mrb[4].mxu0 %vm440_vm2, %v8302_v49 }
  0xb6   : > { %935 = vmatpush1.bf16.msra.mxu0 %v911_v0  ;;  %v891_v6 = vpop.permute.xlu1 %890  ;;  %v889_v7 = vpop.permute.xlu0 %888  ;;  %966 = vmatprep.mubr.bf16.mxu0 %v8355_v10 }
  0xb7   : > { %v902_v14 = vsel %vm898_vm4, %v887_v61, %v889_v7  ;;  %v903_v17 = vsel %vm898_vm4, %v889_v7, %v891_v6 }
  0xb8   : > { %2630 = vrot.lane.b32.xlu1 %v8474_v11, %s8364_s19  ;;  %7533 = vmatprep.subr.msk.bf16.mxu1 %vm444_vm1, %v902_v14  ;;  %v923_v22 = vsel %vm444_vm1, %v903_v17, 0 }
  0xb9   : > { %2396 = vrot.lane.b32.xlu0 %v8482_v13, %s8363_s18  ;;  %978 = vmatpush1.bf16.msra.mxu1 %v917_v15 }
  0xba   : > { %v895_v18 = vpop.permute.xlu1 %894  ;;  %v893_v19 = vpop.permute.xlu0 %892 }
  0xbb   : > { %v904_v20 = vsel %vm898_vm4, %v891_v6, %v893_v19  ;;  %v905_v21 = vsel %vm898_vm4, %v893_v19, %v895_v18 }
  0xbc   : > { %2634 = vrot.lane.b32.xlu1 %v8453_v2, %s8364_s19  ;;  %7535 = vmatprep.subr.msk.bf16.mxu0 %vm444_vm1, %v904_v20  ;;  %v929_v26 = vsel %vm444_vm1, %v905_v21, 0 }
  0xbd   : > { %2632 = vrot.lane.b32.xlu0 %v8455_v3, %s8364_s19  ;;  %7532 = vmatmul.mubr.msk.bf16.vlgmr.msra.gmra.mrb[0].mxu0 %vm440_vm2, %v8303_v16 }
  0xbe   : > { %1021 = vmatpush1.bf16.msra.mxu0 %v923_v22  ;;  %v1131_v23 = vpop.permute.xlu1 %1130  ;;  %v897_v24 = vpop.permute.xlu0 %896  ;;  %7534 = vmatmul.mubr.msk.bf16.vlgmr.msra.gmra.mrb[0].mxu1 %vm440_vm2, %v8303_v16 }
  0xbf   : > { %v906_v25 = vsel %vm898_vm4, %v895_v18, %v897_v24  ;;  %1052 = vmatprep.mubr.bf16.mxu0 %v8355_v10  ;;  %1095 = vmatprep.mubr.bf16.mxu1 %v8355_v10  ;;  %v8306_v24 = vld [vmem:[%s9761_s0 + $0x28] sm:$0xff]   ;;  %vm4621_vm4 = vcmask 957440  }
  0xc0   : > { %2638 = vrot.lane.b32.xlu1 %v8461_v5, %s8364_s19  ;;  %7537 = vmatprep.subr.msk.bf16.mxu1 %vm444_vm1, %v906_v25 }
  0xc1   : > { %2636 = vrot.lane.b32.xlu0 %v8459_v4, %s8364_s19  ;;  %1064 = vmatpush1.bf16.msra.mxu1 %v929_v26 }
  0xc2   : > { %v1135_v27 = vpop.permute.xlu1 %1134  ;;  %v1133_v28 = vpop.permute.xlu0 %1132 }
  0xc3   : > { %v1149_v29 = vsel %vm1148_vm5, %v1131_v23, %v1133_v28  ;;  %v1150_v30 = vsel %vm1148_vm5, %v1133_v28, %v1135_v27 }
  0xc4   : > { %2642 = vrot.lane.b32.xlu1 %v8470_v9, %s8364_s19  ;;  %7542 = vmatprep.subr.msk.bf16.mxu0 %vm444_vm1, %v1150_v30  ;;  %v1161_v31 = vsel %vm444_vm1, %v1149_v29, 0 }
  0xc5   : > { %2640 = vrot.lane.b32.xlu0 %v8468_v8, %s8364_s19  ;;  %7536 = vmatmul.mubr.msk.bf16.vlgmr.msra.gmra.mrb[4].mxu0 %vm440_vm2, %v8303_v16 }
  0xc6   : > { %1185 = vmatpush1.bf16.msra.mxu0 %v1161_v31  ;;  %v1139_v32 = vpop.permute.xlu1 %1138  ;;  %v1137_v33 = vpop.permute.xlu0 %1136  ;;  %7538 = vmatmul.mubr.msk.bf16.vlgmr.msra.gmra.mrb[4].mxu1 %vm440_vm2, %v8303_v16 }
  0xc7   : > { %v1151_v34 = vsel %vm1148_vm5, %v1135_v27, %v1137_v33  ;;  %v1152_v35 = vsel %vm1148_vm5, %v1137_v33, %v1139_v32  ;;  %1216 = vmatprep.mubr.bf16.mxu0 %v8355_v10  ;;  %1259 = vmatprep.mubr.bf16.mxu1 %v8355_v10 }
  0xc8   : > { %2646 = vrot.lane.b32.xlu1 %v8482_v13, %s8364_s19  ;;  %7544 = vmatprep.subr.msk.bf16.mxu1 %vm444_vm1, %v1152_v35  ;;  %v1167_v36 = vsel %vm444_vm1, %v1151_v34, 0 }
  0xc9   : > { %2644 = vrot.lane.b32.xlu0 %v8478_v12, %s8364_s19  ;;  %1228 = vmatpush1.bf16.msra.mxu1 %v1167_v36  ;;  %s8374_s19 = smov 37  }
  0xca   : > { %v1143_v38 = vpop.permute.xlu1 %1142  ;;  %v1141_v39 = vpop.permute.xlu0 %1140 }
  0xcb   : > { %v1153_v40 = vsel %vm1148_vm5, %v1139_v32, %v1141_v39  ;;  %v1154_v41 = vsel %vm1148_vm5, %v1141_v39, %v1143_v38 }
  0xcc   : > { %2882 = vrot.lane.b32.xlu1 %v8455_v3, %s8365_s7  ;;  %7546 = vmatprep.subr.msk.bf16.mxu0 %vm444_vm1, %v1154_v41  ;;  %v1173_v42 = vsel %vm444_vm1, %v1153_v40, 0 }
  0xcd   : > { %2880 = vrot.lane.b32.xlu0 %v8474_v11, %s8365_s7  ;;  %7543 = vmatmul.mubr.msk.bf16.vlgmr.msra.gmra.mrb[0].mxu0 %vm440_vm2, %v8304_v37 }
  0xce   : > { %1271 = vmatpush1.bf16.msra.mxu0 %v1173_v42  ;;  %v1147_v43 = vpop.permute.xlu1 %1146  ;;  %v1145_v44 = vpop.permute.xlu0 %1144  ;;  %7545 = vmatmul.mubr.msk.bf16.vlgmr.msra.gmra.mrb[0].mxu1 %vm440_vm2, %v8304_v37 }
  0xcf   : > { %v1155_v45 = vsel %vm1148_vm5, %v1143_v38, %v1145_v44  ;;  %v1156_v46 = vsel %vm1148_vm5, %v1145_v44, %v1147_v43  ;;  %1302 = vmatprep.mubr.bf16.mxu0 %v8355_v10  ;;  %1345 = vmatprep.mubr.bf16.mxu1 %v8355_v10  ;;  %v8307_v44 = vld [vmem:[%s9761_s0 + $0x30] sm:$0xff]   ;;  %vm4871_vm5 = vcmask 318464  }
  0xd0   : > { %2886 = vrot.lane.b32.xlu1 %v8459_v4, %s8365_s7  ;;  %7548 = vmatprep.subr.msk.bf16.mxu1 %vm444_vm1, %v1156_v46  ;;  %v1179_v47 = vsel %vm444_vm1, %v1155_v45, 0 }
  0xd1   : > { %2884 = vrot.lane.b32.xlu0 %v8453_v2, %s8365_s7  ;;  %1314 = vmatpush1.bf16.msra.mxu1 %v1179_v47 }
  0xd2   : > { %v1383_v48 = vpop.permute.xlu1 %1382  ;;  %v1381_v49 = vpop.permute.xlu0 %1380 }
  0xd3   : > { %v1399_v50 = vsel %vm1398_vm6, %v1381_v49, %v1383_v48 }
  0xd4   : > { %2890 = vrot.lane.b32.xlu1 %v8468_v8, %s8365_s7  ;;  %v1411_v54 = vsel %vm444_vm1, %v1399_v50, 0 }
  0xd5   : > { %2888 = vrot.lane.b32.xlu0 %v8461_v5, %s8365_s7  ;;  %7547 = vmatmul.mubr.msk.bf16.vlgmr.msra.gmra.mrb[4].mxu0 %vm440_vm2, %v8304_v37 }
  0xd6   : > { %v1387_v51 = vpop.permute.xlu1 %1386  ;;  %v1385_v52 = vpop.permute.xlu0 %1384  ;;  %7549 = vmatmul.mubr.msk.bf16.vlgmr.msra.gmra.mrb[4].mxu1 %vm440_vm2, %v8304_v37  ;;  %1466 = vmatprep.mubr.bf16.mxu0 %v8355_v10 }
  0xd7   : > { %v1400_v53 = vsel %vm1398_vm6, %v1383_v48, %v1385_v52  ;;  %1509 = vmatprep.mubr.bf16.mxu1 %v8355_v10  ;;  %v1401_v55 = vsel %vm1398_vm6, %v1385_v52, %v1387_v51 }
  0xd8   : > { %2894 = vrot.lane.b32.xlu1 %v8478_v12, %s8365_s7  ;;  %7553 = vmatprep.subr.msk.bf16.mxu0 %vm444_vm1, %v1400_v53  ;;  %v1417_v60 = vsel %vm444_vm1, %v1401_v55, 0 }
  0xd9   : > { %2892 = vrot.lane.b32.xlu0 %v8470_v9, %s8365_s7  ;;  %1435 = vmatpush1.bf16.msra.mxu0 %v1411_v54 }
  0xda   : > { %v1391_v56 = vpop.permute.xlu1 %1390  ;;  %v1389_v57 = vpop.permute.xlu0 %1388 }
  0xdb   : > { %v1402_v59 = vsel %vm1398_vm6, %v1387_v51, %v1389_v57  ;;  %v1403_v61 = vsel %vm1398_vm6, %v1389_v57, %v1391_v56 }
  0xdc   : > { %3130 = vrot.lane.b32.xlu1 %v8474_v11, %s8366_s10  ;;  %7555 = vmatprep.subr.msk.bf16.mxu1 %vm444_vm1, %v1402_v59  ;;  %v1423_v1 = vsel %vm444_vm1, %v1403_v61, 0 }
  0xdd   : > { %2896 = vrot.lane.b32.xlu0 %v8482_v13, %s8365_s7  ;;  %1478 = vmatpush1.bf16.msra.mxu1 %v1417_v60  ;;  %s7496_s7 = sshll.u32 %s8429_s24, 1 }
  0xde   : > { %v1395_v62 = vpop.permute.xlu1 %1394  ;;  %v1393_v63 = vpop.permute.xlu0 %1392  ;;  %7554 = vmatmul.mubr.msk.bf16.vlgmr.msra.gmra.mrb[0].mxu0 %vm440_vm2, %v8305_v58  ;;  %p363_p12 = scmp.lt.s32.totalorder %s7496_s7, 3 }
  0xdf   : > { %v1404_v0 = vsel %vm1398_vm6, %v1391_v56, %v1393_v63  ;;  %1552 = vmatprep.mubr.bf16.mxu0 %v8355_v10  ;;  %v1405_v6 = vsel %vm1398_vm6, %v1393_v63, %v1395_v62 }
  0xe0   : > { %3134 = vrot.lane.b32.xlu1 %v8453_v2, %s8366_s10  ;;  %7557 = vmatprep.subr.msk.bf16.mxu0 %vm444_vm1, %v1404_v0  ;;  %v1429_v16 = vsel %vm444_vm1, %v1405_v6, 0  ;;  %v8864_v0 = vld [vmem:[%s8550_s12] ss:$0 sps:$4 sm:$0xff]   ;;  %s9799_s7 = smov (!%p363_p12, %s7496_s7), 3 }
  0xe1   : > { %3132 = vrot.lane.b32.xlu0 %v8455_v3, %s8366_s10  ;;  %1521 = vmatpush1.bf16.msra.mxu0 %v1423_v1 }
  0xe2   : > { %v1631_v7 = vpop.permute.xlu1 %1630  ;;  %v1397_v14 = vpop.permute.xlu0 %1396  ;;  %7556 = vmatmul.mubr.msk.bf16.vlgmr.msra.gmra.mrb[0].mxu1 %vm440_vm2, %v8305_v58 }
  0xe3   : > { %v1406_v15 = vsel %vm1398_vm6, %v1395_v62, %v1397_v14  ;;  %1595 = vmatprep.mubr.bf16.mxu1 %v8355_v10  ;;  %vm5121_vm6 = vcmask 310272  }
  0xe4   : > { %3138 = vrot.lane.b32.xlu1 %v8461_v5, %s8366_s10  ;;  %7559 = vmatprep.subr.msk.bf16.mxu1 %vm444_vm1, %v1406_v15 }
  0xe5   : > { %3136 = vrot.lane.b32.xlu0 %v8459_v4, %s8366_s10  ;;  %1564 = vmatpush1.bf16.msra.mxu1 %v1429_v16 }
  0xe6   : > { %v1635_v17 = vpop.permute.xlu1 %1634  ;;  %v1633_v18 = vpop.permute.xlu0 %1632  ;;  %7558 = vmatmul.mubr.msk.bf16.vlgmr.msra.gmra.mrb[4].mxu0 %vm440_vm2, %v8305_v58 }
  0xe7   : > { %v1649_v19 = vsel %vm1648_vm7, %v1631_v7, %v1633_v18  ;;  %v1650_v20 = vsel %vm1648_vm7, %v1633_v18, %v1635_v17  ;;  %1716 = vmatprep.mubr.bf16.mxu0 %v8355_v10  ;;  %v8309_v7 = vld [vmem:[%s9761_s0 + $0x38] sm:$0xff]  }
  0xe8   : > { %3142 = vrot.lane.b32.xlu1 %v8470_v9, %s8366_s10  ;;  %7564 = vmatprep.subr.msk.bf16.mxu0 %vm444_vm1, %v1650_v20  ;;  %v1661_v21 = vsel %vm444_vm1, %v1649_v19, 0 }
  0xe9   : > { %3140 = vrot.lane.b32.xlu0 %v8468_v8, %s8366_s10  ;;  %1685 = vmatpush1.bf16.msra.mxu0 %v1661_v21 }
  0xea   : > { %v1639_v22 = vpop.permute.xlu1 %1638  ;;  %v1637_v23 = vpop.permute.xlu0 %1636  ;;  %7560 = vmatmul.mubr.msk.bf16.vlgmr.msra.gmra.mrb[4].mxu1 %vm440_vm2, %v8305_v58 }
  0xeb   : > { %v1651_v25 = vsel %vm1648_vm7, %v1635_v17, %v1637_v23  ;;  %v1652_v26 = vsel %vm1648_vm7, %v1637_v23, %v1639_v22  ;;  %1759 = vmatprep.mubr.bf16.mxu1 %v8355_v10 }
  0xec   : > { %3146 = vrot.lane.b32.xlu1 %v8482_v13, %s8366_s10  ;;  %7566 = vmatprep.subr.msk.bf16.mxu1 %vm444_vm1, %v1652_v26  ;;  %v1667_v27 = vsel %vm444_vm1, %v1651_v25, 0 }
  0xed   : > { %3144 = vrot.lane.b32.xlu0 %v8478_v12, %s8366_s10  ;;  %1728 = vmatpush1.bf16.msra.mxu1 %v1667_v27 }
  0xee   : > { %v1643_v28 = vpop.permute.xlu1 %1642  ;;  %v1641_v29 = vpop.permute.xlu0 %1640  ;;  %7565 = vmatmul.mubr.msk.bf16.vlgmr.msra.gmra.mrb[0].mxu0 %vm440_vm2, %v8306_v24 }
  0xef   : > { %v1653_v30 = vsel %vm1648_vm7, %v1639_v22, %v1641_v29  ;;  %v1654_v31 = vsel %vm1648_vm7, %v1641_v29, %v1643_v28  ;;  %1802 = vmatprep.mubr.bf16.mxu0 %v8355_v10 }
  0xf0   : > { %3382 = vrot.lane.b32.xlu1 %v8455_v3, %s8367_s14  ;;  %7568 = vmatprep.subr.msk.bf16.mxu0 %vm444_vm1, %v1654_v31  ;;  %v1673_v32 = vsel %vm444_vm1, %v1653_v30, 0 }
  0xf1   : > { %3380 = vrot.lane.b32.xlu0 %v8474_v11, %s8367_s14  ;;  %1771 = vmatpush1.bf16.msra.mxu0 %v1673_v32 }
  0xf2   : > { %v1647_v33 = vpop.permute.xlu1 %1646  ;;  %v1645_v34 = vpop.permute.xlu0 %1644  ;;  %7567 = vmatmul.mubr.msk.bf16.vlgmr.msra.gmra.mrb[0].mxu1 %vm440_vm2, %v8306_v24 }
  0xf3   : > { %v1655_v35 = vsel %vm1648_vm7, %v1643_v28, %v1645_v34  ;;  %v1656_v36 = vsel %vm1648_vm7, %v1645_v34, %v1647_v33  ;;  %1845 = vmatprep.mubr.bf16.mxu1 %v8355_v10  ;;  %vm5371_vm7 = vcmask 302080  }
  0xf4   : > { %3386 = vrot.lane.b32.xlu1 %v8459_v4, %s8367_s14  ;;  %7570 = vmatprep.subr.msk.bf16.mxu1 %vm444_vm1, %v1656_v36  ;;  %v1679_v37 = vsel %vm444_vm1, %v1655_v35, 0 }
  0xf5   : > { %3384 = vrot.lane.b32.xlu0 %v8453_v2, %s8367_s14  ;;  %1814 = vmatpush1.bf16.msra.mxu1 %v1679_v37  ;;  %v8310_v37 = vld [vmem:[%s9761_s0 + $0x40] sm:$0xff]  }
  0xf6   : > { %v1883_v11 = vpop.permute.xlu1 %1882  ;;  %v1881_v38 = vpop.permute.xlu0 %1880  ;;  %7569 = vmatmul.mubr.msk.bf16.vlgmr.msra.gmra.mrb[4].mxu0 %vm440_vm2, %v8306_v24 }
  0xf7   : > { %1966 = vmatprep.mubr.bf16.mxu0 %v8355_v10  ;;  %v1899_v39 = vsel %vm1898_vm8, %v1881_v38, %v1883_v11 }
  0xf8   : > { %3390 = vrot.lane.b32.xlu1 %v8468_v8, %s8367_s14  ;;  %v1911_v43 = vsel %vm444_vm1, %v1899_v39, 0 }
  0xf9   : > { %3388 = vrot.lane.b32.xlu0 %v8461_v5, %s8367_s14 }
  0xfa   : > { %v1887_v40 = vpop.permute.xlu1 %1886  ;;  %v1885_v41 = vpop.permute.xlu0 %1884  ;;  %7571 = vmatmul.mubr.msk.bf16.vlgmr.msra.gmra.mrb[4].mxu1 %vm440_vm2, %v8306_v24 }
  0xfb   : > { %v1900_v42 = vsel %vm1898_vm8, %v1883_v11, %v1885_v41  ;;  %2009 = vmatprep.mubr.bf16.mxu1 %v8355_v10  ;;  %v1901_v45 = vsel %vm1898_vm8, %v1885_v41, %v1887_v40 }
  0xfc   : > { %3394 = vrot.lane.b32.xlu1 %v8478_v12, %s8367_s14  ;;  %7575 = vmatprep.subr.msk.bf16.mxu0 %vm444_vm1, %v1900_v42  ;;  %v1917_v49 = vsel %vm444_vm1, %v1901_v45, 0 }
  0xfd   : > { %3392 = vrot.lane.b32.xlu0 %v8470_v9, %s8367_s14  ;;  %1935 = vmatpush1.bf16.msra.mxu0 %v1911_v43 }
  0xfe   : > { %v1891_v46 = vpop.permute.xlu1 %1890 }
  0xff   : > { %v1889_v47 = vpop.permute.xlu0 %1888 }
 0x100   : > { %3853 = vrot.lane.b32.xlu1 %v8455_v3, %s8368_s17  ;;  %v1902_v48 = vsel %vm1898_vm8, %v1887_v40, %v1889_v47  ;;  %7576 = vmatmul.mubr.msk.bf16.vlgmr.msra.gmra.mrb[0].mxu0 %vm440_vm2, %v8307_v44  ;;  %v1903_v50 = vsel %vm1898_vm8, %v1889_v47, %v1891_v46 }
 0x101   : > { %3396 = vrot.lane.b32.xlu0 %v8482_v13, %s8367_s14  ;;  %7577 = vmatprep.subr.msk.bf16.mxu1 %vm444_vm1, %v1902_v48  ;;  %v1923_v54 = vsel %vm444_vm1, %v1903_v50, 0 }
 0x102   : > { %1978 = vmatpush1.bf16.msra.mxu1 %v1917_v49  ;;  %v1895_v51 = vpop.permute.xlu1 %1894  ;;  %2052 = vmatprep.mubr.bf16.mxu0 %v8355_v10 }
 0x103   : > { %v1893_v52 = vpop.permute.xlu0 %1892 }
 0x104   : > { %3857 = vrot.lane.b32.xlu1 %v8459_v4, %s8368_s17  ;;  %v1904_v53 = vsel %vm1898_vm8, %v1891_v46, %v1893_v52  ;;  %v1905_v55 = vsel %vm1898_vm8, %v1893_v52, %v1895_v51 }
 0x105   : > { %3855 = vrot.lane.b32.xlu0 %v8453_v2, %s8368_s17  ;;  %7579 = vmatprep.subr.msk.bf16.mxu0 %vm444_vm1, %v1904_v53  ;;  %v1929_v59 = vsel %vm444_vm1, %v1905_v55, 0 }
 0x106   : > { %2021 = vmatpush1.bf16.msra.mxu0 %v1923_v54  ;;  %v2131_v56 = vpop.permute.xlu1 %2130  ;;  %7578 = vmatmul.mubr.msk.bf16.vlgmr.msra.gmra.mrb[0].mxu1 %vm440_vm2, %v8307_v44 }
 0x107   : > { %v1897_v57 = vpop.permute.xlu0 %1896  ;;  %2095 = vmatprep.mubr.bf16.mxu1 %v8355_v10 }
 0x108   : > { %v1906_v58 = vsel %vm1898_vm8, %v1895_v51, %v1897_v57  ;;  %3861 = vrot.lane.b32.xlu1 %v8468_v8, %s8368_s17  ;;  %vm5621_vm8 = vcmask 236544  }
 0x109   : > { %3859 = vrot.lane.b32.xlu0 %v8461_v5, %s8368_s17  ;;  %7581 = vmatprep.subr.msk.bf16.mxu1 %vm444_vm1, %v1906_v58 }
 0x10a   : > { %2064 = vmatpush1.bf16.msra.mxu1 %v1929_v59  ;;  %v2135_v60 = vpop.permute.xlu1 %2134  ;;  %7580 = vmatmul.mubr.msk.bf16.vlgmr.msra.gmra.mrb[4].mxu0 %vm440_vm2, %v8307_v44 }
 0x10b   : > { %v2133_v61 = vpop.permute.xlu0 %2132  ;;  %2216 = vmatprep.mubr.bf16.mxu0 %v8355_v10 }
 0x10c   : > { %v2149_v62 = vsel %vm2148_vm9, %v2131_v56, %v2133_v61  ;;  %3865 = vrot.lane.b32.xlu1 %v8478_v12, %s8368_s17  ;;  %v2150_v63 = vsel %vm2148_vm9, %v2133_v61, %v2135_v60  ;;  %v8311_v56 = vld [vmem:[%s9761_s0 + $0x48] sm:$0xff]  }
 0x10d   : > { %3863 = vrot.lane.b32.xlu0 %v8470_v9, %s8368_s17  ;;  %7586 = vmatprep.subr.msk.bf16.mxu0 %vm444_vm1, %v2150_v63  ;;  %v2161_v1 = vsel %vm444_vm1, %v2149_v62, 0 }
 0x10e   : > { %2185 = vmatpush1.bf16.msra.mxu0 %v2161_v1  ;;  %v2139_v6 = vpop.permute.xlu1 %2138  ;;  %7582 = vmatmul.mubr.msk.bf16.vlgmr.msra.gmra.mrb[4].mxu1 %vm440_vm2, %v8307_v44 }
 0x10f   : > { %v2137_v14 = vpop.permute.xlu0 %2136  ;;  %2259 = vmatprep.mubr.bf16.mxu1 %v8355_v10 }
 0x110   : > { %v2151_v15 = vsel %vm2148_vm9, %v2135_v60, %v2137_v14  ;;  %3869 = vrot.lane.b32.xlu1 %v8864_v0, %s8368_s17  ;;  %v2152_v16 = vsel %vm2148_vm9, %v2137_v14, %v2139_v6 }
 0x111   : > { %3867 = vrot.lane.b32.xlu0 %v8482_v13, %s8368_s17  ;;  %7588 = vmatprep.subr.msk.bf16.mxu1 %vm444_vm1, %v2152_v16  ;;  %v2167_v17 = vsel %vm444_vm1, %v2151_v15, 0 }
 0x112   : > { %2228 = vmatpush1.bf16.msra.mxu1 %v2167_v17  ;;  %v2143_v18 = vpop.permute.xlu1 %2142  ;;  %7587 = vmatmul.mubr.msk.bf16.vlgmr.msra.gmra.mrb[0].mxu0 %vm440_vm2, %v8309_v7 }
 0x113   : > { %v2141_v19 = vpop.permute.xlu0 %2140  ;;  %2302 = vmatprep.mubr.bf16.mxu0 %v8355_v10 }
 0x114   : > { %v2153_v20 = vsel %vm2148_vm9, %v2139_v6, %v2141_v19  ;;  %4105 = vrot.lane.b32.xlu1 %v8453_v2, %s8369_s20  ;;  %v2154_v21 = vsel %vm2148_vm9, %v2141_v19, %v2143_v18 }
 0x115   : > { %4103 = vrot.lane.b32.xlu0 %v8455_v3, %s8369_s20  ;;  %7590 = vmatprep.subr.msk.bf16.mxu0 %vm444_vm1, %v2154_v21  ;;  %v2173_v22 = vsel %vm444_vm1, %v2153_v20, 0 }
 0x116   : > { %2271 = vmatpush1.bf16.msra.mxu0 %v2173_v22  ;;  %v2147_v23 = vpop.permute.xlu1 %2146  ;;  %7589 = vmatmul.mubr.msk.bf16.vlgmr.msra.gmra.mrb[0].mxu1 %vm440_vm2, %v8309_v7 }
 0x117   : > { %v2145_v24 = vpop.permute.xlu0 %2144  ;;  %2345 = vmatprep.mubr.bf16.mxu1 %v8355_v10 }
 0x118   : > { %v2155_v25 = vsel %vm2148_vm9, %v2143_v18, %v2145_v24  ;;  %4109 = vrot.lane.b32.xlu1 %v8461_v5, %s8369_s20  ;;  %v2156_v26 = vsel %vm2148_vm9, %v2145_v24, %v2147_v23  ;;  %vm5871_vm9 = vcmask 228352  }
 0x119   : > { %4107 = vrot.lane.b32.xlu0 %v8459_v4, %s8369_s20  ;;  %7592 = vmatprep.subr.msk.bf16.mxu1 %vm444_vm1, %v2156_v26  ;;  %v2179_v27 = vsel %vm444_vm1, %v2155_v25, 0 }
 0x11a   : > { %2314 = vmatpush1.bf16.msra.mxu1 %v2179_v27  ;;  %v2383_v28 = vpop.permute.xlu1 %2382  ;;  %7591 = vmatmul.mubr.msk.bf16.vlgmr.msra.gmra.mrb[4].mxu0 %vm440_vm2, %v8309_v7  ;;  %v8312_v27 = vld [vmem:[%s9761_s0 + $0x50] sm:$0xff]  }
 0x11b   : > { %v2381_v29 = vpop.permute.xlu0 %2380  ;;  %2466 = vmatprep.mubr.bf16.mxu0 %v8355_v10 }
 0x11c   : > { %4113 = vrot.lane.b32.xlu1 %v8470_v9, %s8369_s20  ;;  %v2399_v30 = vsel %vm2398_vm10, %v2381_v29, %v2383_v28 }
 0x11d   : > { %4111 = vrot.lane.b32.xlu0 %v8468_v8, %s8369_s20  ;;  %v2411_v34 = vsel %vm444_vm1, %v2399_v30, 0 }
 0x11e   : > { %v2387_v31 = vpop.permute.xlu1 %2386  ;;  %7593 = vmatmul.mubr.msk.bf16.vlgmr.msra.gmra.mrb[4].mxu1 %vm440_vm2, %v8309_v7 }
 0x11f   : > { %v2385_v32 = vpop.permute.xlu0 %2384  ;;  %2509 = vmatprep.mubr.bf16.mxu1 %v8355_v10 }
 0x120   : > { %4117 = vrot.lane.b32.xlu1 %v8482_v13, %s8369_s20  ;;  %v2400_v33 = vsel %vm2398_vm10, %v2383_v28, %v2385_v32  ;;  %v2401_v35 = vsel %vm2398_vm10, %v2385_v32, %v2387_v31 }
 0x121   : > { %4115 = vrot.lane.b32.xlu0 %v8478_v12, %s8369_s20  ;;  %7597 = vmatprep.subr.msk.bf16.mxu0 %vm444_vm1, %v2400_v33  ;;  %v2417_v39 = vsel %vm444_vm1, %v2401_v35, 0 }
 0x122   : > { %2435 = vmatpush1.bf16.msra.mxu0 %v2411_v34  ;;  %v2391_v36 = vpop.permute.xlu1 %2390 }
 0x123   : > { %v2389_v11 = vpop.permute.xlu0 %2388 }
 0x124   : > { %4353 = vrot.lane.b32.xlu1 %v8455_v3, %s8370_s27  ;;  %v2402_v38 = vsel %vm2398_vm10, %v2387_v31, %v2389_v11  ;;  %v2403_v40 = vsel %vm2398_vm10, %v2389_v11, %v2391_v36 }
 0x125   : > { %4119 = vrot.lane.b32.xlu0 %v8864_v0, %s8369_s20  ;;  %7599 = vmatprep.subr.msk.bf16.mxu1 %vm444_vm1, %v2402_v38  ;;  %v2423_v44 = vsel %vm444_vm1, %v2403_v40, 0  ;;  %s8380_s20 = smov 17  }
 0x126   : > { %2478 = vmatpush1.bf16.msra.mxu1 %v2417_v39  ;;  %v2395_v41 = vpop.permute.xlu1 %2394  ;;  %7598 = vmatmul.mubr.msk.bf16.vlgmr.msra.gmra.mrb[0].mxu0 %vm440_vm2, %v8310_v37 }
 0x127   : > { %v2393_v42 = vpop.permute.xlu0 %2392  ;;  %2552 = vmatprep.mubr.bf16.mxu0 %v8355_v10 }
 0x128   : > { %4357 = vrot.lane.b32.xlu1 %v8459_v4, %s8370_s27  ;;  %v2404_v43 = vsel %vm2398_vm10, %v2391_v36, %v2393_v42  ;;  %v2405_v45 = vsel %vm2398_vm10, %v2393_v42, %v2395_v41 }
 0x129   : > { %4355 = vrot.lane.b32.xlu0 %v8453_v2, %s8370_s27  ;;  %7601 = vmatprep.subr.msk.bf16.mxu0 %vm444_vm1, %v2404_v43  ;;  %v2429_v49 = vsel %vm444_vm1, %v2405_v45, 0 }
 0x12a   : > { %2521 = vmatpush1.bf16.msra.mxu0 %v2423_v44  ;;  %v2631_v46 = vpop.permute.xlu1 %2630  ;;  %7600 = vmatmul.mubr.msk.bf16.vlgmr.msra.gmra.mrb[0].mxu1 %vm440_vm2, %v8310_v37 }
 0x12b   : > { %v2397_v47 = vpop.permute.xlu0 %2396  ;;  %2595 = vmatprep.mubr.bf16.mxu1 %v8355_v10 }
 0x12c   : > { %v2406_v48 = vsel %vm2398_vm10, %v2395_v41, %v2397_v47  ;;  %4361 = vrot.lane.b32.xlu1 %v8468_v8, %s8370_s27  ;;  %vm6121_vm10 = vcmask 220160  }
 0x12d   : > { %4359 = vrot.lane.b32.xlu0 %v8461_v5, %s8370_s27  ;;  %7603 = vmatprep.subr.msk.bf16.mxu1 %vm444_vm1, %v2406_v48 }
 0x12e   : > { %2564 = vmatpush1.bf16.msra.mxu1 %v2429_v49  ;;  %v2635_v50 = vpop.permute.xlu1 %2634  ;;  %7602 = vmatmul.mubr.msk.bf16.vlgmr.msra.gmra.mrb[4].mxu0 %vm440_vm2, %v8310_v37 }
 0x12f   : > { %v2633_v51 = vpop.permute.xlu0 %2632  ;;  %2716 = vmatprep.mubr.bf16.mxu0 %v8355_v10 }
 0x130   : > { %v2649_v52 = vsel %vm2648_vm11, %v2631_v46, %v2633_v51  ;;  %4365 = vrot.lane.b32.xlu1 %v8478_v12, %s8370_s27  ;;  %v2650_v53 = vsel %vm2648_vm11, %v2633_v51, %v2635_v50  ;;  %v8313_v46 = vld [vmem:[%s9761_s0 + $0x58] sm:$0xff]  }
 0x131   : > { %4363 = vrot.lane.b32.xlu0 %v8470_v9, %s8370_s27  ;;  %7608 = vmatprep.subr.msk.bf16.mxu0 %vm444_vm1, %v2650_v53  ;;  %v2661_v54 = vsel %vm444_vm1, %v2649_v52, 0 }
 0x132   : > { %2685 = vmatpush1.bf16.msra.mxu0 %v2661_v54  ;;  %v2639_v55 = vpop.permute.xlu1 %2638  ;;  %7604 = vmatmul.mubr.msk.bf16.vlgmr.msra.gmra.mrb[4].mxu1 %vm440_vm2, %v8310_v37 }
 0x133   : > { %v2637_v57 = vpop.permute.xlu0 %2636  ;;  %2759 = vmatprep.mubr.bf16.mxu1 %v8355_v10 }
 0x134   : > { %v2651_v58 = vsel %vm2648_vm11, %v2635_v50, %v2637_v57  ;;  %4369 = vrot.lane.b32.xlu1 %v8864_v0, %s8370_s27  ;;  %v2652_v59 = vsel %vm2648_vm11, %v2637_v57, %v2639_v55 }
 0x135   : > { %4367 = vrot.lane.b32.xlu0 %v8482_v13, %s8370_s27  ;;  %7610 = vmatprep.subr.msk.bf16.mxu1 %vm444_vm1, %v2652_v59  ;;  %v2667_v60 = vsel %vm444_vm1, %v2651_v58, 0 }
 0x136   : > { %2728 = vmatpush1.bf16.msra.mxu1 %v2667_v60  ;;  %v2643_v61 = vpop.permute.xlu1 %2642  ;;  %7609 = vmatmul.mubr.msk.bf16.vlgmr.msra.gmra.mrb[0].mxu0 %vm440_vm2, %v8311_v56 }
 0x137   : > { %v2641_v62 = vpop.permute.xlu0 %2640  ;;  %2802 = vmatprep.mubr.bf16.mxu0 %v8355_v10 }
 0x138   : > { %v2653_v63 = vsel %vm2648_vm11, %v2639_v55, %v2641_v62  ;;  %4605 = vrot.lane.b32.xlu1 %v8453_v2, %s8371_s9  ;;  %v2654_v1 = vsel %vm2648_vm11, %v2641_v62, %v2643_v61 }
 0x139   : > { %4603 = vrot.lane.b32.xlu0 %v8455_v3, %s8371_s9  ;;  %7612 = vmatprep.subr.msk.bf16.mxu0 %vm444_vm1, %v2654_v1  ;;  %v2673_v6 = vsel %vm444_vm1, %v2653_v63, 0 }
 0x13a   : > { %2771 = vmatpush1.bf16.msra.mxu0 %v2673_v6  ;;  %v2647_v7 = vpop.permute.xlu1 %2646  ;;  %7611 = vmatmul.mubr.msk.bf16.vlgmr.msra.gmra.mrb[0].mxu1 %vm440_vm2, %v8311_v56 }
 0x13b   : > { %v2645_v14 = vpop.permute.xlu0 %2644  ;;  %2845 = vmatprep.mubr.bf16.mxu1 %v8355_v10 }
 0x13c   : > { %v2655_v15 = vsel %vm2648_vm11, %v2643_v61, %v2645_v14  ;;  %4609 = vrot.lane.b32.xlu1 %v8461_v5, %s8371_s9  ;;  %v2656_v16 = vsel %vm2648_vm11, %v2645_v14, %v2647_v7  ;;  %vm6371_vm11 = vcmask 154624  }
 0x13d   : > { %4607 = vrot.lane.b32.xlu0 %v8459_v4, %s8371_s9  ;;  %7614 = vmatprep.subr.msk.bf16.mxu1 %vm444_vm1, %v2656_v16  ;;  %v2679_v17 = vsel %vm444_vm1, %v2655_v15, 0  ;;  %v8314_v15 = vld [vmem:[%s9761_s0 + $0x60] sm:$0xff]  }
 0x13e   : > { %2814 = vmatpush1.bf16.msra.mxu1 %v2679_v17  ;;  %v2883_v18 = vpop.permute.xlu1 %2882  ;;  %7613 = vmatmul.mubr.msk.bf16.vlgmr.msra.gmra.mrb[4].mxu0 %vm440_vm2, %v8311_v56 }
 0x13f   : > { %v2881_v19 = vpop.permute.xlu0 %2880  ;;  %2966 = vmatprep.mubr.bf16.mxu0 %v8355_v10 }
 0x140   : > { %4613 = vrot.lane.b32.xlu1 %v8470_v9, %s8371_s9  ;;  %v2899_v20 = vsel %vm2898_vm12, %v2881_v19, %v2883_v18 }
 0x141   : > { %4611 = vrot.lane.b32.xlu0 %v8468_v8, %s8371_s9  ;;  %v2911_v24 = vsel %vm444_vm1, %v2899_v20, 0 }
 0x142   : > { %v2887_v21 = vpop.permute.xlu1 %2886  ;;  %7615 = vmatmul.mubr.msk.bf16.vlgmr.msra.gmra.mrb[4].mxu1 %vm440_vm2, %v8311_v56 }
 0x143   : > { %v2885_v22 = vpop.permute.xlu0 %2884  ;;  %3009 = vmatprep.mubr.bf16.mxu1 %v8355_v10 }
 0x144   : > { %4617 = vrot.lane.b32.xlu1 %v8482_v13, %s8371_s9  ;;  %v2900_v23 = vsel %vm2898_vm12, %v2883_v18, %v2885_v22  ;;  %v2901_v25 = vsel %vm2898_vm12, %v2885_v22, %v2887_v21 }
 0x145   : > { %4615 = vrot.lane.b32.xlu0 %v8478_v12, %s8371_s9  ;;  %7619 = vmatprep.subr.msk.bf16.mxu0 %vm444_vm1, %v2900_v23  ;;  %v2917_v30 = vsel %vm444_vm1, %v2901_v25, 0 }
 0x146   : > { %2935 = vmatpush1.bf16.msra.mxu0 %v2911_v24  ;;  %v2891_v26 = vpop.permute.xlu1 %2890 }
 0x147   : > { %v2889_v28 = vpop.permute.xlu0 %2888 }
 0x148   : > { %4853 = vrot.lane.b32.xlu1 %v8455_v3, %s8372_s13  ;;  %v2902_v29 = vsel %vm2898_vm12, %v2887_v21, %v2889_v28  ;;  %v2903_v31 = vsel %vm2898_vm12, %v2889_v28, %v2891_v26 }
 0x149   : > { %4619 = vrot.lane.b32.xlu0 %v8864_v0, %s8371_s9  ;;  %7621 = vmatprep.subr.msk.bf16.mxu1 %vm444_vm1, %v2902_v29  ;;  %v2923_v35 = vsel %vm444_vm1, %v2903_v31, 0  ;;  %v3634_v29 = vsel %vm444_vm1, %v8455_v3, 0 }
 0x14a   : > { %2978 = vmatpush1.bf16.msra.mxu1 %v2917_v30  ;;  %v2895_v32 = vpop.permute.xlu1 %2894  ;;  %7620 = vmatmul.mubr.msk.bf16.vlgmr.msra.gmra.mrb[0].mxu0 %vm440_vm2, %v8312_v27 }
 0x14b   : > { %v2893_v33 = vpop.permute.xlu0 %2892  ;;  %3052 = vmatprep.mubr.bf16.mxu0 %v8355_v10 }
 0x14c   : > { %4857 = vrot.lane.b32.xlu1 %v8459_v4, %s8372_s13  ;;  %v2904_v34 = vsel %vm2898_vm12, %v2891_v26, %v2893_v33  ;;  %v2905_v36 = vsel %vm2898_vm12, %v2893_v33, %v2895_v32 }
 0x14d   : > { %4855 = vrot.lane.b32.xlu0 %v8453_v2, %s8372_s13  ;;  %7623 = vmatprep.subr.msk.bf16.mxu0 %vm444_vm1, %v2904_v34  ;;  %v2929_v39 = vsel %vm444_vm1, %v2905_v36, 0  ;;  %v3640_v34 = vsel %vm444_vm1, %v8459_v4, 0 }
 0x14e   : > { %3021 = vmatpush1.bf16.msra.mxu0 %v2923_v35  ;;  %v3131_v37 = vpop.permute.xlu1 %3130  ;;  %7622 = vmatmul.mubr.msk.bf16.vlgmr.msra.gmra.mrb[0].mxu1 %vm440_vm2, %v8312_v27  ;;  %v8315_v35 = vld [vmem:[%s9761_s0 + $0x68] sm:$0xff]  }
 0x14f   : > { %v2897_v11 = vpop.permute.xlu0 %2896  ;;  %3095 = vmatprep.mubr.bf16.mxu1 %v8355_v10 }
 0x150   : > { %v2906_v38 = vsel %vm2898_vm12, %v2895_v32, %v2897_v11  ;;  %4861 = vrot.lane.b32.xlu1 %v8468_v8, %s8372_s13  ;;  %v3646_v11 = vsel %vm444_vm1, %v8468_v8, 0  ;;  %vm6621_vm12 = vcmask 146432  }
 0x151   : > { %4859 = vrot.lane.b32.xlu0 %v8461_v5, %s8372_s13  ;;  %7625 = vmatprep.subr.msk.bf16.mxu1 %vm444_vm1, %v2906_v38 }
 0x152   : > { %3064 = vmatpush1.bf16.msra.mxu1 %v2929_v39  ;;  %v3135_v40 = vpop.permute.xlu1 %3134  ;;  %7624 = vmatmul.mubr.msk.bf16.vlgmr.msra.gmra.mrb[4].mxu0 %vm440_vm2, %v8312_v27 }
 0x153   : > { %v3133_v41 = vpop.permute.xlu0 %3132  ;;  %3216 = vmatprep.mubr.bf16.mxu0 %v8355_v10 }
 0x154   : > { %v3149_v42 = vsel %vm3148_vm13, %v3131_v37, %v3133_v41  ;;  %4865 = vrot.lane.b32.xlu1 %v8478_v12, %s8372_s13  ;;  %v3150_v43 = vsel %vm3148_vm13, %v3133_v41, %v3135_v40  ;;  %v3652_v41 = vsel %vm444_vm1, %v8478_v12, 0 }
 0x155   : > { %4863 = vrot.lane.b32.xlu0 %v8470_v9, %s8372_s13  ;;  %7630 = vmatprep.subr.msk.bf16.mxu0 %vm444_vm1, %v3150_v43  ;;  %v3161_v44 = vsel %vm444_vm1, %v3149_v42, 0 }
 0x156   : > { %3185 = vmatpush1.bf16.msra.mxu0 %v3161_v44  ;;  %v3139_v45 = vpop.permute.xlu1 %3138  ;;  %7626 = vmatmul.mubr.msk.bf16.vlgmr.msra.gmra.mrb[4].mxu1 %vm440_vm2, %v8312_v27 }
 0x157   : > { %v3137_v47 = vpop.permute.xlu0 %3136  ;;  %3259 = vmatprep.mubr.bf16.mxu1 %v8355_v10 }
 0x158   : > { %v3151_v48 = vsel %vm3148_vm13, %v3135_v40, %v3137_v47  ;;  %4869 = vrot.lane.b32.xlu1 %v8864_v0, %s8372_s13  ;;  %v3152_v49 = vsel %vm3148_vm13, %v3137_v47, %v3139_v45 }
 0x159   : > { %4867 = vrot.lane.b32.xlu0 %v8482_v13, %s8372_s13  ;;  %7632 = vmatprep.subr.msk.bf16.mxu1 %vm444_vm1, %v3152_v49  ;;  %v3167_v50 = vsel %vm444_vm1, %v3151_v48, 0  ;;  %s7824_s13 = sshll.u32 (%p8441_p4), %s8429_s24, 5 }
 0x15a   : > { %3228 = vmatpush1.bf16.msra.mxu1 %v3167_v50  ;;  %v3143_v51 = vpop.permute.xlu1 %3142  ;;  %7631 = vmatmul.mubr.msk.bf16.vlgmr.msra.gmra.mrb[0].mxu0 %vm440_vm2, %v8313_v46 }
 0x15b   : > { %v3141_v52 = vpop.permute.xlu0 %3140  ;;  %3302 = vmatprep.mubr.bf16.mxu0 %v8355_v10 }
 0x15c   : > { %v3153_v53 = vsel %vm3148_vm13, %v3139_v45, %v3141_v52  ;;  %5105 = vrot.lane.b32.xlu1 %v8453_v2, %s8373_s16  ;;  %v3154_v54 = vsel %vm3148_vm13, %v3141_v52, %v3143_v51 }
 0x15d   : > { %5103 = vrot.lane.b32.xlu0 %v8455_v3, %s8373_s16  ;;  %7634 = vmatprep.subr.msk.bf16.mxu0 %vm444_vm1, %v3154_v54  ;;  %v3173_v55 = vsel %vm444_vm1, %v3153_v53, 0 }
 0x15e   : > { %3271 = vmatpush1.bf16.msra.mxu0 %v3173_v55  ;;  %v3147_v56 = vpop.permute.xlu1 %3146  ;;  %7633 = vmatmul.mubr.msk.bf16.vlgmr.msra.gmra.mrb[0].mxu1 %vm440_vm2, %v8313_v46 }
 0x15f   : > { %v3145_v57 = vpop.permute.xlu0 %3144  ;;  %3345 = vmatprep.mubr.bf16.mxu1 %v8355_v10 }
 0x160   : > { %v3155_v58 = vsel %vm3148_vm13, %v3143_v51, %v3145_v57  ;;  %5109 = vrot.lane.b32.xlu1 %v8461_v5, %s8373_s16  ;;  %v3156_v59 = vsel %vm3148_vm13, %v3145_v57, %v3147_v56  ;;  %v8316_v51 = vld [vmem:[%s9761_s0 + $0x70] sm:$0xff]   ;;  %vm6871_vm13 = vcmask 138240  }
 0x161   : > { %5107 = vrot.lane.b32.xlu0 %v8459_v4, %s8373_s16  ;;  %7636 = vmatprep.subr.msk.bf16.mxu1 %vm444_vm1, %v3156_v59  ;;  %v3179_v60 = vsel %vm444_vm1, %v3155_v58, 0 }
 0x162   : > { %3314 = vmatpush1.bf16.msra.mxu1 %v3179_v60  ;;  %v3383_v61 = vpop.permute.xlu1 %3382  ;;  %7635 = vmatmul.mubr.msk.bf16.vlgmr.msra.gmra.mrb[4].mxu0 %vm440_vm2, %v8313_v46 }
 0x163   : > { %v3381_v62 = vpop.permute.xlu0 %3380  ;;  %3466 = vmatprep.mubr.bf16.mxu0 %v8355_v10 }
 0x164   : > { %5113 = vrot.lane.b32.xlu1 %v8470_v9, %s8373_s16  ;;  %v3399_v63 = vsel %vm3398_vm14, %v3381_v62, %v3383_v61 }
 0x165   : > { %5111 = vrot.lane.b32.xlu0 %v8468_v8, %s8373_s16  ;;  %v3411_v14 = vsel %vm444_vm1, %v3399_v63, 0 }
 0x166   : > { %v3387_v1 = vpop.permute.xlu1 %3386  ;;  %7637 = vmatmul.mubr.msk.bf16.vlgmr.msra.gmra.mrb[4].mxu1 %vm440_vm2, %v8313_v46 }
 0x167   : > { %v3385_v6 = vpop.permute.xlu0 %3384  ;;  %3509 = vmatprep.mubr.bf16.mxu1 %v8355_v10 }
 0x168   : > { %5117 = vrot.lane.b32.xlu1 %v8482_v13, %s8373_s16  ;;  %v3400_v7 = vsel %vm3398_vm14, %v3383_v61, %v3385_v6  ;;  %v3401_v17 = vsel %vm3398_vm14, %v3385_v6, %v3387_v1 }
 0x169   : > { %5115 = vrot.lane.b32.xlu0 %v8478_v12, %s8373_s16  ;;  %7641 = vmatprep.subr.msk.bf16.mxu0 %vm444_vm1, %v3400_v7  ;;  %v3417_v21 = vsel %vm444_vm1, %v3401_v17, 0 }
 0x16a   : > { %3435 = vmatpush1.bf16.msra.mxu0 %v3411_v14  ;;  %v3391_v16 = vpop.permute.xlu1 %3390 }
 0x16b   : > { %v3389_v18 = vpop.permute.xlu0 %3388 }
 0x16c   : > { %5353 = vrot.lane.b32.xlu1 %v8455_v3, %s8374_s19  ;;  %v3402_v19 = vsel %vm3398_vm14, %v3387_v1, %v3389_v18  ;;  %v3403_v20 = vsel %vm3398_vm14, %v3389_v18, %v3391_v16 }
 0x16d   : > { %5119 = vrot.lane.b32.xlu0 %v8864_v0, %s8373_s16  ;;  %7642 = vmatmul.mubr.msk.bf16.vlgmr.msra.gmra.mrb[0].mxu0 %vm440_vm2, %v8314_v15  ;;  %v3423_v25 = vsel %vm444_vm1, %v3403_v20, 0  ;;  %v8317_v20 = vld [vmem:[%s9761_s0 + $0x78] sm:$0xff]   ;;  %s7336_s16 = scalar_lea.vmem (%p8441_p4), %s9766_s5, %s7824_s13 }
 0x16e   : > { %7643 = vmatprep.subr.msk.bf16.mxu1 %vm444_vm1, %v3402_v19  ;;  %v3395_v22 = vpop.permute.xlu1 %3394  ;;  %3552 = vmatprep.mubr.bf16.mxu0 %v8355_v10 }
 0x16f   : > { %3478 = vmatpush1.bf16.msra.mxu1 %v3417_v21  ;;  %v3393_v23 = vpop.permute.xlu0 %3392 }
 0x170   : > { %5357 = vrot.lane.b32.xlu1 %v8459_v4, %s8374_s19  ;;  %v3404_v24 = vsel %vm3398_vm14, %v3391_v16, %v3393_v23  ;;  %v3405_v27 = vsel %vm3398_vm14, %v3393_v23, %v3395_v22 }
 0x171   : > { %5355 = vrot.lane.b32.xlu0 %v8453_v2, %s8374_s19  ;;  %7645 = vmatprep.subr.msk.bf16.mxu0 %vm444_vm1, %v3404_v24  ;;  %v3429_v31 = vsel %vm444_vm1, %v3405_v27, 0 }
 0x172   : > { %7644 = vmatmul.mubr.msk.bf16.vlgmr.msra.gmra.mrb[0].mxu1 %vm440_vm2, %v8314_v15  ;;  %3521 = vmatpush1.bf16.msra.mxu0 %v3423_v25  ;;  %v3854_v26 = vpop.permute.xlu1 %3853 }
 0x173   : > { %v3397_v28 = vpop.permute.xlu0 %3396  ;;  %3595 = vmatprep.mubr.bf16.mxu1 %v8355_v10  ;;  %7652 = vmatprep.subr.msk.bf16.mxu0 %vm444_vm1, %v8453_v2 }
 0x174   : > { %v3406_v30 = vsel %vm3398_vm14, %v3395_v22, %v3397_v28  ;;  %5361 = vrot.lane.b32.xlu1 %v8468_v8, %s8374_s19 }
 0x175   : > { %5359 = vrot.lane.b32.xlu0 %v8461_v5, %s8374_s19  ;;  %7646 = vmatmul.mubr.msk.bf16.vlgmr.msra.gmra.mrb[4].mxu0 %vm440_vm2, %v8314_v15 }
 0x176   : > { %7647 = vmatprep.subr.msk.bf16.mxu1 %vm444_vm1, %v3406_v30  ;;  %v3858_v32 = vpop.permute.xlu1 %3857  ;;  %3658 = vmatpush1.bf16.msra.mxu0 %v3634_v29 }
 0x177   : > { %3564 = vmatpush1.bf16.msra.mxu1 %v3429_v31  ;;  %v3856_v33 = vpop.permute.xlu0 %3855  ;;  %3689 = vmatprep.mubr.bf16.mxu0 %v8355_v10 }
 0x178   : > { %5365 = vrot.lane.b32.xlu1 %v8478_v12, %s8374_s19  ;;  %7654 = vmatprep.subr.msk.bf16.mxu1 %vm444_vm1, %v8461_v5  ;;  %v3873_v38 = vsel %vm3871_vm15, %v3856_v33, %v3858_v32  ;;  %v3872_v42 = vsel %vm3871_vm15, %v3854_v26, %v3856_v33 }
 0x179   : > { %5363 = vrot.lane.b32.xlu0 %v8470_v9, %s8374_s19  ;;  %7656 = vmatprep.subr.msk.bf16.mxu0 %vm444_vm1, %v8470_v9  ;;  %v3884_v46 = vsel %vm444_vm1, %v3872_v42, 0 }
 0x17a   : > { %7648 = vmatmul.mubr.msk.bf16.vlgmr.msra.gmra.mrb[4].mxu1 %vm440_vm2, %v8314_v15  ;;  %v3862_v36 = vpop.permute.xlu1 %3861 }
 0x17b   : > { %v3860_v37 = vpop.permute.xlu0 %3859  ;;  %3701 = vmatpush1.bf16.msra.mxu1 %v3640_v34  ;;  %3732 = vmatprep.mubr.bf16.mxu1 %v8355_v10 }
 0x17c   : > { %5369 = vrot.lane.b32.xlu1 %v8864_v0, %s8374_s19  ;;  %7658 = vmatprep.subr.msk.bf16.mxu1 %vm444_vm1, %v8482_v13  ;;  %v3875_v44 = vsel %vm3871_vm15, %v3860_v37, %v3862_v36  ;;  %v3874_v49 = vsel %vm3871_vm15, %v3858_v32, %v3860_v37 }
 0x17d   : > { %5367 = vrot.lane.b32.xlu0 %v8482_v13, %s8374_s19  ;;  %7653 = vmatmul.mubr.msk.bf16.vlgmr.msra.gmra.mrb[0].mxu0 %vm440_vm2, %v8315_v35  ;;  %v3890_v53 = vsel %vm444_vm1, %v3874_v49, 0 }
 0x17e   : > { %3744 = vmatpush1.bf16.msra.mxu0 %v3646_v11  ;;  %v3866_v39 = vpop.permute.xlu1 %3865  ;;  %3775 = vmatprep.mubr.bf16.mxu0 %v8355_v10 }
 0x17f   : > { %7663 = vmatprep.subr.msk.bf16.mxu0 %vm444_vm1, %v3873_v38  ;;  %v3864_v40 = vpop.permute.xlu0 %3863 }
 0x180   : > { %5605 = vrot.lane.b32.xlu1 %v8453_v2, %s8375_s26  ;;  %v3877_v47 = vsel %vm3871_vm15, %v3864_v40, %v3866_v39  ;;  %v3876_v52 = vsel %vm3871_vm15, %v3862_v36, %v3864_v40  ;;  %v8318_v40 = vld [vmem:[%s9761_s0 + $0x80] sm:$0xff]  }
 0x181   : > { %5603 = vrot.lane.b32.xlu0 %v8455_v3, %s8375_s26  ;;  %v3896_v58 = vsel %vm444_vm1, %v3876_v52, 0 }
 0x182   : > { %7655 = vmatmul.mubr.msk.bf16.vlgmr.msra.gmra.mrb[0].mxu1 %vm440_vm2, %v8315_v35  ;;  %v3870_v43 = vpop.permute.xlu1 %3869 }
 0x183   : > { %3787 = vmatpush1.bf16.msra.mxu1 %v3652_v41  ;;  %v3868_v45 = vpop.permute.xlu0 %3867  ;;  %3818 = vmatprep.mubr.bf16.mxu1 %v8355_v10 }
 0x184   : > { %7665 = vmatprep.subr.msk.bf16.mxu1 %vm444_vm1, %v3875_v44  ;;  %5609 = vrot.lane.b32.xlu1 %v8461_v5, %s8375_s26  ;;  %v3879_v55 = vsel %vm3871_vm15, %v3868_v45, %v3870_v43  ;;  %v3878_v60 = vsel %vm3871_vm15, %v3866_v39, %v3868_v45 }
 0x185   : > { %5607 = vrot.lane.b32.xlu0 %v8459_v4, %s8375_s26  ;;  %7657 = vmatmul.mubr.msk.bf16.vlgmr.msra.gmra.mrb[4].mxu0 %vm440_vm2, %v8315_v35  ;;  %v3902_v1 = vsel %vm444_vm1, %v3878_v60, 0 }
 0x186   : > { %3908 = vmatpush1.bf16.msra.mxu0 %v3884_v46  ;;  %v4106_v48 = vpop.permute.xlu1 %4105  ;;  %3939 = vmatprep.mubr.bf16.mxu0 %v8355_v10 }
 0x187   : > { %7667 = vmatprep.subr.msk.bf16.mxu0 %vm444_vm1, %v3877_v47  ;;  %v4104_v50 = vpop.permute.xlu0 %4103 }
 0x188   : > { %5613 = vrot.lane.b32.xlu1 %v8470_v9, %s8375_s26  ;;  %v4122_v63 = vsel %vm4121_vm0, %v4104_v50, %v4106_v48 }
 0x189   : > { %5611 = vrot.lane.b32.xlu0 %v8468_v8, %s8375_s26  ;;  %v4134_v15 = vsel %vm444_vm1, %v4122_v63, 0 }
 0x18a   : > { %7659 = vmatmul.mubr.msk.bf16.vlgmr.msra.gmra.mrb[4].mxu1 %vm440_vm2, %v8315_v35  ;;  %v4110_v54 = vpop.permute.xlu1 %4109 }
 0x18b   : > { %3951 = vmatpush1.bf16.msra.mxu1 %v3890_v53  ;;  %v4108_v56 = vpop.permute.xlu0 %4107  ;;  %3982 = vmatprep.mubr.bf16.mxu1 %v8355_v10 }
 0x18c   : > { %7669 = vmatprep.subr.msk.bf16.mxu1 %vm444_vm1, %v3879_v55  ;;  %5617 = vrot.lane.b32.xlu1 %v8482_v13, %s8375_s26  ;;  %v4123_v57 = vsel %vm4121_vm0, %v4106_v48, %v4108_v56  ;;  %v4124_v17 = vsel %vm4121_vm0, %v4108_v56, %v4110_v54 }
 0x18d   : > { %5615 = vrot.lane.b32.xlu0 %v8478_v12, %s8375_s26  ;;  %7664 = vmatmul.mubr.msk.bf16.vlgmr.msra.gmra.mrb[0].mxu0 %vm440_vm2, %v8316_v51  ;;  %v4140_v22 = vsel %vm444_vm1, %v4124_v17, 0 }
 0x18e   : > { %3994 = vmatpush1.bf16.msra.mxu0 %v3896_v58  ;;  %v4114_v59 = vpop.permute.xlu1 %4113  ;;  %4025 = vmatprep.mubr.bf16.mxu0 %v8355_v10 }
 0x18f   : > { %7674 = vmatprep.subr.msk.bf16.mxu0 %vm444_vm1, %v4123_v57  ;;  %v4112_v61 = vpop.permute.xlu0 %4111 }
 0x190   : > { %5853 = vrot.lane.b32.xlu1 %v8455_v3, %s8376_s8  ;;  %v4125_v62 = vsel %vm4121_vm0, %v4110_v54, %v4112_v61  ;;  %v4126_v21 = vsel %vm4121_vm0, %v4112_v61, %v4114_v59 }
 0x191   : > { %5619 = vrot.lane.b32.xlu0 %v8864_v0, %s8375_s26  ;;  %v4146_v26 = vsel %vm444_vm1, %v4126_v21, 0  ;;  %s359_s26 = scalar_lea.vmem %s9765_s4, %s9789_s30  ;;  %s316_s30 = sand.u32 1, %s8344_s21  }
 0x192   : > { %7666 = vmatmul.mubr.msk.bf16.vlgmr.msra.gmra.mrb[0].mxu1 %vm440_vm2, %v8316_v51  ;;  %v4118_v6 = vpop.permute.xlu1 %4117  ;;  %s7487_s27 = sshll.u32 %s316_s30, 6 }
 0x193   : > { %4037 = vmatpush1.bf16.msra.mxu1 %v3902_v1  ;;  %v4116_v7 = vpop.permute.xlu0 %4115  ;;  %4068 = vmatprep.mubr.bf16.mxu1 %v8355_v10  ;;  %s9686_s21 = scalar_lea.vmem [#allocation2], %s7487_s27 }
 0x194   : > { %7676 = vmatprep.subr.msk.bf16.mxu1 %vm444_vm1, %v4125_v62  ;;  %5857 = vrot.lane.b32.xlu1 %v8459_v4, %s8376_s8  ;;  %v4127_v14 = vsel %vm4121_vm0, %v4114_v59, %v4116_v7  ;;  %v4128_v28 = vsel %vm4121_vm0, %v4116_v7, %v4118_v6 }
 0x195   : > { %5855 = vrot.lane.b32.xlu0 %v8453_v2, %s8376_s8  ;;  %7668 = vmatmul.mubr.msk.bf16.vlgmr.msra.gmra.mrb[4].mxu0 %vm440_vm2, %v8316_v51  ;;  %v4152_v32 = vsel %vm444_vm1, %v4128_v28, 0  ;;  %v8320_v28 = vld [vmem:[%s9761_s0 + $0x90] sm:$0xff]  }
 0x196   : > { %4158 = vmatpush1.bf16.msra.mxu0 %v4134_v15  ;;  %v4354_v16 = vpop.permute.xlu1 %4353  ;;  %4189 = vmatprep.mubr.bf16.mxu0 %v8355_v10 }
 0x197   : > { %7678 = vmatprep.subr.msk.bf16.mxu0 %vm444_vm1, %v4127_v14  ;;  %v4120_v18 = vpop.permute.xlu0 %4119 }
 0x198   : > { %5861 = vrot.lane.b32.xlu1 %v8468_v8, %s8376_s8  ;;  %v4129_v19 = vsel %vm4121_vm0, %v4118_v6, %v4120_v18 }
 0x199   : > { %5859 = vrot.lane.b32.xlu0 %v8461_v5, %s8376_s8 }
 0x19a   : > { %7670 = vmatmul.mubr.msk.bf16.vlgmr.msra.gmra.mrb[4].mxu1 %vm440_vm2, %v8316_v51  ;;  %v4358_v23 = vpop.permute.xlu1 %4357 }
 0x19b   : > { %4201 = vmatpush1.bf16.msra.mxu1 %v4140_v22  ;;  %v4356_v24 = vpop.permute.xlu0 %4355  ;;  %4232 = vmatprep.mubr.bf16.mxu1 %v8355_v10  ;;  %v9346_v22 = vld [vmem:[%s8550_s12] ss:$0 sps:$4 sm:$0xff]   ;;  %s8379_s12 = smov 18  }
 0x19c   : > { %7680 = vmatprep.subr.msk.bf16.mxu1 %vm444_vm1, %v4129_v19  ;;  %5865 = vrot.lane.b32.xlu1 %v8478_v12, %s8376_s8  ;;  %v4373_v25 = vsel %vm4371_vm3, %v4356_v24, %v4358_v23  ;;  %v4372_v31 = vsel %vm4371_vm3, %v4354_v16, %v4356_v24 }
 0x19d   : > { %5863 = vrot.lane.b32.xlu0 %v8470_v9, %s8376_s8  ;;  %7675 = vmatmul.mubr.msk.bf16.vlgmr.msra.gmra.mrb[0].mxu0 %vm440_vm2, %v8317_v20  ;;  %v4384_v36 = vsel %vm444_vm1, %v4372_v31, 0 }
 0x19e   : > { %4244 = vmatpush1.bf16.msra.mxu0 %v4146_v26  ;;  %v4362_v27 = vpop.permute.xlu1 %4361  ;;  %4275 = vmatprep.mubr.bf16.mxu0 %v8355_v10 }
 0x19f   : > { %7685 = vmatprep.subr.msk.bf16.mxu0 %vm444_vm1, %v4373_v25  ;;  %v4360_v29 = vpop.permute.xlu0 %4359 }
 0x1a0   : > { %5869 = vrot.lane.b32.xlu1 %v8864_v0, %s8376_s8  ;;  %v4375_v30 = vsel %vm4371_vm3, %v4360_v29, %v4362_v27  ;;  %v4374_v11 = vsel %vm4371_vm3, %v4358_v23, %v4360_v29 }
 0x1a1   : > { %5867 = vrot.lane.b32.xlu0 %v8482_v13, %s8376_s8  ;;  %v4390_v42 = vsel %vm444_vm1, %v4374_v11, 0  ;;  %s7497_s8 = sshll.u32 %s9799_s7, 3 }
 0x1a2   : > { %7677 = vmatmul.mubr.msk.bf16.vlgmr.msra.gmra.mrb[0].mxu1 %vm440_vm2, %v8317_v20  ;;  %v4366_v33 = vpop.permute.xlu1 %4365 }
 0x1a3   : > { %4287 = vmatpush1.bf16.msra.mxu1 %v4152_v32  ;;  %v4364_v34 = vpop.permute.xlu0 %4363  ;;  %4318 = vmatprep.mubr.bf16.mxu1 %v8355_v10 }
 0x1a4   : > { %7687 = vmatprep.subr.msk.bf16.mxu1 %vm444_vm1, %v4375_v30  ;;  %6105 = vrot.lane.b32.xlu1 %v8453_v2, %s8377_s11  ;;  %v4377_v35 = vsel %vm4371_vm3, %v4364_v34, %v4366_v33  ;;  %v4376_v41 = vsel %vm4371_vm3, %v4362_v27, %v4364_v34 }
 0x1a5   : > { %6103 = vrot.lane.b32.xlu0 %v8455_v3, %s8377_s11  ;;  %7679 = vmatmul.mubr.msk.bf16.vlgmr.msra.gmra.mrb[4].mxu0 %vm440_vm2, %v8317_v20  ;;  %v4396_v45 = vsel %vm444_vm1, %v4376_v41, 0 }
 0x1a6   : > { %4408 = vmatpush1.bf16.msra.mxu0 %v4384_v36  ;;  %v4370_v37 = vpop.permute.xlu1 %4369  ;;  %4439 = vmatprep.mubr.bf16.mxu0 %v8355_v10 }
 0x1a7   : > { %7689 = vmatprep.subr.msk.bf16.mxu0 %vm444_vm1, %v4377_v35  ;;  %v4368_v38 = vpop.permute.xlu0 %4367 }
 0x1a8   : > { %6109 = vrot.lane.b32.xlu1 %v8461_v5, %s8377_s11  ;;  %v4379_v39 = vsel %vm4371_vm3, %v4368_v38, %v4370_v37  ;;  %v4378_v47 = vsel %vm4371_vm3, %v4366_v33, %v4368_v38 }
 0x1a9   : > { %6107 = vrot.lane.b32.xlu0 %v8459_v4, %s8377_s11  ;;  %v4402_v50 = vsel %vm444_vm1, %v4378_v47, 0 }
 0x1aa   : > { %7681 = vmatmul.mubr.msk.bf16.vlgmr.msra.gmra.mrb[4].mxu1 %vm440_vm2, %v8317_v20  ;;  %v4606_v43 = vpop.permute.xlu1 %4605 }
 0x1ab   : > { %4451 = vmatpush1.bf16.msra.mxu1 %v4390_v42  ;;  %v4604_v44 = vpop.permute.xlu0 %4603  ;;  %4482 = vmatprep.mubr.bf16.mxu1 %v8355_v10 }
 0x1ac   : > { %7691 = vmatprep.subr.msk.bf16.mxu1 %vm444_vm1, %v4379_v39  ;;  %6113 = vrot.lane.b32.xlu1 %v8470_v9, %s8377_s11  ;;  %v4622_v51 = vsel %vm4621_vm4, %v4604_v44, %v4606_v43 }
 0x1ad   : > { %6111 = vrot.lane.b32.xlu0 %v8468_v8, %s8377_s11  ;;  %7686 = vmatmul.mubr.msk.bf16.vlgmr.msra.gmra.mrb[0].mxu0 %vm440_vm2, %v8318_v40  ;;  %v4634_v55 = vsel %vm444_vm1, %v4622_v51, 0 }
 0x1ae   : > { %4494 = vmatpush1.bf16.msra.mxu0 %v4396_v45  ;;  %v4610_v46 = vpop.permute.xlu1 %4609  ;;  %4525 = vmatprep.mubr.bf16.mxu0 %v8355_v10 }
 0x1af   : > { %v4608_v48 = vpop.permute.xlu0 %4607 }
 0x1b0   : > { %v4623_v49 = vsel %vm4621_vm4, %v4606_v43, %v4608_v48  ;;  %6117 = vrot.lane.b32.xlu1 %v8482_v13, %s8377_s11  ;;  %v4624_v57 = vsel %vm4621_vm4, %v4608_v48, %v4610_v46 }
 0x1b1   : > { %6115 = vrot.lane.b32.xlu0 %v8478_v12, %s8377_s11  ;;  %7696 = vmatprep.subr.msk.bf16.mxu0 %vm444_vm1, %v4623_v49  ;;  %v4640_v60 = vsel %vm444_vm1, %v4624_v57, 0  ;;  %v8321_v49 = vld [vmem:[%s9761_s0 + $0x98] sm:$0xff]  }
 0x1b2   : > { %7688 = vmatmul.mubr.msk.bf16.vlgmr.msra.gmra.mrb[0].mxu1 %vm440_vm2, %v8318_v40  ;;  %v4614_v52 = vpop.permute.xlu1 %4613 }
 0x1b3   : > { %4537 = vmatpush1.bf16.msra.mxu1 %v4402_v50  ;;  %v4612_v53 = vpop.permute.xlu0 %4611  ;;  %4568 = vmatprep.mubr.bf16.mxu1 %v8355_v10 }
 0x1b4   : > { %v4625_v54 = vsel %vm4621_vm4, %v4610_v46, %v4612_v53  ;;  %6353 = vrot.lane.b32.xlu1 %v8455_v3, %s8378_s15  ;;  %v4626_v61 = vsel %vm4621_vm4, %v4612_v53, %v4614_v52 }
 0x1b5   : > { %6119 = vrot.lane.b32.xlu0 %v8864_v0, %s8377_s11  ;;  %7690 = vmatmul.mubr.msk.bf16.vlgmr.msra.gmra.mrb[4].mxu0 %vm440_vm2, %v8318_v40  ;;  %v8319_v0 = vld [vmem:[%s9761_s0 + $0x88] sm:$0xff]   ;;  %v4646_v6 = vsel %vm444_vm1, %v4626_v61, 0  ;;  %s366_s11 = scalar_lea.vmem %s9767_s6, %s7497_s8 }
 0x1b6   : > { %4658 = vmatpush1.bf16.msra.mxu0 %v4634_v55  ;;  %7698 = vmatprep.subr.msk.bf16.mxu1 %vm444_vm1, %v4625_v54  ;;  %v4618_v56 = vpop.permute.xlu1 %4617 }
 0x1b7   : > { %v4616_v58 = vpop.permute.xlu0 %4615  ;;  %4689 = vmatprep.mubr.bf16.mxu0 %v8355_v10 }
 0x1b8   : > { %v4627_v59 = vsel %vm4621_vm4, %v4614_v52, %v4616_v58  ;;  %6357 = vrot.lane.b32.xlu1 %v8459_v4, %s8378_s15  ;;  %v4628_v14 = vsel %vm4621_vm4, %v4616_v58, %v4618_v56 }
 0x1b9   : > { %6355 = vrot.lane.b32.xlu0 %v8453_v2, %s8378_s15  ;;  %7700 = vmatprep.subr.msk.bf16.mxu0 %vm444_vm1, %v4627_v59  ;;  %v4652_v17 = vsel %vm444_vm1, %v4628_v14, 0 }
 0x1ba   : > { %7692 = vmatmul.mubr.msk.bf16.vlgmr.msra.gmra.mrb[4].mxu1 %vm440_vm2, %v8318_v40  ;;  %v4854_v62 = vpop.permute.xlu1 %4853 }
 0x1bb   : > { %4701 = vmatpush1.bf16.msra.mxu1 %v4640_v60  ;;  %v4620_v63 = vpop.permute.xlu0 %4619  ;;  %4732 = vmatprep.mubr.bf16.mxu1 %v8355_v10 }
 0x1bc   : > { %v4629_v1 = vsel %vm4621_vm4, %v4618_v56, %v4620_v63  ;;  %6361 = vrot.lane.b32.xlu1 %v8468_v8, %s8378_s15 }
 0x1bd   : > { %6359 = vrot.lane.b32.xlu0 %v8461_v5, %s8378_s15  ;;  %7697 = vmatmul.mubr.msk.bf16.vlgmr.msra.gmra.mrb[0].mxu0 %vm440_vm2, %v8319_v0 }
 0x1be   : > { %4744 = vmatpush1.bf16.msra.mxu0 %v4646_v6  ;;  %7702 = vmatprep.subr.msk.bf16.mxu1 %vm444_vm1, %v4629_v1  ;;  %v4858_v7 = vpop.permute.xlu1 %4857 }
 0x1bf   : > { %v4856_v15 = vpop.permute.xlu0 %4855  ;;  %4775 = vmatprep.mubr.bf16.mxu0 %v8355_v10 }
 0x1c0   : > { %v4873_v16 = vsel %vm4871_vm5, %v4856_v15, %v4858_v7  ;;  %6365 = vrot.lane.b32.xlu1 %v8478_v12, %s8378_s15  ;;  %v4872_v18 = vsel %vm4871_vm5, %v4854_v62, %v4856_v15  ;;  %v8322_v62 = vld [vmem:[%s9761_s0 + $0xa0] sm:$0xff]  }
 0x1c1   : > { %6363 = vrot.lane.b32.xlu0 %v8470_v9, %s8378_s15  ;;  %7707 = vmatprep.subr.msk.bf16.mxu0 %vm444_vm1, %v4873_v16  ;;  %v4884_v23 = vsel %vm444_vm1, %v4872_v18, 0 }
 0x1c2   : > { %7699 = vmatmul.mubr.msk.bf16.vlgmr.msra.gmra.mrb[0].mxu1 %vm440_vm2, %v8319_v0  ;;  %v4862_v19 = vpop.permute.xlu1 %4861 }
 0x1c3   : > { %4787 = vmatpush1.bf16.msra.mxu1 %v4652_v17  ;;  %v4860_v20 = vpop.permute.xlu0 %4859  ;;  %4818 = vmatprep.mubr.bf16.mxu1 %v8355_v10 }
 0x1c4   : > { %v4875_v21 = vsel %vm4871_vm5, %v4860_v20, %v4862_v19  ;;  %6369 = vrot.lane.b32.xlu1 %v9346_v22, %s8378_s15  ;;  %v4874_v25 = vsel %vm4871_vm5, %v4858_v7, %v4860_v20 }
 0x1c5   : > { %6367 = vrot.lane.b32.xlu0 %v8482_v13, %s8378_s15  ;;  %7701 = vmatmul.mubr.msk.bf16.vlgmr.msra.gmra.mrb[4].mxu0 %vm440_vm2, %v8319_v0  ;;  %v4890_v29 = vsel %vm444_vm1, %v4874_v25, 0 }
 0x1c6   : > { %4908 = vmatpush1.bf16.msra.mxu0 %v4884_v23  ;;  %7709 = vmatprep.subr.msk.bf16.mxu1 %vm444_vm1, %v4875_v21  ;;  %v4866_v24 = vpop.permute.xlu1 %4865 }
 0x1c7   : > { %v4864_v26 = vpop.permute.xlu0 %4863  ;;  %4939 = vmatprep.mubr.bf16.mxu0 %v8355_v10 }
 0x1c8   : > { %v4877_v27 = vsel %vm4871_vm5, %v4864_v26, %v4866_v24  ;;  %6605 = vrot.lane.b32.xlu1 %v8453_v2, %s8379_s12  ;;  %v4876_v30 = vsel %vm4871_vm5, %v4862_v19, %v4864_v26 }
 0x1c9   : > { %6603 = vrot.lane.b32.xlu0 %v8455_v3, %s8379_s12  ;;  %7711 = vmatprep.subr.msk.bf16.mxu0 %vm444_vm1, %v4877_v27  ;;  %v4896_v34 = vsel %vm444_vm1, %v4876_v30, 0  ;;  %v8323_v27 = vld [vmem:[%s9761_s0 + $0xa8] sm:$0xff]  }
 0x1ca   : > { %7703 = vmatmul.mubr.msk.bf16.vlgmr.msra.gmra.mrb[4].mxu1 %vm440_vm2, %v8319_v0  ;;  %v4870_v31 = vpop.permute.xlu1 %4869 }
 0x1cb   : > { %4951 = vmatpush1.bf16.msra.mxu1 %v4890_v29  ;;  %v4868_v32 = vpop.permute.xlu0 %4867  ;;  %4982 = vmatprep.mubr.bf16.mxu1 %v8355_v10 }
 0x1cc   : > { %v4879_v33 = vsel %vm4871_vm5, %v4868_v32, %v4870_v31  ;;  %6609 = vrot.lane.b32.xlu1 %v8461_v5, %s8379_s12  ;;  %v4878_v36 = vsel %vm4871_vm5, %v4866_v24, %v4868_v32 }
 0x1cd   : > { %6607 = vrot.lane.b32.xlu0 %v8459_v4, %s8379_s12  ;;  %7708 = vmatmul.mubr.msk.bf16.vlgmr.msra.gmra.mrb[0].mxu0 %vm440_vm2, %v8320_v28  ;;  %v4902_v11 = vsel %vm444_vm1, %v4878_v36, 0 }
 0x1ce   : > { %4994 = vmatpush1.bf16.msra.mxu0 %v4896_v34  ;;  %7713 = vmatprep.subr.msk.bf16.mxu1 %vm444_vm1, %v4879_v33  ;;  %v5106_v35 = vpop.permute.xlu1 %5105 }
 0x1cf   : > { %v5104_v37 = vpop.permute.xlu0 %5103  ;;  %5025 = vmatprep.mubr.bf16.mxu0 %v8355_v10 }
 0x1d0   : > { %6613 = vrot.lane.b32.xlu1 %v8470_v9, %s8379_s12  ;;  %v5122_v39 = vsel %vm5121_vm6, %v5104_v37, %v5106_v35 }
 0x1d1   : > { %6611 = vrot.lane.b32.xlu0 %v8468_v8, %s8379_s12  ;;  %v5134_v42 = vsel %vm444_vm1, %v5122_v39, 0 }
 0x1d2   : > { %7710 = vmatmul.mubr.msk.bf16.vlgmr.msra.gmra.mrb[0].mxu1 %vm440_vm2, %v8320_v28  ;;  %v5110_v38 = vpop.permute.xlu1 %5109 }
 0x1d3   : > { %5037 = vmatpush1.bf16.msra.mxu1 %v4902_v11  ;;  %v5108_v40 = vpop.permute.xlu0 %5107  ;;  %5068 = vmatprep.mubr.bf16.mxu1 %v8355_v10 }
 0x1d4   : > { %v5123_v41 = vsel %vm5121_vm6, %v5106_v35, %v5108_v40  ;;  %6617 = vrot.lane.b32.xlu1 %v8482_v13, %s8379_s12  ;;  %v5124_v44 = vsel %vm5121_vm6, %v5108_v40, %v5110_v38 }
 0x1d5   : > { %6615 = vrot.lane.b32.xlu0 %v8478_v12, %s8379_s12  ;;  %7718 = vmatprep.subr.msk.bf16.mxu0 %vm444_vm1, %v5123_v41  ;;  %v5140_v47 = vsel %vm444_vm1, %v5124_v44, 0 }
 0x1d6   : > { %7712 = vmatmul.mubr.msk.bf16.vlgmr.msra.gmra.mrb[4].mxu0 %vm440_vm2, %v8320_v28  ;;  %v5114_v43 = vpop.permute.xlu1 %5113 }
 0x1d7   : > { %5158 = vmatpush1.bf16.msra.mxu0 %v5134_v42  ;;  %v5112_v45 = vpop.permute.xlu0 %5111  ;;  %5189 = vmatprep.mubr.bf16.mxu0 %v8355_v10 }
 0x1d8   : > { %v5125_v46 = vsel %vm5121_vm6, %v5110_v38, %v5112_v45  ;;  %6853 = vrot.lane.b32.xlu1 %v8455_v3, %s8380_s20  ;;  %v5126_v50 = vsel %vm5121_vm6, %v5112_v45, %v5114_v43 }
 0x1d9   : > { %6619 = vrot.lane.b32.xlu0 %v9346_v22, %s8379_s12  ;;  %7720 = vmatprep.subr.msk.bf16.mxu1 %vm444_vm1, %v5125_v46  ;;  %v5146_v52 = vsel %vm444_vm1, %v5126_v50, 0  ;;  %v8324_v46 = vld [vmem:[%s9761_s0 + $0xb0] sm:$0xff]  }
 0x1da   : > { %7714 = vmatmul.mubr.msk.bf16.vlgmr.msra.gmra.mrb[4].mxu1 %vm440_vm2, %v8320_v28  ;;  %v5118_v48 = vpop.permute.xlu1 %5117 }
 0x1db   : > { %5201 = vmatpush1.bf16.msra.mxu1 %v5140_v47  ;;  %v5116_v51 = vpop.permute.xlu0 %5115  ;;  %5232 = vmatprep.mubr.bf16.mxu1 %v8355_v10 }
 0x1dc   : > { %v5127_v3 = vsel %vm5121_vm6, %v5114_v43, %v5116_v51  ;;  %6857 = vrot.lane.b32.xlu1 %v8459_v4, %s8380_s20  ;;  %v5128_v54 = vsel %vm5121_vm6, %v5116_v51, %v5118_v48 }
 0x1dd   : > { %6855 = vrot.lane.b32.xlu0 %v8453_v2, %s8380_s20  ;;  %7722 = vmatprep.subr.msk.bf16.mxu0 %vm444_vm1, %v5127_v3  ;;  %v5152_v2 = vsel %vm444_vm1, %v5128_v54, 0 }
 0x1de   : > { %7719 = vmatmul.mubr.msk.bf16.vlgmr.msra.gmra.mrb[0].mxu0 %vm440_vm2, %v8321_v49  ;;  %v5354_v53 = vpop.permute.xlu1 %5353 }
 0x1df   : > { %5244 = vmatpush1.bf16.msra.mxu0 %v5146_v52  ;;  %v5120_v55 = vpop.permute.xlu0 %5119  ;;  %5275 = vmatprep.mubr.bf16.mxu0 %v8355_v10 }
 0x1e0   : > { %v5129_v56 = vsel %vm5121_vm6, %v5118_v48, %v5120_v55  ;;  %6861 = vrot.lane.b32.xlu1 %v8468_v8, %s8380_s20 }
 0x1e1   : > { %6859 = vrot.lane.b32.xlu0 %v8461_v5, %s8380_s20  ;;  %7724 = vmatprep.subr.msk.bf16.mxu1 %vm444_vm1, %v5129_v56 }
 0x1e2   : > { %7721 = vmatmul.mubr.msk.bf16.vlgmr.msra.gmra.mrb[0].mxu1 %vm440_vm2, %v8321_v49  ;;  %v5358_v4 = vpop.permute.xlu1 %5357 }
 0x1e3   : > { %5287 = vmatpush1.bf16.msra.mxu1 %v5152_v2  ;;  %v5356_v57 = vpop.permute.xlu0 %5355  ;;  %5318 = vmatprep.mubr.bf16.mxu1 %v8355_v10 }
 0x1e4   : > { %v5372_v58 = vsel %vm5371_vm7, %v5354_v53, %v5356_v57  ;;  %v5373_v59 = vsel %vm5371_vm7, %v5356_v57, %v5358_v4  ;;  %6865 = vrot.lane.b32.xlu1 %v8478_v12, %s8380_s20 }
 0x1e5   : > { %v5384_v5 = vsel %vm444_vm1, %v5372_v58, 0  ;;  %6863 = vrot.lane.b32.xlu0 %v8470_v9, %s8380_s20  ;;  %7729 = vmatprep.subr.msk.bf16.mxu0 %vm444_vm1, %v5373_v59 }
 0x1e6   : > { %7723 = vmatmul.mubr.msk.bf16.vlgmr.msra.gmra.mrb[4].mxu0 %vm440_vm2, %v8321_v49  ;;  %v5362_v8 = vpop.permute.xlu1 %5361 }
 0x1e7   : > { %5408 = vmatpush1.bf16.msra.mxu0 %v5384_v5  ;;  %v5360_v0 = vpop.permute.xlu0 %5359  ;;  %5439 = vmatprep.mubr.bf16.mxu0 %v8355_v10 }
 0x1e8   : > { %v5374_v60 = vsel %vm5371_vm7, %v5358_v4, %v5360_v0  ;;  %v5375_v61 = vsel %vm5371_vm7, %v5360_v0, %v5362_v8  ;;  %6869 = vrot.lane.b32.xlu1 %v9346_v22, %s8380_s20 }
 0x1e9   : > { %v5390_v12 = vsel %vm444_vm1, %v5374_v60, 0  ;;  %6867 = vrot.lane.b32.xlu0 %v8482_v13, %s8380_s20  ;;  %7731 = vmatprep.subr.msk.bf16.mxu1 %vm444_vm1, %v5375_v61 }
 0x1ea   : > { %7725 = vmatmul.mubr.msk.bf16.vlgmr.msra.gmra.mrb[4].mxu1 %vm440_vm2, %v8321_v49  ;;  %v5366_v9 = vpop.permute.xlu1 %5365 }
 0x1eb   : > { %5451 = vmatpush1.bf16.msra.mxu1 %v5390_v12  ;;  %v5364_v63 = vpop.permute.xlu0 %5363  ;;  %5482 = vmatprep.mubr.bf16.mxu1 %v8355_v10  ;;  %v8325_v12 = vld [vmem:[%s9761_s0 + $0xb8] sm:$0xff]  }
 0x1ec   : > { %v5376_v1 = vsel %vm5371_vm7, %v5362_v8, %v5364_v63  ;;  %v5377_v6 = vsel %vm5371_vm7, %v5364_v63, %v5366_v9 }
 0x1ed   : > { %v5396_v7 = vsel %vm444_vm1, %v5376_v1, 0  ;;  %7733 = vmatprep.subr.msk.bf16.mxu0 %vm444_vm1, %v5377_v6 }
 0x1ee   : > { %7730 = vmatmul.mubr.msk.bf16.vlgmr.msra.gmra.mrb[0].mxu0 %vm440_vm2, %v8322_v62  ;;  %v5370_v13 = vpop.permute.xlu1 %5369 }
 0x1ef   : > { %5494 = vmatpush1.bf16.msra.mxu0 %v5396_v7  ;;  %v5368_v14 = vpop.permute.xlu0 %5367  ;;  %5525 = vmatprep.mubr.bf16.mxu0 %v8355_v10 }
 0x1f0   : > { %v5378_v15 = vsel %vm5371_vm7, %v5366_v9, %v5368_v14  ;;  %v5379_v16 = vsel %vm5371_vm7, %v5368_v14, %v5370_v13 }
 0x1f1   : > { %v5402_v17 = vsel %vm444_vm1, %v5378_v15, 0  ;;  %7735 = vmatprep.subr.msk.bf16.mxu1 %vm444_vm1, %v5379_v16 }
 0x1f2   : > { %7732 = vmatmul.mubr.msk.bf16.vlgmr.msra.gmra.mrb[0].mxu1 %vm440_vm2, %v8322_v62  ;;  %v5606_v18 = vpop.permute.xlu1 %5605 }
 0x1f3   : > { %5537 = vmatpush1.bf16.msra.mxu1 %v5402_v17  ;;  %v5604_v19 = vpop.permute.xlu0 %5603  ;;  %5568 = vmatprep.mubr.bf16.mxu1 %v8355_v10 }
 0x1f4   : > { %v5622_v20 = vsel %vm5621_vm8, %v5604_v19, %v5606_v18 }
 0x1f5   : > { %v5634_v24 = vsel %vm444_vm1, %v5622_v20, 0 }
 0x1f6   : > { %v5610_v21 = vpop.permute.xlu1 %5609  ;;  %7734 = vmatmul.mubr.msk.bf16.vlgmr.msra.gmra.mrb[4].mxu0 %vm440_vm2, %v8322_v62 }
 0x1f7   : > { %v5608_v22 = vpop.permute.xlu0 %5607  ;;  %5689 = vmatprep.mubr.bf16.mxu0 %v8355_v10 }
 0x1f8   : > { %v5623_v23 = vsel %vm5621_vm8, %v5606_v18, %v5608_v22  ;;  %v5624_v25 = vsel %vm5621_vm8, %v5608_v22, %v5610_v21 }
 0x1f9   : > { %7740 = vmatprep.subr.msk.bf16.mxu0 %vm444_vm1, %v5623_v23  ;;  %v5640_v30 = vsel %vm444_vm1, %v5624_v25, 0 }
 0x1fa   : > { %5658 = vmatpush1.bf16.msra.mxu0 %v5634_v24  ;;  %v5614_v26 = vpop.permute.xlu1 %5613  ;;  %7736 = vmatmul.mubr.msk.bf16.vlgmr.msra.gmra.mrb[4].mxu1 %vm440_vm2, %v8322_v62 }
 0x1fb   : > { %v5612_v28 = vpop.permute.xlu0 %5611  ;;  %5732 = vmatprep.mubr.bf16.mxu1 %v8355_v10 }
 0x1fc   : > { %v5625_v29 = vsel %vm5621_vm8, %v5610_v21, %v5612_v28  ;;  %v5626_v31 = vsel %vm5621_vm8, %v5612_v28, %v5614_v26 }
 0x1fd   : > { %7742 = vmatprep.subr.msk.bf16.mxu1 %vm444_vm1, %v5625_v29  ;;  %v5646_v35 = vsel %vm444_vm1, %v5626_v31, 0 }
 0x1fe   : > { %5701 = vmatpush1.bf16.msra.mxu1 %v5640_v30  ;;  %v5618_v32 = vpop.permute.xlu1 %5617  ;;  %7741 = vmatmul.mubr.msk.bf16.vlgmr.msra.gmra.mrb[0].mxu0 %vm440_vm2, %v8323_v27 }
 0x1ff   : > { %v5616_v33 = vpop.permute.xlu0 %5615  ;;  %5775 = vmatprep.mubr.bf16.mxu0 %v8355_v10 }
 0x200   : > { %v5627_v34 = vsel %vm5621_vm8, %v5614_v26, %v5616_v33  ;;  %v5628_v36 = vsel %vm5621_vm8, %v5616_v33, %v5618_v32 }
 0x201   : > { %7744 = vmatprep.subr.msk.bf16.mxu0 %vm444_vm1, %v5627_v34  ;;  %v5652_v39 = vsel %vm444_vm1, %v5628_v36, 0 }
 0x202   : > { %5744 = vmatpush1.bf16.msra.mxu0 %v5646_v35  ;;  %v5854_v37 = vpop.permute.xlu1 %5853  ;;  %7743 = vmatmul.mubr.msk.bf16.vlgmr.msra.gmra.mrb[0].mxu1 %vm440_vm2, %v8323_v27 }
 0x203   : > { %v5620_v11 = vpop.permute.xlu0 %5619  ;;  %5818 = vmatprep.mubr.bf16.mxu1 %v8355_v10 }
 0x204   : > { %v5629_v38 = vsel %vm5621_vm8, %v5618_v32, %v5620_v11 }
 0x205   : > { %7746 = vmatprep.subr.msk.bf16.mxu1 %vm444_vm1, %v5629_v38 }
 0x206   : > { %5787 = vmatpush1.bf16.msra.mxu1 %v5652_v39  ;;  %v5858_v40 = vpop.permute.xlu1 %5857  ;;  %7745 = vmatmul.mubr.msk.bf16.vlgmr.msra.gmra.mrb[4].mxu0 %vm440_vm2, %v8323_v27 }
 0x207   : > { %v5856_v41 = vpop.permute.xlu0 %5855  ;;  %5939 = vmatprep.mubr.bf16.mxu0 %v8355_v10 }
 0x208   : > { %v5872_v42 = vsel %vm5871_vm9, %v5854_v37, %v5856_v41  ;;  %v5873_v43 = vsel %vm5871_vm9, %v5856_v41, %v5858_v40 }
 0x209   : > { %v5884_v44 = vsel %vm444_vm1, %v5872_v42, 0  ;;  %7751 = vmatprep.subr.msk.bf16.mxu0 %vm444_vm1, %v5873_v43 }
 0x20a   : > { %5908 = vmatpush1.bf16.msra.mxu0 %v5884_v44  ;;  %v5862_v45 = vpop.permute.xlu1 %5861  ;;  %7747 = vmatmul.mubr.msk.bf16.vlgmr.msra.gmra.mrb[4].mxu1 %vm440_vm2, %v8323_v27  ;;  %v8326_v27 = vld [vmem:[%s9761_s0 + $0xc0] sm:$0xff]  }
 0x20b   : > { %v5860_v47 = vpop.permute.xlu0 %5859  ;;  %5982 = vmatprep.mubr.bf16.mxu1 %v8355_v10 }
 0x20c   : > { %v5874_v48 = vsel %vm5871_vm9, %v5858_v40, %v5860_v47  ;;  %v5875_v49 = vsel %vm5871_vm9, %v5860_v47, %v5862_v45 }
 0x20d   : > { %v5890_v50 = vsel %vm444_vm1, %v5874_v48, 0  ;;  %7753 = vmatprep.subr.msk.bf16.mxu1 %vm444_vm1, %v5875_v49  ;;  %v8327_v49 = vld [vmem:[%s9761_s0 + $0xc8] sm:$0xff]  }
 0x20e   : > { %5951 = vmatpush1.bf16.msra.mxu1 %v5890_v50  ;;  %v5866_v51 = vpop.permute.xlu1 %5865  ;;  %7752 = vmatmul.mubr.msk.bf16.vlgmr.msra.gmra.mrb[0].mxu0 %vm440_vm2, %v8324_v46 }
 0x20f   : > { %v5864_v3 = vpop.permute.xlu0 %5863  ;;  %6025 = vmatprep.mubr.bf16.mxu0 %v8355_v10 }
 0x210   : > { %v5876_v52 = vsel %vm5871_vm9, %v5862_v45, %v5864_v3  ;;  %v5877_v53 = vsel %vm5871_vm9, %v5864_v3, %v5866_v51 }
 0x211   : > { %v5896_v54 = vsel %vm444_vm1, %v5876_v52, 0  ;;  %7755 = vmatprep.subr.msk.bf16.mxu0 %vm444_vm1, %v5877_v53 }
 0x212   : > { %5994 = vmatpush1.bf16.msra.mxu0 %v5896_v54  ;;  %v5870_v55 = vpop.permute.xlu1 %5869  ;;  %7754 = vmatmul.mubr.msk.bf16.vlgmr.msra.gmra.mrb[0].mxu1 %vm440_vm2, %v8324_v46 }
 0x213   : > { %v5868_v56 = vpop.permute.xlu0 %5867  ;;  %6068 = vmatprep.mubr.bf16.mxu1 %v8355_v10 }
 0x214   : > { %v5878_v2 = vsel %vm5871_vm9, %v5866_v51, %v5868_v56  ;;  %v5879_v4 = vsel %vm5871_vm9, %v5868_v56, %v5870_v55 }
 0x215   : > { %v5902_v57 = vsel %vm444_vm1, %v5878_v2, 0  ;;  %7757 = vmatprep.subr.msk.bf16.mxu1 %vm444_vm1, %v5879_v4 }
 0x216   : > { %6037 = vmatpush1.bf16.msra.mxu1 %v5902_v57  ;;  %v6106_v58 = vpop.permute.xlu1 %6105  ;;  %7756 = vmatmul.mubr.msk.bf16.vlgmr.msra.gmra.mrb[4].mxu0 %vm440_vm2, %v8324_v46 }
 0x217   : > { %v6104_v59 = vpop.permute.xlu0 %6103  ;;  %6189 = vmatprep.mubr.bf16.mxu0 %v8355_v10 }
 0x218   : > { %v6122_v5 = vsel %vm6121_vm10, %v6104_v59, %v6106_v58 }
 0x219   : > { %v6134_v61 = vsel %vm444_vm1, %v6122_v5, 0 }
 0x21a   : > { %v6110_v8 = vpop.permute.xlu1 %6109  ;;  %7758 = vmatmul.mubr.msk.bf16.vlgmr.msra.gmra.mrb[4].mxu1 %vm440_vm2, %v8324_v46 }
 0x21b   : > { %v6108_v0 = vpop.permute.xlu0 %6107  ;;  %6232 = vmatprep.mubr.bf16.mxu1 %v8355_v10 }
 0x21c   : > { %v6123_v60 = vsel %vm6121_vm10, %v6106_v58, %v6108_v0  ;;  %v6124_v9 = vsel %vm6121_vm10, %v6108_v0, %v6110_v8 }
 0x21d   : > { %7762 = vmatprep.subr.msk.bf16.mxu0 %vm444_vm1, %v6123_v60  ;;  %v6140_v6 = vsel %vm444_vm1, %v6124_v9, 0 }
 0x21e   : > { %6158 = vmatpush1.bf16.msra.mxu0 %v6134_v61  ;;  %v6114_v62 = vpop.permute.xlu1 %6113 }
 0x21f   : > { %v6112_v63 = vpop.permute.xlu0 %6111 }
 0x220   : > { %v6125_v1 = vsel %vm6121_vm10, %v6110_v8, %v6112_v63  ;;  %v6126_v7 = vsel %vm6121_vm10, %v6112_v63, %v6114_v62 }
 0x221   : > { %7764 = vmatprep.subr.msk.bf16.mxu1 %vm444_vm1, %v6125_v1  ;;  %7763 = vmatmul.mubr.msk.bf16.vlgmr.msra.gmra.mrb[0].mxu0 %vm440_vm2, %v8325_v12  ;;  %v6146_v16 = vsel %vm444_vm1, %v6126_v7, 0 }
 0x222   : > { %6201 = vmatpush1.bf16.msra.mxu1 %v6140_v6  ;;  %v6118_v13 = vpop.permute.xlu1 %6117  ;;  %6275 = vmatprep.mubr.bf16.mxu0 %v8355_v10 }
 0x223   : > { %v6116_v14 = vpop.permute.xlu0 %6115 }
 0x224   : > { %v6127_v15 = vsel %vm6121_vm10, %v6114_v62, %v6116_v14  ;;  %v6128_v17 = vsel %vm6121_vm10, %v6116_v14, %v6118_v13  ;;  %v8328_v62 = vld [vmem:[%s9761_s0 + $0xd0] sm:$0xff]  }
 0x225   : > { %7766 = vmatprep.subr.msk.bf16.mxu0 %vm444_vm1, %v6127_v15  ;;  %7765 = vmatmul.mubr.msk.bf16.vlgmr.msra.gmra.mrb[0].mxu1 %vm440_vm2, %v8325_v12  ;;  %v6152_v21 = vsel %vm444_vm1, %v6128_v17, 0 }
 0x226   : > { %6244 = vmatpush1.bf16.msra.mxu0 %v6146_v16  ;;  %v6354_v18 = vpop.permute.xlu1 %6353  ;;  %6318 = vmatprep.mubr.bf16.mxu1 %v8355_v10 }
 0x227   : > { %v6120_v19 = vpop.permute.xlu0 %6119 }
 0x228   : > { %v6129_v20 = vsel %vm6121_vm10, %v6118_v13, %v6120_v19 }
 0x229   : > { %7768 = vmatprep.subr.msk.bf16.mxu1 %vm444_vm1, %v6129_v20  ;;  %7767 = vmatmul.mubr.msk.bf16.vlgmr.msra.gmra.mrb[4].mxu0 %vm440_vm2, %v8325_v12 }
 0x22a   : > { %6287 = vmatpush1.bf16.msra.mxu1 %v6152_v21  ;;  %v6358_v22 = vpop.permute.xlu1 %6357  ;;  %6439 = vmatprep.mubr.bf16.mxu0 %v8355_v10 }
 0x22b   : > { %v6356_v23 = vpop.permute.xlu0 %6355 }
 0x22c   : > { %v6372_v24 = vsel %vm6371_vm11, %v6354_v18, %v6356_v23  ;;  %v6373_v25 = vsel %vm6371_vm11, %v6356_v23, %v6358_v22 }
 0x22d   : > { %v6384_v26 = vsel %vm444_vm1, %v6372_v24, 0  ;;  %7773 = vmatprep.subr.msk.bf16.mxu0 %vm444_vm1, %v6373_v25  ;;  %7769 = vmatmul.mubr.msk.bf16.vlgmr.msra.gmra.mrb[4].mxu1 %vm440_vm2, %v8325_v12  ;;  %v7151_v24 = vld [vmem:[%s359_s26] sm:$0xff] }
 0x22e   : > { %6408 = vmatpush1.bf16.msra.mxu0 %v6384_v26  ;;  %v6362_v28 = vpop.permute.xlu1 %6361  ;;  %6482 = vmatprep.mubr.bf16.mxu1 %v8355_v10  ;;  %vm7152_vm15 = vcmp.gt.bf16.partialorder %v7151_v24, 0  ;;  %v7160_v26 = vlaneseq }
 0x22f   : > { %v6360_v29 = vpop.permute.xlu0 %6359  ;;  %v7153_v25 = vsel %vm7152_vm15, 65537, %v8355_v10 }
 0x230   : > { %v6374_v30 = vsel %vm6371_vm11, %v6358_v22, %v6360_v29  ;;  %v6375_v31 = vsel %vm6371_vm11, %v6360_v29, %v6362_v28  ;;  %v7155_v29 = vunpack.c.h.b16 %v7153_v25 }
 0x231   : > { %v6390_v32 = vsel %vm444_vm1, %v6374_v30, 0  ;;  %7775 = vmatprep.subr.msk.bf16.mxu1 %vm444_vm1, %v6375_v31  ;;  %7774 = vmatmul.mubr.msk.bf16.vlgmr.msra.gmra.mrb[0].mxu0 %vm440_vm2, %v8326_v27 }
 0x232   : > { %6451 = vmatpush1.bf16.msra.mxu1 %v6390_v32  ;;  %v6366_v33 = vpop.permute.xlu1 %6365  ;;  %6525 = vmatprep.mubr.bf16.mxu0 %v8355_v10 }
 0x233   : > { %v6364_v34 = vpop.permute.xlu0 %6363 }
 0x234   : > { %v6376_v35 = vsel %vm6371_vm11, %v6362_v28, %v6364_v34  ;;  %v6377_v36 = vsel %vm6371_vm11, %v6364_v34, %v6366_v33  ;;  %v7161_v28 = vshrl.u32 %v7160_v26, 7 }
 0x235   : > { %v6396_v37 = vsel %vm444_vm1, %v6376_v35, 0  ;;  %7777 = vmatprep.subr.msk.bf16.mxu0 %vm444_vm1, %v6377_v36  ;;  %7776 = vmatmul.mubr.msk.bf16.vlgmr.msra.gmra.mrb[0].mxu1 %vm440_vm2, %v8326_v27 }
 0x236   : > { %6494 = vmatpush1.bf16.msra.mxu0 %v6396_v37  ;;  %v6370_v11 = vpop.permute.xlu1 %6369  ;;  %6568 = vmatprep.mubr.bf16.mxu1 %v8355_v10  ;;  %v9634_v30 = vsub.s32 0, %v7161_v28  ;;  %v7166_v32 = vsub.s32 2, %v7161_v28  ;;  %v7174_v34 = vsub.s32 6, %v7161_v28 }
 0x237   : > { %v6368_v38 = vpop.permute.xlu0 %6367 }
 0x238   : > { %v6378_v39 = vsel %vm6371_vm11, %v6366_v33, %v6368_v38  ;;  %v6379_v40 = vsel %vm6371_vm11, %v6368_v38, %v6370_v11  ;;  %v7170_v33 = vsub.s32 4, %v7161_v28 }
 0x239   : > { %v6402_v41 = vsel %vm444_vm1, %v6378_v39, 0  ;;  %7779 = vmatprep.subr.msk.bf16.mxu1 %vm444_vm1, %v6379_v40  ;;  %7778 = vmatmul.mubr.msk.bf16.vlgmr.msra.gmra.mrb[4].mxu0 %vm440_vm2, %v8326_v27 }
 0x23a   : > { %6537 = vmatpush1.bf16.msra.mxu1 %v6402_v41  ;;  %v6606_v42 = vpop.permute.xlu1 %6605  ;;  %6689 = vmatprep.mubr.bf16.mxu0 %v8355_v10 }
 0x23b   : > { %v6604_v43 = vpop.permute.xlu0 %6603 }
 0x23c   : > { %v6622_v44 = vsel %vm6621_vm12, %v6604_v43, %v6606_v42 }
 0x23d   : > { %7780 = vmatmul.mubr.msk.bf16.vlgmr.msra.gmra.mrb[4].mxu1 %vm440_vm2, %v8326_v27  ;;  %v6634_v48 = vsel %vm444_vm1, %v6622_v44, 0  ;;  %v7154_v27 = vunpack.c.l.b16 %v7153_v25 }
 0x23e   : > { %v6610_v45 = vpop.permute.xlu1 %6609  ;;  %6732 = vmatprep.mubr.bf16.mxu1 %v8355_v10 }
 0x23f   : > { %v6608_v46 = vpop.permute.xlu0 %6607  ;;  %vm7156_vm0 = vcmp.ne.s32.totalorder %v7154_v27, 0 }
 0x240   : > { %v6623_v47 = vsel %vm6621_vm12, %v6606_v42, %v6608_v46  ;;  %v6624_v50 = vsel %vm6621_vm12, %v6608_v46, %v6610_v45  ;;  %v7158_v31 = vsel %vm7156_vm0, 1, %v8355_v10 }
 0x241   : > { %7784 = vmatprep.subr.msk.bf16.mxu0 %vm444_vm1, %v6623_v47  ;;  %v6640_v53 = vsel %vm444_vm1, %v6624_v50, 0  ;;  %v7163_v35 = vrot.slane %v7158_v31, %v9634_v30  ;;  %v7167_v37 = vrot.slane %v7158_v31, %v7166_v32  ;;  %v7171_v11 = vrot.slane %v7158_v31, %v7170_v33 }
 0x242   : > { %6658 = vmatpush1.bf16.msra.mxu0 %v6634_v48  ;;  %v6614_v51 = vpop.permute.xlu1 %6613  ;;  %v7175_v38 = vrot.slane %v7158_v31, %v7174_v34 }
 0x243   : > { %v6612_v3 = vpop.permute.xlu0 %6611  ;;  %vm7193_vm3 = vcmp.ne.s32.totalorder %v7167_v37, 0  ;;  %vm7194_vm4 = vcmp.ne.s32.totalorder %v7171_v11, 0 }
 0x244   : > { %v6625_v52 = vsel %vm6621_vm12, %v6610_v45, %v6612_v3  ;;  %v6626_v54 = vsel %vm6621_vm12, %v6612_v3, %v6614_v51  ;;  %vm7195_vm5 = vcmp.ne.s32.totalorder %v7175_v38, 0  ;;  %v7201_v42 = vsel %vm7193_vm3, 1, %v8355_v10 }
 0x245   : > { %7785 = vmatmul.mubr.msk.bf16.vlgmr.msra.gmra.mrb[0].mxu0 %vm440_vm2, %v8327_v49  ;;  %7786 = vmatprep.subr.msk.bf16.mxu1 %vm444_vm1, %v6625_v52  ;;  %v6646_v4 = vsel %vm444_vm1, %v6626_v54, 0  ;;  %v7202_v43 = vsel %vm7194_vm4, 1, %v8355_v10  ;;  %v7203_v46 = vsel %vm7195_vm5, 1, %v8355_v10  ;;  %vm7319_vm3 = vcmask 15368  }
 0x246   : > { %6701 = vmatpush1.bf16.msra.mxu1 %v6640_v53  ;;  %v6618_v55 = vpop.permute.xlu1 %6617  ;;  %6775 = vmatprep.mubr.bf16.mxu0 %v8355_v10  ;;  %v7223_v3 = vrot.slane %v7203_v46, %v9634_v30 }
 0x247   : > { %v6616_v56 = vpop.permute.xlu0 %6615 }
 0x248   : > { %v6627_v2 = vsel %vm6621_vm12, %v6614_v51, %v6616_v56  ;;  %v6628_v57 = vsel %vm6621_vm12, %v6616_v56, %v6618_v55  ;;  %v7219_v51 = vrot.slane %v7202_v43, %v9634_v30 }
 0x249   : > { %7787 = vmatmul.mubr.msk.bf16.vlgmr.msra.gmra.mrb[0].mxu1 %vm440_vm2, %v8327_v49  ;;  %7788 = vmatprep.subr.msk.bf16.mxu0 %vm444_vm1, %v6627_v2  ;;  %v6652_v8 = vsel %vm444_vm1, %v6628_v57, 0 }
 0x24a   : > { %6744 = vmatpush1.bf16.msra.mxu0 %v6646_v4  ;;  %v6854_v58 = vpop.permute.xlu1 %6853  ;;  %6818 = vmatprep.mubr.bf16.mxu1 %v8355_v10 }
 0x24b   : > { %v6620_v59 = vpop.permute.xlu0 %6619 }
 0x24c   : > { %v6629_v5 = vsel %vm6621_vm12, %v6618_v55, %v6620_v59  ;;  %vm9661_vm12 = vcmp.eq.s32.totalorder %v7219_v51, 1 }
 0x24d   : > { %7789 = vmatmul.mubr.msk.bf16.vlgmr.msra.gmra.mrb[4].mxu0 %vm440_vm2, %v8327_v49  ;;  %7790 = vmatprep.subr.msk.bf16.mxu1 %vm444_vm1, %v6629_v5 }
 0x24e   : > { %6787 = vmatpush1.bf16.msra.mxu1 %v6652_v8  ;;  %v6858_v0 = vpop.permute.xlu1 %6857  ;;  %6939 = vmatprep.mubr.bf16.mxu0 %v8355_v10 }
 0x24f   : > { %v6856_v60 = vpop.permute.xlu0 %6855 }
 0x250   : > { %v6872_v61 = vsel %vm6871_vm13, %v6854_v58, %v6856_v60  ;;  %v6873_v12 = vsel %vm6871_vm13, %v6856_v60, %v6858_v0 }
 0x251   : > { %v6884_v9 = vsel %vm444_vm1, %v6872_v61, 0  ;;  %7791 = vmatmul.mubr.msk.bf16.vlgmr.msra.gmra.mrb[4].mxu1 %vm440_vm2, %v8327_v49  ;;  %7795 = vmatprep.subr.msk.bf16.mxu0 %vm444_vm1, %v6873_v12  ;;  %v7215_v49 = vrot.slane %v7201_v42, %v9634_v30 }
 0x252   : > { %6908 = vmatpush1.bf16.msra.mxu0 %v6884_v9  ;;  %v6862_v63 = vpop.permute.xlu1 %6861  ;;  %6982 = vmatprep.mubr.bf16.mxu1 %v8355_v10 }
 0x253   : > { %v6860_v1 = vpop.permute.xlu0 %6859  ;;  %vm9657_vm11 = vcmp.eq.s32.totalorder %v7215_v49, 1 }
 0x254   : > { %v6874_v6 = vsel %vm6871_vm13, %v6858_v0, %v6860_v1  ;;  %v6875_v7 = vsel %vm6871_vm13, %v6860_v1, %v6862_v63 }
 0x255   : > { %v6890_v13 = vsel %vm444_vm1, %v6874_v6, 0  ;;  %7796 = vmatmul.mubr.msk.bf16.vlgmr.msra.gmra.mrb[0].mxu0 %vm440_vm2, %v8328_v62  ;;  %7797 = vmatprep.subr.msk.bf16.mxu1 %vm444_vm1, %v6875_v7 }
 0x256   : > { %6951 = vmatpush1.bf16.msra.mxu1 %v6890_v13  ;;  %v6866_v14 = vpop.permute.xlu1 %6865  ;;  %7025 = vmatprep.mubr.bf16.mxu0 %v8355_v10 }
 0x257   : > { %v6864_v15 = vpop.permute.xlu0 %6863 }
 0x258   : > { %v6876_v16 = vsel %vm6871_vm13, %v6862_v63, %v6864_v15  ;;  %v6877_v17 = vsel %vm6871_vm13, %v6864_v15, %v6866_v14 }
 0x259   : > { %v6896_v18 = vsel %vm444_vm1, %v6876_v16, 0  ;;  %7798 = vmatmul.mubr.msk.bf16.vlgmr.msra.gmra.mrb[0].mxu1 %vm440_vm2, %v8328_v62  ;;  %7799 = vmatprep.subr.msk.bf16.mxu0 %vm444_vm1, %v6877_v17 }
 0x25a   : > { %6994 = vmatpush1.bf16.msra.mxu0 %v6896_v18  ;;  %v6870_v19 = vpop.permute.xlu1 %6869  ;;  %7068 = vmatprep.mubr.bf16.mxu1 %v8355_v10 }
 0x25b   : > { %v6868_v20 = vpop.permute.xlu0 %6867 }
 0x25c   : > { %v6878_v21 = vsel %vm6871_vm13, %v6866_v14, %v6868_v20  ;;  %v6879_v22 = vsel %vm6871_vm13, %v6868_v20, %v6870_v19  ;;  %vm9668_vm13 = vcmp.eq.s32.totalorder %v7223_v3, 1 }
 0x25d   : > { %v6902_v23 = vsel %vm444_vm1, %v6878_v21, 0  ;;  %7800 = vmatmul.mubr.msk.bf16.vlgmr.msra.gmra.mrb[4].mxu0 %vm440_vm2, %v8328_v62  ;;  %7801 = vmatprep.subr.msk.bf16.mxu1 %vm444_vm1, %v6879_v22  ;;  %vm7157_vm1 = vcmp.ne.s32.totalorder %v7155_v29, 0 }
 0x25e   : > { %7037 = vmatpush1.bf16.msra.mxu1 %v6902_v23  ;;  %v7159_v36 = vsel %vm7157_vm1, 1, %v8355_v10 }
 0x25f   : > { %v7179_v39 = vrot.slane %v7159_v36, %v9634_v30  ;;  %v7183_v40 = vrot.slane %v7159_v36, %v7166_v32  ;;  %v7187_v44 = vrot.slane %v7159_v36, %v7170_v33  ;;  %v7191_v48 = vrot.slane %v7159_v36, %v7174_v34 }
 0x261   : > { %7802 = vmatmul.mubr.msk.bf16.vlgmr.msra.gmra.mrb[4].mxu1 %vm440_vm2, %v8328_v62  ;;  %vm7192_vm2 = vcmp.ne.s32.totalorder %v7163_v35, 0  ;;  %vm7196_vm6 = vcmp.ne.s32.totalorder %v7179_v39, 0  ;;  %vm7197_vm7 = vcmp.ne.s32.totalorder %v7183_v40, 0  ;;  %vm7198_vm8 = vcmp.ne.s32.totalorder %v7187_v44, 0 }
 0x262   : > { %v7200_v41 = vsel %vm7192_vm2, 1, %v8355_v10  ;;  %v7204_v47 = vsel %vm7196_vm6, 1, %v8355_v10  ;;  %v7205_v50 = vsel %vm7197_vm7, 1, %v8355_v10  ;;  %vm7199_vm10 = vcmp.ne.s32.totalorder %v7191_v48, 0 }
 0x263   : > { %v7211_v45 = vrot.slane %v7200_v41, %v9634_v30  ;;  %v7227_v52 = vrot.slane %v7204_v47, %v9634_v30  ;;  %v7231_v54 = vrot.slane %v7205_v50, %v9634_v30  ;;  %v7206_v4 = vsel %vm7198_vm8, 1, %v8355_v10 }
 0x264   : > { %v7207_v8 = vsel %vm7199_vm10, 1, %v8355_v10  ;;  %v7235_v7 = vrot.slane %v7206_v4, %v9634_v30 }
 0x265   : > { %vm9652_vm9 = vcmp.eq.s32.totalorder %v7211_v45, 1  ;;  %vm9672_vm15 = vcmp.eq.s32.totalorder %v7227_v52, 1  ;;  %vm9679_vm0 = vcmp.eq.s32.totalorder %v7231_v54, 1  ;;  %v7239_v16 = vrot.slane %v7207_v8, %v9634_v30 }
 0x266   : > { %vm9699_vm1 = vcmp.eq.s32.totalorder %v7235_v7, 1 }
 0x267   : > { %vm9708_vm2 = vcmp.eq.s32.totalorder %v7239_v16, 1 }
 0x328   : > { %v6941_v56 = vpop.f32.mrb[0].mxu0 }
 0x329   : > { %v7248_v57 = vsel %vm9652_vm9, %v6941_v56, 0.0  ;;  %v6943_v58 = vpop.f32.mrb[1].mxu0 }
 0x32a   : > { %v7285_v0 = vmul.f32 %v7248_v57, %v7248_v57  ;;  %v7816_v60 = vpack.c.bf16 %v6943_v58, %v6941_v56  ;;  %v7249_v61 = vsel %vm9657_vm11, %v6943_v58, 0.0  ;;  %v6945_v12 = vpop.f32.mrb[2].mxu0 }
 0x32b   : > { %v7264_v62 = vadd.f32 %v7249_v61, %v7248_v57  ;;  %v7286_v63 = vmul.f32 %v7249_v61, %v7249_v61  ;;  %v7256_v1 = vsel %vm9652_vm9, %v6945_v12, 0.0  ;;  %v6947_v6 = vpop.f32.mrb[3].mxu0 }
 0x32c   : > { %7143 = vst [vmem:[%s9686_s21] sm:$0xff] %v7816_v60  ;;  %v7293_v10 = vmul.f32 %v7256_v1, %v7256_v1  ;;  %v7820_v13 = vpack.c.bf16 %v6947_v6, %v6945_v12  ;;  %v7257_v14 = vsel %vm9657_vm11, %v6947_v6, 0.0  ;;  %v6984_v15 = vpop.f32.mrb[0].mxu1 }
 0x32d   : > { %v7301_v17 = vadd.f32 %v7286_v63, %v7285_v0  ;;  %v7273_v18 = vadd.f32 %v7257_v14, %v7256_v1  ;;  %v7294_v19 = vmul.f32 %v7257_v14, %v7257_v14  ;;  %v7250_v20 = vsel %vm9661_vm12, %v6984_v15, 0.0  ;;  %v6986_v21 = vpop.f32.mrb[1].mxu1 }
 0x32e   : > { %7147 = vst [vmem:[%s9686_s21 + $0x20] sm:$0xff] %v7820_v13  ;;  %v7265_v22 = vadd.f32 %v7264_v62, %v7250_v20  ;;  %v7287_v23 = vmul.f32 %v7250_v20, %v7250_v20  ;;  %v7817_v24 = vpack.c.bf16 %v6986_v21, %v6984_v15  ;;  %v7251_v25 = vsel %vm9668_vm13, %v6986_v21, 0.0  ;;  %v6988_v26 = vpop.f32.mrb[2].mxu1 }
 0x32f   : > { %v7310_v27 = vadd.f32 %v7294_v19, %v7293_v10  ;;  %v7288_v28 = vmul.f32 %v7251_v25, %v7251_v25  ;;  %v7258_v29 = vsel %vm9661_vm12, %v6988_v26, 0.0  ;;  %v6990_v30 = vpop.f32.mrb[3].mxu1 }
 0x330   : > { %v7302_v32 = vadd.f32 %v7301_v17, %v7287_v23  ;;  %7144 = vst [vmem:[%s9686_s21 + $0x8] sm:$0xff] %v7817_v24  ;;  %v7266_v33 = vadd.f32 %v7265_v22, %v7251_v25  ;;  %v7274_v34 = vadd.f32 %v7273_v18, %v7258_v29  ;;  %v7295_v35 = vmul.f32 %v7258_v29, %v7258_v29  ;;  %v7027_v36 = vpop.f32.mrb[4].mxu0 }
 0x331   : > { %v7821_v37 = vpack.c.bf16 %v6990_v30, %v6988_v26  ;;  %v7259_v11 = vsel %vm9668_vm13, %v6990_v30, 0.0  ;;  %v7252_v38 = vsel %vm9672_vm15, %v7027_v36, 0.0  ;;  %v7029_v39 = vpop.f32.mrb[5].mxu0 }
 0x332   : > { %v7303_v41 = vadd.f32 %v7302_v32, %v7288_v28  ;;  %v7311_v42 = vadd.f32 %v7310_v27, %v7295_v35  ;;  %v7275_v43 = vadd.f32 %v7274_v34, %v7259_v11  ;;  %v7296_v44 = vmul.f32 %v7259_v11, %v7259_v11  ;;  %v7031_v45 = vpop.f32.mrb[6].mxu0 }
 0x333   : > { %7148 = vst [vmem:[%s9686_s21 + $0x28] sm:$0xff] %v7821_v37  ;;  %v7267_v46 = vadd.f32 %v7266_v33, %v7252_v38  ;;  %v7289_v47 = vmul.f32 %v7252_v38, %v7252_v38  ;;  %v7818_v48 = vpack.c.bf16 %v7029_v39, %v7027_v36  ;;  %v7260_v49 = vsel %vm9672_vm15, %v7031_v45, 0.0  ;;  %v7033_v50 = vpop.f32.mrb[7].mxu0  ;;  %v7349_v28 = vld [vmem:[%s9686_s21] sm:$0xff] (%p8441_p4) }
 0x334   : > { %v7312_v51 = vadd.f32 %v7311_v42, %v7296_v44  ;;  %v7276_v3 = vadd.f32 %v7275_v43, %v7260_v49  ;;  %v7297_v52 = vmul.f32 %v7260_v49, %v7260_v49  ;;  %v7822_v53 = vpack.c.bf16 %v7033_v50, %v7031_v45  ;;  %v7070_v54 = vpop.f32.mrb[4].mxu1  ;;  %7350 = vst [vmem:[%s7336_s16] sm:$0xff] (%p8441_p4), %v7349_v28 }
 0x335   : > { %v7304_v55 = vadd.f32 %v7303_v41, %v7289_v47  ;;  %7145 = vst [vmem:[%s9686_s21 + $0x10] sm:$0xff] %v7818_v48  ;;  %v7253_v56 = vsel %vm9679_vm0, %v7029_v39, 0.0  ;;  %v7261_v2 = vsel %vm9679_vm0, %v7033_v50, 0.0  ;;  %v7254_v4 = vsel %vm9699_vm1, %v7070_v54, 0.0  ;;  %v7072_v57 = vpop.f32.mrb[5].mxu1  ;;  %v7357_v32 = vld [vmem:[%s9686_s21 + $0x20] sm:$0xff] (%p8441_p4) }
 0x336   : > { %v7313_v58 = vadd.f32 %v7312_v51, %v7297_v52  ;;  %7149 = vst [vmem:[%s9686_s21 + $0x30] sm:$0xff] %v7822_v53  ;;  %v7268_v59 = vadd.f32 %v7267_v46, %v7253_v56  ;;  %v7277_v5 = vadd.f32 %v7276_v3, %v7261_v2  ;;  %v7290_v8 = vmul.f32 %v7253_v56, %v7253_v56  ;;  %v7074_v0 = vpop.f32.mrb[6].mxu1 }
 0x337   : > { %v7298_v60 = vmul.f32 %v7261_v2, %v7261_v2  ;;  %v7291_v61 = vmul.f32 %v7254_v4, %v7254_v4  ;;  %v7819_v12 = vpack.c.bf16 %v7072_v57, %v7070_v54  ;;  %v7262_v62 = vsel %vm9699_vm1, %v7074_v0, 0.0  ;;  %v7076_v9 = vpop.f32.mrb[7].mxu1  ;;  %v7351_v29 = vld [vmem:[%s9686_s21 + $0x8] sm:$0xff] (%p8441_p4)  ;;  %7358 = vst [vmem:[%s7336_s16 + $0x40] sm:$0xff] (%p8441_p4), %v7357_v32 }
 0x338   : > { %v7305_v63 = vadd.f32 %v7304_v55, %v7290_v8  ;;  %v7269_v1 = vadd.f32 %v7268_v59, %v7254_v4  ;;  %v7278_v6 = vadd.f32 %v7277_v5, %v7262_v62  ;;  %v7299_v7 = vmul.f32 %v7262_v62, %v7262_v62  ;;  %7352 = vst [vmem:[%s7336_s16 + $0x8] sm:$0xff] (%p8441_p4), %v7351_v29 }
 0x339   : > { %v7314_v10 = vadd.f32 %v7313_v58, %v7298_v60  ;;  %7146 = vst [vmem:[%s9686_s21 + $0x18] sm:$0xff] %v7819_v12  ;;  %v7823_v13 = vpack.c.bf16 %v7076_v9, %v7074_v0  ;;  %v7255_v14 = vsel %vm9708_vm2, %v7072_v57, 0.0  ;;  %v7263_v15 = vsel %vm9708_vm2, %v7076_v9, 0.0 }
 0x33a   : > { %v7306_v16 = vadd.f32 %v7305_v63, %v7291_v61  ;;  %v7270_v17 = vadd.f32 %v7269_v1, %v7255_v14  ;;  %v7279_v18 = vadd.f32 %v7278_v6, %v7263_v15  ;;  %v7292_v19 = vmul.f32 %v7255_v14, %v7255_v14  ;;  %v7359_v33 = vld [vmem:[%s9686_s21 + $0x28] sm:$0xff] (%p8441_p4) }
 0x33b   : > { %v7315_v20 = vadd.f32 %v7314_v10, %v7299_v7  ;;  %7150 = vst [vmem:[%s9686_s21 + $0x38] sm:$0xff] %v7823_v13  ;;  %v7300_v21 = vmul.f32 %v7263_v15, %v7263_v15  ;;  %7360 = vst [vmem:[%s7336_s16 + $0x48] sm:$0xff] (%p8441_p4), %v7359_v33 }
 0x33c   : > { %7271 = vadd.xlane.f32.xlu0 %v7270_v17  ;;  %7280 = vadd.xlane.f32.xlu1 %v7279_v18  ;;  %v7307_v22 = vadd.f32 %v7306_v16, %v7292_v19  ;;  %v7353_v30 = vld [vmem:[%s9686_s21 + $0x10] sm:$0xff] (%p8441_p4) }
 0x33d   : > { %v7316_v23 = vadd.f32 %v7315_v20, %v7300_v21  ;;  %7354 = vst [vmem:[%s7336_s16 + $0x10] sm:$0xff] (%p8441_p4), %v7353_v30  ;;  %v7361_v34 = vld [vmem:[%s9686_s21 + $0x30] sm:$0xff] (%p8441_p4) }
 0x33e   : > { %7362 = vst [vmem:[%s7336_s16 + $0x50] sm:$0xff] (%p8441_p4), %v7361_v34 }
 0x340   : > { %7308 = vadd.xlane.f32.xlu0 %v7307_v22  ;;  %v7355_v31 = vld [vmem:[%s9686_s21 + $0x18] sm:$0xff] (%p8441_p4) }
 0x341   : > { %7356 = vst [vmem:[%s7336_s16 + $0x18] sm:$0xff] (%p8441_p4), %v7355_v31 }
 0x342   : > { %v7363_v35 = vld [vmem:[%s9686_s21 + $0x38] sm:$0xff] (%p8441_p4) }
 0x343   : > { %7364 = vst [vmem:[%s7336_s16 + $0x58] sm:$0xff] (%p8441_p4), %v7363_v35 }
 0x344   : > { %7317 = vadd.xlane.f32.xlu0 %v7316_v23 }
 0x3c9   : > { %v7272_v24 = vpop.xlane.xlu0 %7271  ;;  %v7281_v25 = vpop.xlane.xlu1 %7280 }
 0x3ca   : > { %7283 = vst.msk [vmem:[%s366_s11] sm:$0xff] %vm3398_vm14, %v7272_v24  ;;  %7284 = vst.msk [vmem:[%s366_s11 + $0x8] sm:$0xff] %vm3398_vm14, %v7281_v25 }
 0x3cc   : > { %7333 = sbr.rel (!%p8441_p4) target bundleno = 979 (0x3d3), region = 44 }
 0x3cd   : > { %v7309_v26 = vpop.xlane.xlu0 %7308 }
 0x3ce   : > { %7320 = vst.msk [vmem:[%s366_s11] sm:$0xff] %vm7319_vm3, %v7309_v26 }
 0x3d1   : > { %v7318_v27 = vpop.xlane.xlu0 %7317 }
 0x3d2   : > { %7321 = vst.msk [vmem:[%s366_s11 + $0x8] sm:$0xff] %vm7319_vm3, %v7318_v27 }
 0x3d3 PF: > { %p14_p13 = scmp.ge.s32.totalorder %s8431_s25, 4   ;;  %s9785_s21 = smov %s8348_s22 }
 0x3d4   : > { %s9786_s22 = smov %s8439_s28  ;;  %s9787_s23 = smov %s8431_s25 }
 0x3d5   :  { %16 = sbr.rel (!%p14_p13) target bundleno = 2 (0x2), region = 140 }

// kernel: unet3d_convblock.6
= control target key start
LH: loop header
LB: loop body
LE: loop exit
PB: predicated region body
PF: predicated region fallthrough
CT: control target
= control target key end

     0   :  { %s8058_s21 = smov 0   ;;  %s8060_s22 = smov 0   ;;  %s9273_s0 = inlined_call_operand.vmem [shape: bf16[27,16,16], index: 0, kind: input, shape index: {}]   ;;  %s9274_s1 = inlined_call_operand.vmem [shape: bf16[16,2048], index: 1, kind: input, shape index: {}, may-alias: {1,2,3}]   ;;  %s9275_s2 = inlined_call_operand.vmem [shape: bf16[16,2048], index: 2, kind: input, shape index: {}, may-alias: {1,2,3}]   ;;  %s9276_s3 = inlined_call_operand.vmem [shape: bf16[16,2048], index: 3, kind: input, shape index: {}, may-alias: {1,2,3}]   ;;  %s9277_s4 = inlined_call_operand.vmem [shape: bf16[1,2048], index: 4, kind: input, shape index: {}]   ;;  %s9278_s5 = inlined_call_operand.vmem [shape: bf16[16,2048], index: 5, kind: output, shape index: {0}]   ;;  %s9279_s6 = inlined_call_operand.vmem [shape: f32[32,128], index: 6, kind: output, shape index: {1}]  }
   0x1   :  { %s8062_s23 = smov 0   ;;  %s8064_s24 = smov 0  }
   0x2   :  { %s8066_s25 = smov 0   ;;  %s8068_s26 = smov 0  }
   0x3   :  { %s8070_s27 = smov 0  }
   0x4 LB: > { %s8094_s28 = sadd.s32 4294967295, %s7994_s27   ;;  %s8097_s29 = sadd.s32 1, %s7994_s27   ;;  %s7994_s27 = sphi %s8070_s27, %s9308_s27   ;;  %s7990_s26 = sphi %s8068_s26, %s9307_s26   ;;  %s7986_s25 = sphi %s8066_s25, %s9306_s25   ;;  %s7982_s24 = sphi %s8064_s24, %s9305_s24   ;;  %s7978_s23 = sphi %s8062_s23, %s9304_s23   ;;  %s7974_s22 = sphi %s8060_s22, %s9303_s22   ;;  %s7970_s21 = sphi %s8058_s21, %s9302_s21  }
   0x5   : > { %p43_p0 = scmp.gt.s32.totalorder %s8094_s28, 0  ;;  %s7171_s30 = sadd.s32 4294967295, %s8097_s29 }
   0x6   : > { %p46_p1 = scmp.gt.s32.totalorder %s7171_s30, 0  ;;  %s51_s7 = sadd.s32 1, %s7990_s26 }
   0x7   : > { %s8103_s8 = scalar_select %p43_p0, %s8094_s28, 0 }
   0x8   : > { %s9310_s30 = smov (!%p46_p1, %s7171_s30), 0  ;;  %p58_p2 = scmp.ne.s32.totalorder %s7990_s26, %s7986_s25 }
   0x9   : > { %p59_p3 = scmp.eq.s32.totalorder %s7994_s27, 0  ;;  %s48_s9 = ssub.s32 %s8103_s8, %s9310_s30 }
   0xa   : > { %s74_s10 = ssub.s32 %s7994_s27, %s8097_s29  ;;  %p49_p4 = scmp.eq.s32.totalorder %s48_s9, 0 }
   0xb   : > { %p8113_p5 = por %p59_p3, %p58_p2  ;;  %p75_p6 = scmp.eq.s32.totalorder %s74_s10, 0 }
   0xc   : > { %s77_s12 = sadd.s32 1, %s7982_s24  ;;  %p84_p7 = scmp.ne.s32.totalorder %s7982_s24, %s7978_s23 }
   0xd   : > { %s8119_s13 = scalar_select %p49_p4, %s7990_s26, %s51_s7  }
   0xe   : > { %s8122_s14 = scalar_select %p75_p6, %s7982_s24, %s77_s12  }
   0xf   : > { %9281 = sst [smem:[#allocation6_spill]] %s8119_s13  ;;  %p101_p8 = scmp.lt.s32.totalorder %s8097_s29, 1 }
  0x10   : > { %s103_s15 = sadd.s32 1, %s8097_s29  ;;  %p8133_p9 = por %p84_p7, %p59_p3 }
  0x11   : > { %p104_p10 = scmp.lt.s32.totalorder %s103_s15, 1  ;;  %p116_p11 = scmp.ne.s32.totalorder %s7974_s22, %s7970_s21 }
  0x12   : > { %s8138_s17 = scalar_select %p101_p8, %s8097_s29, 1 }
  0x13   : > { %s9312_s15 = smov (!%p104_p10, %s103_s15), 1  ;;  %p172_p12 = scmp.eq.s32.totalorder %s8094_s28, 1 }
  0x14   : > { %s106_s18 = ssub.s32 %s8138_s17, %s9312_s15  ;;  %s109_s19 = sadd.s32 1, %s7974_s22 }
  0x15   : > { %p107_p13 = scmp.eq.s32.totalorder %s106_s18, 0  ;;  %p8147_p0 = por %p116_p11, %p59_p3 }
  0x16   : > { %p8154_p1 = por %p172_p12, %p84_p7  ;;  %p7173_p2 = scmp.ge.s32.totalorder %s7994_s27, 2 }
  0x17   : > { %s8159_s7 = scalar_select %p107_p13, %s7974_s22, %s109_s19  }
  0x18   : > { %223 = sbr.rel (%p7173_p2) target bundleno = 55 (0x37), region = 20 }
  0x1f   : > { %226 = sbr.rel (!%p8113_p5) target bundleno = 39 (0x27), region = 24  ;;  %s228_s9 = sand.u32 (%p8113_p5), 1, %s7990_s26  }
  0x20   : > { %s7402_s10 = sshll.u32 (%p8113_p5), %s8103_s8, 5  ;;  %s7174_s12 = sshll.u32 (%p8113_p5), %s228_s9, 6 }
  0x21   : > { %s236_s13 = scalar_lea.vmem (%p8113_p5), %s9274_s1, %s7402_s10  ;;  %s230_s19 = scalar_lea.vmem (%p8113_p5), [#allocation2], %s7174_s12 }
  0x22   : > { %v249_v0 = vld [vmem:[%s236_s13] sm:$0xff] (%p8113_p5)  ;;  %v251_v1 = vld [vmem:[%s236_s13 + $0x8] sm:$0xff] (%p8113_p5)  ;;  %v253_v2 = vld [vmem:[%s236_s13 + $0x10] sm:$0xff] (%p8113_p5) }
  0x23   : > { %250 = vst [vmem:[%s230_s19] sm:$0xff] (%p8113_p5), %v249_v0  ;;  %252 = vst [vmem:[%s230_s19 + $0x8] sm:$0xff] (%p8113_p5), %v251_v1  ;;  %v255_v3 = vld [vmem:[%s236_s13 + $0x18] sm:$0xff] (%p8113_p5)  ;;  %v257_v4 = vld [vmem:[%s236_s13 + $0x40] sm:$0xff] (%p8113_p5) }
  0x24   : > { %254 = vst [vmem:[%s230_s19 + $0x10] sm:$0xff] (%p8113_p5), %v253_v2  ;;  %v259_v5 = vld [vmem:[%s236_s13 + $0x48] sm:$0xff] (%p8113_p5)  ;;  %256 = vst [vmem:[%s230_s19 + $0x18] sm:$0xff] (%p8113_p5), %v255_v3  ;;  %v261_v6 = vld [vmem:[%s236_s13 + $0x50] sm:$0xff] (%p8113_p5) }
  0x25   : > { %258 = vst [vmem:[%s230_s19 + $0x20] sm:$0xff] (%p8113_p5), %v257_v4  ;;  %260 = vst [vmem:[%s230_s19 + $0x28] sm:$0xff] (%p8113_p5), %v259_v5  ;;  %v263_v7 = vld [vmem:[%s236_s13 + $0x58] sm:$0xff] (%p8113_p5) }
  0x26   : > { %262 = vst [vmem:[%s230_s19 + $0x30] sm:$0xff] %v261_v6  ;;  %264 = vst [vmem:[%s230_s19 + $0x38] sm:$0xff] %v263_v7 }
  0x27 PF: > { %270 = sbr.rel (!%p8133_p9) target bundleno = 47 (0x2f), region = 47  ;;  %s272_s8 = sand.u32 (%p8133_p9), 1, %s7982_s24  }
  0x28   : > { %s7403_s11 = sshll.u32 (%p8133_p9), %s7994_s27, 5  ;;  %s7178_s9 = sshll.u32 (%p8133_p9), %s272_s8, 6 }
  0x29   : > { %s277_s15 = scalar_lea.vmem (%p8133_p9), %s9275_s2, %s7403_s11  ;;  %s274_s18 = scalar_lea.vmem (%p8133_p9), [#allocation3], %s7178_s9 }
  0x2a   : > { %v290_v8 = vld [vmem:[%s277_s15] sm:$0xff] (%p8133_p9)  ;;  %v292_v9 = vld [vmem:[%s277_s15 + $0x8] sm:$0xff] (%p8133_p9)  ;;  %v294_v10 = vld [vmem:[%s277_s15 + $0x10] sm:$0xff] (%p8133_p9) }
  0x2b   : > { %291 = vst [vmem:[%s274_s18] sm:$0xff] (%p8133_p9), %v290_v8  ;;  %293 = vst [vmem:[%s274_s18 + $0x8] sm:$0xff] (%p8133_p9), %v292_v9  ;;  %v296_v11 = vld [vmem:[%s277_s15 + $0x18] sm:$0xff] (%p8133_p9)  ;;  %v298_v12 = vld [vmem:[%s277_s15 + $0x40] sm:$0xff] (%p8133_p9) }
  0x2c   : > { %295 = vst [vmem:[%s274_s18 + $0x10] sm:$0xff] (%p8133_p9), %v294_v10  ;;  %v300_v13 = vld [vmem:[%s277_s15 + $0x48] sm:$0xff] (%p8133_p9)  ;;  %297 = vst [vmem:[%s274_s18 + $0x18] sm:$0xff] (%p8133_p9), %v296_v11  ;;  %v302_v14 = vld [vmem:[%s277_s15 + $0x50] sm:$0xff] (%p8133_p9) }
  0x2d   : > { %299 = vst [vmem:[%s274_s18 + $0x20] sm:$0xff] (%p8133_p9), %v298_v12  ;;  %301 = vst [vmem:[%s274_s18 + $0x28] sm:$0xff] (%p8133_p9), %v300_v13  ;;  %v304_v15 = vld [vmem:[%s277_s15 + $0x58] sm:$0xff] (%p8133_p9) }
  0x2e   : > { %303 = vst [vmem:[%s274_s18 + $0x30] sm:$0xff] %v302_v14  ;;  %305 = vst [vmem:[%s274_s18 + $0x38] sm:$0xff] %v304_v15 }
  0x2f PF: > { %311 = sbr.rel (!%p8147_p0) target bundleno = 55 (0x37), region = 70  ;;  %s313_s13 = sand.u32 (%p8147_p0), 1, %s7974_s22  }
  0x30   : > { %s7404_s16 = sshll.u32 (%p8147_p0), %s8138_s17, 5  ;;  %s7181_s19 = sshll.u32 (%p8147_p0), %s313_s13, 6 }
  0x31   : > { %s321_s9 = scalar_lea.vmem (%p8147_p0), %s9276_s3, %s7404_s16  ;;  %s315_s10 = scalar_lea.vmem (%p8147_p0), [#allocation4], %s7181_s19 }
  0x32   : > { %v334_v16 = vld [vmem:[%s321_s9] sm:$0xff] (%p8147_p0)  ;;  %v336_v17 = vld [vmem:[%s321_s9 + $0x8] sm:$0xff] (%p8147_p0)  ;;  %v338_v18 = vld [vmem:[%s321_s9 + $0x10] sm:$0xff] (%p8147_p0) }
  0x33   : > { %335 = vst [vmem:[%s315_s10] sm:$0xff] (%p8147_p0), %v334_v16  ;;  %337 = vst [vmem:[%s315_s10 + $0x8] sm:$0xff] (%p8147_p0), %v336_v17  ;;  %v340_v19 = vld [vmem:[%s321_s9 + $0x18] sm:$0xff] (%p8147_p0)  ;;  %v342_v20 = vld [vmem:[%s321_s9 + $0x40] sm:$0xff] (%p8147_p0) }
  0x34   : > { %339 = vst [vmem:[%s315_s10 + $0x10] sm:$0xff] (%p8147_p0), %v338_v18  ;;  %v344_v21 = vld [vmem:[%s321_s9 + $0x48] sm:$0xff] (%p8147_p0)  ;;  %341 = vst [vmem:[%s315_s10 + $0x18] sm:$0xff] (%p8147_p0), %v340_v19  ;;  %v346_v22 = vld [vmem:[%s321_s9 + $0x50] sm:$0xff] (%p8147_p0) }
  0x35   : > { %343 = vst [vmem:[%s315_s10 + $0x20] sm:$0xff] (%p8147_p0), %v342_v20  ;;  %345 = vst [vmem:[%s315_s10 + $0x28] sm:$0xff] (%p8147_p0), %v344_v21  ;;  %v348_v23 = vld [vmem:[%s321_s9 + $0x58] sm:$0xff] (%p8147_p0) }
  0x36   : > { %347 = vst [vmem:[%s315_s10 + $0x30] sm:$0xff] %v346_v22  ;;  %349 = vst [vmem:[%s315_s10 + $0x38] sm:$0xff] %v348_v23 }
  0x37 PF: > { %p7184_p3 = scmp.ge.s32.totalorder %s7994_s27, 1  ;;  %p362_p4 = scmp.lt.s32.totalorder %s7994_s27, 3 }
  0x39   : > { %p363_p5 = pnand %p7184_p3, %p362_p4 }
  0x3a   : > { %s376_s17 = sand.u32 (!%p363_p5), 1, %s7978_s23   ;;  %s369_s12 = sand.u32 (!%p363_p5), 1, %s7986_s25   ;;  %v7997_v34 = vmov (!%p363_p5), 0   ;;  %vm542_vm0 = vcmask (!%p363_p5), 900096   ;;  %v7913_v51 = vld [vmem:[%s9273_s0 + $0x8] sm:$0xff] (!%p363_p5)   ;;  %vm559_vm1 = vcmask (!%p363_p5), 130048  }
  0x3b   : > { %366 = sbr.rel (%p363_p5) target bundleno = 1020 (0x3fc), region = 97  ;;  %s8186_s20 = sshll.u32 (!%p363_p5), %s376_s17, 6  ;;  %595 = vmatprep.mubr.bf16.mxu0 (!%p363_p5), %v7997_v34  ;;  %638 = vmatprep.mubr.bf16.mxu1 (!%p363_p5), %v7997_v34  ;;  %vm758_vm2 = vcmask (!%p363_p5), 908288   ;;  %v7914_v4 = vld [vmem:[%s9273_s0] sm:$0xff] (!%p363_p5)   ;;  %vm976_vm3 = vcmask (!%p363_p5), 891904   ;;  %v7915_v22 = vld [vmem:[%s9273_s0 + $0x10] sm:$0xff] (!%p363_p5)  }
  0x3c   : > { %s7185_s15 = sshll.u32 (!%p363_p5), %s369_s12, 6  ;;  %s378_s18 = scalar_lea.vmem (!%p363_p5), [#allocation3], %s8186_s20  ;;  %vm1210_vm4 = vcmask (!%p363_p5), 826368   ;;  %vm1444_vm5 = vcmask (!%p363_p5), 818176   ;;  %vm1678_vm6 = vcmask (!%p363_p5), 809984   ;;  %vm1912_vm7 = vcmask (!%p363_p5), 744448  }
  0x3d   : > { %v454_v24 = vld [vmem:[%s378_s18] sm:$0xff] (!%p363_p5)  ;;  %v455_v26 = vld [vmem:[%s378_s18 + $0x8] sm:$0xff] (!%p363_p5)  ;;  %s371_s13 = scalar_lea.vmem (!%p363_p5), [#allocation2], %s7185_s15  ;;  %s7996_s27 = smov (!%p363_p5), 110   ;;  %v456_v33 = vld [vmem:[%s378_s18 + $0x10] sm:$0xff] (!%p363_p5)  ;;  %vm2146_vm8 = vcmask (!%p363_p5), 736256  }
  0x3e   : > { %v458_v25 = vld [vmem:[%s378_s18 + $0x20] sm:$0xff] (!%p363_p5)  ;;  %v452_v28 = vld [vmem:[%s371_s13 + $0x18] sm:$0xff] (!%p363_p5)  ;;  %v459_v30 = vld [vmem:[%s378_s18 + $0x28] sm:$0xff] (!%p363_p5)  ;;  %s7998_s23 = smov (!%p363_p5), 111   ;;  %s7999_s25 = smov (!%p363_p5), 109   ;;  %vm2380_vm9 = vcmask (!%p363_p5), 728064  }
  0x3f   : > { %v8190_v27 = vcombine.low (!%p363_p5), %v454_v24, %v458_v25  ;;  %v453_v29 = vld [vmem:[%s371_s13 + $0x38] sm:$0xff] (!%p363_p5)  ;;  %v8195_v32 = vcombine.high (!%p363_p5), %v454_v24, %v458_v25  ;;  %v8199_v35 = vcombine.low (!%p363_p5), %v455_v26, %v459_v30  ;;  %v460_v36 = vld [vmem:[%s378_s18 + $0x30] sm:$0xff] (!%p363_p5)  ;;  %v8203_v37 = vcombine.high (!%p363_p5), %v455_v26, %v459_v30  ;;  %s8000_s16 = smov (!%p363_p5), 101   ;;  %s8001_s19 = smov (!%p363_p5), 100  }
  0x40   : > { %v8192_v31 = vcombine.high (!%p363_p5), %v452_v28, %v453_v29  ;;  %v457_v38 = vld [vmem:[%s378_s18 + $0x18] sm:$0xff] (!%p363_p5)  ;;  %v8206_v39 = vcombine.low (!%p363_p5), %v456_v33, %v460_v36  ;;  %v8209_v41 = vcombine.high (!%p363_p5), %v456_v33, %v460_v36  ;;  %s8002_s8 = smov (!%p363_p5), 99   ;;  %s8003_s11 = smov (!%p363_p5), 91   ;;  %vm2614_vm10 = vcmask (!%p363_p5), 89088  }
  0x41   : > { %526 = vrot.lane.b32.xlu0 (!%p363_p5), %v8190_v27, %s7996_s27  ;;  %v461_v40 = vld [vmem:[%s378_s18 + $0x38] sm:$0xff] (!%p363_p5)  ;;  %s8004_s17 = smov (!%p363_p5), 90   ;;  %s8005_s18 = smov (!%p363_p5), 89   ;;  %vm2848_vm11 = vcmask (!%p363_p5), 80896   ;;  %vm3082_vm12 = vcmask (!%p363_p5), 72704   ;;  %vm3316_vm13 = vcmask (!%p363_p5), 7168  }
  0x42   : > { %524 = vrot.lane.b32.xlu1 %v8192_v31, %s7996_s27  ;;  %v8212_v42 = vcombine.low %v457_v38, %v461_v40  ;;  %v8215_v43 = vcombine.high %v457_v38, %v461_v40  ;;  %s8008_s9 = smov 9   ;;  %s8009_s12 = smov 1   ;;  %vm3749_vm14 = vcmask 1039360   ;;  %vm3983_vm15 = vcmask 973824  }
  0x43   : > { %s8010_s13 = smov 127  }
  0x45   : > { %528 = vrot.lane.b32.xlu0 %v8195_v32, %s7996_s27 }
  0x46   : > { %530 = vrot.lane.b32.xlu1 %v8199_v35, %s7996_s27 }
  0x49   : > { %532 = vrot.lane.b32.xlu0 %v8203_v37, %s7996_s27 }
  0x4a   : > { %534 = vrot.lane.b32.xlu1 %v8206_v39, %s7996_s27 }
  0x4d   : > { %536 = vrot.lane.b32.xlu0 %v8209_v41, %s7996_s27 }
  0x4e   : > { %538 = vrot.lane.b32.xlu1 %v8212_v42, %s7996_s27 }
  0x51   : > { %540 = vrot.lane.b32.xlu0 %v8215_v43, %s7996_s27  ;;  %s383_s27 = sand.u32 1, %s7970_s21  }
  0x52   : > { %742 = vrot.lane.b32.xlu1 %v8190_v27, %s7998_s23 }
  0x55   : > { %744 = vrot.lane.b32.xlu0 %v8195_v32, %s7998_s23 }
  0x56   : > { %740 = vrot.lane.b32.xlu1 %v8192_v31, %s7998_s23 }
  0x59   : > { %746 = vrot.lane.b32.xlu0 %v8199_v35, %s7998_s23 }
  0x5a   : > { %748 = vrot.lane.b32.xlu1 %v8203_v37, %s7998_s23 }
  0x5d   : > { %750 = vrot.lane.b32.xlu0 %v8206_v39, %s7998_s23 }
  0x5e   : > { %752 = vrot.lane.b32.xlu1 %v8209_v41, %s7998_s23 }
  0x61   : > { %754 = vrot.lane.b32.xlu0 %v8212_v42, %s7998_s23 }
  0x62   : > { %756 = vrot.lane.b32.xlu1 %v8215_v43, %s7998_s23  ;;  %s8006_s23 = smov 11  }
  0x65   : > { %960 = vrot.lane.b32.xlu0 %v8190_v27, %s7999_s25 }
  0x66   : > { %962 = vrot.lane.b32.xlu1 %v8195_v32, %s7999_s25 }
  0x69   : > { %958 = vrot.lane.b32.xlu0 %v8192_v31, %s7999_s25 }
  0x6a   : > { %964 = vrot.lane.b32.xlu1 %v8199_v35, %s7999_s25 }
  0x6d   : > { %966 = vrot.lane.b32.xlu0 %v8203_v37, %s7999_s25 }
  0x6e   : > { %968 = vrot.lane.b32.xlu1 %v8206_v39, %s7999_s25 }
  0x71   : > { %970 = vrot.lane.b32.xlu0 %v8209_v41, %s7999_s25 }
  0x72   : > { %972 = vrot.lane.b32.xlu1 %v8212_v42, %s7999_s25 }
  0x75   : > { %974 = vrot.lane.b32.xlu0 %v8215_v43, %s7999_s25 }
  0x76   : > { %1194 = vrot.lane.b32.xlu1 %v8190_v27, %s8000_s16 }
  0x79   : > { %1196 = vrot.lane.b32.xlu0 %v8195_v32, %s8000_s16 }
  0x7a   : > { %1192 = vrot.lane.b32.xlu1 %v8192_v31, %s8000_s16 }
  0x7d   : > { %1198 = vrot.lane.b32.xlu0 %v8199_v35, %s8000_s16 }
  0x7e   : > { %1200 = vrot.lane.b32.xlu1 %v8203_v37, %s8000_s16 }
  0x81   : > { %1202 = vrot.lane.b32.xlu0 %v8206_v39, %s8000_s16 }
  0x82   : > { %1204 = vrot.lane.b32.xlu1 %v8209_v41, %s8000_s16 }
  0x85   : > { %1206 = vrot.lane.b32.xlu0 %v8212_v42, %s8000_s16 }
  0x86   : > { %1208 = vrot.lane.b32.xlu1 %v8215_v43, %s8000_s16  ;;  %s7413_s16 = sshll.u32 (%p8154_p1), %s8094_s28, 5 }
  0x89   : > { %1428 = vrot.lane.b32.xlu0 %v8190_v27, %s8001_s19 }
  0x8a   : > { %1430 = vrot.lane.b32.xlu1 %v8195_v32, %s8001_s19 }
  0x8d   : > { %1426 = vrot.lane.b32.xlu0 %v8192_v31, %s8001_s19 }
  0x8e   : > { %1432 = vrot.lane.b32.xlu1 %v8199_v35, %s8001_s19 }
  0x91   : > { %1434 = vrot.lane.b32.xlu0 %v8203_v37, %s8001_s19 }
  0x92   : > { %1436 = vrot.lane.b32.xlu1 %v8206_v39, %s8001_s19 }
  0x95   : > { %1438 = vrot.lane.b32.xlu0 %v8209_v41, %s8001_s19 }
  0x96   : > { %1440 = vrot.lane.b32.xlu1 %v8212_v42, %s8001_s19 }
  0x99   : > { %1442 = vrot.lane.b32.xlu0 %v8215_v43, %s8001_s19  ;;  %s8007_s19 = smov 10  }
  0x9a   : > { %1662 = vrot.lane.b32.xlu1 %v8190_v27, %s8002_s8 }
  0x9d   : > { %1664 = vrot.lane.b32.xlu0 %v8195_v32, %s8002_s8 }
  0x9e   : > { %1660 = vrot.lane.b32.xlu1 %v8192_v31, %s8002_s8 }
  0xa1   : > { %1666 = vrot.lane.b32.xlu0 %v8199_v35, %s8002_s8 }
  0xa2   : > { %1668 = vrot.lane.b32.xlu1 %v8203_v37, %s8002_s8 }
  0xa5   : > { %1670 = vrot.lane.b32.xlu0 %v8206_v39, %s8002_s8 }
  0xa6   : > { %1672 = vrot.lane.b32.xlu1 %v8209_v41, %s8002_s8 }
  0xa9   : > { %1674 = vrot.lane.b32.xlu0 %v8212_v42, %s8002_s8 }
  0xaa   : > { %1676 = vrot.lane.b32.xlu1 %v8215_v43, %s8002_s8 }
  0xad   : > { %1896 = vrot.lane.b32.xlu0 %v8190_v27, %s8003_s11 }
  0xae   : > { %1898 = vrot.lane.b32.xlu1 %v8195_v32, %s8003_s11 }
  0xb1   : > { %1894 = vrot.lane.b32.xlu0 %v8192_v31, %s8003_s11 }
  0xb2   : > { %1900 = vrot.lane.b32.xlu1 %v8199_v35, %s8003_s11 }
  0xb3   : > { %v527_v44 = vpop.permute.xlu0 %526 }
  0xb4   : > { %v525_v45 = vpop.permute.xlu1 %524 }
  0xb5   : > { %1902 = vrot.lane.b32.xlu0 %v8203_v37, %s8003_s11  ;;  %v543_v49 = vsel %vm542_vm0, %v525_v45, %v527_v44 }
  0xb6   : > { %1904 = vrot.lane.b32.xlu1 %v8206_v39, %s8003_s11 }
  0xb7   : > { %v529_v46 = vpop.permute.xlu0 %528 }
  0xb8   : > { %v531_v47 = vpop.permute.xlu1 %530  ;;  %v544_v48 = vsel %vm542_vm0, %v527_v44, %v529_v46 }
  0xb9   : > { %563 = vmatprep.subr.bf16.mxu0 %v544_v48  ;;  %1906 = vrot.lane.b32.xlu0 %v8209_v41, %s8003_s11  ;;  %v545_v54 = vsel %vm542_vm0, %v529_v46, %v531_v47 }
  0xba   : > { %1908 = vrot.lane.b32.xlu1 %v8212_v42, %s8003_s11  ;;  %564 = vmatpush1.bf16.msra.mxu0 %v543_v49 }
  0xbb   : > { %v533_v50 = vpop.permute.xlu0 %532 }
  0xbc   : > { %v535_v52 = vpop.permute.xlu1 %534  ;;  %v546_v53 = vsel %vm542_vm0, %v531_v47, %v533_v50 }
  0xbd   : > { %1910 = vrot.lane.b32.xlu0 %v8215_v43, %s8003_s11  ;;  %606 = vmatprep.subr.bf16.mxu1 %v546_v53  ;;  %v547_v58 = vsel %vm542_vm0, %v533_v50, %v535_v52  ;;  %v7916_v50 = vld [vmem:[%s9273_s0 + $0x18] sm:$0xff]   ;;  %s7006_s11 = scalar_lea.vmem (%p8154_p1), %s9278_s5, %s7413_s16 }
  0xbe   : > { %2130 = vrot.lane.b32.xlu1 %v8190_v27, %s8004_s17  ;;  %607 = vmatpush1.bf16.msra.mxu1 %v545_v54 }
  0xbf   : > { %v537_v55 = vpop.permute.xlu0 %536  ;;  %7205 = vmatmul.mubr.msk.bf16.vlgmr.msra.gmra.mrb[0].mxu0 %vm559_vm1, %v7913_v51 }
  0xc0   : > { %v539_v56 = vpop.permute.xlu1 %538  ;;  %v548_v57 = vsel %vm542_vm0, %v535_v52, %v537_v55  ;;  %681 = vmatprep.mubr.bf16.mxu0 %v7997_v34 }
  0xc1   : > { %2132 = vrot.lane.b32.xlu0 %v8195_v32, %s8004_s17  ;;  %649 = vmatprep.subr.bf16.mxu0 %v548_v57  ;;  %v549_v62 = vsel %vm542_vm0, %v537_v55, %v539_v56 }
  0xc2   : > { %2128 = vrot.lane.b32.xlu1 %v8192_v31, %s8004_s17  ;;  %650 = vmatpush1.bf16.msra.mxu0 %v547_v58 }
  0xc3   : > { %v541_v59 = vpop.permute.xlu0 %540  ;;  %7206 = vmatmul.mubr.msk.bf16.vlgmr.msra.gmra.mrb[0].mxu1 %vm559_vm1, %v7913_v51 }
  0xc4   : > { %v743_v60 = vpop.permute.xlu1 %742  ;;  %v550_v61 = vsel %vm542_vm0, %v539_v56, %v541_v59  ;;  %724 = vmatprep.mubr.bf16.mxu1 %v7997_v34  ;;  %vm4217_vm0 = vcmask 965632  }
  0xc5   : > { %2134 = vrot.lane.b32.xlu0 %v8199_v35, %s8004_s17  ;;  %692 = vmatprep.subr.bf16.mxu1 %v550_v61 }
  0xc6   : > { %2136 = vrot.lane.b32.xlu1 %v8203_v37, %s8004_s17  ;;  %693 = vmatpush1.bf16.msra.mxu1 %v549_v62 }
  0xc7   : > { %v745_v63 = vpop.permute.xlu0 %744  ;;  %7207 = vmatmul.mubr.msk.bf16.vlgmr.msra.gmra.mrb[4].mxu0 %vm559_vm1, %v7913_v51 }
  0xc8   : > { %v741_v0 = vpop.permute.xlu1 %740  ;;  %v760_v1 = vsel %vm758_vm2, %v743_v60, %v745_v63  ;;  %810 = vmatprep.mubr.bf16.mxu0 %v7997_v34 }
  0xc9   : > { %v759_v2 = vsel %vm758_vm2, %v741_v0, %v743_v60  ;;  %2138 = vrot.lane.b32.xlu0 %v8206_v39, %s8004_s17  ;;  %778 = vmatprep.subr.bf16.mxu0 %v760_v1 }
  0xca   : > { %2140 = vrot.lane.b32.xlu1 %v8209_v41, %s8004_s17  ;;  %779 = vmatpush1.bf16.msra.mxu0 %v759_v2 }
  0xcb   : > { %v747_v3 = vpop.permute.xlu0 %746  ;;  %7208 = vmatmul.mubr.msk.bf16.vlgmr.msra.gmra.mrb[4].mxu1 %vm559_vm1, %v7913_v51 }
  0xcc   : > { %v749_v5 = vpop.permute.xlu1 %748  ;;  %v761_v6 = vsel %vm758_vm2, %v745_v63, %v747_v3  ;;  %853 = vmatprep.mubr.bf16.mxu1 %v7997_v34 }
  0xcd   : > { %2142 = vrot.lane.b32.xlu0 %v8212_v42, %s8004_s17  ;;  %v762_v7 = vsel %vm758_vm2, %v747_v3, %v749_v5 }
  0xce   : > { %2144 = vrot.lane.b32.xlu1 %v8215_v43, %s8004_s17  ;;  %821 = vmatprep.subr.bf16.mxu1 %v762_v7  ;;  %s7189_s17 = sshll.u32 %s8094_s28, 3 }
  0xcf   : > { %822 = vmatpush1.bf16.msra.mxu1 %v761_v6  ;;  %v751_v8 = vpop.permute.xlu0 %750  ;;  %7210 = vmatmul.mubr.msk.bf16.vlgmr.msra.gmra.mrb[0].mxu0 %vm559_vm1, %v7914_v4  ;;  %p438_p6 = scmp.lt.s32.totalorder %s7189_s17, 15 }
  0xd0   : > { %v753_v9 = vpop.permute.xlu1 %752  ;;  %v763_v10 = vsel %vm758_vm2, %v749_v5, %v751_v8  ;;  %896 = vmatprep.mubr.bf16.mxu0 %v7997_v34 }
  0xd1   : > { %2364 = vrot.lane.b32.xlu0 %v8190_v27, %s8005_s18  ;;  %v764_v11 = vsel %vm758_vm2, %v751_v8, %v753_v9  ;;  %s9314_s17 = smov (!%p438_p6, %s7189_s17), 15 }
  0xd2   : > { %2366 = vrot.lane.b32.xlu1 %v8195_v32, %s8005_s18  ;;  %864 = vmatprep.subr.bf16.mxu0 %v764_v11 }
  0xd3   : > { %865 = vmatpush1.bf16.msra.mxu0 %v763_v10  ;;  %v755_v12 = vpop.permute.xlu0 %754  ;;  %7211 = vmatmul.mubr.msk.bf16.vlgmr.msra.gmra.mrb[0].mxu1 %vm559_vm1, %v7914_v4 }
  0xd4   : > { %v757_v13 = vpop.permute.xlu1 %756  ;;  %v765_v14 = vsel %vm758_vm2, %v753_v9, %v755_v12  ;;  %939 = vmatprep.mubr.bf16.mxu1 %v7997_v34 }
  0xd5   : > { %2362 = vrot.lane.b32.xlu0 %v8192_v31, %s8005_s18  ;;  %v766_v15 = vsel %vm758_vm2, %v755_v12, %v757_v13  ;;  %vm4451_vm2 = vcmask 957440  }
  0xd6   : > { %2368 = vrot.lane.b32.xlu1 %v8199_v35, %s8005_s18  ;;  %907 = vmatprep.subr.bf16.mxu1 %v766_v15 }
  0xd7   : > { %908 = vmatpush1.bf16.msra.mxu1 %v765_v14  ;;  %v961_v16 = vpop.permute.xlu0 %960  ;;  %7212 = vmatmul.mubr.msk.bf16.vlgmr.msra.gmra.mrb[4].mxu0 %vm559_vm1, %v7914_v4 }
  0xd8   : > { %v963_v17 = vpop.permute.xlu1 %962  ;;  %1028 = vmatprep.mubr.bf16.mxu0 %v7997_v34 }
  0xd9   : > { %2370 = vrot.lane.b32.xlu0 %v8203_v37, %s8005_s18  ;;  %v978_v18 = vsel %vm976_vm3, %v961_v16, %v963_v17 }
  0xda   : > { %2372 = vrot.lane.b32.xlu1 %v8206_v39, %s8005_s18  ;;  %996 = vmatprep.subr.bf16.mxu0 %v978_v18 }
  0xdb   : > { %v959_v19 = vpop.permute.xlu0 %958  ;;  %7213 = vmatmul.mubr.msk.bf16.vlgmr.msra.gmra.mrb[4].mxu1 %vm559_vm1, %v7914_v4  ;;  %v7917_v4 = vld [vmem:[%s9273_s0 + $0x20] sm:$0xff]  }
  0xdc   : > { %v977_v20 = vsel %vm976_vm3, %v959_v19, %v961_v16  ;;  %v965_v21 = vpop.permute.xlu1 %964  ;;  %1071 = vmatprep.mubr.bf16.mxu1 %v7997_v34 }
  0xdd   : > { %2374 = vrot.lane.b32.xlu0 %v8209_v41, %s8005_s18  ;;  %997 = vmatpush1.bf16.msra.mxu0 %v977_v20  ;;  %v979_v26 = vsel %vm976_vm3, %v963_v17, %v965_v21 }
  0xde   : > { %2376 = vrot.lane.b32.xlu1 %v8212_v42, %s8005_s18 }
  0xdf   : > { %v967_v23 = vpop.permute.xlu0 %966 }
  0xe0   : > { %v969_v24 = vpop.permute.xlu1 %968  ;;  %v980_v25 = vsel %vm976_vm3, %v965_v21, %v967_v23  ;;  %7217 = vmatmul.mubr.msk.bf16.vlgmr.msra.gmra.mrb[0].mxu0 %vm559_vm1, %v7915_v22 }
  0xe1   : > { %2378 = vrot.lane.b32.xlu0 %v8215_v43, %s8005_s18  ;;  %1039 = vmatprep.subr.bf16.mxu1 %v980_v25  ;;  %v981_v33 = vsel %vm976_vm3, %v967_v23, %v969_v24  ;;  %s440_s18 = scalar_lea.vmem %s9277_s4, %s9314_s17 }
  0xe2   : > { %2598 = vrot.lane.b32.xlu1 %v8190_v27, %s8006_s23  ;;  %1040 = vmatpush1.bf16.msra.mxu1 %v979_v26 }
  0xe3   : > { %v971_v28 = vpop.permute.xlu0 %970  ;;  %1114 = vmatprep.mubr.bf16.mxu0 %v7997_v34 }
  0xe4   : > { %v973_v29 = vpop.permute.xlu1 %972  ;;  %v982_v30 = vsel %vm976_vm3, %v969_v24, %v971_v28 }
  0xe5   : > { %2600 = vrot.lane.b32.xlu0 %v8195_v32, %s8006_s23  ;;  %1082 = vmatprep.subr.bf16.mxu0 %v982_v30  ;;  %v983_v44 = vsel %vm976_vm3, %v971_v28, %v973_v29 }
  0xe6   : > { %2596 = vrot.lane.b32.xlu1 %v8192_v31, %s8006_s23  ;;  %1083 = vmatpush1.bf16.msra.mxu0 %v981_v33 }
  0xe7   : > { %v975_v36 = vpop.permute.xlu0 %974  ;;  %7218 = vmatmul.mubr.msk.bf16.vlgmr.msra.gmra.mrb[0].mxu1 %vm559_vm1, %v7915_v22 }
  0xe8   : > { %v1195_v38 = vpop.permute.xlu1 %1194  ;;  %v984_v40 = vsel %vm976_vm3, %v973_v29, %v975_v36  ;;  %1157 = vmatprep.mubr.bf16.mxu1 %v7997_v34  ;;  %vm4685_vm3 = vcmask 318464  }
  0xe9   : > { %2602 = vrot.lane.b32.xlu0 %v8199_v35, %s8006_s23  ;;  %1125 = vmatprep.subr.bf16.mxu1 %v984_v40 }
  0xea   : > { %2604 = vrot.lane.b32.xlu1 %v8203_v37, %s8006_s23  ;;  %1126 = vmatpush1.bf16.msra.mxu1 %v983_v44 }
  0xeb   : > { %v1197_v45 = vpop.permute.xlu0 %1196  ;;  %7219 = vmatmul.mubr.msk.bf16.vlgmr.msra.gmra.mrb[4].mxu0 %vm559_vm1, %v7915_v22 }
  0xec   : > { %v1193_v46 = vpop.permute.xlu1 %1192  ;;  %v1212_v47 = vsel %vm1210_vm4, %v1195_v38, %v1197_v45  ;;  %1262 = vmatprep.mubr.bf16.mxu0 %v7997_v34 }
  0xed   : > { %v1211_v48 = vsel %vm1210_vm4, %v1193_v46, %v1195_v38  ;;  %2606 = vrot.lane.b32.xlu0 %v8206_v39, %s8006_s23  ;;  %1230 = vmatprep.subr.bf16.mxu0 %v1212_v47 }
  0xee   : > { %2608 = vrot.lane.b32.xlu1 %v8209_v41, %s8006_s23  ;;  %1231 = vmatpush1.bf16.msra.mxu0 %v1211_v48 }
  0xef   : > { %v1199_v49 = vpop.permute.xlu0 %1198  ;;  %7220 = vmatmul.mubr.msk.bf16.vlgmr.msra.gmra.mrb[4].mxu1 %vm559_vm1, %v7915_v22  ;;  %v7918_v22 = vld [vmem:[%s9273_s0 + $0x28] sm:$0xff]  }
  0xf0   : > { %v1201_v51 = vpop.permute.xlu1 %1200  ;;  %v1213_v52 = vsel %vm1210_vm4, %v1197_v45, %v1199_v49  ;;  %1305 = vmatprep.mubr.bf16.mxu1 %v7997_v34 }
  0xf1   : > { %2610 = vrot.lane.b32.xlu0 %v8212_v42, %s8006_s23  ;;  %v1214_v53 = vsel %vm1210_vm4, %v1199_v49, %v1201_v51  ;;  %v7919_v49 = vld [vmem:[%s9273_s0 + $0x30] sm:$0xff]  }
  0xf2   : > { %2612 = vrot.lane.b32.xlu1 %v8215_v43, %s8006_s23  ;;  %1273 = vmatprep.subr.bf16.mxu1 %v1214_v53  ;;  %s7187_s23 = sshll.u32 %s383_s27, 6 }
  0xf3   : > { %1274 = vmatpush1.bf16.msra.mxu1 %v1213_v52  ;;  %v1203_v54 = vpop.permute.xlu0 %1202  ;;  %7224 = vmatmul.mubr.msk.bf16.vlgmr.msra.gmra.mrb[0].mxu0 %vm559_vm1, %v7916_v50  ;;  %s385_s21 = scalar_lea.vmem [#allocation4], %s7187_s23 }
  0xf4   : > { %v1205_v55 = vpop.permute.xlu1 %1204  ;;  %v1215_v56 = vsel %vm1210_vm4, %v1201_v51, %v1203_v54  ;;  %1348 = vmatprep.mubr.bf16.mxu0 %v7997_v34 }
  0xf5   : > { %2832 = vrot.lane.b32.xlu0 %v8190_v27, %s8007_s19  ;;  %v1216_v57 = vsel %vm1210_vm4, %v1203_v54, %v1205_v55 }
  0xf6   : > { %2834 = vrot.lane.b32.xlu1 %v8195_v32, %s8007_s19  ;;  %1316 = vmatprep.subr.bf16.mxu0 %v1216_v57 }
  0xf7   : > { %1317 = vmatpush1.bf16.msra.mxu0 %v1215_v56  ;;  %v1207_v58 = vpop.permute.xlu0 %1206  ;;  %7225 = vmatmul.mubr.msk.bf16.vlgmr.msra.gmra.mrb[0].mxu1 %vm559_vm1, %v7916_v50 }
  0xf8   : > { %v1209_v59 = vpop.permute.xlu1 %1208  ;;  %v1217_v60 = vsel %vm1210_vm4, %v1205_v55, %v1207_v58  ;;  %1391 = vmatprep.mubr.bf16.mxu1 %v7997_v34 }
  0xf9   : > { %2830 = vrot.lane.b32.xlu0 %v8192_v31, %s8007_s19  ;;  %v1218_v61 = vsel %vm1210_vm4, %v1207_v58, %v1209_v59  ;;  %vm4919_vm4 = vcmask 310272  }
  0xfa   : > { %2836 = vrot.lane.b32.xlu1 %v8199_v35, %s8007_s19  ;;  %1359 = vmatprep.subr.bf16.mxu1 %v1218_v61 }
  0xfb   : > { %1360 = vmatpush1.bf16.msra.mxu1 %v1217_v60  ;;  %v1429_v62 = vpop.permute.xlu0 %1428  ;;  %7226 = vmatmul.mubr.msk.bf16.vlgmr.msra.gmra.mrb[4].mxu0 %vm559_vm1, %v7916_v50 }
  0xfc   : > { %v1431_v63 = vpop.permute.xlu1 %1430  ;;  %1496 = vmatprep.mubr.bf16.mxu0 %v7997_v34 }
  0xfd   : > { %2838 = vrot.lane.b32.xlu0 %v8203_v37, %s8007_s19  ;;  %v1446_v0 = vsel %vm1444_vm5, %v1429_v62, %v1431_v63 }
  0xfe   : > { %2840 = vrot.lane.b32.xlu1 %v8206_v39, %s8007_s19  ;;  %1464 = vmatprep.subr.bf16.mxu0 %v1446_v0  ;;  %v463_v0 = vld [vmem:[%s385_s21 + $0x20] sm:$0xff] }
  0xff   : > { %v1427_v1 = vpop.permute.xlu0 %1426  ;;  %7227 = vmatmul.mubr.msk.bf16.vlgmr.msra.gmra.mrb[4].mxu1 %vm559_vm1, %v7916_v50 }
 0x100   : > { %v1445_v2 = vsel %vm1444_vm5, %v1427_v1, %v1429_v62  ;;  %v1433_v3 = vpop.permute.xlu1 %1432  ;;  %1539 = vmatprep.mubr.bf16.mxu1 %v7997_v34 }
 0x101   : > { %2842 = vrot.lane.b32.xlu0 %v8209_v41, %s8007_s19  ;;  %1465 = vmatpush1.bf16.msra.mxu0 %v1445_v2  ;;  %v1447_v8 = vsel %vm1444_vm5, %v1431_v63, %v1433_v3  ;;  %v462_v63 = vld [vmem:[%s385_s21] sm:$0xff]  ;;  %s8015_s21 = smov 38  }
 0x102   : > { %2844 = vrot.lane.b32.xlu1 %v8212_v42, %s8007_s19 }
 0x103   : > { %v1435_v5 = vpop.permute.xlu0 %1434 }
 0x104   : > { %v1437_v6 = vpop.permute.xlu1 %1436  ;;  %v1448_v7 = vsel %vm1444_vm5, %v1433_v3, %v1435_v5  ;;  %7231 = vmatmul.mubr.msk.bf16.vlgmr.msra.gmra.mrb[0].mxu0 %vm559_vm1, %v7917_v4 }
 0x105   : > { %2846 = vrot.lane.b32.xlu0 %v8215_v43, %s8007_s19  ;;  %1507 = vmatprep.subr.bf16.mxu1 %v1448_v7  ;;  %v1449_v12 = vsel %vm1444_vm5, %v1435_v5, %v1437_v6  ;;  %s8011_s19 = smov 119  }
 0x106   : > { %3066 = vrot.lane.b32.xlu1 %v8190_v27, %s8008_s9  ;;  %1508 = vmatpush1.bf16.msra.mxu1 %v1447_v8 }
 0x107   : > { %v1439_v9 = vpop.permute.xlu0 %1438  ;;  %1582 = vmatprep.mubr.bf16.mxu0 %v7997_v34 }
 0x108   : > { %v1441_v10 = vpop.permute.xlu1 %1440  ;;  %v1450_v11 = vsel %vm1444_vm5, %v1437_v6, %v1439_v9  ;;  %v7920_v6 = vld [vmem:[%s9273_s0 + $0x38] sm:$0xff]  }
 0x109   : > { %3068 = vrot.lane.b32.xlu0 %v8195_v32, %s8008_s9  ;;  %1550 = vmatprep.subr.bf16.mxu0 %v1450_v11  ;;  %v1451_v16 = vsel %vm1444_vm5, %v1439_v9, %v1441_v10 }
 0x10a   : > { %3064 = vrot.lane.b32.xlu1 %v8192_v31, %s8008_s9  ;;  %1551 = vmatpush1.bf16.msra.mxu0 %v1449_v12 }
 0x10b   : > { %v1443_v13 = vpop.permute.xlu0 %1442  ;;  %7232 = vmatmul.mubr.msk.bf16.vlgmr.msra.gmra.mrb[0].mxu1 %vm559_vm1, %v7917_v4 }
 0x10c   : > { %v1663_v14 = vpop.permute.xlu1 %1662  ;;  %v1452_v15 = vsel %vm1444_vm5, %v1441_v10, %v1443_v13  ;;  %1625 = vmatprep.mubr.bf16.mxu1 %v7997_v34  ;;  %vm5153_vm5 = vcmask 302080  }
 0x10d   : > { %3070 = vrot.lane.b32.xlu0 %v8199_v35, %s8008_s9  ;;  %1593 = vmatprep.subr.bf16.mxu1 %v1452_v15 }
 0x10e   : > { %3072 = vrot.lane.b32.xlu1 %v8203_v37, %s8008_s9  ;;  %1594 = vmatpush1.bf16.msra.mxu1 %v1451_v16 }
 0x10f   : > { %v1665_v17 = vpop.permute.xlu0 %1664  ;;  %7233 = vmatmul.mubr.msk.bf16.vlgmr.msra.gmra.mrb[4].mxu0 %vm559_vm1, %v7917_v4 }
 0x110   : > { %v1661_v18 = vpop.permute.xlu1 %1660  ;;  %v1680_v19 = vsel %vm1678_vm6, %v1663_v14, %v1665_v17  ;;  %1730 = vmatprep.mubr.bf16.mxu0 %v7997_v34 }
 0x111   : > { %v1679_v20 = vsel %vm1678_vm6, %v1661_v18, %v1663_v14  ;;  %3074 = vrot.lane.b32.xlu0 %v8206_v39, %s8008_s9  ;;  %1698 = vmatprep.subr.bf16.mxu0 %v1680_v19 }
 0x112   : > { %3076 = vrot.lane.b32.xlu1 %v8209_v41, %s8008_s9  ;;  %1699 = vmatpush1.bf16.msra.mxu0 %v1679_v20 }
 0x113   : > { %v1667_v21 = vpop.permute.xlu0 %1666  ;;  %7234 = vmatmul.mubr.msk.bf16.vlgmr.msra.gmra.mrb[4].mxu1 %vm559_vm1, %v7917_v4  ;;  %v8529_v4 = vcombine.low %v462_v63, %v463_v0 }
 0x114   : > { %v1669_v23 = vpop.permute.xlu1 %1668  ;;  %v1681_v24 = vsel %vm1678_vm6, %v1665_v17, %v1667_v21  ;;  %1773 = vmatprep.mubr.bf16.mxu1 %v7997_v34 }
 0x115   : > { %3078 = vrot.lane.b32.xlu0 %v8212_v42, %s8008_s9  ;;  %v1682_v25 = vsel %vm1678_vm6, %v1667_v21, %v1669_v23 }
 0x116   : > { %3080 = vrot.lane.b32.xlu1 %v8215_v43, %s8008_s9  ;;  %1741 = vmatprep.subr.bf16.mxu1 %v1682_v25  ;;  %s8012_s9 = smov 118  }
 0x117   : > { %1742 = vmatpush1.bf16.msra.mxu1 %v1681_v24  ;;  %v1671_v26 = vpop.permute.xlu0 %1670  ;;  %7238 = vmatmul.mubr.msk.bf16.vlgmr.msra.gmra.mrb[0].mxu0 %vm559_vm1, %v7918_v22  ;;  %v7921_v24 = vld [vmem:[%s9273_s0 + $0x40] sm:$0xff]  }
 0x118   : > { %v1673_v28 = vpop.permute.xlu1 %1672  ;;  %v1683_v29 = vsel %vm1678_vm6, %v1669_v23, %v1671_v26  ;;  %1816 = vmatprep.mubr.bf16.mxu0 %v7997_v34 }
 0x119   : > { %3300 = vrot.lane.b32.xlu0 %v8190_v27, %s8009_s12  ;;  %v1684_v30 = vsel %vm1678_vm6, %v1671_v26, %v1673_v28 }
 0x11a   : > { %3302 = vrot.lane.b32.xlu1 %v8195_v32, %s8009_s12  ;;  %1784 = vmatprep.subr.bf16.mxu0 %v1684_v30 }
 0x11b   : > { %1785 = vmatpush1.bf16.msra.mxu0 %v1683_v29  ;;  %v1675_v33 = vpop.permute.xlu0 %1674  ;;  %7239 = vmatmul.mubr.msk.bf16.vlgmr.msra.gmra.mrb[0].mxu1 %vm559_vm1, %v7918_v22 }
 0x11c   : > { %v1677_v36 = vpop.permute.xlu1 %1676  ;;  %v1685_v38 = vsel %vm1678_vm6, %v1673_v28, %v1675_v33  ;;  %1859 = vmatprep.mubr.bf16.mxu1 %v7997_v34 }
 0x11d   : > { %3298 = vrot.lane.b32.xlu0 %v8192_v31, %s8009_s12  ;;  %v1686_v40 = vsel %vm1678_vm6, %v1675_v33, %v1677_v36  ;;  %vm5387_vm6 = vcmask 236544  }
 0x11e   : > { %3304 = vrot.lane.b32.xlu1 %v8199_v35, %s8009_s12  ;;  %1827 = vmatprep.subr.bf16.mxu1 %v1686_v40 }
 0x11f   : > { %1828 = vmatpush1.bf16.msra.mxu1 %v1685_v38  ;;  %v1897_v44 = vpop.permute.xlu0 %1896  ;;  %7240 = vmatmul.mubr.msk.bf16.vlgmr.msra.gmra.mrb[4].mxu0 %vm559_vm1, %v7918_v22 }
 0x120   : > { %v1899_v45 = vpop.permute.xlu1 %1898  ;;  %1964 = vmatprep.mubr.bf16.mxu0 %v7997_v34 }
 0x121   : > { %3306 = vrot.lane.b32.xlu0 %v8203_v37, %s8009_s12  ;;  %v1914_v46 = vsel %vm1912_vm7, %v1897_v44, %v1899_v45 }
 0x122   : > { %3308 = vrot.lane.b32.xlu1 %v8206_v39, %s8009_s12  ;;  %1932 = vmatprep.subr.bf16.mxu0 %v1914_v46 }
 0x123   : > { %v1895_v31 = vpop.permute.xlu0 %1894  ;;  %7241 = vmatmul.mubr.msk.bf16.vlgmr.msra.gmra.mrb[4].mxu1 %vm559_vm1, %v7918_v22 }
 0x124   : > { %v1913_v47 = vsel %vm1912_vm7, %v1895_v31, %v1897_v44  ;;  %v1901_v48 = vpop.permute.xlu1 %1900  ;;  %2007 = vmatprep.mubr.bf16.mxu1 %v7997_v34 }
 0x125   : > { %3310 = vrot.lane.b32.xlu0 %v8209_v41, %s8009_s12  ;;  %1933 = vmatpush1.bf16.msra.mxu0 %v1913_v47  ;;  %v1915_v53 = vsel %vm1912_vm7, %v1899_v45, %v1901_v48 }
 0x126   : > { %3312 = vrot.lane.b32.xlu1 %v8212_v42, %s8009_s12 }
 0x127   : > { %v1903_v50 = vpop.permute.xlu0 %1902 }
 0x128   : > { %v1905_v51 = vpop.permute.xlu1 %1904  ;;  %v1916_v52 = vsel %vm1912_vm7, %v1901_v48, %v1903_v50  ;;  %7245 = vmatmul.mubr.msk.bf16.vlgmr.msra.gmra.mrb[0].mxu0 %vm559_vm1, %v7919_v49 }
 0x129   : > { %3314 = vrot.lane.b32.xlu0 %v8215_v43, %s8009_s12  ;;  %1975 = vmatprep.subr.bf16.mxu1 %v1916_v52  ;;  %v1917_v57 = vsel %vm1912_vm7, %v1903_v50, %v1905_v51  ;;  %s8013_s12 = smov 117  }
 0x12a   : > { %3733 = vrot.lane.b32.xlu1 %v8195_v32, %s8010_s13  ;;  %1976 = vmatpush1.bf16.msra.mxu1 %v1915_v53 }
 0x12b   : > { %v1907_v54 = vpop.permute.xlu0 %1906  ;;  %2050 = vmatprep.mubr.bf16.mxu0 %v7997_v34 }
 0x12c   : > { %v1909_v55 = vpop.permute.xlu1 %1908  ;;  %v1918_v56 = vsel %vm1912_vm7, %v1905_v51, %v1907_v54  ;;  %v7922_v51 = vld [vmem:[%s9273_s0 + $0x48] sm:$0xff]  }
 0x12d   : > { %3735 = vrot.lane.b32.xlu0 %v8199_v35, %s8010_s13  ;;  %2018 = vmatprep.subr.bf16.mxu0 %v1918_v56  ;;  %v1919_v61 = vsel %vm1912_vm7, %v1907_v54, %v1909_v55 }
 0x12e   : > { %3731 = vrot.lane.b32.xlu1 %v8190_v27, %s8010_s13  ;;  %2019 = vmatpush1.bf16.msra.mxu0 %v1917_v57 }
 0x12f   : > { %v1911_v58 = vpop.permute.xlu0 %1910  ;;  %7246 = vmatmul.mubr.msk.bf16.vlgmr.msra.gmra.mrb[0].mxu1 %vm559_vm1, %v7919_v49 }
 0x130   : > { %v2131_v59 = vpop.permute.xlu1 %2130  ;;  %v1920_v60 = vsel %vm1912_vm7, %v1909_v55, %v1911_v58  ;;  %2093 = vmatprep.mubr.bf16.mxu1 %v7997_v34  ;;  %vm5621_vm7 = vcmask 228352  }
 0x131   : > { %3737 = vrot.lane.b32.xlu0 %v8203_v37, %s8010_s13  ;;  %2061 = vmatprep.subr.bf16.mxu1 %v1920_v60 }
 0x132   : > { %3739 = vrot.lane.b32.xlu1 %v8206_v39, %s8010_s13  ;;  %2062 = vmatpush1.bf16.msra.mxu1 %v1919_v61 }
 0x133   : > { %v2133_v62 = vpop.permute.xlu0 %2132  ;;  %7247 = vmatmul.mubr.msk.bf16.vlgmr.msra.gmra.mrb[4].mxu0 %vm559_vm1, %v7919_v49 }
 0x134   : > { %v2129_v1 = vpop.permute.xlu1 %2128  ;;  %v2148_v2 = vsel %vm2146_vm8, %v2131_v59, %v2133_v62  ;;  %2198 = vmatprep.mubr.bf16.mxu0 %v7997_v34 }
 0x135   : > { %v2147_v3 = vsel %vm2146_vm8, %v2129_v1, %v2131_v59  ;;  %3741 = vrot.lane.b32.xlu0 %v8209_v41, %s8010_s13  ;;  %2166 = vmatprep.subr.bf16.mxu0 %v2148_v2 }
 0x136   : > { %3743 = vrot.lane.b32.xlu1 %v8212_v42, %s8010_s13  ;;  %2167 = vmatpush1.bf16.msra.mxu0 %v2147_v3 }
 0x137   : > { %v2135_v5 = vpop.permute.xlu0 %2134  ;;  %7248 = vmatmul.mubr.msk.bf16.vlgmr.msra.gmra.mrb[4].mxu1 %vm559_vm1, %v7919_v49 }
 0x138   : > { %v2137_v7 = vpop.permute.xlu1 %2136  ;;  %v2149_v8 = vsel %vm2146_vm8, %v2133_v62, %v2135_v5  ;;  %2241 = vmatprep.mubr.bf16.mxu1 %v7997_v34 }
 0x139   : > { %3745 = vrot.lane.b32.xlu0 %v8215_v43, %s8010_s13  ;;  %v2150_v9 = vsel %vm2146_vm8, %v2135_v5, %v2137_v7 }
 0x13a   : > { %3747 = vrot.lane.b32.xlu1 %v8529_v4, %s8010_s13  ;;  %2209 = vmatprep.subr.bf16.mxu1 %v2150_v9  ;;  %s8014_s13 = smov 39  }
 0x13b   : > { %2210 = vmatpush1.bf16.msra.mxu1 %v2149_v8  ;;  %v2139_v10 = vpop.permute.xlu0 %2138  ;;  %7252 = vmatmul.mubr.msk.bf16.vlgmr.msra.gmra.mrb[0].mxu0 %vm559_vm1, %v7920_v6 }
 0x13c   : > { %v2141_v11 = vpop.permute.xlu1 %2140  ;;  %v2151_v12 = vsel %vm2146_vm8, %v2137_v7, %v2139_v10  ;;  %2284 = vmatprep.mubr.bf16.mxu0 %v7997_v34 }
 0x13d   : > { %3967 = vrot.lane.b32.xlu0 %v8195_v32, %s8011_s19  ;;  %v2152_v13 = vsel %vm2146_vm8, %v2139_v10, %v2141_v11 }
 0x13e   : > { %3969 = vrot.lane.b32.xlu1 %v8199_v35, %s8011_s19  ;;  %2252 = vmatprep.subr.bf16.mxu0 %v2152_v13 }
 0x13f   : > { %2253 = vmatpush1.bf16.msra.mxu0 %v2151_v12  ;;  %v2143_v14 = vpop.permute.xlu0 %2142  ;;  %7253 = vmatmul.mubr.msk.bf16.vlgmr.msra.gmra.mrb[0].mxu1 %vm559_vm1, %v7920_v6 }
 0x140   : > { %v2145_v15 = vpop.permute.xlu1 %2144  ;;  %v2153_v16 = vsel %vm2146_vm8, %v2141_v11, %v2143_v14  ;;  %2327 = vmatprep.mubr.bf16.mxu1 %v7997_v34 }
 0x141   : > { %3965 = vrot.lane.b32.xlu0 %v8190_v27, %s8011_s19  ;;  %v2154_v17 = vsel %vm2146_vm8, %v2143_v14, %v2145_v15  ;;  %vm5855_vm8 = vcmask 220160  }
 0x142   : > { %3971 = vrot.lane.b32.xlu1 %v8203_v37, %s8011_s19  ;;  %2295 = vmatprep.subr.bf16.mxu1 %v2154_v17 }
 0x143   : > { %2296 = vmatpush1.bf16.msra.mxu1 %v2153_v16  ;;  %v2365_v18 = vpop.permute.xlu0 %2364  ;;  %7254 = vmatmul.mubr.msk.bf16.vlgmr.msra.gmra.mrb[4].mxu0 %vm559_vm1, %v7920_v6 }
 0x144   : > { %v2367_v19 = vpop.permute.xlu1 %2366  ;;  %2432 = vmatprep.mubr.bf16.mxu0 %v7997_v34 }
 0x145   : > { %3973 = vrot.lane.b32.xlu0 %v8206_v39, %s8011_s19  ;;  %v2382_v20 = vsel %vm2380_vm9, %v2365_v18, %v2367_v19 }
 0x146   : > { %3975 = vrot.lane.b32.xlu1 %v8209_v41, %s8011_s19  ;;  %2400 = vmatprep.subr.bf16.mxu0 %v2382_v20 }
 0x147   : > { %v2363_v21 = vpop.permute.xlu0 %2362  ;;  %7255 = vmatmul.mubr.msk.bf16.vlgmr.msra.gmra.mrb[4].mxu1 %vm559_vm1, %v7920_v6  ;;  %v7923_v6 = vld [vmem:[%s9273_s0 + $0x50] sm:$0xff]  }
 0x148   : > { %v2381_v22 = vsel %vm2380_vm9, %v2363_v21, %v2365_v18  ;;  %v2369_v23 = vpop.permute.xlu1 %2368  ;;  %2475 = vmatprep.mubr.bf16.mxu1 %v7997_v34 }
 0x149   : > { %3977 = vrot.lane.b32.xlu0 %v8212_v42, %s8011_s19  ;;  %2401 = vmatpush1.bf16.msra.mxu0 %v2381_v22  ;;  %v2383_v29 = vsel %vm2380_vm9, %v2367_v19, %v2369_v23 }
 0x14a   : > { %3979 = vrot.lane.b32.xlu1 %v8215_v43, %s8011_s19 }
 0x14b   : > { %v2371_v25 = vpop.permute.xlu0 %2370 }
 0x14c   : > { %v2373_v26 = vpop.permute.xlu1 %2372  ;;  %v2384_v28 = vsel %vm2380_vm9, %v2369_v23, %v2371_v25  ;;  %7259 = vmatmul.mubr.msk.bf16.vlgmr.msra.gmra.mrb[0].mxu0 %vm559_vm1, %v7921_v24 }
 0x14d   : > { %3981 = vrot.lane.b32.xlu0 %v8529_v4, %s8011_s19  ;;  %2443 = vmatprep.subr.bf16.mxu1 %v2384_v28  ;;  %v2385_v38 = vsel %vm2380_vm9, %v2371_v25, %v2373_v26  ;;  %s8016_s19 = smov 37  }
 0x14e   : > { %4201 = vrot.lane.b32.xlu1 %v8195_v32, %s8012_s9  ;;  %2444 = vmatpush1.bf16.msra.mxu1 %v2383_v29 }
 0x14f   : > { %v2375_v30 = vpop.permute.xlu0 %2374  ;;  %2518 = vmatprep.mubr.bf16.mxu0 %v7997_v34 }
 0x150   : > { %v2377_v33 = vpop.permute.xlu1 %2376  ;;  %v2386_v36 = vsel %vm2380_vm9, %v2373_v26, %v2375_v30 }
 0x151   : > { %4203 = vrot.lane.b32.xlu0 %v8199_v35, %s8012_s9  ;;  %2486 = vmatprep.subr.bf16.mxu0 %v2386_v36  ;;  %v2387_v46 = vsel %vm2380_vm9, %v2375_v30, %v2377_v33 }
 0x152   : > { %4199 = vrot.lane.b32.xlu1 %v8190_v27, %s8012_s9  ;;  %2487 = vmatpush1.bf16.msra.mxu0 %v2385_v38 }
 0x153   : > { %v2379_v40 = vpop.permute.xlu0 %2378  ;;  %7260 = vmatmul.mubr.msk.bf16.vlgmr.msra.gmra.mrb[0].mxu1 %vm559_vm1, %v7921_v24 }
 0x154   : > { %v2599_v44 = vpop.permute.xlu1 %2598  ;;  %v2388_v45 = vsel %vm2380_vm9, %v2377_v33, %v2379_v40  ;;  %2561 = vmatprep.mubr.bf16.mxu1 %v7997_v34  ;;  %vm6089_vm9 = vcmask 154624  }
 0x155   : > { %4205 = vrot.lane.b32.xlu0 %v8203_v37, %s8012_s9  ;;  %2529 = vmatprep.subr.bf16.mxu1 %v2388_v45 }
 0x156   : > { %4207 = vrot.lane.b32.xlu1 %v8206_v39, %s8012_s9  ;;  %2530 = vmatpush1.bf16.msra.mxu1 %v2387_v46 }
 0x157   : > { %v2601_v31 = vpop.permute.xlu0 %2600  ;;  %7261 = vmatmul.mubr.msk.bf16.vlgmr.msra.gmra.mrb[4].mxu0 %vm559_vm1, %v7921_v24 }
 0x158   : > { %v2597_v47 = vpop.permute.xlu1 %2596  ;;  %v2616_v48 = vsel %vm2614_vm10, %v2599_v44, %v2601_v31  ;;  %2666 = vmatprep.mubr.bf16.mxu0 %v7997_v34 }
 0x159   : > { %v2615_v49 = vsel %vm2614_vm10, %v2597_v47, %v2599_v44  ;;  %4209 = vrot.lane.b32.xlu0 %v8209_v41, %s8012_s9  ;;  %2634 = vmatprep.subr.bf16.mxu0 %v2616_v48 }
 0x15a   : > { %4211 = vrot.lane.b32.xlu1 %v8212_v42, %s8012_s9  ;;  %2635 = vmatpush1.bf16.msra.mxu0 %v2615_v49 }
 0x15b   : > { %v2603_v50 = vpop.permute.xlu0 %2602  ;;  %7262 = vmatmul.mubr.msk.bf16.vlgmr.msra.gmra.mrb[4].mxu1 %vm559_vm1, %v7921_v24  ;;  %v7924_v24 = vld [vmem:[%s9273_s0 + $0x58] sm:$0xff]  }
 0x15c   : > { %v2605_v52 = vpop.permute.xlu1 %2604  ;;  %v2617_v53 = vsel %vm2614_vm10, %v2601_v31, %v2603_v50  ;;  %2709 = vmatprep.mubr.bf16.mxu1 %v7997_v34 }
 0x15d   : > { %4213 = vrot.lane.b32.xlu0 %v8215_v43, %s8012_s9  ;;  %v2618_v54 = vsel %vm2614_vm10, %v2603_v50, %v2605_v52 }
 0x15e   : > { %4215 = vrot.lane.b32.xlu1 %v8529_v4, %s8012_s9  ;;  %2677 = vmatprep.subr.bf16.mxu1 %v2618_v54  ;;  %s8017_s9 = smov 29  }
 0x15f   : > { %2678 = vmatpush1.bf16.msra.mxu1 %v2617_v53  ;;  %v2607_v55 = vpop.permute.xlu0 %2606  ;;  %7266 = vmatmul.mubr.msk.bf16.vlgmr.msra.gmra.mrb[0].mxu0 %vm559_vm1, %v7922_v51 }
 0x160   : > { %v2609_v56 = vpop.permute.xlu1 %2608  ;;  %v2619_v57 = vsel %vm2614_vm10, %v2605_v52, %v2607_v55  ;;  %2752 = vmatprep.mubr.bf16.mxu0 %v7997_v34 }
 0x161   : > { %4435 = vrot.lane.b32.xlu0 %v8195_v32, %s8013_s12  ;;  %v2620_v58 = vsel %vm2614_vm10, %v2607_v55, %v2609_v56 }
 0x162   : > { %4437 = vrot.lane.b32.xlu1 %v8199_v35, %s8013_s12  ;;  %2720 = vmatprep.subr.bf16.mxu0 %v2620_v58 }
 0x163   : > { %2721 = vmatpush1.bf16.msra.mxu0 %v2619_v57  ;;  %v2611_v59 = vpop.permute.xlu0 %2610  ;;  %7267 = vmatmul.mubr.msk.bf16.vlgmr.msra.gmra.mrb[0].mxu1 %vm559_vm1, %v7922_v51 }
 0x164   : > { %v2613_v60 = vpop.permute.xlu1 %2612  ;;  %v2621_v61 = vsel %vm2614_vm10, %v2609_v56, %v2611_v59  ;;  %2795 = vmatprep.mubr.bf16.mxu1 %v7997_v34 }
 0x165   : > { %4433 = vrot.lane.b32.xlu0 %v8190_v27, %s8013_s12  ;;  %v2622_v62 = vsel %vm2614_vm10, %v2611_v59, %v2613_v60  ;;  %vm6323_vm10 = vcmask 146432  }
 0x166   : > { %4439 = vrot.lane.b32.xlu1 %v8203_v37, %s8013_s12  ;;  %2763 = vmatprep.subr.bf16.mxu1 %v2622_v62 }
 0x167   : > { %2764 = vmatpush1.bf16.msra.mxu1 %v2621_v61  ;;  %v2833_v63 = vpop.permute.xlu0 %2832  ;;  %7268 = vmatmul.mubr.msk.bf16.vlgmr.msra.gmra.mrb[4].mxu0 %vm559_vm1, %v7922_v51 }
 0x168   : > { %v2835_v0 = vpop.permute.xlu1 %2834  ;;  %2900 = vmatprep.mubr.bf16.mxu0 %v7997_v34 }
 0x169   : > { %4441 = vrot.lane.b32.xlu0 %v8206_v39, %s8013_s12  ;;  %v2850_v1 = vsel %vm2848_vm11, %v2833_v63, %v2835_v0 }
 0x16a   : > { %4443 = vrot.lane.b32.xlu1 %v8209_v41, %s8013_s12  ;;  %2868 = vmatprep.subr.bf16.mxu0 %v2850_v1 }
 0x16b   : > { %v2831_v2 = vpop.permute.xlu0 %2830  ;;  %7269 = vmatmul.mubr.msk.bf16.vlgmr.msra.gmra.mrb[4].mxu1 %vm559_vm1, %v7922_v51  ;;  %v7925_v51 = vld [vmem:[%s9273_s0 + $0x60] sm:$0xff]  }
 0x16c   : > { %v2849_v3 = vsel %vm2848_vm11, %v2831_v2, %v2833_v63  ;;  %v2837_v5 = vpop.permute.xlu1 %2836  ;;  %2943 = vmatprep.mubr.bf16.mxu1 %v7997_v34  ;;  %v7926_v2 = vld [vmem:[%s9273_s0 + $0x68] sm:$0xff]  }
 0x16d   : > { %4445 = vrot.lane.b32.xlu0 %v8212_v42, %s8013_s12  ;;  %2869 = vmatpush1.bf16.msra.mxu0 %v2849_v3  ;;  %v2851_v10 = vsel %vm2848_vm11, %v2835_v0, %v2837_v5 }
 0x16e   : > { %4447 = vrot.lane.b32.xlu1 %v8215_v43, %s8013_s12 }
 0x16f   : > { %v2839_v7 = vpop.permute.xlu0 %2838 }
 0x170   : > { %v2841_v8 = vpop.permute.xlu1 %2840  ;;  %v2852_v9 = vsel %vm2848_vm11, %v2837_v5, %v2839_v7  ;;  %7273 = vmatmul.mubr.msk.bf16.vlgmr.msra.gmra.mrb[0].mxu0 %vm559_vm1, %v7923_v6 }
 0x171   : > { %4449 = vrot.lane.b32.xlu0 %v8529_v4, %s8013_s12  ;;  %2911 = vmatprep.subr.bf16.mxu1 %v2852_v9  ;;  %v2853_v14 = vsel %vm2848_vm11, %v2839_v7, %v2841_v8  ;;  %s8018_s12 = smov 28  }
 0x172   : > { %4669 = vrot.lane.b32.xlu1 %v8195_v32, %s8014_s13  ;;  %2912 = vmatpush1.bf16.msra.mxu1 %v2851_v10 }
 0x173   : > { %v2843_v11 = vpop.permute.xlu0 %2842  ;;  %2986 = vmatprep.mubr.bf16.mxu0 %v7997_v34 }
 0x174   : > { %v2845_v12 = vpop.permute.xlu1 %2844  ;;  %v2854_v13 = vsel %vm2848_vm11, %v2841_v8, %v2843_v11 }
 0x175   : > { %4671 = vrot.lane.b32.xlu0 %v8199_v35, %s8014_s13  ;;  %2954 = vmatprep.subr.bf16.mxu0 %v2854_v13  ;;  %v2855_v18 = vsel %vm2848_vm11, %v2843_v11, %v2845_v12 }
 0x176   : > { %4667 = vrot.lane.b32.xlu1 %v8190_v27, %s8014_s13  ;;  %2955 = vmatpush1.bf16.msra.mxu0 %v2853_v14 }
 0x177   : > { %v2847_v15 = vpop.permute.xlu0 %2846  ;;  %7274 = vmatmul.mubr.msk.bf16.vlgmr.msra.gmra.mrb[0].mxu1 %vm559_vm1, %v7923_v6 }
 0x178   : > { %v3067_v16 = vpop.permute.xlu1 %3066  ;;  %v2856_v17 = vsel %vm2848_vm11, %v2845_v12, %v2847_v15  ;;  %3029 = vmatprep.mubr.bf16.mxu1 %v7997_v34  ;;  %vm6557_vm11 = vcmask 138240  }
 0x179   : > { %4673 = vrot.lane.b32.xlu0 %v8203_v37, %s8014_s13  ;;  %2997 = vmatprep.subr.bf16.mxu1 %v2856_v17  ;;  %v7927_v17 = vld [vmem:[%s9273_s0 + $0x70] sm:$0xff]  }
 0x17a   : > { %4675 = vrot.lane.b32.xlu1 %v8206_v39, %s8014_s13  ;;  %2998 = vmatpush1.bf16.msra.mxu1 %v2855_v18 }
 0x17b   : > { %v3069_v19 = vpop.permute.xlu0 %3068  ;;  %7275 = vmatmul.mubr.msk.bf16.vlgmr.msra.gmra.mrb[4].mxu0 %vm559_vm1, %v7923_v6 }
 0x17c   : > { %v3065_v20 = vpop.permute.xlu1 %3064  ;;  %v3084_v21 = vsel %vm3082_vm12, %v3067_v16, %v3069_v19  ;;  %3134 = vmatprep.mubr.bf16.mxu0 %v7997_v34 }
 0x17d   : > { %v3083_v22 = vsel %vm3082_vm12, %v3065_v20, %v3067_v16  ;;  %4677 = vrot.lane.b32.xlu0 %v8209_v41, %s8014_s13  ;;  %3102 = vmatprep.subr.bf16.mxu0 %v3084_v21 }
 0x17e   : > { %4679 = vrot.lane.b32.xlu1 %v8212_v42, %s8014_s13  ;;  %3103 = vmatpush1.bf16.msra.mxu0 %v3083_v22 }
 0x17f   : > { %v3071_v23 = vpop.permute.xlu0 %3070  ;;  %7276 = vmatmul.mubr.msk.bf16.vlgmr.msra.gmra.mrb[4].mxu1 %vm559_vm1, %v7923_v6 }
 0x180   : > { %v3073_v25 = vpop.permute.xlu1 %3072  ;;  %v3085_v26 = vsel %vm3082_vm12, %v3069_v19, %v3071_v23  ;;  %3177 = vmatprep.mubr.bf16.mxu1 %v7997_v34 }
 0x181   : > { %4681 = vrot.lane.b32.xlu0 %v8215_v43, %s8014_s13  ;;  %v3086_v28 = vsel %vm3082_vm12, %v3071_v23, %v3073_v25 }
 0x182   : > { %4683 = vrot.lane.b32.xlu1 %v8529_v4, %s8014_s13  ;;  %3145 = vmatprep.subr.bf16.mxu1 %v3086_v28  ;;  %s8019_s13 = smov 27  }
 0x183   : > { %3146 = vmatpush1.bf16.msra.mxu1 %v3085_v26  ;;  %v3075_v29 = vpop.permute.xlu0 %3074  ;;  %7280 = vmatmul.mubr.msk.bf16.vlgmr.msra.gmra.mrb[0].mxu0 %vm559_vm1, %v7924_v24 }
 0x184   : > { %v3077_v30 = vpop.permute.xlu1 %3076  ;;  %v3087_v33 = vsel %vm3082_vm12, %v3073_v25, %v3075_v29  ;;  %3220 = vmatprep.mubr.bf16.mxu0 %v7997_v34 }
 0x185   : > { %4903 = vrot.lane.b32.xlu0 %v8195_v32, %s8015_s21  ;;  %v3088_v36 = vsel %vm3082_vm12, %v3075_v29, %v3077_v30 }
 0x186   : > { %4905 = vrot.lane.b32.xlu1 %v8199_v35, %s8015_s21  ;;  %3188 = vmatprep.subr.bf16.mxu0 %v3088_v36 }
 0x187   : > { %3189 = vmatpush1.bf16.msra.mxu0 %v3087_v33  ;;  %v3079_v38 = vpop.permute.xlu0 %3078  ;;  %7281 = vmatmul.mubr.msk.bf16.vlgmr.msra.gmra.mrb[0].mxu1 %vm559_vm1, %v7924_v24 }
 0x188   : > { %v3081_v40 = vpop.permute.xlu1 %3080  ;;  %v3089_v44 = vsel %vm3082_vm12, %v3077_v30, %v3079_v38  ;;  %3263 = vmatprep.mubr.bf16.mxu1 %v7997_v34 }
 0x189   : > { %4901 = vrot.lane.b32.xlu0 %v8190_v27, %s8015_s21  ;;  %v3090_v45 = vsel %vm3082_vm12, %v3079_v38, %v3081_v40 }
 0x18a   : > { %4907 = vrot.lane.b32.xlu1 %v8203_v37, %s8015_s21  ;;  %3231 = vmatprep.subr.bf16.mxu1 %v3090_v45  ;;  %v7928_v45 = vld [vmem:[%s9273_s0 + $0x78] sm:$0xff]  }
 0x18b   : > { %3232 = vmatpush1.bf16.msra.mxu1 %v3089_v44  ;;  %v3301_v46 = vpop.permute.xlu0 %3300  ;;  %7282 = vmatmul.mubr.msk.bf16.vlgmr.msra.gmra.mrb[4].mxu0 %vm559_vm1, %v7924_v24 }
 0x18c   : > { %v3303_v31 = vpop.permute.xlu1 %3302  ;;  %3368 = vmatprep.mubr.bf16.mxu0 %v7997_v34 }
 0x18d   : > { %4909 = vrot.lane.b32.xlu0 %v8206_v39, %s8015_s21  ;;  %v3318_v47 = vsel %vm3316_vm13, %v3301_v46, %v3303_v31 }
 0x18e   : > { %4911 = vrot.lane.b32.xlu1 %v8209_v41, %s8015_s21  ;;  %3336 = vmatprep.subr.bf16.mxu0 %v3318_v47 }
 0x18f   : > { %v3299_v48 = vpop.permute.xlu0 %3298  ;;  %7283 = vmatmul.mubr.msk.bf16.vlgmr.msra.gmra.mrb[4].mxu1 %vm559_vm1, %v7924_v24 }
 0x190   : > { %v3317_v49 = vsel %vm3316_vm13, %v3299_v48, %v3301_v46  ;;  %v3305_v50 = vpop.permute.xlu1 %3304  ;;  %3411 = vmatprep.mubr.bf16.mxu1 %v7997_v34 }
 0x191   : > { %4913 = vrot.lane.b32.xlu0 %v8212_v42, %s8015_s21  ;;  %3337 = vmatpush1.bf16.msra.mxu0 %v3317_v49  ;;  %v3319_v55 = vsel %vm3316_vm13, %v3303_v31, %v3305_v50 }
 0x192   : > { %4915 = vrot.lane.b32.xlu1 %v8215_v43, %s8015_s21 }
 0x193   : > { %v3307_v52 = vpop.permute.xlu0 %3306 }
 0x194   : > { %v3309_v53 = vpop.permute.xlu1 %3308  ;;  %7287 = vmatmul.mubr.msk.bf16.vlgmr.msra.gmra.mrb[0].mxu0 %vm559_vm1, %v7925_v51  ;;  %v3320_v54 = vsel %vm3316_vm13, %v3305_v50, %v3307_v52 }
 0x195   : > { %4917 = vrot.lane.b32.xlu0 %v8529_v4, %s8015_s21  ;;  %3379 = vmatprep.subr.bf16.mxu1 %v3320_v54  ;;  %v3321_v59 = vsel %vm3316_vm13, %v3307_v52, %v3309_v53  ;;  %s8020_s21 = smov 19  }
 0x196   : > { %5137 = vrot.lane.b32.xlu1 %v8195_v32, %s8016_s19  ;;  %3380 = vmatpush1.bf16.msra.mxu1 %v3319_v55 }
 0x197   : > { %v3311_v56 = vpop.permute.xlu0 %3310  ;;  %3454 = vmatprep.mubr.bf16.mxu0 %v7997_v34 }
 0x198   : > { %v3313_v57 = vpop.permute.xlu1 %3312  ;;  %v3322_v58 = vsel %vm3316_vm13, %v3309_v53, %v3311_v56 }
 0x199   : > { %5139 = vrot.lane.b32.xlu0 %v8199_v35, %s8016_s19  ;;  %7288 = vmatmul.mubr.msk.bf16.vlgmr.msra.gmra.mrb[0].mxu1 %vm559_vm1, %v7925_v51  ;;  %v3323_v63 = vsel %vm3316_vm13, %v3311_v56, %v3313_v57 }
 0x19a   : > { %5135 = vrot.lane.b32.xlu1 %v8190_v27, %s8016_s19  ;;  %3422 = vmatprep.subr.bf16.mxu0 %v3322_v58 }
 0x19b   : > { %3423 = vmatpush1.bf16.msra.mxu0 %v3321_v59  ;;  %v3315_v60 = vpop.permute.xlu0 %3314  ;;  %3497 = vmatprep.mubr.bf16.mxu1 %v7997_v34 }
 0x19c   : > { %v3734_v61 = vpop.permute.xlu1 %3733  ;;  %v3324_v62 = vsel %vm3316_vm13, %v3313_v57, %v3315_v60  ;;  %3535 = vmatprep.subr.bf16.mxu0 %v8195_v32 }
 0x19d   : > { %5141 = vrot.lane.b32.xlu0 %v8203_v37, %s8016_s19  ;;  %3465 = vmatprep.subr.bf16.mxu1 %v3324_v62 }
 0x19e   : > { %5143 = vrot.lane.b32.xlu1 %v8206_v39, %s8016_s19  ;;  %7289 = vmatmul.mubr.msk.bf16.vlgmr.msra.gmra.mrb[4].mxu0 %vm559_vm1, %v7925_v51 }
 0x19f   : > { %3466 = vmatpush1.bf16.msra.mxu1 %v3323_v63  ;;  %v3736_v0 = vpop.permute.xlu0 %3735  ;;  %3536 = vmatpush1.bf16.msra.mxu0 %v8190_v27 }
 0x1a0   : > { %v3732_v1 = vpop.permute.xlu1 %3731  ;;  %3567 = vmatprep.mubr.bf16.mxu0 %v7997_v34  ;;  %3578 = vmatprep.subr.bf16.mxu1 %v8203_v37  ;;  %v3751_v6 = vsel %vm3749_vm14, %v3734_v61, %v3736_v0 }
 0x1a1   : > { %5145 = vrot.lane.b32.xlu0 %v8209_v41, %s8016_s19  ;;  %3621 = vmatprep.subr.bf16.mxu0 %v8209_v41  ;;  %v3750_v12 = vsel %vm3749_vm14, %v3732_v1, %v3734_v61  ;;  %v7929_v61 = vld [vmem:[%s9273_s0 + $0x80] sm:$0xff]  }
 0x1a2   : > { %5147 = vrot.lane.b32.xlu1 %v8212_v42, %s8016_s19  ;;  %7290 = vmatmul.mubr.msk.bf16.vlgmr.msra.gmra.mrb[4].mxu1 %vm559_vm1, %v7925_v51 }
 0x1a3   : > { %v3738_v3 = vpop.permute.xlu0 %3737  ;;  %3579 = vmatpush1.bf16.msra.mxu1 %v8199_v35  ;;  %3610 = vmatprep.mubr.bf16.mxu1 %v7997_v34 }
 0x1a4   : > { %v3740_v5 = vpop.permute.xlu1 %3739  ;;  %3664 = vmatprep.subr.bf16.mxu1 %v8215_v43  ;;  %v3752_v16 = vsel %vm3749_vm14, %v3736_v0, %v3738_v3 }
 0x1a5   : > { %5149 = vrot.lane.b32.xlu0 %v8215_v43, %s8016_s19  ;;  %v3753_v9 = vsel %vm3749_vm14, %v3738_v3, %v3740_v5 }
 0x1a6   : > { %5151 = vrot.lane.b32.xlu1 %v8529_v4, %s8016_s19  ;;  %7294 = vmatmul.mubr.msk.bf16.vlgmr.msra.gmra.mrb[0].mxu0 %vm559_vm1, %v7926_v2  ;;  %s8021_s19 = smov 18  }
 0x1a7   : > { %3622 = vmatpush1.bf16.msra.mxu0 %v8206_v39  ;;  %v3742_v7 = vpop.permute.xlu0 %3741  ;;  %3653 = vmatprep.mubr.bf16.mxu0 %v7997_v34 }
 0x1a8   : > { %3769 = vmatprep.subr.bf16.mxu0 %v3751_v6  ;;  %v3744_v8 = vpop.permute.xlu1 %3743  ;;  %v3754_v21 = vsel %vm3749_vm14, %v3740_v5, %v3742_v7 }
 0x1a9   : > { %5371 = vrot.lane.b32.xlu0 %v8195_v32, %s8017_s9  ;;  %v3755_v13 = vsel %vm3749_vm14, %v3742_v7, %v3744_v8 }
 0x1aa   : > { %5373 = vrot.lane.b32.xlu1 %v8199_v35, %s8017_s9  ;;  %7295 = vmatmul.mubr.msk.bf16.vlgmr.msra.gmra.mrb[0].mxu1 %vm559_vm1, %v7926_v2 }
 0x1ab   : > { %3665 = vmatpush1.bf16.msra.mxu1 %v8212_v42  ;;  %v3746_v10 = vpop.permute.xlu0 %3745  ;;  %3696 = vmatprep.mubr.bf16.mxu1 %v7997_v34 }
 0x1ac   : > { %3812 = vmatprep.subr.bf16.mxu1 %v3753_v9  ;;  %v3748_v11 = vpop.permute.xlu1 %3747  ;;  %v3756_v26 = vsel %vm3749_vm14, %v3744_v8, %v3746_v10 }
 0x1ad   : > { %5369 = vrot.lane.b32.xlu0 %v8190_v27, %s8017_s9  ;;  %v3757_v18 = vsel %vm3749_vm14, %v3746_v10, %v3748_v11 }
 0x1ae   : > { %5375 = vrot.lane.b32.xlu1 %v8203_v37, %s8017_s9  ;;  %7296 = vmatmul.mubr.msk.bf16.vlgmr.msra.gmra.mrb[4].mxu0 %vm559_vm1, %v7926_v2 }
 0x1af   : > { %3770 = vmatpush1.bf16.msra.mxu0 %v3750_v12  ;;  %v3968_v14 = vpop.permute.xlu0 %3967  ;;  %3801 = vmatprep.mubr.bf16.mxu0 %v7997_v34 }
 0x1b0   : > { %3855 = vmatprep.subr.bf16.mxu0 %v3755_v13  ;;  %v3970_v15 = vpop.permute.xlu1 %3969 }
 0x1b1   : > { %5377 = vrot.lane.b32.xlu0 %v8206_v39, %s8017_s9  ;;  %v3985_v22 = vsel %vm3983_vm15, %v3968_v14, %v3970_v15 }
 0x1b2   : > { %5379 = vrot.lane.b32.xlu1 %v8209_v41, %s8017_s9  ;;  %7297 = vmatmul.mubr.msk.bf16.vlgmr.msra.gmra.mrb[4].mxu1 %vm559_vm1, %v7926_v2 }
 0x1b3   : > { %3813 = vmatpush1.bf16.msra.mxu1 %v3752_v16  ;;  %v3966_v19 = vpop.permute.xlu0 %3965  ;;  %3844 = vmatprep.mubr.bf16.mxu1 %v7997_v34 }
 0x1b4   : > { %3898 = vmatprep.subr.bf16.mxu1 %v3757_v18  ;;  %v3972_v20 = vpop.permute.xlu1 %3971  ;;  %v3984_v33 = vsel %vm3983_vm15, %v3966_v19, %v3968_v14  ;;  %v7930_v14 = vld [vmem:[%s9273_s0 + $0x88] sm:$0xff]  }
 0x1b5   : > { %5381 = vrot.lane.b32.xlu0 %v8212_v42, %s8017_s9  ;;  %v3986_v44 = vsel %vm3983_vm15, %v3970_v15, %v3972_v20 }
 0x1b6   : > { %5383 = vrot.lane.b32.xlu1 %v8215_v43, %s8017_s9  ;;  %7301 = vmatmul.mubr.msk.bf16.vlgmr.msra.gmra.mrb[0].mxu0 %vm559_vm1, %v7927_v17 }
 0x1b7   : > { %3856 = vmatpush1.bf16.msra.mxu0 %v3754_v21  ;;  %v3974_v23 = vpop.permute.xlu0 %3973  ;;  %3887 = vmatprep.mubr.bf16.mxu0 %v7997_v34 }
 0x1b8   : > { %4003 = vmatprep.subr.bf16.mxu0 %v3985_v22  ;;  %v3976_v24 = vpop.permute.xlu1 %3975  ;;  %v3987_v25 = vsel %vm3983_vm15, %v3972_v20, %v3974_v23 }
 0x1b9   : > { %5385 = vrot.lane.b32.xlu0 %v8529_v4, %s8017_s9  ;;  %v3988_v48 = vsel %vm3983_vm15, %v3974_v23, %v3976_v24  ;;  %s8022_s9 = smov 17  }
 0x1ba   : > { %5605 = vrot.lane.b32.xlu1 %v8195_v32, %s8018_s12  ;;  %7302 = vmatmul.mubr.msk.bf16.vlgmr.msra.gmra.mrb[0].mxu1 %vm559_vm1, %v7927_v17 }
 0x1bb   : > { %3899 = vmatpush1.bf16.msra.mxu1 %v3756_v26  ;;  %v3978_v28 = vpop.permute.xlu0 %3977  ;;  %3930 = vmatprep.mubr.bf16.mxu1 %v7997_v34 }
 0x1bc   : > { %4046 = vmatprep.subr.bf16.mxu1 %v3987_v25  ;;  %v3980_v29 = vpop.permute.xlu1 %3979  ;;  %v3989_v30 = vsel %vm3983_vm15, %v3976_v24, %v3978_v28 }
 0x1bd   : > { %5607 = vrot.lane.b32.xlu0 %v8199_v35, %s8018_s12  ;;  %v3990_v52 = vsel %vm3983_vm15, %v3978_v28, %v3980_v29 }
 0x1be   : > { %5603 = vrot.lane.b32.xlu1 %v8190_v27, %s8018_s12  ;;  %7303 = vmatmul.mubr.msk.bf16.vlgmr.msra.gmra.mrb[4].mxu0 %vm559_vm1, %v7927_v17 }
 0x1bf   : > { %4004 = vmatpush1.bf16.msra.mxu0 %v3984_v33  ;;  %v3982_v36 = vpop.permute.xlu0 %3981  ;;  %4035 = vmatprep.mubr.bf16.mxu0 %v7997_v34 }
 0x1c0   : > { %4089 = vmatprep.subr.bf16.mxu0 %v3989_v30  ;;  %v4202_v38 = vpop.permute.xlu1 %4201  ;;  %v3991_v40 = vsel %vm3983_vm15, %v3980_v29, %v3982_v36  ;;  %v7931_v36 = vld [vmem:[%s9273_s0 + $0x90] sm:$0xff]  }
 0x1c1   : > { %5609 = vrot.lane.b32.xlu0 %v8203_v37, %s8018_s12 }
 0x1c2   : > { %5611 = vrot.lane.b32.xlu1 %v8206_v39, %s8018_s12  ;;  %7304 = vmatmul.mubr.msk.bf16.vlgmr.msra.gmra.mrb[4].mxu1 %vm559_vm1, %v7927_v17 }
 0x1c3   : > { %4047 = vmatpush1.bf16.msra.mxu1 %v3986_v44  ;;  %v4204_v46 = vpop.permute.xlu0 %4203  ;;  %4078 = vmatprep.mubr.bf16.mxu1 %v7997_v34 }
 0x1c4   : > { %4132 = vmatprep.subr.bf16.mxu1 %v3991_v40  ;;  %v4200_v31 = vpop.permute.xlu1 %4199  ;;  %v4219_v47 = vsel %vm4217_vm0, %v4202_v38, %v4204_v46 }
 0x1c5   : > { %5613 = vrot.lane.b32.xlu0 %v8209_v41, %s8018_s12  ;;  %v4218_v56 = vsel %vm4217_vm0, %v4200_v31, %v4202_v38 }
 0x1c6   : > { %5615 = vrot.lane.b32.xlu1 %v8212_v42, %s8018_s12  ;;  %7308 = vmatmul.mubr.msk.bf16.vlgmr.msra.gmra.mrb[0].mxu0 %vm559_vm1, %v7928_v45 }
 0x1c7   : > { %4090 = vmatpush1.bf16.msra.mxu0 %v3988_v48  ;;  %v4206_v49 = vpop.permute.xlu0 %4205  ;;  %4121 = vmatprep.mubr.bf16.mxu0 %v7997_v34 }
 0x1c8   : > { %4237 = vmatprep.subr.bf16.mxu0 %v4219_v47  ;;  %v4208_v50 = vpop.permute.xlu1 %4207  ;;  %v4220_v60 = vsel %vm4217_vm0, %v4204_v46, %v4206_v49 }
 0x1c9   : > { %5617 = vrot.lane.b32.xlu0 %v8215_v43, %s8018_s12  ;;  %v4221_v51 = vsel %vm4217_vm0, %v4206_v49, %v4208_v50 }
 0x1ca   : > { %5619 = vrot.lane.b32.xlu1 %v8529_v4, %s8018_s12  ;;  %7309 = vmatmul.mubr.msk.bf16.vlgmr.msra.gmra.mrb[0].mxu1 %vm559_vm1, %v7928_v45 }
 0x1cb   : > { %4133 = vmatpush1.bf16.msra.mxu1 %v3990_v52  ;;  %v4210_v53 = vpop.permute.xlu0 %4209  ;;  %4164 = vmatprep.mubr.bf16.mxu1 %v7997_v34 }
 0x1cc   : > { %4280 = vmatprep.subr.bf16.mxu1 %v4221_v51  ;;  %v4212_v54 = vpop.permute.xlu1 %4211  ;;  %v4222_v1 = vsel %vm4217_vm0, %v4208_v50, %v4210_v53 }
 0x1cd   : > { %5839 = vrot.lane.b32.xlu0 %v8195_v32, %s8019_s13  ;;  %v4223_v55 = vsel %vm4217_vm0, %v4210_v53, %v4212_v54 }
 0x1ce   : > { %5841 = vrot.lane.b32.xlu1 %v8199_v35, %s8019_s13  ;;  %7310 = vmatmul.mubr.msk.bf16.vlgmr.msra.gmra.mrb[4].mxu0 %vm559_vm1, %v7928_v45 }
 0x1cf   : > { %4238 = vmatpush1.bf16.msra.mxu0 %v4218_v56  ;;  %v4214_v57 = vpop.permute.xlu0 %4213  ;;  %4269 = vmatprep.mubr.bf16.mxu0 %v7997_v34  ;;  %v7932_v56 = vld [vmem:[%s9273_s0 + $0x98] sm:$0xff]  }
 0x1d0   : > { %4323 = vmatprep.subr.bf16.mxu0 %v4223_v55  ;;  %v4216_v58 = vpop.permute.xlu1 %4215  ;;  %v4224_v5 = vsel %vm4217_vm0, %v4212_v54, %v4214_v57 }
 0x1d1   : > { %5837 = vrot.lane.b32.xlu0 %v8190_v27, %s8019_s13  ;;  %v4225_v59 = vsel %vm4217_vm0, %v4214_v57, %v4216_v58 }
 0x1d2   : > { %5843 = vrot.lane.b32.xlu1 %v8203_v37, %s8019_s13  ;;  %7311 = vmatmul.mubr.msk.bf16.vlgmr.msra.gmra.mrb[4].mxu1 %vm559_vm1, %v7928_v45 }
 0x1d3   : > { %4281 = vmatpush1.bf16.msra.mxu1 %v4220_v60  ;;  %v4436_v62 = vpop.permute.xlu0 %4435  ;;  %4312 = vmatprep.mubr.bf16.mxu1 %v7997_v34 }
 0x1d4   : > { %4366 = vmatprep.subr.bf16.mxu1 %v4225_v59  ;;  %v4438_v63 = vpop.permute.xlu1 %4437 }
 0x1d5   : > { %5845 = vrot.lane.b32.xlu0 %v8206_v39, %s8019_s13  ;;  %v4453_v0 = vsel %vm4451_vm2, %v4436_v62, %v4438_v63 }
 0x1d6   : > { %5847 = vrot.lane.b32.xlu1 %v8209_v41, %s8019_s13  ;;  %7315 = vmatmul.mubr.msk.bf16.vlgmr.msra.gmra.mrb[0].mxu0 %vm559_vm1, %v7929_v61 }
 0x1d7   : > { %4324 = vmatpush1.bf16.msra.mxu0 %v4222_v1  ;;  %v4434_v2 = vpop.permute.xlu0 %4433  ;;  %4355 = vmatprep.mubr.bf16.mxu0 %v7997_v34 }
 0x1d8   : > { %4471 = vmatprep.subr.bf16.mxu0 %v4453_v0  ;;  %v4440_v3 = vpop.permute.xlu1 %4439  ;;  %v4452_v9 = vsel %vm4451_vm2, %v4434_v2, %v4436_v62 }
 0x1d9   : > { %5849 = vrot.lane.b32.xlu0 %v8212_v42, %s8019_s13  ;;  %v4454_v13 = vsel %vm4451_vm2, %v4438_v63, %v4440_v3 }
 0x1da   : > { %5851 = vrot.lane.b32.xlu1 %v8215_v43, %s8019_s13  ;;  %7316 = vmatmul.mubr.msk.bf16.vlgmr.msra.gmra.mrb[0].mxu1 %vm559_vm1, %v7929_v61 }
 0x1db   : > { %4367 = vmatpush1.bf16.msra.mxu1 %v4224_v5  ;;  %v4442_v6 = vpop.permute.xlu0 %4441  ;;  %4398 = vmatprep.mubr.bf16.mxu1 %v7997_v34 }
 0x1dc   : > { %v4444_v7 = vpop.permute.xlu1 %4443  ;;  %v4455_v8 = vsel %vm4451_vm2, %v4440_v3, %v4442_v6 }
 0x1dd   : > { %5853 = vrot.lane.b32.xlu0 %v8529_v4, %s8019_s13  ;;  %4514 = vmatprep.subr.bf16.mxu1 %v4455_v8  ;;  %v4456_v18 = vsel %vm4451_vm2, %v4442_v6, %v4444_v7  ;;  %s9174_s13 = scalar_lea.vmem [#allocation5], %s8186_s20  ;;  %s7190_s20 = sshll.u32 %s8094_s28, 1 }
 0x1de   : > { %6073 = vrot.lane.b32.xlu1 %v8195_v32, %s8020_s21  ;;  %7317 = vmatmul.mubr.msk.bf16.vlgmr.msra.gmra.mrb[4].mxu0 %vm559_vm1, %v7929_v61  ;;  %p444_p7 = scmp.lt.s32.totalorder %s7190_s20, 3 }
 0x1df   : > { %4472 = vmatpush1.bf16.msra.mxu0 %v4452_v9  ;;  %v4446_v10 = vpop.permute.xlu0 %4445  ;;  %4503 = vmatprep.mubr.bf16.mxu0 %v7997_v34 }
 0x1e0   : > { %v4448_v11 = vpop.permute.xlu1 %4447  ;;  %v4457_v12 = vsel %vm4451_vm2, %v4444_v7, %v4446_v10  ;;  %s9316_s20 = smov (!%p444_p7, %s7190_s20), 3 }
 0x1e1   : > { %6075 = vrot.lane.b32.xlu0 %v8199_v35, %s8020_s21  ;;  %4557 = vmatprep.subr.bf16.mxu0 %v4457_v12  ;;  %v4458_v22 = vsel %vm4451_vm2, %v4446_v10, %v4448_v11  ;;  %s7191_s27 = sshll.u32 %s9316_s20, 3 }
 0x1e2   : > { %6071 = vrot.lane.b32.xlu1 %v8190_v27, %s8020_s21  ;;  %7318 = vmatmul.mubr.msk.bf16.vlgmr.msra.gmra.mrb[4].mxu1 %vm559_vm1, %v7929_v61  ;;  %s447_s25 = scalar_lea.vmem %s9279_s6, %s7191_s27 }
 0x1e3   : > { %4515 = vmatpush1.bf16.msra.mxu1 %v4454_v13  ;;  %v4450_v15 = vpop.permute.xlu0 %4449  ;;  %4546 = vmatprep.mubr.bf16.mxu1 %v7997_v34 }
 0x1e4   : > { %v4670_v16 = vpop.permute.xlu1 %4669  ;;  %v4459_v17 = vsel %vm4451_vm2, %v4448_v11, %v4450_v15 }
 0x1e5   : > { %6077 = vrot.lane.b32.xlu0 %v8203_v37, %s8020_s21  ;;  %4600 = vmatprep.subr.bf16.mxu1 %v4459_v17 }
 0x1e6   : > { %6079 = vrot.lane.b32.xlu1 %v8206_v39, %s8020_s21  ;;  %7322 = vmatmul.mubr.msk.bf16.vlgmr.msra.gmra.mrb[0].mxu0 %vm559_vm1, %v7930_v14 }
 0x1e7   : > { %4558 = vmatpush1.bf16.msra.mxu0 %v4456_v18  ;;  %v4672_v19 = vpop.permute.xlu0 %4671  ;;  %4589 = vmatprep.mubr.bf16.mxu0 %v7997_v34 }
 0x1e8   : > { %v4668_v20 = vpop.permute.xlu1 %4667  ;;  %v4687_v21 = vsel %vm4685_vm3, %v4670_v16, %v4672_v19 }
 0x1e9   : > { %6081 = vrot.lane.b32.xlu0 %v8209_v41, %s8020_s21  ;;  %4705 = vmatprep.subr.bf16.mxu0 %v4687_v21  ;;  %v4686_v26 = vsel %vm4685_vm3, %v4668_v20, %v4670_v16  ;;  %v7934_v16 = vld [vmem:[%s9273_s0 + $0xa8] sm:$0xff]  }
 0x1ea   : > { %6083 = vrot.lane.b32.xlu1 %v8212_v42, %s8020_s21  ;;  %7323 = vmatmul.mubr.msk.bf16.vlgmr.msra.gmra.mrb[0].mxu1 %vm559_vm1, %v7930_v14 }
 0x1eb   : > { %4601 = vmatpush1.bf16.msra.mxu1 %v4458_v22  ;;  %v4674_v23 = vpop.permute.xlu0 %4673  ;;  %4632 = vmatprep.mubr.bf16.mxu1 %v7997_v34 }
 0x1ec   : > { %v4676_v24 = vpop.permute.xlu1 %4675  ;;  %v4688_v33 = vsel %vm4685_vm3, %v4672_v19, %v4674_v23 }
 0x1ed   : > { %6085 = vrot.lane.b32.xlu0 %v8215_v43, %s8020_s21  ;;  %v4689_v25 = vsel %vm4685_vm3, %v4674_v23, %v4676_v24 }
 0x1ee   : > { %6087 = vrot.lane.b32.xlu1 %v8529_v4, %s8020_s21  ;;  %7324 = vmatmul.mubr.msk.bf16.vlgmr.msra.gmra.mrb[4].mxu0 %vm559_vm1, %v7930_v14 }
 0x1ef   : > { %4706 = vmatpush1.bf16.msra.mxu0 %v4686_v26  ;;  %4748 = vmatprep.subr.bf16.mxu1 %v4689_v25  ;;  %v4678_v28 = vpop.permute.xlu0 %4677 }
 0x1f0   : > { %v4680_v29 = vpop.permute.xlu1 %4679  ;;  %4737 = vmatprep.mubr.bf16.mxu0 %v7997_v34  ;;  %v4690_v45 = vsel %vm4685_vm3, %v4676_v24, %v4678_v28 }
 0x1f1   : > { %6307 = vrot.lane.b32.xlu0 %v8195_v32, %s8021_s19  ;;  %v4691_v30 = vsel %vm4685_vm3, %v4678_v28, %v4680_v29 }
 0x1f2   : > { %6309 = vrot.lane.b32.xlu1 %v8199_v35, %s8021_s19  ;;  %7325 = vmatmul.mubr.msk.bf16.vlgmr.msra.gmra.mrb[4].mxu1 %vm559_vm1, %v7930_v14 }
 0x1f3   : > { %4749 = vmatpush1.bf16.msra.mxu1 %v4688_v33  ;;  %4791 = vmatprep.subr.bf16.mxu0 %v4691_v30  ;;  %v4682_v38 = vpop.permute.xlu0 %4681 }
 0x1f4   : > { %v4684_v40 = vpop.permute.xlu1 %4683  ;;  %4780 = vmatprep.mubr.bf16.mxu1 %v7997_v34  ;;  %v4692_v48 = vsel %vm4685_vm3, %v4680_v29, %v4682_v38 }
 0x1f5   : > { %6305 = vrot.lane.b32.xlu0 %v8190_v27, %s8021_s19  ;;  %v4693_v44 = vsel %vm4685_vm3, %v4682_v38, %v4684_v40  ;;  %v7935_v40 = vld [vmem:[%s9273_s0 + $0xb0] sm:$0xff]  }
 0x1f6   : > { %6311 = vrot.lane.b32.xlu1 %v8203_v37, %s8021_s19  ;;  %7329 = vmatmul.mubr.msk.bf16.vlgmr.msra.gmra.mrb[0].mxu0 %vm559_vm1, %v7931_v36 }
 0x1f7   : > { %4792 = vmatpush1.bf16.msra.mxu0 %v4690_v45  ;;  %4834 = vmatprep.subr.bf16.mxu1 %v4693_v44  ;;  %v4904_v46 = vpop.permute.xlu0 %4903 }
 0x1f8   : > { %v4906_v31 = vpop.permute.xlu1 %4905  ;;  %4823 = vmatprep.mubr.bf16.mxu0 %v7997_v34 }
 0x1f9   : > { %6313 = vrot.lane.b32.xlu0 %v8206_v39, %s8021_s19  ;;  %v4921_v47 = vsel %vm4919_vm4, %v4904_v46, %v4906_v31 }
 0x1fa   : > { %6315 = vrot.lane.b32.xlu1 %v8209_v41, %s8021_s19  ;;  %7330 = vmatmul.mubr.msk.bf16.vlgmr.msra.gmra.mrb[0].mxu1 %vm559_vm1, %v7931_v36 }
 0x1fb   : > { %4835 = vmatpush1.bf16.msra.mxu1 %v4692_v48  ;;  %4939 = vmatprep.subr.bf16.mxu0 %v4921_v47  ;;  %v4902_v49 = vpop.permute.xlu0 %4901 }
 0x1fc   : > { %v4920_v50 = vsel %vm4919_vm4, %v4902_v49, %v4904_v46  ;;  %v4908_v51 = vpop.permute.xlu1 %4907  ;;  %4866 = vmatprep.mubr.bf16.mxu1 %v7997_v34 }
 0x1fd   : > { %6317 = vrot.lane.b32.xlu0 %v8212_v42, %s8021_s19  ;;  %v4922_v55 = vsel %vm4919_vm4, %v4906_v31, %v4908_v51 }
 0x1fe   : > { %6319 = vrot.lane.b32.xlu1 %v8215_v43, %s8021_s19  ;;  %7331 = vmatmul.mubr.msk.bf16.vlgmr.msra.gmra.mrb[4].mxu0 %vm559_vm1, %v7931_v36 }
 0x1ff   : > { %4940 = vmatpush1.bf16.msra.mxu0 %v4920_v50  ;;  %v4910_v52 = vpop.permute.xlu0 %4909  ;;  %4971 = vmatprep.mubr.bf16.mxu0 %v7997_v34 }
 0x200   : > { %v4912_v53 = vpop.permute.xlu1 %4911  ;;  %v4923_v54 = vsel %vm4919_vm4, %v4908_v51, %v4910_v52 }
 0x201   : > { %6321 = vrot.lane.b32.xlu0 %v8529_v4, %s8021_s19  ;;  %4982 = vmatprep.subr.bf16.mxu1 %v4923_v54  ;;  %v4924_v60 = vsel %vm4919_vm4, %v4910_v52, %v4912_v53 }
 0x202   : > { %6541 = vrot.lane.b32.xlu1 %v8195_v32, %s8022_s9  ;;  %7332 = vmatmul.mubr.msk.bf16.vlgmr.msra.gmra.mrb[4].mxu1 %vm559_vm1, %v7931_v36 }
 0x203   : > { %4983 = vmatpush1.bf16.msra.mxu1 %v4922_v55  ;;  %v4914_v57 = vpop.permute.xlu0 %4913  ;;  %5014 = vmatprep.mubr.bf16.mxu1 %v7997_v34 }
 0x204   : > { %v4916_v58 = vpop.permute.xlu1 %4915  ;;  %v4925_v59 = vsel %vm4919_vm4, %v4912_v53, %v4914_v57 }
 0x205   : > { %6543 = vrot.lane.b32.xlu0 %v8199_v35, %s8022_s9  ;;  %5025 = vmatprep.subr.bf16.mxu0 %v4925_v59  ;;  %v4926_v35 = vsel %vm4919_vm4, %v4914_v57, %v4916_v58 }
 0x206   : > { %6539 = vrot.lane.b32.xlu1 %v8190_v27, %s8022_s9  ;;  %7336 = vmatmul.mubr.msk.bf16.vlgmr.msra.gmra.mrb[0].mxu0 %vm559_vm1, %v7932_v56 }
 0x207   : > { %5026 = vmatpush1.bf16.msra.mxu0 %v4924_v60  ;;  %v4918_v32 = vpop.permute.xlu0 %4917  ;;  %5057 = vmatprep.mubr.bf16.mxu0 %v7997_v34 }
 0x208   : > { %v5138_v61 = vpop.permute.xlu1 %5137  ;;  %v4927_v62 = vsel %vm4919_vm4, %v4916_v58, %v4918_v32  ;;  %v7936_v32 = vld [vmem:[%s9273_s0 + $0xb8] sm:$0xff]  }
 0x209   : > { %6545 = vrot.lane.b32.xlu0 %v8203_v37, %s8022_s9  ;;  %5068 = vmatprep.subr.bf16.mxu1 %v4927_v62 }
 0x20a   : > { %6547 = vrot.lane.b32.xlu1 %v8206_v39, %s8022_s9  ;;  %7337 = vmatmul.mubr.msk.bf16.vlgmr.msra.gmra.mrb[0].mxu1 %vm559_vm1, %v7932_v56 }
 0x20b   : > { %5069 = vmatpush1.bf16.msra.mxu1 %v4926_v35  ;;  %v5140_v27 = vpop.permute.xlu0 %5139  ;;  %5100 = vmatprep.mubr.bf16.mxu1 %v7997_v34 }
 0x20c   : > { %v5136_v63 = vpop.permute.xlu1 %5135  ;;  %v5155_v0 = vsel %vm5153_vm5, %v5138_v61, %v5140_v27 }
 0x20d   : > { %v5154_v1 = vsel %vm5153_vm5, %v5136_v63, %v5138_v61  ;;  %6549 = vrot.lane.b32.xlu0 %v8209_v41, %s8022_s9  ;;  %5173 = vmatprep.subr.bf16.mxu0 %v5155_v0  ;;  %v7933_v41 = vld [vmem:[%s9273_s0 + $0xa0] sm:$0xff]  }
 0x20e   : > { %6551 = vrot.lane.b32.xlu1 %v8212_v42, %s8022_s9  ;;  %7338 = vmatmul.mubr.msk.bf16.vlgmr.msra.gmra.mrb[4].mxu0 %vm559_vm1, %v7932_v56 }
 0x20f   : > { %5174 = vmatpush1.bf16.msra.mxu0 %v5154_v1  ;;  %v5142_v37 = vpop.permute.xlu0 %5141  ;;  %5205 = vmatprep.mubr.bf16.mxu0 %v7997_v34 }
 0x210   : > { %v5144_v39 = vpop.permute.xlu1 %5143  ;;  %v5156_v2 = vsel %vm5153_vm5, %v5140_v27, %v5142_v37 }
 0x211   : > { %6553 = vrot.lane.b32.xlu0 %v8215_v43, %s8022_s9  ;;  %v5157_v3 = vsel %vm5153_vm5, %v5142_v37, %v5144_v39 }
 0x212   : > { %6555 = vrot.lane.b32.xlu1 %v8529_v4, %s8022_s9  ;;  %5216 = vmatprep.subr.bf16.mxu1 %v5157_v3 }
 0x213   : > { %7339 = vmatmul.mubr.msk.bf16.vlgmr.msra.gmra.mrb[4].mxu1 %vm559_vm1, %v7932_v56  ;;  %v5146_v42 = vpop.permute.xlu0 %5145 }
 0x214   : > { %5217 = vmatpush1.bf16.msra.mxu1 %v5156_v2  ;;  %v5158_v5 = vsel %vm5153_vm5, %v5144_v39, %v5146_v42  ;;  %v5148_v6 = vpop.permute.xlu1 %5147  ;;  %5248 = vmatprep.mubr.bf16.mxu1 %v7997_v34 }
 0x215   : > { %v5159_v43 = vsel %vm5153_vm5, %v5146_v42, %v5148_v6 }
 0x216   : > { %5259 = vmatprep.subr.bf16.mxu0 %v5159_v43  ;;  %7343 = vmatmul.mubr.msk.bf16.vlgmr.msra.gmra.mrb[0].mxu0 %vm559_vm1, %v7933_v41 }
 0x217   : > { %5260 = vmatpush1.bf16.msra.mxu0 %v5158_v5  ;;  %v5150_v4 = vpop.permute.xlu0 %5149  ;;  %5291 = vmatprep.mubr.bf16.mxu0 %v7997_v34 }
 0x218   : > { %v5152_v7 = vpop.permute.xlu1 %5151  ;;  %v5160_v8 = vsel %vm5153_vm5, %v5148_v6, %v5150_v4 }
 0x219   : > { %v5161_v9 = vsel %vm5153_vm5, %v5150_v4, %v5152_v7  ;;  %v7937_v4 = vld [vmem:[%s9273_s0 + $0xc0] sm:$0xff]  }
 0x21a   : > { %5302 = vmatprep.subr.bf16.mxu1 %v5161_v9 }
 0x21b   : > { %7344 = vmatmul.mubr.msk.bf16.vlgmr.msra.gmra.mrb[0].mxu1 %vm559_vm1, %v7933_v41  ;;  %v5372_v10 = vpop.permute.xlu0 %5371 }
 0x21c   : > { %5303 = vmatpush1.bf16.msra.mxu1 %v5160_v8  ;;  %v5374_v11 = vpop.permute.xlu1 %5373  ;;  %5334 = vmatprep.mubr.bf16.mxu1 %v7997_v34 }
 0x21d   : > { %v5389_v12 = vsel %vm5387_vm6, %v5372_v10, %v5374_v11 }
 0x21e   : > { %5407 = vmatprep.subr.bf16.mxu0 %v5389_v12  ;;  %7345 = vmatmul.mubr.msk.bf16.vlgmr.msra.gmra.mrb[4].mxu0 %vm559_vm1, %v7933_v41 }
 0x21f   : > { %v5370_v13 = vpop.permute.xlu0 %5369  ;;  %5439 = vmatprep.mubr.bf16.mxu0 %v7997_v34 }
 0x220   : > { %v5388_v14 = vsel %vm5387_vm6, %v5370_v13, %v5372_v10  ;;  %v5376_v15 = vpop.permute.xlu1 %5375 }
 0x221   : > { %5408 = vmatpush1.bf16.msra.mxu0 %v5388_v14  ;;  %v5390_v20 = vsel %vm5387_vm6, %v5374_v11, %v5376_v15 }
 0x223   : > { %v5378_v17 = vpop.permute.xlu0 %5377  ;;  %7346 = vmatmul.mubr.msk.bf16.vlgmr.msra.gmra.mrb[4].mxu1 %vm559_vm1, %v7933_v41 }
 0x224   : > { %v5380_v18 = vpop.permute.xlu1 %5379  ;;  %v5391_v19 = vsel %vm5387_vm6, %v5376_v15, %v5378_v17  ;;  %5482 = vmatprep.mubr.bf16.mxu1 %v7997_v34 }
 0x225   : > { %5450 = vmatprep.subr.bf16.mxu1 %v5391_v19  ;;  %v5392_v24 = vsel %vm5387_vm6, %v5378_v17, %v5380_v18 }
 0x226   : > { %5451 = vmatpush1.bf16.msra.mxu1 %v5390_v20  ;;  %7350 = vmatmul.mubr.msk.bf16.vlgmr.msra.gmra.mrb[0].mxu0 %vm559_vm1, %v7934_v16 }
 0x227   : > { %v5382_v21 = vpop.permute.xlu0 %5381  ;;  %5525 = vmatprep.mubr.bf16.mxu0 %v7997_v34 }
 0x228   : > { %v5384_v22 = vpop.permute.xlu1 %5383  ;;  %v5393_v23 = vsel %vm5387_vm6, %v5380_v18, %v5382_v21 }
 0x229   : > { %5493 = vmatprep.subr.bf16.mxu0 %v5393_v23  ;;  %v5394_v29 = vsel %vm5387_vm6, %v5382_v21, %v5384_v22 }
 0x22a   : > { %5494 = vmatpush1.bf16.msra.mxu0 %v5392_v24 }
 0x22b   : > { %v5386_v25 = vpop.permute.xlu0 %5385  ;;  %7351 = vmatmul.mubr.msk.bf16.vlgmr.msra.gmra.mrb[0].mxu1 %vm559_vm1, %v7934_v16 }
 0x22c   : > { %v5606_v26 = vpop.permute.xlu1 %5605  ;;  %v5395_v28 = vsel %vm5387_vm6, %v5384_v22, %v5386_v25  ;;  %5568 = vmatprep.mubr.bf16.mxu1 %v7997_v34  ;;  %v7938_v25 = vld [vmem:[%s9273_s0 + $0xc8] sm:$0xff]  }
 0x22d   : > { %5536 = vmatprep.subr.bf16.mxu1 %v5395_v28 }
 0x22e   : > { %5537 = vmatpush1.bf16.msra.mxu1 %v5394_v29  ;;  %7352 = vmatmul.mubr.msk.bf16.vlgmr.msra.gmra.mrb[4].mxu0 %vm559_vm1, %v7934_v16 }
 0x22f   : > { %v5608_v30 = vpop.permute.xlu0 %5607  ;;  %5673 = vmatprep.mubr.bf16.mxu0 %v7997_v34 }
 0x230   : > { %v5604_v33 = vpop.permute.xlu1 %5603  ;;  %v5623_v36 = vsel %vm5621_vm7, %v5606_v26, %v5608_v30 }
 0x231   : > { %v5622_v38 = vsel %vm5621_vm7, %v5604_v33, %v5606_v26  ;;  %5641 = vmatprep.subr.bf16.mxu0 %v5623_v36 }
 0x232   : > { %5642 = vmatpush1.bf16.msra.mxu0 %v5622_v38 }
 0x233   : > { %v5610_v44 = vpop.permute.xlu0 %5609  ;;  %7353 = vmatmul.mubr.msk.bf16.vlgmr.msra.gmra.mrb[4].mxu1 %vm559_vm1, %v7934_v16 }
 0x234   : > { %v5624_v45 = vsel %vm5621_vm7, %v5608_v30, %v5610_v44  ;;  %v5612_v46 = vpop.permute.xlu1 %5611  ;;  %5716 = vmatprep.mubr.bf16.mxu1 %v7997_v34 }
 0x235   : > { %v5625_v31 = vsel %vm5621_vm7, %v5610_v44, %v5612_v46 }
 0x236   : > { %5684 = vmatprep.subr.bf16.mxu1 %v5625_v31  ;;  %7357 = vmatmul.mubr.msk.bf16.vlgmr.msra.gmra.mrb[0].mxu0 %vm559_vm1, %v7935_v40 }
 0x237   : > { %5685 = vmatpush1.bf16.msra.mxu1 %v5624_v45  ;;  %v5614_v47 = vpop.permute.xlu0 %5613  ;;  %5759 = vmatprep.mubr.bf16.mxu0 %v7997_v34 }
 0x238   : > { %v5626_v48 = vsel %vm5621_vm7, %v5612_v46, %v5614_v47  ;;  %v5616_v49 = vpop.permute.xlu1 %5615 }
 0x239   : > { %v5627_v50 = vsel %vm5621_vm7, %v5614_v47, %v5616_v49 }
 0x23a   : > { %5727 = vmatprep.subr.bf16.mxu0 %v5627_v50 }
 0x23b   : > { %5728 = vmatpush1.bf16.msra.mxu0 %v5626_v48  ;;  %v5618_v51 = vpop.permute.xlu0 %5617  ;;  %7358 = vmatmul.mubr.msk.bf16.vlgmr.msra.gmra.mrb[0].mxu1 %vm559_vm1, %v7935_v40 }
 0x23c   : > { %v5628_v52 = vsel %vm5621_vm7, %v5616_v49, %v5618_v51  ;;  %v5620_v53 = vpop.permute.xlu1 %5619  ;;  %5802 = vmatprep.mubr.bf16.mxu1 %v7997_v34 }
 0x23d   : > { %v5629_v54 = vsel %vm5621_vm7, %v5618_v51, %v5620_v53  ;;  %v7939_v51 = vld [vmem:[%s9273_s0 + $0xd0] sm:$0xff]  }
 0x23e   : > { %5770 = vmatprep.subr.bf16.mxu1 %v5629_v54  ;;  %7359 = vmatmul.mubr.msk.bf16.vlgmr.msra.gmra.mrb[4].mxu0 %vm559_vm1, %v7935_v40 }
 0x23f   : > { %5771 = vmatpush1.bf16.msra.mxu1 %v5628_v52  ;;  %v5840_v55 = vpop.permute.xlu0 %5839  ;;  %5907 = vmatprep.mubr.bf16.mxu0 %v7997_v34 }
 0x240   : > { %v5842_v56 = vpop.permute.xlu1 %5841 }
 0x241   : > { %v5857_v57 = vsel %vm5855_vm8, %v5840_v55, %v5842_v56 }
 0x242   : > { %5875 = vmatprep.subr.bf16.mxu0 %v5857_v57 }
 0x243   : > { %v5838_v58 = vpop.permute.xlu0 %5837  ;;  %7360 = vmatmul.mubr.msk.bf16.vlgmr.msra.gmra.mrb[4].mxu1 %vm559_vm1, %v7935_v40 }
 0x244   : > { %v5856_v59 = vsel %vm5855_vm8, %v5838_v58, %v5840_v55  ;;  %v5844_v60 = vpop.permute.xlu1 %5843  ;;  %5950 = vmatprep.mubr.bf16.mxu1 %v7997_v34 }
 0x245   : > { %5876 = vmatpush1.bf16.msra.mxu0 %v5856_v59  ;;  %v5858_v27 = vsel %vm5855_vm8, %v5842_v56, %v5844_v60 }
 0x247   : > { %v5846_v61 = vpop.permute.xlu0 %5845 }
 0x248   : > { %v5848_v62 = vpop.permute.xlu1 %5847  ;;  %v5859_v35 = vsel %vm5855_vm8, %v5844_v60, %v5846_v61  ;;  %7364 = vmatmul.mubr.msk.bf16.vlgmr.msra.gmra.mrb[0].mxu0 %vm559_vm1, %v7936_v32 }
 0x249   : > { %5918 = vmatprep.subr.bf16.mxu1 %v5859_v35  ;;  %5993 = vmatprep.mubr.bf16.mxu0 %v7997_v34  ;;  %v5860_v37 = vsel %vm5855_vm8, %v5846_v61, %v5848_v62  ;;  %v6821_v35 = vld [vmem:[%s440_s18] sm:$0xff] }
 0x24a   : > { %5919 = vmatpush1.bf16.msra.mxu1 %v5858_v27  ;;  %vm6822_vm12 = vcmp.gt.bf16.partialorder %v6821_v35, 0 }
 0x24b   : > { %v5850_v63 = vpop.permute.xlu0 %5849  ;;  %v6823_v27 = vsel %vm6822_vm12, 65537, %v7997_v34 }
 0x24c   : > { %v5852_v0 = vpop.permute.xlu1 %5851  ;;  %v5861_v1 = vsel %vm5855_vm8, %v5848_v62, %v5850_v63 }
 0x24d   : > { %5961 = vmatprep.subr.bf16.mxu0 %v5861_v1  ;;  %7365 = vmatmul.mubr.msk.bf16.vlgmr.msra.gmra.mrb[0].mxu1 %vm559_vm1, %v7936_v32  ;;  %v5862_v41 = vsel %vm5855_vm8, %v5850_v63, %v5852_v0  ;;  %v6830_v63 = vlaneseq }
 0x24e   : > { %5962 = vmatpush1.bf16.msra.mxu0 %v5860_v37  ;;  %6036 = vmatprep.mubr.bf16.mxu1 %v7997_v34 }
 0x24f   : > { %v5854_v39 = vpop.permute.xlu0 %5853  ;;  %v6831_v1 = vshrl.u32 %v6830_v63, 7 }
 0x250   : > { %v6074_v2 = vpop.permute.xlu1 %6073  ;;  %v5863_v3 = vsel %vm5855_vm8, %v5852_v0, %v5854_v39  ;;  %v6824_v0 = vunpack.c.l.b16 %v6823_v27 }
 0x251   : > { %6004 = vmatprep.subr.bf16.mxu1 %v5863_v3  ;;  %7366 = vmatmul.mubr.msk.bf16.vlgmr.msra.gmra.mrb[4].mxu0 %vm559_vm1, %v7936_v32  ;;  %v9134_v37 = vsub.s32 0, %v6831_v1  ;;  %v6825_v3 = vunpack.c.h.b16 %v6823_v27 }
 0x252   : > { %6005 = vmatpush1.bf16.msra.mxu1 %v5862_v41  ;;  %6141 = vmatprep.mubr.bf16.mxu0 %v7997_v34  ;;  %vm6826_vm14 = vcmp.ne.s32.totalorder %v6824_v0, 0  ;;  %v6840_v41 = vsub.s32 4, %v6831_v1 }
 0x253   : > { %v6076_v42 = vpop.permute.xlu0 %6075  ;;  %v6828_v39 = vsel %vm6826_vm14, 1, %v7997_v34 }
 0x254   : > { %v6072_v5 = vpop.permute.xlu1 %6071  ;;  %v6091_v6 = vsel %vm6089_vm9, %v6074_v2, %v6076_v42 }
 0x255   : > { %v6090_v43 = vsel %vm6089_vm9, %v6072_v5, %v6074_v2  ;;  %6109 = vmatprep.subr.bf16.mxu0 %v6091_v6  ;;  %7367 = vmatmul.mubr.msk.bf16.vlgmr.msra.gmra.mrb[4].mxu1 %vm559_vm1, %v7936_v32  ;;  %v6836_v2 = vsub.s32 2, %v6831_v1  ;;  %v6844_v6 = vsub.s32 6, %v6831_v1 }
 0x256   : > { %6110 = vmatpush1.bf16.msra.mxu0 %v6090_v43  ;;  %6184 = vmatprep.mubr.bf16.mxu1 %v7997_v34  ;;  %v6841_v43 = vrot.slane %v6828_v39, %v6840_v41 }
 0x257   : > { %v6078_v7 = vpop.permute.xlu0 %6077  ;;  %v6837_v5 = vrot.slane %v6828_v39, %v6836_v2 }
 0x258   : > { %v6092_v8 = vsel %vm6089_vm9, %v6076_v42, %v6078_v7  ;;  %v6080_v9 = vpop.permute.xlu1 %6079  ;;  %v6833_v42 = vrot.slane %v6828_v39, %v9134_v37  ;;  %vm6864_vm2 = vcmp.ne.s32.totalorder %v6841_v43, 0 }
 0x259   : > { %v6093_v10 = vsel %vm6089_vm9, %v6078_v7, %v6080_v9  ;;  %7371 = vmatmul.mubr.msk.bf16.vlgmr.msra.gmra.mrb[0].mxu0 %vm559_vm1, %v7937_v4  ;;  %vm6863_vm0 = vcmp.ne.s32.totalorder %v6837_v5, 0  ;;  %v6845_v7 = vrot.slane %v6828_v39, %v6844_v6 }
 0x25a   : > { %6152 = vmatprep.subr.bf16.mxu1 %v6093_v10  ;;  %6227 = vmatprep.mubr.bf16.mxu0 %v7997_v34  ;;  %vm6862_vm15 = vcmp.ne.s32.totalorder %v6833_v42, 0  ;;  %v6871_v10 = vsel %vm6863_vm0, 1, %v7997_v34  ;;  %vm6989_vm0 = vcmask 15368  }
 0x25b   : > { %6153 = vmatpush1.bf16.msra.mxu1 %v6092_v8  ;;  %v6082_v11 = vpop.permute.xlu0 %6081  ;;  %v6870_v8 = vsel %vm6862_vm15, 1, %v7997_v34  ;;  %vm6865_vm3 = vcmp.ne.s32.totalorder %v6845_v7, 0 }
 0x25c   : > { %v6094_v12 = vsel %vm6089_vm9, %v6080_v9, %v6082_v11  ;;  %v6084_v13 = vpop.permute.xlu1 %6083 }
 0x25d   : > { %v6095_v14 = vsel %vm6089_vm9, %v6082_v11, %v6084_v13 }
 0x25e   : > { %6195 = vmatprep.subr.bf16.mxu0 %v6095_v14  ;;  %7372 = vmatmul.mubr.msk.bf16.vlgmr.msra.gmra.mrb[0].mxu1 %vm559_vm1, %v7937_v4  ;;  %v6872_v14 = vsel %vm6864_vm2, 1, %v7997_v34 }
 0x25f   : > { %6196 = vmatpush1.bf16.msra.mxu0 %v6094_v12  ;;  %v6086_v15 = vpop.permute.xlu0 %6085  ;;  %6270 = vmatprep.mubr.bf16.mxu1 %v7997_v34 }
 0x260   : > { %v6096_v16 = vsel %vm6089_vm9, %v6084_v13, %v6086_v15  ;;  %v6088_v17 = vpop.permute.xlu1 %6087  ;;  %v6881_v13 = vrot.slane %v6870_v8, %v9134_v37 }
 0x261   : > { %v6097_v18 = vsel %vm6089_vm9, %v6086_v15, %v6088_v17  ;;  %v6889_v17 = vrot.slane %v6872_v14, %v9134_v37 }
 0x262   : > { %6238 = vmatprep.subr.bf16.mxu1 %v6097_v18  ;;  %7373 = vmatmul.mubr.msk.bf16.vlgmr.msra.gmra.mrb[4].mxu0 %vm559_vm1, %v7937_v4  ;;  %v6873_v18 = vsel %vm6865_vm3, 1, %v7997_v34  ;;  %vm9147_vm7 = vcmp.eq.s32.totalorder %v6881_v13, 1 }
 0x263   : > { %6239 = vmatpush1.bf16.msra.mxu1 %v6096_v16  ;;  %v6308_v19 = vpop.permute.xlu0 %6307  ;;  %6375 = vmatprep.mubr.bf16.mxu0 %v7997_v34  ;;  %v6885_v16 = vrot.slane %v6871_v10, %v9134_v37 }
 0x264   : > { %v6310_v20 = vpop.permute.xlu1 %6309 }
 0x265   : > { %v6325_v21 = vsel %vm6323_vm10, %v6308_v19, %v6310_v20  ;;  %vm9152_vm9 = vcmp.eq.s32.totalorder %v6885_v16, 1 }
 0x266   : > { %6343 = vmatprep.subr.bf16.mxu0 %v6325_v21  ;;  %7374 = vmatmul.mubr.msk.bf16.vlgmr.msra.gmra.mrb[4].mxu1 %vm559_vm1, %v7937_v4 }
 0x267   : > { %v6306_v22 = vpop.permute.xlu0 %6305  ;;  %6418 = vmatprep.mubr.bf16.mxu1 %v7997_v34 }
 0x268   : > { %v6324_v23 = vsel %vm6323_vm10, %v6306_v22, %v6308_v19  ;;  %v6312_v24 = vpop.permute.xlu1 %6311 }
 0x269   : > { %6344 = vmatpush1.bf16.msra.mxu0 %v6324_v23  ;;  %v6326_v30 = vsel %vm6323_vm10, %v6310_v20, %v6312_v24 }
 0x26b   : > { %v6314_v26 = vpop.permute.xlu0 %6313 }
 0x26c   : > { %v6316_v28 = vpop.permute.xlu1 %6315  ;;  %7378 = vmatmul.mubr.msk.bf16.vlgmr.msra.gmra.mrb[0].mxu0 %vm559_vm1, %v7938_v25  ;;  %v6327_v29 = vsel %vm6323_vm10, %v6312_v24, %v6314_v26  ;;  %v6893_v24 = vrot.slane %v6873_v18, %v9134_v37 }
 0x26d   : > { %6386 = vmatprep.subr.bf16.mxu1 %v6327_v29  ;;  %6461 = vmatprep.mubr.bf16.mxu0 %v7997_v34  ;;  %v6328_v40 = vsel %vm6323_vm10, %v6314_v26, %v6316_v28 }
 0x26e   : > { %6387 = vmatpush1.bf16.msra.mxu1 %v6326_v30 }
 0x26f   : > { %v6318_v33 = vpop.permute.xlu0 %6317 }
 0x270   : > { %v6320_v36 = vpop.permute.xlu1 %6319  ;;  %v6329_v38 = vsel %vm6323_vm10, %v6316_v28, %v6318_v33 }
 0x271   : > { %7379 = vmatmul.mubr.msk.bf16.vlgmr.msra.gmra.mrb[0].mxu1 %vm559_vm1, %v7938_v25  ;;  %6429 = vmatprep.subr.bf16.mxu0 %v6329_v38  ;;  %v6330_v31 = vsel %vm6323_vm10, %v6318_v33, %v6320_v36 }
 0x272   : > { %6430 = vmatpush1.bf16.msra.mxu0 %v6328_v40  ;;  %6504 = vmatprep.mubr.bf16.mxu1 %v7997_v34 }
 0x273   : > { %v6322_v44 = vpop.permute.xlu0 %6321 }
 0x274   : > { %v6542_v45 = vpop.permute.xlu1 %6541  ;;  %v6331_v46 = vsel %vm6323_vm10, %v6320_v36, %v6322_v44  ;;  %vm9161_vm10 = vcmp.eq.s32.totalorder %v6889_v17, 1 }
 0x275   : > { %7380 = vmatmul.mubr.msk.bf16.vlgmr.msra.gmra.mrb[4].mxu0 %vm559_vm1, %v7938_v25  ;;  %6472 = vmatprep.subr.bf16.mxu1 %v6331_v46 }
 0x276   : > { %6473 = vmatpush1.bf16.msra.mxu1 %v6330_v31  ;;  %6609 = vmatprep.mubr.bf16.mxu0 %v7997_v34 }
 0x277   : > { %v6544_v47 = vpop.permute.xlu0 %6543 }
 0x278   : > { %v6540_v48 = vpop.permute.xlu1 %6539  ;;  %v6559_v49 = vsel %vm6557_vm11, %v6542_v45, %v6544_v47 }
 0x279   : > { %v6558_v50 = vsel %vm6557_vm11, %v6540_v48, %v6542_v45  ;;  %7381 = vmatmul.mubr.msk.bf16.vlgmr.msra.gmra.mrb[4].mxu1 %vm559_vm1, %v7938_v25  ;;  %6577 = vmatprep.subr.bf16.mxu0 %v6559_v49 }
 0x27a   : > { %6578 = vmatpush1.bf16.msra.mxu0 %v6558_v50  ;;  %6652 = vmatprep.mubr.bf16.mxu1 %v7997_v34 }
 0x27b   : > { %v6546_v52 = vpop.permute.xlu0 %6545 }
 0x27c   : > { %v6560_v53 = vsel %vm6557_vm11, %v6544_v47, %v6546_v52  ;;  %v6548_v54 = vpop.permute.xlu1 %6547 }
 0x27d   : > { %7385 = vmatmul.mubr.msk.bf16.vlgmr.msra.gmra.mrb[0].mxu0 %vm559_vm1, %v7939_v51  ;;  %v6561_v55 = vsel %vm6557_vm11, %v6546_v52, %v6548_v54 }
 0x27e   : > { %6620 = vmatprep.subr.bf16.mxu1 %v6561_v55  ;;  %6695 = vmatprep.mubr.bf16.mxu0 %v7997_v34 }
 0x27f   : > { %6621 = vmatpush1.bf16.msra.mxu1 %v6560_v53  ;;  %v6550_v56 = vpop.permute.xlu0 %6549 }
 0x280   : > { %v6562_v57 = vsel %vm6557_vm11, %v6548_v54, %v6550_v56  ;;  %v6552_v58 = vpop.permute.xlu1 %6551 }
 0x281   : > { %v6563_v59 = vsel %vm6557_vm11, %v6550_v56, %v6552_v58 }
 0x282   : > { %7386 = vmatmul.mubr.msk.bf16.vlgmr.msra.gmra.mrb[0].mxu1 %vm559_vm1, %v7939_v51  ;;  %6663 = vmatprep.subr.bf16.mxu0 %v6563_v59 }
 0x283   : > { %6664 = vmatpush1.bf16.msra.mxu0 %v6562_v57  ;;  %v6554_v60 = vpop.permute.xlu0 %6553  ;;  %6738 = vmatprep.mubr.bf16.mxu1 %v7997_v34 }
 0x284   : > { %v6564_v32 = vsel %vm6557_vm11, %v6552_v58, %v6554_v60  ;;  %v6556_v61 = vpop.permute.xlu1 %6555 }
 0x285   : > { %v6565_v62 = vsel %vm6557_vm11, %v6554_v60, %v6556_v61  ;;  %vm9180_vm11 = vcmp.eq.s32.totalorder %v6893_v24, 1 }
 0x286   : > { %7387 = vmatmul.mubr.msk.bf16.vlgmr.msra.gmra.mrb[4].mxu0 %vm559_vm1, %v7939_v51  ;;  %6706 = vmatprep.subr.bf16.mxu1 %v6565_v62 }
 0x287   : > { %6707 = vmatpush1.bf16.msra.mxu1 %v6564_v32 }
 0x28a   : > { %7388 = vmatmul.mubr.msk.bf16.vlgmr.msra.gmra.mrb[4].mxu1 %vm559_vm1, %v7939_v51  ;;  %vm6827_vm1 = vcmp.ne.s32.totalorder %v6825_v3, 0 }
 0x28b   : > { %v6829_v4 = vsel %vm6827_vm1, 1, %v7997_v34 }
 0x28c   : > { %v6849_v9 = vrot.slane %v6829_v4, %v9134_v37  ;;  %v6853_v11 = vrot.slane %v6829_v4, %v6836_v2  ;;  %v6857_v12 = vrot.slane %v6829_v4, %v6840_v41  ;;  %v6861_v15 = vrot.slane %v6829_v4, %v6844_v6 }
 0x28e   : > { %vm6866_vm4 = vcmp.ne.s32.totalorder %v6849_v9, 0  ;;  %vm6867_vm5 = vcmp.ne.s32.totalorder %v6853_v11, 0  ;;  %vm6868_vm6 = vcmp.ne.s32.totalorder %v6857_v12, 0  ;;  %vm6869_vm8 = vcmp.ne.s32.totalorder %v6861_v15, 0 }
 0x28f   : > { %v6874_v20 = vsel %vm6866_vm4, 1, %v7997_v34  ;;  %v6875_v22 = vsel %vm6867_vm5, 1, %v7997_v34  ;;  %v6876_v25 = vsel %vm6868_vm6, 1, %v7997_v34  ;;  %v6877_v33 = vsel %vm6869_vm8, 1, %v7997_v34 }
 0x290   : > { %v6897_v30 = vrot.slane %v6874_v20, %v9134_v37  ;;  %v6901_v45 = vrot.slane %v6875_v22, %v9134_v37  ;;  %v6905_v49 = vrot.slane %v6876_v25, %v9134_v37  ;;  %v6909_v52 = vrot.slane %v6877_v33, %v9134_v37 }
 0x292   : > { %vm9187_vm12 = vcmp.eq.s32.totalorder %v6897_v30, 1  ;;  %vm9191_vm14 = vcmp.eq.s32.totalorder %v6901_v45, 1  ;;  %vm9199_vm1 = vcmp.eq.s32.totalorder %v6905_v49, 1  ;;  %vm9203_vm15 = vcmp.eq.s32.totalorder %v6909_v52, 1 }
 0x350   : > { %v6611_v23 = vpop.f32.mrb[0].mxu0 }
 0x351   : > { %v6918_v26 = vsel %vm9147_vm7, %v6611_v23, 0.0  ;;  %v6613_v28 = vpop.f32.mrb[1].mxu0 }
 0x352   : > { %v6955_v36 = vmul.f32 %v6918_v26, %v6918_v26  ;;  %v7405_v38 = vpack.c.bf16 %v6613_v28, %v6611_v23  ;;  %v6919_v40 = vsel %vm9152_vm9, %v6613_v28, 0.0  ;;  %v6615_v44 = vpop.f32.mrb[2].mxu0 }
 0x353   : > { %v6934_v46 = vadd.f32 %v6919_v40, %v6918_v26  ;;  %v6956_v31 = vmul.f32 %v6919_v40, %v6919_v40  ;;  %v6926_v47 = vsel %vm9147_vm7, %v6615_v44, 0.0  ;;  %v6617_v48 = vpop.f32.mrb[3].mxu0 }
 0x354   : > { %6813 = vst [vmem:[%s9174_s13] sm:$0xff] %v7405_v38  ;;  %v6963_v34 = vmul.f32 %v6926_v47, %v6926_v47  ;;  %v7409_v50 = vpack.c.bf16 %v6617_v48, %v6615_v44  ;;  %v6927_v51 = vsel %vm9152_vm9, %v6617_v48, 0.0 }
 0x355   : > { %v6971_v53 = vadd.f32 %v6956_v31, %v6955_v36  ;;  %v6943_v54 = vadd.f32 %v6927_v51, %v6926_v47  ;;  %v6964_v55 = vmul.f32 %v6927_v51, %v6927_v51  ;;  %v6654_v56 = vpop.f32.mrb[0].mxu1 }
 0x356   : > { %6817 = vst [vmem:[%s9174_s13 + $0x20] sm:$0xff] %v7409_v50  ;;  %v6920_v58 = vsel %vm9161_vm10, %v6654_v56, 0.0  ;;  %v6656_v59 = vpop.f32.mrb[1].mxu1 }
 0x357   : > { %v6980_v61 = vadd.f32 %v6964_v55, %v6963_v34  ;;  %v6935_v62 = vadd.f32 %v6934_v46, %v6920_v58  ;;  %v6957_v35 = vmul.f32 %v6920_v58, %v6920_v58  ;;  %v7406_v27 = vpack.c.bf16 %v6656_v59, %v6654_v56  ;;  %v6658_v63 = vpop.f32.mrb[2].mxu1 }
 0x358   : > { %v6921_v0 = vsel %vm9180_vm11, %v6656_v59, 0.0  ;;  %v6928_v1 = vsel %vm9161_vm10, %v6658_v63, 0.0  ;;  %v6660_v37 = vpop.f32.mrb[3].mxu1 }
 0x359   : > { %v6972_v3 = vadd.f32 %v6971_v53, %v6957_v35  ;;  %6814 = vst [vmem:[%s9174_s13 + $0x8] sm:$0xff] %v7406_v27  ;;  %v6936_v41 = vadd.f32 %v6935_v62, %v6921_v0  ;;  %v6958_v42 = vmul.f32 %v6921_v0, %v6921_v0  ;;  %v6944_v5 = vadd.f32 %v6943_v54, %v6928_v1  ;;  %v6697_v6 = vpop.f32.mrb[4].mxu0 }
 0x35a   : > { %v6965_v43 = vmul.f32 %v6928_v1, %v6928_v1  ;;  %v7410_v4 = vpack.c.bf16 %v6660_v37, %v6658_v63  ;;  %v6929_v7 = vsel %vm9180_vm11, %v6660_v37, 0.0  ;;  %v6922_v8 = vsel %vm9187_vm12, %v6697_v6, 0.0  ;;  %v6699_v9 = vpop.f32.mrb[5].mxu0 }
 0x35b   : > { %v6973_v10 = vadd.f32 %v6972_v3, %v6958_v42  ;;  %v6945_v11 = vadd.f32 %v6944_v5, %v6929_v7  ;;  %v6966_v12 = vmul.f32 %v6929_v7, %v6929_v7  ;;  %v6937_v13 = vadd.f32 %v6936_v41, %v6922_v8  ;;  %v6701_v14 = vpop.f32.mrb[6].mxu0  ;;  %v7019_v1 = vld [vmem:[%s9174_s13] sm:$0xff] (%p8154_p1) }
 0x35c   : > { %v6981_v15 = vadd.f32 %v6980_v61, %v6965_v43  ;;  %6818 = vst [vmem:[%s9174_s13 + $0x28] sm:$0xff] %v7410_v4  ;;  %v6959_v16 = vmul.f32 %v6922_v8, %v6922_v8  ;;  %v7407_v17 = vpack.c.bf16 %v6699_v9, %v6697_v6  ;;  %v6930_v18 = vsel %vm9187_vm12, %v6701_v14, 0.0  ;;  %v6703_v19 = vpop.f32.mrb[7].mxu0  ;;  %7020 = vst [vmem:[%s7006_s11] sm:$0xff] (%p8154_p1), %v7019_v1 }
 0x35d   : > { %v6946_v20 = vadd.f32 %v6945_v11, %v6930_v18  ;;  %v6967_v21 = vmul.f32 %v6930_v18, %v6930_v18  ;;  %v7411_v22 = vpack.c.bf16 %v6703_v19, %v6701_v14  ;;  %v6923_v23 = vsel %vm9191_vm14, %v6699_v9, 0.0  ;;  %v6740_v24 = vpop.f32.mrb[4].mxu1  ;;  %v7027_v3 = vld [vmem:[%s9174_s13 + $0x20] sm:$0xff] (%p8154_p1) }
 0x35e   : > { %v6982_v25 = vadd.f32 %v6981_v15, %v6966_v12  ;;  %v6974_v26 = vadd.f32 %v6973_v10, %v6959_v16  ;;  %6815 = vst [vmem:[%s9174_s13 + $0x10] sm:$0xff] %v7407_v17  ;;  %v6931_v28 = vsel %vm9191_vm14, %v6703_v19, 0.0  ;;  %v6938_v29 = vadd.f32 %v6937_v13, %v6923_v23  ;;  %v6742_v30 = vpop.f32.mrb[5].mxu1  ;;  %7028 = vst [vmem:[%s7006_s11 + $0x40] sm:$0xff] (%p8154_p1), %v7027_v3 }
 0x35f   : > { %6819 = vst [vmem:[%s9174_s13 + $0x30] sm:$0xff] %v7411_v22  ;;  %v6947_v33 = vadd.f32 %v6946_v20, %v6931_v28  ;;  %v6960_v36 = vmul.f32 %v6923_v23, %v6923_v23  ;;  %v6968_v38 = vmul.f32 %v6931_v28, %v6931_v28  ;;  %v6924_v40 = vsel %vm9199_vm1, %v6740_v24, 0.0  ;;  %v6744_v44 = vpop.f32.mrb[6].mxu1 }
 0x360   : > { %v6983_v45 = vadd.f32 %v6982_v25, %v6967_v21  ;;  %v6939_v46 = vadd.f32 %v6938_v29, %v6924_v40  ;;  %v6961_v31 = vmul.f32 %v6924_v40, %v6924_v40  ;;  %v7408_v47 = vpack.c.bf16 %v6742_v30, %v6740_v24  ;;  %v6746_v48 = vpop.f32.mrb[7].mxu1  ;;  %v7021_v37 = vld [vmem:[%s9174_s13 + $0x8] sm:$0xff] (%p8154_p1) }
 0x361   : > { %v6975_v49 = vadd.f32 %v6974_v26, %v6960_v36  ;;  %v6932_v34 = vsel %vm9199_vm1, %v6744_v44, 0.0  ;;  %v7412_v50 = vpack.c.bf16 %v6746_v48, %v6744_v44  ;;  %v6925_v51 = vsel %vm9203_vm15, %v6742_v30, 0.0  ;;  %7022 = vst [vmem:[%s7006_s11 + $0x8] sm:$0xff] (%p8154_p1), %v7021_v37 }
 0x362   : > { %v6984_v52 = vadd.f32 %v6983_v45, %v6968_v38  ;;  %6816 = vst [vmem:[%s9174_s13 + $0x18] sm:$0xff] %v7408_v47  ;;  %v6948_v53 = vadd.f32 %v6947_v33, %v6932_v34  ;;  %v6969_v54 = vmul.f32 %v6932_v34, %v6932_v34  ;;  %v6933_v55 = vsel %vm9203_vm15, %v6746_v48, 0.0 }
 0x363   : > { %v6976_v56 = vadd.f32 %v6975_v49, %v6961_v31  ;;  %6820 = vst [vmem:[%s9174_s13 + $0x38] sm:$0xff] %v7412_v50  ;;  %v6940_v57 = vadd.f32 %v6939_v46, %v6925_v51  ;;  %v6962_v58 = vmul.f32 %v6925_v51, %v6925_v51  ;;  %v6970_v59 = vmul.f32 %v6933_v55, %v6933_v55  ;;  %v7029_v41 = vld [vmem:[%s9174_s13 + $0x28] sm:$0xff] (%p8154_p1) }
 0x364   : > { %v6985_v60 = vadd.f32 %v6984_v52, %v6969_v54  ;;  %v6949_v32 = vadd.f32 %v6948_v53, %v6933_v55  ;;  %7030 = vst [vmem:[%s7006_s11 + $0x48] sm:$0xff] (%p8154_p1), %v7029_v41 }
 0x365   : > { %6941 = vadd.xlane.f32.xlu0 %v6940_v57  ;;  %v6977_v61 = vadd.f32 %v6976_v56, %v6962_v58  ;;  %v7023_v39 = vld [vmem:[%s9174_s13 + $0x10] sm:$0xff] (%p8154_p1) }
 0x366   : > { %v6986_v62 = vadd.f32 %v6985_v60, %v6970_v59  ;;  %6950 = vadd.xlane.f32.xlu1 %v6949_v32  ;;  %7024 = vst [vmem:[%s7006_s11 + $0x10] sm:$0xff] (%p8154_p1), %v7023_v39  ;;  %v7031_v42 = vld [vmem:[%s9174_s13 + $0x30] sm:$0xff] (%p8154_p1) }
 0x367   : > { %7032 = vst [vmem:[%s7006_s11 + $0x50] sm:$0xff] (%p8154_p1), %v7031_v42 }
 0x369   : > { %6978 = vadd.xlane.f32.xlu0 %v6977_v61  ;;  %v7025_v2 = vld [vmem:[%s9174_s13 + $0x18] sm:$0xff] (%p8154_p1) }
 0x36a   : > { %7026 = vst [vmem:[%s7006_s11 + $0x18] sm:$0xff] (%p8154_p1), %v7025_v2  ;;  %v7033_v5 = vld [vmem:[%s9174_s13 + $0x38] sm:$0xff] (%p8154_p1) }
 0x36b   : > { %7034 = vst [vmem:[%s7006_s11 + $0x58] sm:$0xff] (%p8154_p1), %v7033_v5 }
 0x36d   : > { %6987 = vadd.xlane.f32.xlu0 %v6986_v62 }
 0x3f2   : > { %v6942_v35 = vpop.xlane.xlu0 %6941 }
 0x3f3   : > { %6953 = vst.msk [vmem:[%s447_s25] sm:$0xff] %vm3316_vm13, %v6942_v35  ;;  %v6951_v27 = vpop.xlane.xlu1 %6950 }
 0x3f4   : > { %6954 = vst.msk [vmem:[%s447_s25 + $0x8] sm:$0xff] %vm3316_vm13, %v6951_v27 }
 0x3f5   : > { %7003 = sbr.rel (!%p8154_p1) target bundleno = 1020 (0x3fc), region = 113 }
 0x3f6   : > { %v6979_v63 = vpop.xlane.xlu0 %6978 }
 0x3f7   : > { %6990 = vst.msk [vmem:[%s447_s25] sm:$0xff] %vm6989_vm0, %v6979_v63 }
 0x3fa   : > { %v6988_v0 = vpop.xlane.xlu0 %6987 }
 0x3fb   : > { %6991 = vst.msk [vmem:[%s447_s25 + $0x8] sm:$0xff] %vm6989_vm0, %v6988_v0 }
 0x3fc PF: > { %s9301_s28 = sld [smem:[#allocation6_spill]]  ;;  %p14_p8 = scmp.ge.s32.totalorder %s8097_s29, 4  }
 0x3fd   : > { %s9302_s21 = smov %s7974_s22  ;;  %s9303_s22 = smov %s8159_s7 }
 0x3fe   : > { %s9304_s23 = smov %s7982_s24  ;;  %s9305_s24 = smov %s8122_s14 }
 0x3ff   : > { %s9306_s25 = smov %s7990_s26  ;;  %s9308_s27 = smov %s8097_s29 }
 0x400   :  { %16 = sbr.rel (!%p14_p8) target bundleno = 4 (0x4), region = 224 }
 0x402   : > { %s9307_s26 = smov %s9301_s28 }

</bundles_post_ra>
